<compile_context>
chip_gen: v5e
topology: v5e:2x2
jax: 0.10.0
libtpu: 0.0.40
codegen_flags: <defaults>
</compile_context>

<pallas_src>
import functools

import numpy as np
import jax
import jax.numpy as jnp
from jax.experimental import pallas as pl
from jax.experimental.pallas import tpu as pltpu


# --------------------------------------------------------------------------
# Fused Pallas kernel: stem conv -> maxpool -> block1 -> block2 -> GAP
# One grid step == one image.  Everything post-stem is a flat (M, C) slab.
# --------------------------------------------------------------------------
def _fused_forward_kernel(
    x_ref,                                  # (1, 2, R, kw*Cin)  packed stem lhs
    wstem_ref, bstem_ref,                   # (7, kw*Cin, C0), (1, C0)
    gmp_ref,                                # (9, M1, M0)   maxpool tap gathers
    gb1_ref, w11_ref, b11_ref, w12_ref, b12_ref,              # block1
    gb2a_ref, w21_ref, b21_ref, gb2b_ref, w22_ref, b22_ref,   # block2
    gds_ref, wds_ref, bds_ref,              # 1x1 / stride-2 projection
    out_ref,                                # (1, 1, C2)
    *, stem_taps, stem_row_step, stem_m):
  dot = functools.partial(jnp.dot, preferred_element_type=jnp.float32)

  # ---- stem: 7x7 / stride-2 conv + folded BN + ReLU ----------------------
  # Tap ki reads a contiguous, sublane-aligned (M0, kw*Cin) slab of the
  # row-parity plane ki % 2 (packed by the wrapper) and accumulates in f32.
  acc = dot(x_ref[0, 0, 0:stem_m, :], wstem_ref[0])
  for ki in range(1, stem_taps):
    base = (ki // 2) * stem_row_step
    acc = acc + dot(x_ref[0, ki % 2, base:base + stem_m, :], wstem_ref[ki])
  stem = jnp.maximum(acc + bstem_ref[...], 0.0)             # (M0, C0)

  # ---- maxpool 3x3 / stride-2 / pad-1 ------------------------------------
  # Each tap is a 0/1 gather matmul; out-of-bounds rows gather 0 which is a
  # valid padding value here because the input is post-ReLU (>= 0).
  mp = dot(gmp_ref[0], stem)
  for t in range(1, gmp_ref.shape[0]):
    mp = jnp.maximum(mp, dot(gmp_ref[t], stem))             # (M1, C0)

  # ---- block1: BasicBlock 16 -> 16, stride 1 -----------------------------
  acc = dot(dot(gb1_ref[0], mp), w11_ref[0])
  for t in range(1, gb1_ref.shape[0]):
    acc = acc + dot(dot(gb1_ref[t], mp), w11_ref[t])
  h = jnp.maximum(acc + b11_ref[...], 0.0)                  # (M1, C0)

  acc = dot(dot(gb1_ref[0], h), w12_ref[0])
  for t in range(1, gb1_ref.shape[0]):
    acc = acc + dot(dot(gb1_ref[t], h), w12_ref[t])
  b1 = jnp.maximum(acc + b12_ref[...] + mp, 0.0)            # residual + ReLU

  # ---- block2: BasicBlock 16 -> 32, stride 2, 1x1 projection -------------
  acc = dot(dot(gb2a_ref[0], b1), w21_ref[0])
  for t in range(1, gb2a_ref.shape[0]):
    acc = acc + dot(dot(gb2a_ref[t], b1), w21_ref[t])
  h2 = jnp.maximum(acc + b21_ref[...], 0.0)                 # (M2, C2)

  acc = dot(dot(gb2b_ref[0], h2), w22_ref[0])
  for t in range(1, gb2b_ref.shape[0]):
    acc = acc + dot(dot(gb2b_ref[t], h2), w22_ref[t])

  ident = dot(dot(gds_ref[...], b1), wds_ref[...]) + bds_ref[...]
  b2 = jnp.maximum(acc + b22_ref[...] + ident, 0.0)         # (M2, C2)

  # ---- global average pool + flatten (fused epilogue) --------------------
  gap = jnp.sum(b2, axis=0, keepdims=True) * (1.0 / b2.shape[0])
  out_ref[...] = gap.reshape(1, 1, b2.shape[1]).astype(out_ref.dtype)


# --------------------------------------------------------------------------
# Wrapper-side packing (tiny tensors; runs once under jit at trace time)
# --------------------------------------------------------------------------
def _bn_scale_bias(bn, eps=1e-5):
  s = bn["gamma"] * jax.lax.rsqrt(bn["var"] + eps)
  return s, bn["beta"] - bn["mean"] * s


def _pack_conv(w, bn):
  """Torch (Cout,Cin,kh,kw) conv + eval BN -> ((kh*kw, Cin, Cout), (1, Cout))."""
  cout, cin, kh, kw = w.shape
  s, b = _bn_scale_bias(bn)
  wt = jnp.transpose(w, (2, 3, 1, 0)) * s                   # (kh, kw, Cin, Cout)
  return wt.reshape(kh * kw, cin, cout), b.reshape(1, cout)


def _pack_stem(w, bn):
  """Stem conv packed per kernel-row: (kh, kw*Cin, Cout), bias (1, Cout)."""
  cout, cin, kh, kw = w.shape
  s, b = _bn_scale_bias(bn)
  wt = jnp.transpose(w, (2, 3, 1, 0)) * s
  return wt.reshape(kh, kw * cin, cout), b.reshape(1, cout)


def _gather_mats(hin, win, k, stride, pad, hout, wout):
  """(k*k, hout*wout, hin*win) 0/1 tap-gather matrices (zero rows if OOB)."""
  g = np.zeros((k * k, hout * wout, hin * win), np.float32)
  for ki in range(k):
    for kj in range(k):
      for oh in range(hout):
        ih = oh * stride + ki - pad
        if not 0 <= ih < hin:
          continue
        for ow in range(wout):
          iw = ow * stride + kj - pad
          if 0 <= iw < win:
            g[ki * k + kj, oh * wout + ow, ih * win + iw] = 1.0
  return jnp.asarray(g)


def _prep_stem_lhs(x_nhwc, k, pad, hout, wout):
  """Pack the padded input for the stride-2 stem conv.

  Returns (N, 2, R, k*C) with
    out[n, r, t*wout + ow, kj*C + c] = xpad[n, 2*t + r, 2*ow + kj, c]
  so kernel-row tap ki reads rows [(ki//2)*wout : (ki//2)*wout + hout*wout] of
  parity plane ki % 2 — a contiguous, lane-packed (M0, k*C) slab. ~3x data
  duplication instead of the 49x of a full im2col.
  """
  n, h, w, c = x_nhwc.shape
  xp = jnp.pad(x_nhwc, ((0, 0), (pad, pad), (pad, pad), (0, 0)))
  cols = [xp[:, :, kj:kj + 2 * wout - 1:2, :] for kj in range(k)]
  u = jnp.stack(cols, axis=3).reshape(n, h + 2 * pad, wout, k * c)
  planes = jnp.stack([u[:, 0::2], u[:, 1::2]], axis=1)      # (N,2,Hp//2,wout,kC)
  return planes.reshape(n, 2, planes.shape[2] * wout, k * c)


# --------------------------------------------------------------------------
# Forward
# --------------------------------------------------------------------------
def res_code_forward(x_nchw, params):
  """Res_code.forward: f = network._forward_conv(x); return f.view(N, -1)."""
  x = jnp.transpose(x_nchw, (0, 2, 3, 1)).astype(jnp.float32)   # NCHW -> NHWC
  n, h, w, _ = x.shape

  # static geometry of the feature network
  ks, ps = 7, 3                                             # stem 7x7/s2/p3
  h0, w0 = (h + 2 * ps - ks) // 2 + 1, (w + 2 * ps - ks) // 2 + 1   # 16, 16
  h1, w1 = (h0 + 2 - 3) // 2 + 1, (w0 + 2 - 3) // 2 + 1     # maxpool -> 8, 8
  h2, w2 = (h1 + 2 - 3) // 2 + 1, (w1 + 2 - 3) // 2 + 1     # block2  -> 4, 4

  # wrapper-side packing (all tiny)
  x_lhs = _prep_stem_lhs(x, ks, ps, h0, w0)                 # (N, 2, R, 21)
  w_stem, b_stem = _pack_stem(params["stem_w"], params["stem_bn"])
  g_mp = _gather_mats(h0, w0, 3, 2, 1, h1, w1)              # (9,  64, 256)
  g_b1 = _gather_mats(h1, w1, 3, 1, 1, h1, w1)              # (9,  64,  64)
  g_b2a = _gather_mats(h1, w1, 3, 2, 1, h2, w2)             # (9,  16,  64)
  g_b2b = _gather_mats(h2, w2, 3, 1, 1, h2, w2)             # (9,  16,  16)
  g_ds = _gather_mats(h1, w1, 1, 2, 0, h2, w2)[0]           # (16, 64)
  p1, p2 = params["block1"], params["block2"]
  w11, b11 = _pack_conv(p1["conv1_w"], p1["bn1"])
  w12, b12 = _pack_conv(p1["conv2_w"], p1["bn2"])
  w21, b21 = _pack_conv(p2["conv1_w"], p2["bn1"])
  w22, b22 = _pack_conv(p2["conv2_w"], p2["bn2"])
  w_ds, b_ds = _pack_conv(p2["down_w"], p2["down_bn"])
  w_ds = w_ds[0]                                            # (Cin, Cout)
  c2 = w22.shape[-1]

  operands = (x_lhs, w_stem, b_stem, g_mp,
              g_b1, w11, b11, w12, b12,
              g_b2a, w21, b21, g_b2b, w22, b22,
              g_ds, w_ds, b_ds)

  def _resident(a):      # whole array VMEM-resident; same block for every image
    nd = a.ndim
    return pl.BlockSpec(a.shape, lambda i: (0,) * nd)

  in_specs = [pl.BlockSpec((1,) + x_lhs.shape[1:], lambda i: (i, 0, 0, 0))]
  in_specs += [_resident(a) for a in operands[1:]]

  kern = functools.partial(_fused_forward_kernel,
                           stem_taps=ks, stem_row_step=w0, stem_m=h0 * w0)
  out = pl.pallas_call(
      kern,
      grid=(n,),
      in_specs=in_specs,
      out_specs=pl.BlockSpec((1, 1, c2), lambda i: (i, 0, 0)),
      out_shape=jax.ShapeDtypeStruct((n, 1, c2), jnp.float32),
      compiler_params=pltpu.CompilerParams(
          dimension_semantics=("parallel",)),       # both TensorCores on v7x
  )(*operands)
  return out.reshape(n, c2)                                  # == f.view(N, -1)


# --------------------------------------------------------------------------
# Pure-JAX reference (sanity check of the Pallas path)
# --------------------------------------------------------------------------
def _ref_conv_bn(x, w, bn, stride, pad, relu, eps=1e-5):
  y = jax.lax.conv_general_dilated(
      x, w, (stride, stride), [(pad, pad), (pad, pad)],
      dimension_numbers=("NHWC", "OIHW", "NHWC"))
  s = bn["gamma"] / jnp.sqrt(bn["var"] + eps)
  b = bn["beta"] - bn["mean"] * s
  y = y * s + b
  return jnp.maximum(y, 0.0) if relu else y


def _ref_block(x, p, stride):
  out = _ref_conv_bn(x, p["conv1_w"], p["bn1"], stride, 1, True)
  out = _ref_conv_bn(out, p["conv2_w"], p["bn2"], 1, 1, False)
  ident = (_ref_conv_bn(x, p["down_w"], p["down_bn"], stride, 0, False)
           if "down_w" in p else x)
  return jnp.maximum(out + ident, 0.0)


def res_code_reference(x_nchw, params):
  x = jnp.transpose(x_nchw, (0, 2, 3, 1))
  x = _ref_conv_bn(x, params["stem_w"], params["stem_bn"], 2, 3, True)
  x = jax.lax.reduce_window(x, -jnp.inf, jax.lax.max,
                            (1, 3, 3, 1), (1, 2, 2, 1),
                            [(0, 0), (1, 1), (1, 1), (0, 0)])
  x = _ref_block(x, params["block1"], 1)
  x = _ref_block(x, params["block2"], 2)
  return jnp.mean(x, axis=(1, 2))


# --------------------------------------------------------------------------
# Deterministic parameter construction
# --------------------------------------------------------------------------
def _bn_params(key, c):
  k1, k2, k3, k4 = jax.random.split(key, 4)
  return dict(gamma=1.0 + 0.1 * jax.random.normal(k1, (c,), jnp.float32),
              beta=0.1 * jax.random.normal(k2, (c,), jnp.float32),
              mean=0.1 * jax.random.normal(k3, (c,), jnp.float32),
              var=1.0 + 0.1 * jax.random.uniform(k4, (c,), jnp.float32))


def init_params(key):
  ks = jax.random.split(key, 12)
  c0, c1, c2 = 16, 16, 32

  def cw(k, cout, cin, kh, kw):
    return 0.1 * jax.random.normal(k, (cout, cin, kh, kw), jnp.float32)

  return {
      "stem_w": cw(ks[0], c0, 3, 7, 7),
      "stem_bn": _bn_params(ks[1], c0),
      "block1": {
          "conv1_w": cw(ks[2], c1, c0, 3, 3), "bn1": _bn_params(ks[3], c1),
          "conv2_w": cw(ks[4], c1, c1, 3, 3), "bn2": _bn_params(ks[5], c1),
      },
      "block2": {
          "conv1_w": cw(ks[6], c2, c1, 3, 3), "bn1": _bn_params(ks[7], c2),
          "conv2_w": cw(ks[8], c2, c2, 3, 3), "bn2": _bn_params(ks[9], c2),
          "down_w": cw(ks[10], c2, c1, 1, 1), "down_bn": _bn_params(ks[11], c2),
      },
  }


# --------------------------------------------------------------------------
if __name__ == "__main__":
  key = jax.random.PRNGKey(0)
  kx, kp = jax.random.split(key)
  x = jax.random.normal(kx, (2, 3, 32, 32), jnp.float32)   # NCHW, like PyTorch
  params = init_params(kp)

  fwd = jax.jit(res_code_forward)
  out = jax.block_until_ready(fwd(x, params))

  ref = jax.block_until_ready(res_code_reference(x, params))
  assert out.shape == (2, 32), out.shape
  assert jnp.allclose(out, ref, rtol=1e-3, atol=1e-4), (
      float(jnp.max(jnp.abs(out - ref))))

  print("KERNEL_OK")
</pallas_src>

<mosaic_0001>
module attributes {stable_mosaic.version = 11 : i64} {
  func.func @_fused_forward_kernel(%arg0: i32, %arg1: memref<1x2x304x21xf32, #tpu.memory_space<vmem>>, %arg2: memref<7x21x16xf32, #tpu.memory_space<vmem>>, %arg3: memref<1x16xf32, #tpu.memory_space<vmem>>, %arg4: memref<9x64x256xf32, #tpu.memory_space<vmem>>, %arg5: memref<9x64x64xf32, #tpu.memory_space<vmem>>, %arg6: memref<9x16x16xf32, #tpu.memory_space<vmem>>, %arg7: memref<1x16xf32, #tpu.memory_space<vmem>>, %arg8: memref<9x16x16xf32, #tpu.memory_space<vmem>>, %arg9: memref<1x16xf32, #tpu.memory_space<vmem>>, %arg10: memref<9x16x64xf32, #tpu.memory_space<vmem>>, %arg11: memref<9x16x32xf32, #tpu.memory_space<vmem>>, %arg12: memref<1x32xf32, #tpu.memory_space<vmem>>, %arg13: memref<9x16x16xf32, #tpu.memory_space<vmem>>, %arg14: memref<9x32x32xf32, #tpu.memory_space<vmem>>, %arg15: memref<1x32xf32, #tpu.memory_space<vmem>>, %arg16: memref<16x64xf32, #tpu.memory_space<vmem>>, %arg17: memref<16x32xf32, #tpu.memory_space<vmem>>, %arg18: memref<1x32xf32, #tpu.memory_space<vmem>>, %arg19: memref<1x1x32xf32, #tpu.memory_space<vmem>>) attributes {dimension_semantics = [#tpu.dimension_semantics<parallel>], iteration_bounds = array<i64: 2>, scalar_prefetch = 0 : i64, scratch_operands = 0 : i64, tpu.core_type = #tpu.core_type<tc>, window_params = [{transform_indices = @transform_0, window_bounds = array<i64: 1, 2, 304, 21>}, {pipeline_mode = #tpu.pipeline_mode<synchronous>, transform_indices = @transform_1, window_bounds = array<i64: 7, 21, 16>}, {pipeline_mode = #tpu.pipeline_mode<synchronous>, transform_indices = @transform_2, window_bounds = array<i64: 1, 16>}, {pipeline_mode = #tpu.pipeline_mode<synchronous>, transform_indices = @transform_3, window_bounds = array<i64: 9, 64, 256>}, {pipeline_mode = #tpu.pipeline_mode<synchronous>, transform_indices = @transform_4, window_bounds = array<i64: 9, 64, 64>}, {pipeline_mode = #tpu.pipeline_mode<synchronous>, transform_indices = @transform_5, window_bounds = array<i64: 9, 16, 16>}, {pipeline_mode = #tpu.pipeline_mode<synchronous>, transform_indices = @transform_6, window_bounds = array<i64: 1, 16>}, {pipeline_mode = #tpu.pipeline_mode<synchronous>, transform_indices = @transform_7, window_bounds = array<i64: 9, 16, 16>}, {pipeline_mode = #tpu.pipeline_mode<synchronous>, transform_indices = @transform_8, window_bounds = array<i64: 1, 16>}, {pipeline_mode = #tpu.pipeline_mode<synchronous>, transform_indices = @transform_9, window_bounds = array<i64: 9, 16, 64>}, {pipeline_mode = #tpu.pipeline_mode<synchronous>, transform_indices = @transform_10, window_bounds = array<i64: 9, 16, 32>}, {pipeline_mode = #tpu.pipeline_mode<synchronous>, transform_indices = @transform_11, window_bounds = array<i64: 1, 32>}, {pipeline_mode = #tpu.pipeline_mode<synchronous>, transform_indices = @transform_12, window_bounds = array<i64: 9, 16, 16>}, {pipeline_mode = #tpu.pipeline_mode<synchronous>, transform_indices = @transform_13, window_bounds = array<i64: 9, 32, 32>}, {pipeline_mode = #tpu.pipeline_mode<synchronous>, transform_indices = @transform_14, window_bounds = array<i64: 1, 32>}, {pipeline_mode = #tpu.pipeline_mode<synchronous>, transform_indices = @transform_15, window_bounds = array<i64: 16, 64>}, {pipeline_mode = #tpu.pipeline_mode<synchronous>, transform_indices = @transform_16, window_bounds = array<i64: 16, 32>}, {pipeline_mode = #tpu.pipeline_mode<synchronous>, transform_indices = @transform_17, window_bounds = array<i64: 1, 32>}, {transform_indices = @transform_18, window_bounds = array<i64: 1, 1, 32>}]} {
    %c0 = arith.constant 0 : index
    %c0_0 = arith.constant 0 : index
    %c0_1 = arith.constant 0 : index
    %c0_2 = arith.constant 0 : index
    %0 = vector.load %arg1[%c0, %c0_0, %c0_1, %c0_2] : memref<1x2x304x21xf32, #tpu.memory_space<vmem>>, vector<1x1x256x21xf32>
    %1 = vector.shape_cast %0 : vector<1x1x256x21xf32> to vector<256x21xf32>
    %c0_3 = arith.constant 0 : index
    %c0_4 = arith.constant 0 : index
    %c0_5 = arith.constant 0 : index
    %2 = vector.load %arg2[%c0_3, %c0_4, %c0_5] : memref<7x21x16xf32, #tpu.memory_space<vmem>>, vector<1x21x16xf32>
    %3 = vector.shape_cast %2 : vector<1x21x16xf32> to vector<21x16xf32>
    %cst = arith.constant dense<0.000000e+00> : vector<256x16xf32>
    %4 = tpu.matmul %1, %3, %cst {dimension_numbers = #tpu.dot_dimension_numbers<[1], [0], [0], [1], [0, 0, 1, 1], [], []>} : vector<256x21xf32>, vector<21x16xf32>, vector<256x16xf32> -> vector<256x16xf32>
    %c0_6 = arith.constant 0 : index
    %c1 = arith.constant 1 : index
    %c0_7 = arith.constant 0 : index
    %c0_8 = arith.constant 0 : index
    %5 = vector.load %arg1[%c0_6, %c1, %c0_7, %c0_8] : memref<1x2x304x21xf32, #tpu.memory_space<vmem>>, vector<1x1x256x21xf32>
    %6 = vector.shape_cast %5 : vector<1x1x256x21xf32> to vector<256x21xf32>
    %c1_9 = arith.constant 1 : index
    %c0_10 = arith.constant 0 : index
    %c0_11 = arith.constant 0 : index
    %7 = vector.load %arg2[%c1_9, %c0_10, %c0_11] : memref<7x21x16xf32, #tpu.memory_space<vmem>>, vector<1x21x16xf32>
    %8 = vector.shape_cast %7 : vector<1x21x16xf32> to vector<21x16xf32>
    %cst_12 = arith.constant dense<0.000000e+00> : vector<256x16xf32>
    %9 = tpu.matmul %6, %8, %cst_12 {dimension_numbers = #tpu.dot_dimension_numbers<[1], [0], [0], [1], [0, 0, 1, 1], [], []>} : vector<256x21xf32>, vector<21x16xf32>, vector<256x16xf32> -> vector<256x16xf32>
    %10 = arith.addf %4, %9 : vector<256x16xf32>
    %c0_13 = arith.constant 0 : index
    %c0_14 = arith.constant 0 : index
    %c16 = arith.constant 16 : index
    %c0_15 = arith.constant 0 : index
    %11 = vector.load %arg1[%c0_13, %c0_14, %c16, %c0_15] : memref<1x2x304x21xf32, #tpu.memory_space<vmem>>, vector<1x1x256x21xf32>
    %12 = vector.shape_cast %11 : vector<1x1x256x21xf32> to vector<256x21xf32>
    %c2 = arith.constant 2 : index
    %c0_16 = arith.constant 0 : index
    %c0_17 = arith.constant 0 : index
    %13 = vector.load %arg2[%c2, %c0_16, %c0_17] : memref<7x21x16xf32, #tpu.memory_space<vmem>>, vector<1x21x16xf32>
    %14 = vector.shape_cast %13 : vector<1x21x16xf32> to vector<21x16xf32>
    %cst_18 = arith.constant dense<0.000000e+00> : vector<256x16xf32>
    %15 = tpu.matmul %12, %14, %cst_18 {dimension_numbers = #tpu.dot_dimension_numbers<[1], [0], [0], [1], [0, 0, 1, 1], [], []>} : vector<256x21xf32>, vector<21x16xf32>, vector<256x16xf32> -> vector<256x16xf32>
    %16 = arith.addf %10, %15 : vector<256x16xf32>
    %c0_19 = arith.constant 0 : index
    %c1_20 = arith.constant 1 : index
    %c16_21 = arith.constant 16 : index
    %c0_22 = arith.constant 0 : index
    %17 = vector.load %arg1[%c0_19, %c1_20, %c16_21, %c0_22] : memref<1x2x304x21xf32, #tpu.memory_space<vmem>>, vector<1x1x256x21xf32>
    %18 = vector.shape_cast %17 : vector<1x1x256x21xf32> to vector<256x21xf32>
    %c3 = arith.constant 3 : index
    %c0_23 = arith.constant 0 : index
    %c0_24 = arith.constant 0 : index
    %19 = vector.load %arg2[%c3, %c0_23, %c0_24] : memref<7x21x16xf32, #tpu.memory_space<vmem>>, vector<1x21x16xf32>
    %20 = vector.shape_cast %19 : vector<1x21x16xf32> to vector<21x16xf32>
    %cst_25 = arith.constant dense<0.000000e+00> : vector<256x16xf32>
    %21 = tpu.matmul %18, %20, %cst_25 {dimension_numbers = #tpu.dot_dimension_numbers<[1], [0], [0], [1], [0, 0, 1, 1], [], []>} : vector<256x21xf32>, vector<21x16xf32>, vector<256x16xf32> -> vector<256x16xf32>
    %22 = arith.addf %16, %21 : vector<256x16xf32>
    %c0_26 = arith.constant 0 : index
    %c0_27 = arith.constant 0 : index
    %c32 = arith.constant 32 : index
    %c0_28 = arith.constant 0 : index
    %23 = vector.load %arg1[%c0_26, %c0_27, %c32, %c0_28] : memref<1x2x304x21xf32, #tpu.memory_space<vmem>>, vector<1x1x256x21xf32>
    %24 = vector.shape_cast %23 : vector<1x1x256x21xf32> to vector<256x21xf32>
    %c4 = arith.constant 4 : index
    %c0_29 = arith.constant 0 : index
    %c0_30 = arith.constant 0 : index
    %25 = vector.load %arg2[%c4, %c0_29, %c0_30] : memref<7x21x16xf32, #tpu.memory_space<vmem>>, vector<1x21x16xf32>
    %26 = vector.shape_cast %25 : vector<1x21x16xf32> to vector<21x16xf32>
    %cst_31 = arith.constant dense<0.000000e+00> : vector<256x16xf32>
    %27 = tpu.matmul %24, %26, %cst_31 {dimension_numbers = #tpu.dot_dimension_numbers<[1], [0], [0], [1], [0, 0, 1, 1], [], []>} : vector<256x21xf32>, vector<21x16xf32>, vector<256x16xf32> -> vector<256x16xf32>
    %28 = arith.addf %22, %27 : vector<256x16xf32>
    %c0_32 = arith.constant 0 : index
    %c1_33 = arith.constant 1 : index
    %c32_34 = arith.constant 32 : index
    %c0_35 = arith.constant 0 : index
    %29 = vector.load %arg1[%c0_32, %c1_33, %c32_34, %c0_35] : memref<1x2x304x21xf32, #tpu.memory_space<vmem>>, vector<1x1x256x21xf32>
    %30 = vector.shape_cast %29 : vector<1x1x256x21xf32> to vector<256x21xf32>
    %c5 = arith.constant 5 : index
    %c0_36 = arith.constant 0 : index
    %c0_37 = arith.constant 0 : index
    %31 = vector.load %arg2[%c5, %c0_36, %c0_37] : memref<7x21x16xf32, #tpu.memory_space<vmem>>, vector<1x21x16xf32>
    %32 = vector.shape_cast %31 : vector<1x21x16xf32> to vector<21x16xf32>
    %cst_38 = arith.constant dense<0.000000e+00> : vector<256x16xf32>
    %33 = tpu.matmul %30, %32, %cst_38 {dimension_numbers = #tpu.dot_dimension_numbers<[1], [0], [0], [1], [0, 0, 1, 1], [], []>} : vector<256x21xf32>, vector<21x16xf32>, vector<256x16xf32> -> vector<256x16xf32>
    %34 = arith.addf %28, %33 : vector<256x16xf32>
    %c0_39 = arith.constant 0 : index
    %c0_40 = arith.constant 0 : index
    %c48 = arith.constant 48 : index
    %c0_41 = arith.constant 0 : index
    %35 = vector.load %arg1[%c0_39, %c0_40, %c48, %c0_41] : memref<1x2x304x21xf32, #tpu.memory_space<vmem>>, vector<1x1x256x21xf32>
    %36 = vector.shape_cast %35 : vector<1x1x256x21xf32> to vector<256x21xf32>
    %c6 = arith.constant 6 : index
    %c0_42 = arith.constant 0 : index
    %c0_43 = arith.constant 0 : index
    %37 = vector.load %arg2[%c6, %c0_42, %c0_43] : memref<7x21x16xf32, #tpu.memory_space<vmem>>, vector<1x21x16xf32>
    %38 = vector.shape_cast %37 : vector<1x21x16xf32> to vector<21x16xf32>
    %cst_44 = arith.constant dense<0.000000e+00> : vector<256x16xf32>
    %39 = tpu.matmul %36, %38, %cst_44 {dimension_numbers = #tpu.dot_dimension_numbers<[1], [0], [0], [1], [0, 0, 1, 1], [], []>} : vector<256x21xf32>, vector<21x16xf32>, vector<256x16xf32> -> vector<256x16xf32>
    %40 = arith.addf %34, %39 : vector<256x16xf32>
    %c0_45 = arith.constant 0 : index
    %c0_46 = arith.constant 0 : index
    %41 = vector.load %arg3[%c0_45, %c0_46] : memref<1x16xf32, #tpu.memory_space<vmem>>, vector<1x16xf32>
    %42 = vector.broadcast %41 : vector<1x16xf32> to vector<256x16xf32>
    %43 = arith.addf %40, %42 : vector<256x16xf32>
    %cst_47 = arith.constant 0.000000e+00 : f32
    %44 = vector.broadcast %cst_47 : f32 to vector<256x16xf32>
    %45 = arith.maximumf %43, %44 : vector<256x16xf32>
    %c0_48 = arith.constant 0 : index
    %c0_49 = arith.constant 0 : index
    %c0_50 = arith.constant 0 : index
    %46 = vector.load %arg4[%c0_48, %c0_49, %c0_50] : memref<9x64x256xf32, #tpu.memory_space<vmem>>, vector<1x64x256xf32>
    %47 = vector.shape_cast %46 : vector<1x64x256xf32> to vector<64x256xf32>
    %cst_51 = arith.constant dense<0.000000e+00> : vector<64x16xf32>
    %48 = tpu.matmul %47, %45, %cst_51 {dimension_numbers = #tpu.dot_dimension_numbers<[1], [0], [0], [1], [0, 0, 1, 1], [], []>} : vector<64x256xf32>, vector<256x16xf32>, vector<64x16xf32> -> vector<64x16xf32>
    %c1_52 = arith.constant 1 : index
    %c0_53 = arith.constant 0 : index
    %c0_54 = arith.constant 0 : index
    %49 = vector.load %arg4[%c1_52, %c0_53, %c0_54] : memref<9x64x256xf32, #tpu.memory_space<vmem>>, vector<1x64x256xf32>
    %50 = vector.shape_cast %49 : vector<1x64x256xf32> to vector<64x256xf32>
    %cst_55 = arith.constant dense<0.000000e+00> : vector<64x16xf32>
    %51 = tpu.matmul %50, %45, %cst_55 {dimension_numbers = #tpu.dot_dimension_numbers<[1], [0], [0], [1], [0, 0, 1, 1], [], []>} : vector<64x256xf32>, vector<256x16xf32>, vector<64x16xf32> -> vector<64x16xf32>
    %52 = arith.maximumf %48, %51 : vector<64x16xf32>
    %c2_56 = arith.constant 2 : index
    %c0_57 = arith.constant 0 : index
    %c0_58 = arith.constant 0 : index
    %53 = vector.load %arg4[%c2_56, %c0_57, %c0_58] : memref<9x64x256xf32, #tpu.memory_space<vmem>>, vector<1x64x256xf32>
    %54 = vector.shape_cast %53 : vector<1x64x256xf32> to vector<64x256xf32>
    %cst_59 = arith.constant dense<0.000000e+00> : vector<64x16xf32>
    %55 = tpu.matmul %54, %45, %cst_59 {dimension_numbers = #tpu.dot_dimension_numbers<[1], [0], [0], [1], [0, 0, 1, 1], [], []>} : vector<64x256xf32>, vector<256x16xf32>, vector<64x16xf32> -> vector<64x16xf32>
    %56 = arith.maximumf %52, %55 : vector<64x16xf32>
    %c3_60 = arith.constant 3 : index
    %c0_61 = arith.constant 0 : index
    %c0_62 = arith.constant 0 : index
    %57 = vector.load %arg4[%c3_60, %c0_61, %c0_62] : memref<9x64x256xf32, #tpu.memory_space<vmem>>, vector<1x64x256xf32>
    %58 = vector.shape_cast %57 : vector<1x64x256xf32> to vector<64x256xf32>
    %cst_63 = arith.constant dense<0.000000e+00> : vector<64x16xf32>
    %59 = tpu.matmul %58, %45, %cst_63 {dimension_numbers = #tpu.dot_dimension_numbers<[1], [0], [0], [1], [0, 0, 1, 1], [], []>} : vector<64x256xf32>, vector<256x16xf32>, vector<64x16xf32> -> vector<64x16xf32>
    %60 = arith.maximumf %56, %59 : vector<64x16xf32>
    %c4_64 = arith.constant 4 : index
    %c0_65 = arith.constant 0 : index
    %c0_66 = arith.constant 0 : index
    %61 = vector.load %arg4[%c4_64, %c0_65, %c0_66] : memref<9x64x256xf32, #tpu.memory_space<vmem>>, vector<1x64x256xf32>
    %62 = vector.shape_cast %61 : vector<1x64x256xf32> to vector<64x256xf32>
    %cst_67 = arith.constant dense<0.000000e+00> : vector<64x16xf32>
    %63 = tpu.matmul %62, %45, %cst_67 {dimension_numbers = #tpu.dot_dimension_numbers<[1], [0], [0], [1], [0, 0, 1, 1], [], []>} : vector<64x256xf32>, vector<256x16xf32>, vector<64x16xf32> -> vector<64x16xf32>
    %64 = arith.maximumf %60, %63 : vector<64x16xf32>
    %c5_68 = arith.constant 5 : index
    %c0_69 = arith.constant 0 : index
    %c0_70 = arith.constant 0 : index
    %65 = vector.load %arg4[%c5_68, %c0_69, %c0_70] : memref<9x64x256xf32, #tpu.memory_space<vmem>>, vector<1x64x256xf32>
    %66 = vector.shape_cast %65 : vector<1x64x256xf32> to vector<64x256xf32>
    %cst_71 = arith.constant dense<0.000000e+00> : vector<64x16xf32>
    %67 = tpu.matmul %66, %45, %cst_71 {dimension_numbers = #tpu.dot_dimension_numbers<[1], [0], [0], [1], [0, 0, 1, 1], [], []>} : vector<64x256xf32>, vector<256x16xf32>, vector<64x16xf32> -> vector<64x16xf32>
    %68 = arith.maximumf %64, %67 : vector<64x16xf32>
    %c6_72 = arith.constant 6 : index
    %c0_73 = arith.constant 0 : index
    %c0_74 = arith.constant 0 : index
    %69 = vector.load %arg4[%c6_72, %c0_73, %c0_74] : memref<9x64x256xf32, #tpu.memory_space<vmem>>, vector<1x64x256xf32>
    %70 = vector.shape_cast %69 : vector<1x64x256xf32> to vector<64x256xf32>
    %cst_75 = arith.constant dense<0.000000e+00> : vector<64x16xf32>
    %71 = tpu.matmul %70, %45, %cst_75 {dimension_numbers = #tpu.dot_dimension_numbers<[1], [0], [0], [1], [0, 0, 1, 1], [], []>} : vector<64x256xf32>, vector<256x16xf32>, vector<64x16xf32> -> vector<64x16xf32>
    %72 = arith.maximumf %68, %71 : vector<64x16xf32>
    %c7 = arith.constant 7 : index
    %c0_76 = arith.constant 0 : index
    %c0_77 = arith.constant 0 : index
    %73 = vector.load %arg4[%c7, %c0_76, %c0_77] : memref<9x64x256xf32, #tpu.memory_space<vmem>>, vector<1x64x256xf32>
    %74 = vector.shape_cast %73 : vector<1x64x256xf32> to vector<64x256xf32>
    %cst_78 = arith.constant dense<0.000000e+00> : vector<64x16xf32>
    %75 = tpu.matmul %74, %45, %cst_78 {dimension_numbers = #tpu.dot_dimension_numbers<[1], [0], [0], [1], [0, 0, 1, 1], [], []>} : vector<64x256xf32>, vector<256x16xf32>, vector<64x16xf32> -> vector<64x16xf32>
    %76 = arith.maximumf %72, %75 : vector<64x16xf32>
    %c8 = arith.constant 8 : index
    %c0_79 = arith.constant 0 : index
    %c0_80 = arith.constant 0 : index
    %77 = vector.load %arg4[%c8, %c0_79, %c0_80] : memref<9x64x256xf32, #tpu.memory_space<vmem>>, vector<1x64x256xf32>
    %78 = vector.shape_cast %77 : vector<1x64x256xf32> to vector<64x256xf32>
    %cst_81 = arith.constant dense<0.000000e+00> : vector<64x16xf32>
    %79 = tpu.matmul %78, %45, %cst_81 {dimension_numbers = #tpu.dot_dimension_numbers<[1], [0], [0], [1], [0, 0, 1, 1], [], []>} : vector<64x256xf32>, vector<256x16xf32>, vector<64x16xf32> -> vector<64x16xf32>
    %80 = arith.maximumf %76, %79 : vector<64x16xf32>
    %c0_82 = arith.constant 0 : index
    %c0_83 = arith.constant 0 : index
    %c0_84 = arith.constant 0 : index
    %81 = vector.load %arg5[%c0_82, %c0_83, %c0_84] : memref<9x64x64xf32, #tpu.memory_space<vmem>>, vector<1x64x64xf32>
    %82 = vector.shape_cast %81 : vector<1x64x64xf32> to vector<64x64xf32>
    %cst_85 = arith.constant dense<0.000000e+00> : vector<64x16xf32>
    %83 = tpu.matmul %82, %80, %cst_85 {dimension_numbers = #tpu.dot_dimension_numbers<[1], [0], [0], [1], [0, 0, 1, 1], [], []>} : vector<64x64xf32>, vector<64x16xf32>, vector<64x16xf32> -> vector<64x16xf32>
    %c0_86 = arith.constant 0 : index
    %c0_87 = arith.constant 0 : index
    %c0_88 = arith.constant 0 : index
    %84 = vector.load %arg6[%c0_86, %c0_87, %c0_88] : memref<9x16x16xf32, #tpu.memory_space<vmem>>, vector<1x16x16xf32>
    %85 = vector.shape_cast %84 : vector<1x16x16xf32> to vector<16x16xf32>
    %cst_89 = arith.constant dense<0.000000e+00> : vector<64x16xf32>
    %86 = tpu.matmul %83, %85, %cst_89 {dimension_numbers = #tpu.dot_dimension_numbers<[1], [0], [0], [1], [0, 0, 1, 1], [], []>} : vector<64x16xf32>, vector<16x16xf32>, vector<64x16xf32> -> vector<64x16xf32>
    %c1_90 = arith.constant 1 : index
    %c0_91 = arith.constant 0 : index
    %c0_92 = arith.constant 0 : index
    %87 = vector.load %arg5[%c1_90, %c0_91, %c0_92] : memref<9x64x64xf32, #tpu.memory_space<vmem>>, vector<1x64x64xf32>
    %88 = vector.shape_cast %87 : vector<1x64x64xf32> to vector<64x64xf32>
    %cst_93 = arith.constant dense<0.000000e+00> : vector<64x16xf32>
    %89 = tpu.matmul %88, %80, %cst_93 {dimension_numbers = #tpu.dot_dimension_numbers<[1], [0], [0], [1], [0, 0, 1, 1], [], []>} : vector<64x64xf32>, vector<64x16xf32>, vector<64x16xf32> -> vector<64x16xf32>
    %c1_94 = arith.constant 1 : index
    %c0_95 = arith.constant 0 : index
    %c0_96 = arith.constant 0 : index
    %90 = vector.load %arg6[%c1_94, %c0_95, %c0_96] : memref<9x16x16xf32, #tpu.memory_space<vmem>>, vector<1x16x16xf32>
    %91 = vector.shape_cast %90 : vector<1x16x16xf32> to vector<16x16xf32>
    %cst_97 = arith.constant dense<0.000000e+00> : vector<64x16xf32>
    %92 = tpu.matmul %89, %91, %cst_97 {dimension_numbers = #tpu.dot_dimension_numbers<[1], [0], [0], [1], [0, 0, 1, 1], [], []>} : vector<64x16xf32>, vector<16x16xf32>, vector<64x16xf32> -> vector<64x16xf32>
    %93 = arith.addf %86, %92 : vector<64x16xf32>
    %c2_98 = arith.constant 2 : index
    %c0_99 = arith.constant 0 : index
    %c0_100 = arith.constant 0 : index
    %94 = vector.load %arg5[%c2_98, %c0_99, %c0_100] : memref<9x64x64xf32, #tpu.memory_space<vmem>>, vector<1x64x64xf32>
    %95 = vector.shape_cast %94 : vector<1x64x64xf32> to vector<64x64xf32>
    %cst_101 = arith.constant dense<0.000000e+00> : vector<64x16xf32>
    %96 = tpu.matmul %95, %80, %cst_101 {dimension_numbers = #tpu.dot_dimension_numbers<[1], [0], [0], [1], [0, 0, 1, 1], [], []>} : vector<64x64xf32>, vector<64x16xf32>, vector<64x16xf32> -> vector<64x16xf32>
    %c2_102 = arith.constant 2 : index
    %c0_103 = arith.constant 0 : index
    %c0_104 = arith.constant 0 : index
    %97 = vector.load %arg6[%c2_102, %c0_103, %c0_104] : memref<9x16x16xf32, #tpu.memory_space<vmem>>, vector<1x16x16xf32>
    %98 = vector.shape_cast %97 : vector<1x16x16xf32> to vector<16x16xf32>
    %cst_105 = arith.constant dense<0.000000e+00> : vector<64x16xf32>
    %99 = tpu.matmul %96, %98, %cst_105 {dimension_numbers = #tpu.dot_dimension_numbers<[1], [0], [0], [1], [0, 0, 1, 1], [], []>} : vector<64x16xf32>, vector<16x16xf32>, vector<64x16xf32> -> vector<64x16xf32>
    %100 = arith.addf %93, %99 : vector<64x16xf32>
    %c3_106 = arith.constant 3 : index
    %c0_107 = arith.constant 0 : index
    %c0_108 = arith.constant 0 : index
    %101 = vector.load %arg5[%c3_106, %c0_107, %c0_108] : memref<9x64x64xf32, #tpu.memory_space<vmem>>, vector<1x64x64xf32>
    %102 = vector.shape_cast %101 : vector<1x64x64xf32> to vector<64x64xf32>
    %cst_109 = arith.constant dense<0.000000e+00> : vector<64x16xf32>
    %103 = tpu.matmul %102, %80, %cst_109 {dimension_numbers = #tpu.dot_dimension_numbers<[1], [0], [0], [1], [0, 0, 1, 1], [], []>} : vector<64x64xf32>, vector<64x16xf32>, vector<64x16xf32> -> vector<64x16xf32>
    %c3_110 = arith.constant 3 : index
    %c0_111 = arith.constant 0 : index
    %c0_112 = arith.constant 0 : index
    %104 = vector.load %arg6[%c3_110, %c0_111, %c0_112] : memref<9x16x16xf32, #tpu.memory_space<vmem>>, vector<1x16x16xf32>
    %105 = vector.shape_cast %104 : vector<1x16x16xf32> to vector<16x16xf32>
    %cst_113 = arith.constant dense<0.000000e+00> : vector<64x16xf32>
    %106 = tpu.matmul %103, %105, %cst_113 {dimension_numbers = #tpu.dot_dimension_numbers<[1], [0], [0], [1], [0, 0, 1, 1], [], []>} : vector<64x16xf32>, vector<16x16xf32>, vector<64x16xf32> -> vector<64x16xf32>
    %107 = arith.addf %100, %106 : vector<64x16xf32>
    %c4_114 = arith.constant 4 : index
    %c0_115 = arith.constant 0 : index
    %c0_116 = arith.constant 0 : index
    %108 = vector.load %arg5[%c4_114, %c0_115, %c0_116] : memref<9x64x64xf32, #tpu.memory_space<vmem>>, vector<1x64x64xf32>
    %109 = vector.shape_cast %108 : vector<1x64x64xf32> to vector<64x64xf32>
    %cst_117 = arith.constant dense<0.000000e+00> : vector<64x16xf32>
    %110 = tpu.matmul %109, %80, %cst_117 {dimension_numbers = #tpu.dot_dimension_numbers<[1], [0], [0], [1], [0, 0, 1, 1], [], []>} : vector<64x64xf32>, vector<64x16xf32>, vector<64x16xf32> -> vector<64x16xf32>
    %c4_118 = arith.constant 4 : index
    %c0_119 = arith.constant 0 : index
    %c0_120 = arith.constant 0 : index
    %111 = vector.load %arg6[%c4_118, %c0_119, %c0_120] : memref<9x16x16xf32, #tpu.memory_space<vmem>>, vector<1x16x16xf32>
    %112 = vector.shape_cast %111 : vector<1x16x16xf32> to vector<16x16xf32>
    %cst_121 = arith.constant dense<0.000000e+00> : vector<64x16xf32>
    %113 = tpu.matmul %110, %112, %cst_121 {dimension_numbers = #tpu.dot_dimension_numbers<[1], [0], [0], [1], [0, 0, 1, 1], [], []>} : vector<64x16xf32>, vector<16x16xf32>, vector<64x16xf32> -> vector<64x16xf32>
    %114 = arith.addf %107, %113 : vector<64x16xf32>
    %c5_122 = arith.constant 5 : index
    %c0_123 = arith.constant 0 : index
    %c0_124 = arith.constant 0 : index
    %115 = vector.load %arg5[%c5_122, %c0_123, %c0_124] : memref<9x64x64xf32, #tpu.memory_space<vmem>>, vector<1x64x64xf32>
    %116 = vector.shape_cast %115 : vector<1x64x64xf32> to vector<64x64xf32>
    %cst_125 = arith.constant dense<0.000000e+00> : vector<64x16xf32>
    %117 = tpu.matmul %116, %80, %cst_125 {dimension_numbers = #tpu.dot_dimension_numbers<[1], [0], [0], [1], [0, 0, 1, 1], [], []>} : vector<64x64xf32>, vector<64x16xf32>, vector<64x16xf32> -> vector<64x16xf32>
    %c5_126 = arith.constant 5 : index
    %c0_127 = arith.constant 0 : index
    %c0_128 = arith.constant 0 : index
    %118 = vector.load %arg6[%c5_126, %c0_127, %c0_128] : memref<9x16x16xf32, #tpu.memory_space<vmem>>, vector<1x16x16xf32>
    %119 = vector.shape_cast %118 : vector<1x16x16xf32> to vector<16x16xf32>
    %cst_129 = arith.constant dense<0.000000e+00> : vector<64x16xf32>
    %120 = tpu.matmul %117, %119, %cst_129 {dimension_numbers = #tpu.dot_dimension_numbers<[1], [0], [0], [1], [0, 0, 1, 1], [], []>} : vector<64x16xf32>, vector<16x16xf32>, vector<64x16xf32> -> vector<64x16xf32>
    %121 = arith.addf %114, %120 : vector<64x16xf32>
    %c6_130 = arith.constant 6 : index
    %c0_131 = arith.constant 0 : index
    %c0_132 = arith.constant 0 : index
    %122 = vector.load %arg5[%c6_130, %c0_131, %c0_132] : memref<9x64x64xf32, #tpu.memory_space<vmem>>, vector<1x64x64xf32>
    %123 = vector.shape_cast %122 : vector<1x64x64xf32> to vector<64x64xf32>
    %cst_133 = arith.constant dense<0.000000e+00> : vector<64x16xf32>
    %124 = tpu.matmul %123, %80, %cst_133 {dimension_numbers = #tpu.dot_dimension_numbers<[1], [0], [0], [1], [0, 0, 1, 1], [], []>} : vector<64x64xf32>, vector<64x16xf32>, vector<64x16xf32> -> vector<64x16xf32>
    %c6_134 = arith.constant 6 : index
    %c0_135 = arith.constant 0 : index
    %c0_136 = arith.constant 0 : index
    %125 = vector.load %arg6[%c6_134, %c0_135, %c0_136] : memref<9x16x16xf32, #tpu.memory_space<vmem>>, vector<1x16x16xf32>
    %126 = vector.shape_cast %125 : vector<1x16x16xf32> to vector<16x16xf32>
    %cst_137 = arith.constant dense<0.000000e+00> : vector<64x16xf32>
    %127 = tpu.matmul %124, %126, %cst_137 {dimension_numbers = #tpu.dot_dimension_numbers<[1], [0], [0], [1], [0, 0, 1, 1], [], []>} : vector<64x16xf32>, vector<16x16xf32>, vector<64x16xf32> -> vector<64x16xf32>
    %128 = arith.addf %121, %127 : vector<64x16xf32>
    %c7_138 = arith.constant 7 : index
    %c0_139 = arith.constant 0 : index
    %c0_140 = arith.constant 0 : index
    %129 = vector.load %arg5[%c7_138, %c0_139, %c0_140] : memref<9x64x64xf32, #tpu.memory_space<vmem>>, vector<1x64x64xf32>
    %130 = vector.shape_cast %129 : vector<1x64x64xf32> to vector<64x64xf32>
    %cst_141 = arith.constant dense<0.000000e+00> : vector<64x16xf32>
    %131 = tpu.matmul %130, %80, %cst_141 {dimension_numbers = #tpu.dot_dimension_numbers<[1], [0], [0], [1], [0, 0, 1, 1], [], []>} : vector<64x64xf32>, vector<64x16xf32>, vector<64x16xf32> -> vector<64x16xf32>
    %c7_142 = arith.constant 7 : index
    %c0_143 = arith.constant 0 : index
    %c0_144 = arith.constant 0 : index
    %132 = vector.load %arg6[%c7_142, %c0_143, %c0_144] : memref<9x16x16xf32, #tpu.memory_space<vmem>>, vector<1x16x16xf32>
    %133 = vector.shape_cast %132 : vector<1x16x16xf32> to vector<16x16xf32>
    %cst_145 = arith.constant dense<0.000000e+00> : vector<64x16xf32>
    %134 = tpu.matmul %131, %133, %cst_145 {dimension_numbers = #tpu.dot_dimension_numbers<[1], [0], [0], [1], [0, 0, 1, 1], [], []>} : vector<64x16xf32>, vector<16x16xf32>, vector<64x16xf32> -> vector<64x16xf32>
    %135 = arith.addf %128, %134 : vector<64x16xf32>
    %c8_146 = arith.constant 8 : index
    %c0_147 = arith.constant 0 : index
    %c0_148 = arith.constant 0 : index
    %136 = vector.load %arg5[%c8_146, %c0_147, %c0_148] : memref<9x64x64xf32, #tpu.memory_space<vmem>>, vector<1x64x64xf32>
    %137 = vector.shape_cast %136 : vector<1x64x64xf32> to vector<64x64xf32>
    %cst_149 = arith.constant dense<0.000000e+00> : vector<64x16xf32>
    %138 = tpu.matmul %137, %80, %cst_149 {dimension_numbers = #tpu.dot_dimension_numbers<[1], [0], [0], [1], [0, 0, 1, 1], [], []>} : vector<64x64xf32>, vector<64x16xf32>, vector<64x16xf32> -> vector<64x16xf32>
    %c8_150 = arith.constant 8 : index
    %c0_151 = arith.constant 0 : index
    %c0_152 = arith.constant 0 : index
    %139 = vector.load %arg6[%c8_150, %c0_151, %c0_152] : memref<9x16x16xf32, #tpu.memory_space<vmem>>, vector<1x16x16xf32>
    %140 = vector.shape_cast %139 : vector<1x16x16xf32> to vector<16x16xf32>
    %cst_153 = arith.constant dense<0.000000e+00> : vector<64x16xf32>
    %141 = tpu.matmul %138, %140, %cst_153 {dimension_numbers = #tpu.dot_dimension_numbers<[1], [0], [0], [1], [0, 0, 1, 1], [], []>} : vector<64x16xf32>, vector<16x16xf32>, vector<64x16xf32> -> vector<64x16xf32>
    %142 = arith.addf %135, %141 : vector<64x16xf32>
    %c0_154 = arith.constant 0 : index
    %c0_155 = arith.constant 0 : index
    %143 = vector.load %arg7[%c0_154, %c0_155] : memref<1x16xf32, #tpu.memory_space<vmem>>, vector<1x16xf32>
    %144 = vector.broadcast %143 : vector<1x16xf32> to vector<64x16xf32>
    %145 = arith.addf %142, %144 : vector<64x16xf32>
    %cst_156 = arith.constant 0.000000e+00 : f32
    %146 = vector.broadcast %cst_156 : f32 to vector<64x16xf32>
    %147 = arith.maximumf %145, %146 : vector<64x16xf32>
    %c0_157 = arith.constant 0 : index
    %c0_158 = arith.constant 0 : index
    %c0_159 = arith.constant 0 : index
    %148 = vector.load %arg5[%c0_157, %c0_158, %c0_159] : memref<9x64x64xf32, #tpu.memory_space<vmem>>, vector<1x64x64xf32>
    %149 = vector.shape_cast %148 : vector<1x64x64xf32> to vector<64x64xf32>
    %cst_160 = arith.constant dense<0.000000e+00> : vector<64x16xf32>
    %150 = tpu.matmul %149, %147, %cst_160 {dimension_numbers = #tpu.dot_dimension_numbers<[1], [0], [0], [1], [0, 0, 1, 1], [], []>} : vector<64x64xf32>, vector<64x16xf32>, vector<64x16xf32> -> vector<64x16xf32>
    %c0_161 = arith.constant 0 : index
    %c0_162 = arith.constant 0 : index
    %c0_163 = arith.constant 0 : index
    %151 = vector.load %arg8[%c0_161, %c0_162, %c0_163] : memref<9x16x16xf32, #tpu.memory_space<vmem>>, vector<1x16x16xf32>
    %152 = vector.shape_cast %151 : vector<1x16x16xf32> to vector<16x16xf32>
    %cst_164 = arith.constant dense<0.000000e+00> : vector<64x16xf32>
    %153 = tpu.matmul %150, %152, %cst_164 {dimension_numbers = #tpu.dot_dimension_numbers<[1], [0], [0], [1], [0, 0, 1, 1], [], []>} : vector<64x16xf32>, vector<16x16xf32>, vector<64x16xf32> -> vector<64x16xf32>
    %c1_165 = arith.constant 1 : index
    %c0_166 = arith.constant 0 : index
    %c0_167 = arith.constant 0 : index
    %154 = vector.load %arg5[%c1_165, %c0_166, %c0_167] : memref<9x64x64xf32, #tpu.memory_space<vmem>>, vector<1x64x64xf32>
    %155 = vector.shape_cast %154 : vector<1x64x64xf32> to vector<64x64xf32>
    %cst_168 = arith.constant dense<0.000000e+00> : vector<64x16xf32>
    %156 = tpu.matmul %155, %147, %cst_168 {dimension_numbers = #tpu.dot_dimension_numbers<[1], [0], [0], [1], [0, 0, 1, 1], [], []>} : vector<64x64xf32>, vector<64x16xf32>, vector<64x16xf32> -> vector<64x16xf32>
    %c1_169 = arith.constant 1 : index
    %c0_170 = arith.constant 0 : index
    %c0_171 = arith.constant 0 : index
    %157 = vector.load %arg8[%c1_169, %c0_170, %c0_171] : memref<9x16x16xf32, #tpu.memory_space<vmem>>, vector<1x16x16xf32>
    %158 = vector.shape_cast %157 : vector<1x16x16xf32> to vector<16x16xf32>
    %cst_172 = arith.constant dense<0.000000e+00> : vector<64x16xf32>
    %159 = tpu.matmul %156, %158, %cst_172 {dimension_numbers = #tpu.dot_dimension_numbers<[1], [0], [0], [1], [0, 0, 1, 1], [], []>} : vector<64x16xf32>, vector<16x16xf32>, vector<64x16xf32> -> vector<64x16xf32>
    %160 = arith.addf %153, %159 : vector<64x16xf32>
    %c2_173 = arith.constant 2 : index
    %c0_174 = arith.constant 0 : index
    %c0_175 = arith.constant 0 : index
    %161 = vector.load %arg5[%c2_173, %c0_174, %c0_175] : memref<9x64x64xf32, #tpu.memory_space<vmem>>, vector<1x64x64xf32>
    %162 = vector.shape_cast %161 : vector<1x64x64xf32> to vector<64x64xf32>
    %cst_176 = arith.constant dense<0.000000e+00> : vector<64x16xf32>
    %163 = tpu.matmul %162, %147, %cst_176 {dimension_numbers = #tpu.dot_dimension_numbers<[1], [0], [0], [1], [0, 0, 1, 1], [], []>} : vector<64x64xf32>, vector<64x16xf32>, vector<64x16xf32> -> vector<64x16xf32>
    %c2_177 = arith.constant 2 : index
    %c0_178 = arith.constant 0 : index
    %c0_179 = arith.constant 0 : index
    %164 = vector.load %arg8[%c2_177, %c0_178, %c0_179] : memref<9x16x16xf32, #tpu.memory_space<vmem>>, vector<1x16x16xf32>
    %165 = vector.shape_cast %164 : vector<1x16x16xf32> to vector<16x16xf32>
    %cst_180 = arith.constant dense<0.000000e+00> : vector<64x16xf32>
    %166 = tpu.matmul %163, %165, %cst_180 {dimension_numbers = #tpu.dot_dimension_numbers<[1], [0], [0], [1], [0, 0, 1, 1], [], []>} : vector<64x16xf32>, vector<16x16xf32>, vector<64x16xf32> -> vector<64x16xf32>
    %167 = arith.addf %160, %166 : vector<64x16xf32>
    %c3_181 = arith.constant 3 : index
    %c0_182 = arith.constant 0 : index
    %c0_183 = arith.constant 0 : index
    %168 = vector.load %arg5[%c3_181, %c0_182, %c0_183] : memref<9x64x64xf32, #tpu.memory_space<vmem>>, vector<1x64x64xf32>
    %169 = vector.shape_cast %168 : vector<1x64x64xf32> to vector<64x64xf32>
    %cst_184 = arith.constant dense<0.000000e+00> : vector<64x16xf32>
    %170 = tpu.matmul %169, %147, %cst_184 {dimension_numbers = #tpu.dot_dimension_numbers<[1], [0], [0], [1], [0, 0, 1, 1], [], []>} : vector<64x64xf32>, vector<64x16xf32>, vector<64x16xf32> -> vector<64x16xf32>
    %c3_185 = arith.constant 3 : index
    %c0_186 = arith.constant 0 : index
    %c0_187 = arith.constant 0 : index
    %171 = vector.load %arg8[%c3_185, %c0_186, %c0_187] : memref<9x16x16xf32, #tpu.memory_space<vmem>>, vector<1x16x16xf32>
    %172 = vector.shape_cast %171 : vector<1x16x16xf32> to vector<16x16xf32>
    %cst_188 = arith.constant dense<0.000000e+00> : vector<64x16xf32>
    %173 = tpu.matmul %170, %172, %cst_188 {dimension_numbers = #tpu.dot_dimension_numbers<[1], [0], [0], [1], [0, 0, 1, 1], [], []>} : vector<64x16xf32>, vector<16x16xf32>, vector<64x16xf32> -> vector<64x16xf32>
    %174 = arith.addf %167, %173 : vector<64x16xf32>
    %c4_189 = arith.constant 4 : index
    %c0_190 = arith.constant 0 : index
    %c0_191 = arith.constant 0 : index
    %175 = vector.load %arg5[%c4_189, %c0_190, %c0_191] : memref<9x64x64xf32, #tpu.memory_space<vmem>>, vector<1x64x64xf32>
    %176 = vector.shape_cast %175 : vector<1x64x64xf32> to vector<64x64xf32>
    %cst_192 = arith.constant dense<0.000000e+00> : vector<64x16xf32>
    %177 = tpu.matmul %176, %147, %cst_192 {dimension_numbers = #tpu.dot_dimension_numbers<[1], [0], [0], [1], [0, 0, 1, 1], [], []>} : vector<64x64xf32>, vector<64x16xf32>, vector<64x16xf32> -> vector<64x16xf32>
    %c4_193 = arith.constant 4 : index
    %c0_194 = arith.constant 0 : index
    %c0_195 = arith.constant 0 : index
    %178 = vector.load %arg8[%c4_193, %c0_194, %c0_195] : memref<9x16x16xf32, #tpu.memory_space<vmem>>, vector<1x16x16xf32>
    %179 = vector.shape_cast %178 : vector<1x16x16xf32> to vector<16x16xf32>
    %cst_196 = arith.constant dense<0.000000e+00> : vector<64x16xf32>
    %180 = tpu.matmul %177, %179, %cst_196 {dimension_numbers = #tpu.dot_dimension_numbers<[1], [0], [0], [1], [0, 0, 1, 1], [], []>} : vector<64x16xf32>, vector<16x16xf32>, vector<64x16xf32> -> vector<64x16xf32>
    %181 = arith.addf %174, %180 : vector<64x16xf32>
    %c5_197 = arith.constant 5 : index
    %c0_198 = arith.constant 0 : index
    %c0_199 = arith.constant 0 : index
    %182 = vector.load %arg5[%c5_197, %c0_198, %c0_199] : memref<9x64x64xf32, #tpu.memory_space<vmem>>, vector<1x64x64xf32>
    %183 = vector.shape_cast %182 : vector<1x64x64xf32> to vector<64x64xf32>
    %cst_200 = arith.constant dense<0.000000e+00> : vector<64x16xf32>
    %184 = tpu.matmul %183, %147, %cst_200 {dimension_numbers = #tpu.dot_dimension_numbers<[1], [0], [0], [1], [0, 0, 1, 1], [], []>} : vector<64x64xf32>, vector<64x16xf32>, vector<64x16xf32> -> vector<64x16xf32>
    %c5_201 = arith.constant 5 : index
    %c0_202 = arith.constant 0 : index
    %c0_203 = arith.constant 0 : index
    %185 = vector.load %arg8[%c5_201, %c0_202, %c0_203] : memref<9x16x16xf32, #tpu.memory_space<vmem>>, vector<1x16x16xf32>
    %186 = vector.shape_cast %185 : vector<1x16x16xf32> to vector<16x16xf32>
    %cst_204 = arith.constant dense<0.000000e+00> : vector<64x16xf32>
    %187 = tpu.matmul %184, %186, %cst_204 {dimension_numbers = #tpu.dot_dimension_numbers<[1], [0], [0], [1], [0, 0, 1, 1], [], []>} : vector<64x16xf32>, vector<16x16xf32>, vector<64x16xf32> -> vector<64x16xf32>
    %188 = arith.addf %181, %187 : vector<64x16xf32>
    %c6_205 = arith.constant 6 : index
    %c0_206 = arith.constant 0 : index
    %c0_207 = arith.constant 0 : index
    %189 = vector.load %arg5[%c6_205, %c0_206, %c0_207] : memref<9x64x64xf32, #tpu.memory_space<vmem>>, vector<1x64x64xf32>
    %190 = vector.shape_cast %189 : vector<1x64x64xf32> to vector<64x64xf32>
    %cst_208 = arith.constant dense<0.000000e+00> : vector<64x16xf32>
    %191 = tpu.matmul %190, %147, %cst_208 {dimension_numbers = #tpu.dot_dimension_numbers<[1], [0], [0], [1], [0, 0, 1, 1], [], []>} : vector<64x64xf32>, vector<64x16xf32>, vector<64x16xf32> -> vector<64x16xf32>
    %c6_209 = arith.constant 6 : index
    %c0_210 = arith.constant 0 : index
    %c0_211 = arith.constant 0 : index
    %192 = vector.load %arg8[%c6_209, %c0_210, %c0_211] : memref<9x16x16xf32, #tpu.memory_space<vmem>>, vector<1x16x16xf32>
    %193 = vector.shape_cast %192 : vector<1x16x16xf32> to vector<16x16xf32>
    %cst_212 = arith.constant dense<0.000000e+00> : vector<64x16xf32>
    %194 = tpu.matmul %191, %193, %cst_212 {dimension_numbers = #tpu.dot_dimension_numbers<[1], [0], [0], [1], [0, 0, 1, 1], [], []>} : vector<64x16xf32>, vector<16x16xf32>, vector<64x16xf32> -> vector<64x16xf32>
    %195 = arith.addf %188, %194 : vector<64x16xf32>
    %c7_213 = arith.constant 7 : index
    %c0_214 = arith.constant 0 : index
    %c0_215 = arith.constant 0 : index
    %196 = vector.load %arg5[%c7_213, %c0_214, %c0_215] : memref<9x64x64xf32, #tpu.memory_space<vmem>>, vector<1x64x64xf32>
    %197 = vector.shape_cast %196 : vector<1x64x64xf32> to vector<64x64xf32>
    %cst_216 = arith.constant dense<0.000000e+00> : vector<64x16xf32>
    %198 = tpu.matmul %197, %147, %cst_216 {dimension_numbers = #tpu.dot_dimension_numbers<[1], [0], [0], [1], [0, 0, 1, 1], [], []>} : vector<64x64xf32>, vector<64x16xf32>, vector<64x16xf32> -> vector<64x16xf32>
    %c7_217 = arith.constant 7 : index
    %c0_218 = arith.constant 0 : index
    %c0_219 = arith.constant 0 : index
    %199 = vector.load %arg8[%c7_217, %c0_218, %c0_219] : memref<9x16x16xf32, #tpu.memory_space<vmem>>, vector<1x16x16xf32>
    %200 = vector.shape_cast %199 : vector<1x16x16xf32> to vector<16x16xf32>
    %cst_220 = arith.constant dense<0.000000e+00> : vector<64x16xf32>
    %201 = tpu.matmul %198, %200, %cst_220 {dimension_numbers = #tpu.dot_dimension_numbers<[1], [0], [0], [1], [0, 0, 1, 1], [], []>} : vector<64x16xf32>, vector<16x16xf32>, vector<64x16xf32> -> vector<64x16xf32>
    %202 = arith.addf %195, %201 : vector<64x16xf32>
    %c8_221 = arith.constant 8 : index
    %c0_222 = arith.constant 0 : index
    %c0_223 = arith.constant 0 : index
    %203 = vector.load %arg5[%c8_221, %c0_222, %c0_223] : memref<9x64x64xf32, #tpu.memory_space<vmem>>, vector<1x64x64xf32>
    %204 = vector.shape_cast %203 : vector<1x64x64xf32> to vector<64x64xf32>
    %cst_224 = arith.constant dense<0.000000e+00> : vector<64x16xf32>
    %205 = tpu.matmul %204, %147, %cst_224 {dimension_numbers = #tpu.dot_dimension_numbers<[1], [0], [0], [1], [0, 0, 1, 1], [], []>} : vector<64x64xf32>, vector<64x16xf32>, vector<64x16xf32> -> vector<64x16xf32>
    %c8_225 = arith.constant 8 : index
    %c0_226 = arith.constant 0 : index
    %c0_227 = arith.constant 0 : index
    %206 = vector.load %arg8[%c8_225, %c0_226, %c0_227] : memref<9x16x16xf32, #tpu.memory_space<vmem>>, vector<1x16x16xf32>
    %207 = vector.shape_cast %206 : vector<1x16x16xf32> to vector<16x16xf32>
    %cst_228 = arith.constant dense<0.000000e+00> : vector<64x16xf32>
    %208 = tpu.matmul %205, %207, %cst_228 {dimension_numbers = #tpu.dot_dimension_numbers<[1], [0], [0], [1], [0, 0, 1, 1], [], []>} : vector<64x16xf32>, vector<16x16xf32>, vector<64x16xf32> -> vector<64x16xf32>
    %209 = arith.addf %202, %208 : vector<64x16xf32>
    %c0_229 = arith.constant 0 : index
    %c0_230 = arith.constant 0 : index
    %210 = vector.load %arg9[%c0_229, %c0_230] : memref<1x16xf32, #tpu.memory_space<vmem>>, vector<1x16xf32>
    %211 = vector.broadcast %210 : vector<1x16xf32> to vector<64x16xf32>
    %212 = arith.addf %209, %211 : vector<64x16xf32>
    %213 = arith.addf %212, %80 : vector<64x16xf32>
    %cst_231 = arith.constant 0.000000e+00 : f32
    %214 = vector.broadcast %cst_231 : f32 to vector<64x16xf32>
    %215 = arith.maximumf %213, %214 : vector<64x16xf32>
    %c0_232 = arith.constant 0 : index
    %c0_233 = arith.constant 0 : index
    %c0_234 = arith.constant 0 : index
    %216 = vector.load %arg10[%c0_232, %c0_233, %c0_234] : memref<9x16x64xf32, #tpu.memory_space<vmem>>, vector<1x16x64xf32>
    %217 = vector.shape_cast %216 : vector<1x16x64xf32> to vector<16x64xf32>
    %cst_235 = arith.constant dense<0.000000e+00> : vector<16x16xf32>
    %218 = tpu.matmul %217, %215, %cst_235 {dimension_numbers = #tpu.dot_dimension_numbers<[1], [0], [0], [1], [0, 0, 1, 1], [], []>} : vector<16x64xf32>, vector<64x16xf32>, vector<16x16xf32> -> vector<16x16xf32>
    %c0_236 = arith.constant 0 : index
    %c0_237 = arith.constant 0 : index
    %c0_238 = arith.constant 0 : index
    %219 = vector.load %arg11[%c0_236, %c0_237, %c0_238] : memref<9x16x32xf32, #tpu.memory_space<vmem>>, vector<1x16x32xf32>
    %220 = vector.shape_cast %219 : vector<1x16x32xf32> to vector<16x32xf32>
    %cst_239 = arith.constant dense<0.000000e+00> : vector<16x32xf32>
    %221 = tpu.matmul %218, %220, %cst_239 {dimension_numbers = #tpu.dot_dimension_numbers<[1], [0], [0], [1], [0, 0, 1, 1], [], []>} : vector<16x16xf32>, vector<16x32xf32>, vector<16x32xf32> -> vector<16x32xf32>
    %c1_240 = arith.constant 1 : index
    %c0_241 = arith.constant 0 : index
    %c0_242 = arith.constant 0 : index
    %222 = vector.load %arg10[%c1_240, %c0_241, %c0_242] : memref<9x16x64xf32, #tpu.memory_space<vmem>>, vector<1x16x64xf32>
    %223 = vector.shape_cast %222 : vector<1x16x64xf32> to vector<16x64xf32>
    %cst_243 = arith.constant dense<0.000000e+00> : vector<16x16xf32>
    %224 = tpu.matmul %223, %215, %cst_243 {dimension_numbers = #tpu.dot_dimension_numbers<[1], [0], [0], [1], [0, 0, 1, 1], [], []>} : vector<16x64xf32>, vector<64x16xf32>, vector<16x16xf32> -> vector<16x16xf32>
    %c1_244 = arith.constant 1 : index
    %c0_245 = arith.constant 0 : index
    %c0_246 = arith.constant 0 : index
    %225 = vector.load %arg11[%c1_244, %c0_245, %c0_246] : memref<9x16x32xf32, #tpu.memory_space<vmem>>, vector<1x16x32xf32>
    %226 = vector.shape_cast %225 : vector<1x16x32xf32> to vector<16x32xf32>
    %cst_247 = arith.constant dense<0.000000e+00> : vector<16x32xf32>
    %227 = tpu.matmul %224, %226, %cst_247 {dimension_numbers = #tpu.dot_dimension_numbers<[1], [0], [0], [1], [0, 0, 1, 1], [], []>} : vector<16x16xf32>, vector<16x32xf32>, vector<16x32xf32> -> vector<16x32xf32>
    %228 = arith.addf %221, %227 : vector<16x32xf32>
    %c2_248 = arith.constant 2 : index
    %c0_249 = arith.constant 0 : index
    %c0_250 = arith.constant 0 : index
    %229 = vector.load %arg10[%c2_248, %c0_249, %c0_250] : memref<9x16x64xf32, #tpu.memory_space<vmem>>, vector<1x16x64xf32>
    %230 = vector.shape_cast %229 : vector<1x16x64xf32> to vector<16x64xf32>
    %cst_251 = arith.constant dense<0.000000e+00> : vector<16x16xf32>
    %231 = tpu.matmul %230, %215, %cst_251 {dimension_numbers = #tpu.dot_dimension_numbers<[1], [0], [0], [1], [0, 0, 1, 1], [], []>} : vector<16x64xf32>, vector<64x16xf32>, vector<16x16xf32> -> vector<16x16xf32>
    %c2_252 = arith.constant 2 : index
    %c0_253 = arith.constant 0 : index
    %c0_254 = arith.constant 0 : index
    %232 = vector.load %arg11[%c2_252, %c0_253, %c0_254] : memref<9x16x32xf32, #tpu.memory_space<vmem>>, vector<1x16x32xf32>
    %233 = vector.shape_cast %232 : vector<1x16x32xf32> to vector<16x32xf32>
    %cst_255 = arith.constant dense<0.000000e+00> : vector<16x32xf32>
    %234 = tpu.matmul %231, %233, %cst_255 {dimension_numbers = #tpu.dot_dimension_numbers<[1], [0], [0], [1], [0, 0, 1, 1], [], []>} : vector<16x16xf32>, vector<16x32xf32>, vector<16x32xf32> -> vector<16x32xf32>
    %235 = arith.addf %228, %234 : vector<16x32xf32>
    %c3_256 = arith.constant 3 : index
    %c0_257 = arith.constant 0 : index
    %c0_258 = arith.constant 0 : index
    %236 = vector.load %arg10[%c3_256, %c0_257, %c0_258] : memref<9x16x64xf32, #tpu.memory_space<vmem>>, vector<1x16x64xf32>
    %237 = vector.shape_cast %236 : vector<1x16x64xf32> to vector<16x64xf32>
    %cst_259 = arith.constant dense<0.000000e+00> : vector<16x16xf32>
    %238 = tpu.matmul %237, %215, %cst_259 {dimension_numbers = #tpu.dot_dimension_numbers<[1], [0], [0], [1], [0, 0, 1, 1], [], []>} : vector<16x64xf32>, vector<64x16xf32>, vector<16x16xf32> -> vector<16x16xf32>
    %c3_260 = arith.constant 3 : index
    %c0_261 = arith.constant 0 : index
    %c0_262 = arith.constant 0 : index
    %239 = vector.load %arg11[%c3_260, %c0_261, %c0_262] : memref<9x16x32xf32, #tpu.memory_space<vmem>>, vector<1x16x32xf32>
    %240 = vector.shape_cast %239 : vector<1x16x32xf32> to vector<16x32xf32>
    %cst_263 = arith.constant dense<0.000000e+00> : vector<16x32xf32>
    %241 = tpu.matmul %238, %240, %cst_263 {dimension_numbers = #tpu.dot_dimension_numbers<[1], [0], [0], [1], [0, 0, 1, 1], [], []>} : vector<16x16xf32>, vector<16x32xf32>, vector<16x32xf32> -> vector<16x32xf32>
    %242 = arith.addf %235, %241 : vector<16x32xf32>
    %c4_264 = arith.constant 4 : index
    %c0_265 = arith.constant 0 : index
    %c0_266 = arith.constant 0 : index
    %243 = vector.load %arg10[%c4_264, %c0_265, %c0_266] : memref<9x16x64xf32, #tpu.memory_space<vmem>>, vector<1x16x64xf32>
    %244 = vector.shape_cast %243 : vector<1x16x64xf32> to vector<16x64xf32>
    %cst_267 = arith.constant dense<0.000000e+00> : vector<16x16xf32>
    %245 = tpu.matmul %244, %215, %cst_267 {dimension_numbers = #tpu.dot_dimension_numbers<[1], [0], [0], [1], [0, 0, 1, 1], [], []>} : vector<16x64xf32>, vector<64x16xf32>, vector<16x16xf32> -> vector<16x16xf32>
    %c4_268 = arith.constant 4 : index
    %c0_269 = arith.constant 0 : index
    %c0_270 = arith.constant 0 : index
    %246 = vector.load %arg11[%c4_268, %c0_269, %c0_270] : memref<9x16x32xf32, #tpu.memory_space<vmem>>, vector<1x16x32xf32>
    %247 = vector.shape_cast %246 : vector<1x16x32xf32> to vector<16x32xf32>
    %cst_271 = arith.constant dense<0.000000e+00> : vector<16x32xf32>
    %248 = tpu.matmul %245, %247, %cst_271 {dimension_numbers = #tpu.dot_dimension_numbers<[1], [0], [0], [1], [0, 0, 1, 1], [], []>} : vector<16x16xf32>, vector<16x32xf32>, vector<16x32xf32> -> vector<16x32xf32>
    %249 = arith.addf %242, %248 : vector<16x32xf32>
    %c5_272 = arith.constant 5 : index
    %c0_273 = arith.constant 0 : index
    %c0_274 = arith.constant 0 : index
    %250 = vector.load %arg10[%c5_272, %c0_273, %c0_274] : memref<9x16x64xf32, #tpu.memory_space<vmem>>, vector<1x16x64xf32>
    %251 = vector.shape_cast %250 : vector<1x16x64xf32> to vector<16x64xf32>
    %cst_275 = arith.constant dense<0.000000e+00> : vector<16x16xf32>
    %252 = tpu.matmul %251, %215, %cst_275 {dimension_numbers = #tpu.dot_dimension_numbers<[1], [0], [0], [1], [0, 0, 1, 1], [], []>} : vector<16x64xf32>, vector<64x16xf32>, vector<16x16xf32> -> vector<16x16xf32>
    %c5_276 = arith.constant 5 : index
    %c0_277 = arith.constant 0 : index
    %c0_278 = arith.constant 0 : index
    %253 = vector.load %arg11[%c5_276, %c0_277, %c0_278] : memref<9x16x32xf32, #tpu.memory_space<vmem>>, vector<1x16x32xf32>
    %254 = vector.shape_cast %253 : vector<1x16x32xf32> to vector<16x32xf32>
    %cst_279 = arith.constant dense<0.000000e+00> : vector<16x32xf32>
    %255 = tpu.matmul %252, %254, %cst_279 {dimension_numbers = #tpu.dot_dimension_numbers<[1], [0], [0], [1], [0, 0, 1, 1], [], []>} : vector<16x16xf32>, vector<16x32xf32>, vector<16x32xf32> -> vector<16x32xf32>
    %256 = arith.addf %249, %255 : vector<16x32xf32>
    %c6_280 = arith.constant 6 : index
    %c0_281 = arith.constant 0 : index
    %c0_282 = arith.constant 0 : index
    %257 = vector.load %arg10[%c6_280, %c0_281, %c0_282] : memref<9x16x64xf32, #tpu.memory_space<vmem>>, vector<1x16x64xf32>
    %258 = vector.shape_cast %257 : vector<1x16x64xf32> to vector<16x64xf32>
    %cst_283 = arith.constant dense<0.000000e+00> : vector<16x16xf32>
    %259 = tpu.matmul %258, %215, %cst_283 {dimension_numbers = #tpu.dot_dimension_numbers<[1], [0], [0], [1], [0, 0, 1, 1], [], []>} : vector<16x64xf32>, vector<64x16xf32>, vector<16x16xf32> -> vector<16x16xf32>
    %c6_284 = arith.constant 6 : index
    %c0_285 = arith.constant 0 : index
    %c0_286 = arith.constant 0 : index
    %260 = vector.load %arg11[%c6_284, %c0_285, %c0_286] : memref<9x16x32xf32, #tpu.memory_space<vmem>>, vector<1x16x32xf32>
    %261 = vector.shape_cast %260 : vector<1x16x32xf32> to vector<16x32xf32>
    %cst_287 = arith.constant dense<0.000000e+00> : vector<16x32xf32>
    %262 = tpu.matmul %259, %261, %cst_287 {dimension_numbers = #tpu.dot_dimension_numbers<[1], [0], [0], [1], [0, 0, 1, 1], [], []>} : vector<16x16xf32>, vector<16x32xf32>, vector<16x32xf32> -> vector<16x32xf32>
    %263 = arith.addf %256, %262 : vector<16x32xf32>
    %c7_288 = arith.constant 7 : index
    %c0_289 = arith.constant 0 : index
    %c0_290 = arith.constant 0 : index
    %264 = vector.load %arg10[%c7_288, %c0_289, %c0_290] : memref<9x16x64xf32, #tpu.memory_space<vmem>>, vector<1x16x64xf32>
    %265 = vector.shape_cast %264 : vector<1x16x64xf32> to vector<16x64xf32>
    %cst_291 = arith.constant dense<0.000000e+00> : vector<16x16xf32>
    %266 = tpu.matmul %265, %215, %cst_291 {dimension_numbers = #tpu.dot_dimension_numbers<[1], [0], [0], [1], [0, 0, 1, 1], [], []>} : vector<16x64xf32>, vector<64x16xf32>, vector<16x16xf32> -> vector<16x16xf32>
    %c7_292 = arith.constant 7 : index
    %c0_293 = arith.constant 0 : index
    %c0_294 = arith.constant 0 : index
    %267 = vector.load %arg11[%c7_292, %c0_293, %c0_294] : memref<9x16x32xf32, #tpu.memory_space<vmem>>, vector<1x16x32xf32>
    %268 = vector.shape_cast %267 : vector<1x16x32xf32> to vector<16x32xf32>
    %cst_295 = arith.constant dense<0.000000e+00> : vector<16x32xf32>
    %269 = tpu.matmul %266, %268, %cst_295 {dimension_numbers = #tpu.dot_dimension_numbers<[1], [0], [0], [1], [0, 0, 1, 1], [], []>} : vector<16x16xf32>, vector<16x32xf32>, vector<16x32xf32> -> vector<16x32xf32>
    %270 = arith.addf %263, %269 : vector<16x32xf32>
    %c8_296 = arith.constant 8 : index
    %c0_297 = arith.constant 0 : index
    %c0_298 = arith.constant 0 : index
    %271 = vector.load %arg10[%c8_296, %c0_297, %c0_298] : memref<9x16x64xf32, #tpu.memory_space<vmem>>, vector<1x16x64xf32>
    %272 = vector.shape_cast %271 : vector<1x16x64xf32> to vector<16x64xf32>
    %cst_299 = arith.constant dense<0.000000e+00> : vector<16x16xf32>
    %273 = tpu.matmul %272, %215, %cst_299 {dimension_numbers = #tpu.dot_dimension_numbers<[1], [0], [0], [1], [0, 0, 1, 1], [], []>} : vector<16x64xf32>, vector<64x16xf32>, vector<16x16xf32> -> vector<16x16xf32>
    %c8_300 = arith.constant 8 : index
    %c0_301 = arith.constant 0 : index
    %c0_302 = arith.constant 0 : index
    %274 = vector.load %arg11[%c8_300, %c0_301, %c0_302] : memref<9x16x32xf32, #tpu.memory_space<vmem>>, vector<1x16x32xf32>
    %275 = vector.shape_cast %274 : vector<1x16x32xf32> to vector<16x32xf32>
    %cst_303 = arith.constant dense<0.000000e+00> : vector<16x32xf32>
    %276 = tpu.matmul %273, %275, %cst_303 {dimension_numbers = #tpu.dot_dimension_numbers<[1], [0], [0], [1], [0, 0, 1, 1], [], []>} : vector<16x16xf32>, vector<16x32xf32>, vector<16x32xf32> -> vector<16x32xf32>
    %277 = arith.addf %270, %276 : vector<16x32xf32>
    %c0_304 = arith.constant 0 : index
    %c0_305 = arith.constant 0 : index
    %278 = vector.load %arg12[%c0_304, %c0_305] : memref<1x32xf32, #tpu.memory_space<vmem>>, vector<1x32xf32>
    %279 = vector.broadcast %278 : vector<1x32xf32> to vector<16x32xf32>
    %280 = arith.addf %277, %279 : vector<16x32xf32>
    %cst_306 = arith.constant 0.000000e+00 : f32
    %281 = vector.broadcast %cst_306 : f32 to vector<16x32xf32>
    %282 = arith.maximumf %280, %281 : vector<16x32xf32>
    %c0_307 = arith.constant 0 : index
    %c0_308 = arith.constant 0 : index
    %c0_309 = arith.constant 0 : index
    %283 = vector.load %arg13[%c0_307, %c0_308, %c0_309] : memref<9x16x16xf32, #tpu.memory_space<vmem>>, vector<1x16x16xf32>
    %284 = vector.shape_cast %283 : vector<1x16x16xf32> to vector<16x16xf32>
    %cst_310 = arith.constant dense<0.000000e+00> : vector<16x32xf32>
    %285 = tpu.matmul %284, %282, %cst_310 {dimension_numbers = #tpu.dot_dimension_numbers<[1], [0], [0], [1], [0, 0, 1, 1], [], []>} : vector<16x16xf32>, vector<16x32xf32>, vector<16x32xf32> -> vector<16x32xf32>
    %c0_311 = arith.constant 0 : index
    %c0_312 = arith.constant 0 : index
    %c0_313 = arith.constant 0 : index
    %286 = vector.load %arg14[%c0_311, %c0_312, %c0_313] : memref<9x32x32xf32, #tpu.memory_space<vmem>>, vector<1x32x32xf32>
    %287 = vector.shape_cast %286 : vector<1x32x32xf32> to vector<32x32xf32>
    %cst_314 = arith.constant dense<0.000000e+00> : vector<16x32xf32>
    %288 = tpu.matmul %285, %287, %cst_314 {dimension_numbers = #tpu.dot_dimension_numbers<[1], [0], [0], [1], [0, 0, 1, 1], [], []>} : vector<16x32xf32>, vector<32x32xf32>, vector<16x32xf32> -> vector<16x32xf32>
    %c1_315 = arith.constant 1 : index
    %c0_316 = arith.constant 0 : index
    %c0_317 = arith.constant 0 : index
    %289 = vector.load %arg13[%c1_315, %c0_316, %c0_317] : memref<9x16x16xf32, #tpu.memory_space<vmem>>, vector<1x16x16xf32>
    %290 = vector.shape_cast %289 : vector<1x16x16xf32> to vector<16x16xf32>
    %cst_318 = arith.constant dense<0.000000e+00> : vector<16x32xf32>
    %291 = tpu.matmul %290, %282, %cst_318 {dimension_numbers = #tpu.dot_dimension_numbers<[1], [0], [0], [1], [0, 0, 1, 1], [], []>} : vector<16x16xf32>, vector<16x32xf32>, vector<16x32xf32> -> vector<16x32xf32>
    %c1_319 = arith.constant 1 : index
    %c0_320 = arith.constant 0 : index
    %c0_321 = arith.constant 0 : index
    %292 = vector.load %arg14[%c1_319, %c0_320, %c0_321] : memref<9x32x32xf32, #tpu.memory_space<vmem>>, vector<1x32x32xf32>
    %293 = vector.shape_cast %292 : vector<1x32x32xf32> to vector<32x32xf32>
    %cst_322 = arith.constant dense<0.000000e+00> : vector<16x32xf32>
    %294 = tpu.matmul %291, %293, %cst_322 {dimension_numbers = #tpu.dot_dimension_numbers<[1], [0], [0], [1], [0, 0, 1, 1], [], []>} : vector<16x32xf32>, vector<32x32xf32>, vector<16x32xf32> -> vector<16x32xf32>
    %295 = arith.addf %288, %294 : vector<16x32xf32>
    %c2_323 = arith.constant 2 : index
    %c0_324 = arith.constant 0 : index
    %c0_325 = arith.constant 0 : index
    %296 = vector.load %arg13[%c2_323, %c0_324, %c0_325] : memref<9x16x16xf32, #tpu.memory_space<vmem>>, vector<1x16x16xf32>
    %297 = vector.shape_cast %296 : vector<1x16x16xf32> to vector<16x16xf32>
    %cst_326 = arith.constant dense<0.000000e+00> : vector<16x32xf32>
    %298 = tpu.matmul %297, %282, %cst_326 {dimension_numbers = #tpu.dot_dimension_numbers<[1], [0], [0], [1], [0, 0, 1, 1], [], []>} : vector<16x16xf32>, vector<16x32xf32>, vector<16x32xf32> -> vector<16x32xf32>
    %c2_327 = arith.constant 2 : index
    %c0_328 = arith.constant 0 : index
    %c0_329 = arith.constant 0 : index
    %299 = vector.load %arg14[%c2_327, %c0_328, %c0_329] : memref<9x32x32xf32, #tpu.memory_space<vmem>>, vector<1x32x32xf32>
    %300 = vector.shape_cast %299 : vector<1x32x32xf32> to vector<32x32xf32>
    %cst_330 = arith.constant dense<0.000000e+00> : vector<16x32xf32>
    %301 = tpu.matmul %298, %300, %cst_330 {dimension_numbers = #tpu.dot_dimension_numbers<[1], [0], [0], [1], [0, 0, 1, 1], [], []>} : vector<16x32xf32>, vector<32x32xf32>, vector<16x32xf32> -> vector<16x32xf32>
    %302 = arith.addf %295, %301 : vector<16x32xf32>
    %c3_331 = arith.constant 3 : index
    %c0_332 = arith.constant 0 : index
    %c0_333 = arith.constant 0 : index
    %303 = vector.load %arg13[%c3_331, %c0_332, %c0_333] : memref<9x16x16xf32, #tpu.memory_space<vmem>>, vector<1x16x16xf32>
    %304 = vector.shape_cast %303 : vector<1x16x16xf32> to vector<16x16xf32>
    %cst_334 = arith.constant dense<0.000000e+00> : vector<16x32xf32>
    %305 = tpu.matmul %304, %282, %cst_334 {dimension_numbers = #tpu.dot_dimension_numbers<[1], [0], [0], [1], [0, 0, 1, 1], [], []>} : vector<16x16xf32>, vector<16x32xf32>, vector<16x32xf32> -> vector<16x32xf32>
    %c3_335 = arith.constant 3 : index
    %c0_336 = arith.constant 0 : index
    %c0_337 = arith.constant 0 : index
    %306 = vector.load %arg14[%c3_335, %c0_336, %c0_337] : memref<9x32x32xf32, #tpu.memory_space<vmem>>, vector<1x32x32xf32>
    %307 = vector.shape_cast %306 : vector<1x32x32xf32> to vector<32x32xf32>
    %cst_338 = arith.constant dense<0.000000e+00> : vector<16x32xf32>
    %308 = tpu.matmul %305, %307, %cst_338 {dimension_numbers = #tpu.dot_dimension_numbers<[1], [0], [0], [1], [0, 0, 1, 1], [], []>} : vector<16x32xf32>, vector<32x32xf32>, vector<16x32xf32> -> vector<16x32xf32>
    %309 = arith.addf %302, %308 : vector<16x32xf32>
    %c4_339 = arith.constant 4 : index
    %c0_340 = arith.constant 0 : index
    %c0_341 = arith.constant 0 : index
    %310 = vector.load %arg13[%c4_339, %c0_340, %c0_341] : memref<9x16x16xf32, #tpu.memory_space<vmem>>, vector<1x16x16xf32>
    %311 = vector.shape_cast %310 : vector<1x16x16xf32> to vector<16x16xf32>
    %cst_342 = arith.constant dense<0.000000e+00> : vector<16x32xf32>
    %312 = tpu.matmul %311, %282, %cst_342 {dimension_numbers = #tpu.dot_dimension_numbers<[1], [0], [0], [1], [0, 0, 1, 1], [], []>} : vector<16x16xf32>, vector<16x32xf32>, vector<16x32xf32> -> vector<16x32xf32>
    %c4_343 = arith.constant 4 : index
    %c0_344 = arith.constant 0 : index
    %c0_345 = arith.constant 0 : index
    %313 = vector.load %arg14[%c4_343, %c0_344, %c0_345] : memref<9x32x32xf32, #tpu.memory_space<vmem>>, vector<1x32x32xf32>
    %314 = vector.shape_cast %313 : vector<1x32x32xf32> to vector<32x32xf32>
    %cst_346 = arith.constant dense<0.000000e+00> : vector<16x32xf32>
    %315 = tpu.matmul %312, %314, %cst_346 {dimension_numbers = #tpu.dot_dimension_numbers<[1], [0], [0], [1], [0, 0, 1, 1], [], []>} : vector<16x32xf32>, vector<32x32xf32>, vector<16x32xf32> -> vector<16x32xf32>
    %316 = arith.addf %309, %315 : vector<16x32xf32>
    %c5_347 = arith.constant 5 : index
    %c0_348 = arith.constant 0 : index
    %c0_349 = arith.constant 0 : index
    %317 = vector.load %arg13[%c5_347, %c0_348, %c0_349] : memref<9x16x16xf32, #tpu.memory_space<vmem>>, vector<1x16x16xf32>
    %318 = vector.shape_cast %317 : vector<1x16x16xf32> to vector<16x16xf32>
    %cst_350 = arith.constant dense<0.000000e+00> : vector<16x32xf32>
    %319 = tpu.matmul %318, %282, %cst_350 {dimension_numbers = #tpu.dot_dimension_numbers<[1], [0], [0], [1], [0, 0, 1, 1], [], []>} : vector<16x16xf32>, vector<16x32xf32>, vector<16x32xf32> -> vector<16x32xf32>
    %c5_351 = arith.constant 5 : index
    %c0_352 = arith.constant 0 : index
    %c0_353 = arith.constant 0 : index
    %320 = vector.load %arg14[%c5_351, %c0_352, %c0_353] : memref<9x32x32xf32, #tpu.memory_space<vmem>>, vector<1x32x32xf32>
    %321 = vector.shape_cast %320 : vector<1x32x32xf32> to vector<32x32xf32>
    %cst_354 = arith.constant dense<0.000000e+00> : vector<16x32xf32>
    %322 = tpu.matmul %319, %321, %cst_354 {dimension_numbers = #tpu.dot_dimension_numbers<[1], [0], [0], [1], [0, 0, 1, 1], [], []>} : vector<16x32xf32>, vector<32x32xf32>, vector<16x32xf32> -> vector<16x32xf32>
    %323 = arith.addf %316, %322 : vector<16x32xf32>
    %c6_355 = arith.constant 6 : index
    %c0_356 = arith.constant 0 : index
    %c0_357 = arith.constant 0 : index
    %324 = vector.load %arg13[%c6_355, %c0_356, %c0_357] : memref<9x16x16xf32, #tpu.memory_space<vmem>>, vector<1x16x16xf32>
    %325 = vector.shape_cast %324 : vector<1x16x16xf32> to vector<16x16xf32>
    %cst_358 = arith.constant dense<0.000000e+00> : vector<16x32xf32>
    %326 = tpu.matmul %325, %282, %cst_358 {dimension_numbers = #tpu.dot_dimension_numbers<[1], [0], [0], [1], [0, 0, 1, 1], [], []>} : vector<16x16xf32>, vector<16x32xf32>, vector<16x32xf32> -> vector<16x32xf32>
    %c6_359 = arith.constant 6 : index
    %c0_360 = arith.constant 0 : index
    %c0_361 = arith.constant 0 : index
    %327 = vector.load %arg14[%c6_359, %c0_360, %c0_361] : memref<9x32x32xf32, #tpu.memory_space<vmem>>, vector<1x32x32xf32>
    %328 = vector.shape_cast %327 : vector<1x32x32xf32> to vector<32x32xf32>
    %cst_362 = arith.constant dense<0.000000e+00> : vector<16x32xf32>
    %329 = tpu.matmul %326, %328, %cst_362 {dimension_numbers = #tpu.dot_dimension_numbers<[1], [0], [0], [1], [0, 0, 1, 1], [], []>} : vector<16x32xf32>, vector<32x32xf32>, vector<16x32xf32> -> vector<16x32xf32>
    %330 = arith.addf %323, %329 : vector<16x32xf32>
    %c7_363 = arith.constant 7 : index
    %c0_364 = arith.constant 0 : index
    %c0_365 = arith.constant 0 : index
    %331 = vector.load %arg13[%c7_363, %c0_364, %c0_365] : memref<9x16x16xf32, #tpu.memory_space<vmem>>, vector<1x16x16xf32>
    %332 = vector.shape_cast %331 : vector<1x16x16xf32> to vector<16x16xf32>
    %cst_366 = arith.constant dense<0.000000e+00> : vector<16x32xf32>
    %333 = tpu.matmul %332, %282, %cst_366 {dimension_numbers = #tpu.dot_dimension_numbers<[1], [0], [0], [1], [0, 0, 1, 1], [], []>} : vector<16x16xf32>, vector<16x32xf32>, vector<16x32xf32> -> vector<16x32xf32>
    %c7_367 = arith.constant 7 : index
    %c0_368 = arith.constant 0 : index
    %c0_369 = arith.constant 0 : index
    %334 = vector.load %arg14[%c7_367, %c0_368, %c0_369] : memref<9x32x32xf32, #tpu.memory_space<vmem>>, vector<1x32x32xf32>
    %335 = vector.shape_cast %334 : vector<1x32x32xf32> to vector<32x32xf32>
    %cst_370 = arith.constant dense<0.000000e+00> : vector<16x32xf32>
    %336 = tpu.matmul %333, %335, %cst_370 {dimension_numbers = #tpu.dot_dimension_numbers<[1], [0], [0], [1], [0, 0, 1, 1], [], []>} : vector<16x32xf32>, vector<32x32xf32>, vector<16x32xf32> -> vector<16x32xf32>
    %337 = arith.addf %330, %336 : vector<16x32xf32>
    %c8_371 = arith.constant 8 : index
    %c0_372 = arith.constant 0 : index
    %c0_373 = arith.constant 0 : index
    %338 = vector.load %arg13[%c8_371, %c0_372, %c0_373] : memref<9x16x16xf32, #tpu.memory_space<vmem>>, vector<1x16x16xf32>
    %339 = vector.shape_cast %338 : vector<1x16x16xf32> to vector<16x16xf32>
    %cst_374 = arith.constant dense<0.000000e+00> : vector<16x32xf32>
    %340 = tpu.matmul %339, %282, %cst_374 {dimension_numbers = #tpu.dot_dimension_numbers<[1], [0], [0], [1], [0, 0, 1, 1], [], []>} : vector<16x16xf32>, vector<16x32xf32>, vector<16x32xf32> -> vector<16x32xf32>
    %c8_375 = arith.constant 8 : index
    %c0_376 = arith.constant 0 : index
    %c0_377 = arith.constant 0 : index
    %341 = vector.load %arg14[%c8_375, %c0_376, %c0_377] : memref<9x32x32xf32, #tpu.memory_space<vmem>>, vector<1x32x32xf32>
    %342 = vector.shape_cast %341 : vector<1x32x32xf32> to vector<32x32xf32>
    %cst_378 = arith.constant dense<0.000000e+00> : vector<16x32xf32>
    %343 = tpu.matmul %340, %342, %cst_378 {dimension_numbers = #tpu.dot_dimension_numbers<[1], [0], [0], [1], [0, 0, 1, 1], [], []>} : vector<16x32xf32>, vector<32x32xf32>, vector<16x32xf32> -> vector<16x32xf32>
    %344 = arith.addf %337, %343 : vector<16x32xf32>
    %c0_379 = arith.constant 0 : index
    %c0_380 = arith.constant 0 : index
    %345 = vector.load %arg16[%c0_379, %c0_380] : memref<16x64xf32, #tpu.memory_space<vmem>>, vector<16x64xf32>
    %cst_381 = arith.constant dense<0.000000e+00> : vector<16x16xf32>
    %346 = tpu.matmul %345, %215, %cst_381 {dimension_numbers = #tpu.dot_dimension_numbers<[1], [0], [0], [1], [0, 0, 1, 1], [], []>} : vector<16x64xf32>, vector<64x16xf32>, vector<16x16xf32> -> vector<16x16xf32>
    %c0_382 = arith.constant 0 : index
    %c0_383 = arith.constant 0 : index
    %347 = vector.load %arg17[%c0_382, %c0_383] : memref<16x32xf32, #tpu.memory_space<vmem>>, vector<16x32xf32>
    %cst_384 = arith.constant dense<0.000000e+00> : vector<16x32xf32>
    %348 = tpu.matmul %346, %347, %cst_384 {dimension_numbers = #tpu.dot_dimension_numbers<[1], [0], [0], [1], [0, 0, 1, 1], [], []>} : vector<16x16xf32>, vector<16x32xf32>, vector<16x32xf32> -> vector<16x32xf32>
    %c0_385 = arith.constant 0 : index
    %c0_386 = arith.constant 0 : index
    %349 = vector.load %arg18[%c0_385, %c0_386] : memref<1x32xf32, #tpu.memory_space<vmem>>, vector<1x32xf32>
    %350 = vector.broadcast %349 : vector<1x32xf32> to vector<16x32xf32>
    %351 = arith.addf %348, %350 : vector<16x32xf32>
    %c0_387 = arith.constant 0 : index
    %c0_388 = arith.constant 0 : index
    %352 = vector.load %arg15[%c0_387, %c0_388] : memref<1x32xf32, #tpu.memory_space<vmem>>, vector<1x32xf32>
    %353 = vector.broadcast %352 : vector<1x32xf32> to vector<16x32xf32>
    %354 = arith.addf %344, %353 : vector<16x32xf32>
    %355 = arith.addf %354, %351 : vector<16x32xf32>
    %cst_389 = arith.constant 0.000000e+00 : f32
    %356 = vector.broadcast %cst_389 : f32 to vector<16x32xf32>
    %357 = arith.maximumf %355, %356 : vector<16x32xf32>
    %cst_390 = arith.constant dense<0.000000e+00> : vector<32xf32>
    %358 = vector.multi_reduction <add>, %357, %cst_390 [0] : vector<16x32xf32> to vector<32xf32>
    %359 = vector.shape_cast %358 : vector<32xf32> to vector<1x32xf32>
    %cst_391 = arith.constant 6.250000e-02 : f32
    %360 = vector.broadcast %cst_391 : f32 to vector<1x32xf32>
    %361 = arith.mulf %359, %360 : vector<1x32xf32>
    %362 = vector.shape_cast %361 : vector<1x32xf32> to vector<1x1x32xf32>
    %c0_392 = arith.constant 0 : index
    %c0_393 = arith.constant 0 : index
    %c0_394 = arith.constant 0 : index
    %363 = vector.load %arg19[%c0_392, %c0_393, %c0_394] : memref<1x1x32xf32, #tpu.memory_space<vmem>>, vector<1x1x32xf32>
    tpu.vector_store %arg19[%c0_392, %c0_393, %c0_394], %362 {strides = array<i32>} : memref<1x1x32xf32, #tpu.memory_space<vmem>>, vector<1x1x32xf32>,
    return
  }
  func.func @transform_0(%arg0: i32) -> (i32, i32, i32, i32) {
    %c0_i32 = arith.constant 0 : i32
    %c0_i32_0 = arith.constant 0 : i32
    %c0_i32_1 = arith.constant 0 : i32
    %c0_i32_2 = arith.constant 0 : i32
    return %arg0, %c0_i32, %c0_i32_0, %c0_i32_1 : i32, i32, i32, i32
  }
  func.func @transform_1(%arg0: i32) -> (i32, i32, i32) {
    %c0_i32 = arith.constant 0 : i32
    %c0_i32_0 = arith.constant 0 : i32
    %c0_i32_1 = arith.constant 0 : i32
    %c0_i32_2 = arith.constant 0 : i32
    return %c0_i32, %c0_i32_0, %c0_i32_1 : i32, i32, i32
  }
  func.func @transform_2(%arg0: i32) -> (i32, i32) {
    %c0_i32 = arith.constant 0 : i32
    %c0_i32_0 = arith.constant 0 : i32
    %c0_i32_1 = arith.constant 0 : i32
    return %c0_i32, %c0_i32_0 : i32, i32
  }
  func.func @transform_3(%arg0: i32) -> (i32, i32, i32) {
    %c0_i32 = arith.constant 0 : i32
    %c0_i32_0 = arith.constant 0 : i32
    %c0_i32_1 = arith.constant 0 : i32
    %c0_i32_2 = arith.constant 0 : i32
    return %c0_i32, %c0_i32_0, %c0_i32_1 : i32, i32, i32
  }
  func.func @transform_4(%arg0: i32) -> (i32, i32, i32) {
    %c0_i32 = arith.constant 0 : i32
    %c0_i32_0 = arith.constant 0 : i32
    %c0_i32_1 = arith.constant 0 : i32
    %c0_i32_2 = arith.constant 0 : i32
    return %c0_i32, %c0_i32_0, %c0_i32_1 : i32, i32, i32
  }
  func.func @transform_5(%arg0: i32) -> (i32, i32, i32) {
    %c0_i32 = arith.constant 0 : i32
    %c0_i32_0 = arith.constant 0 : i32
    %c0_i32_1 = arith.constant 0 : i32
    %c0_i32_2 = arith.constant 0 : i32
    return %c0_i32, %c0_i32_0, %c0_i32_1 : i32, i32, i32
  }
  func.func @transform_6(%arg0: i32) -> (i32, i32) {
    %c0_i32 = arith.constant 0 : i32
    %c0_i32_0 = arith.constant 0 : i32
    %c0_i32_1 = arith.constant 0 : i32
    return %c0_i32, %c0_i32_0 : i32, i32
  }
  func.func @transform_7(%arg0: i32) -> (i32, i32, i32) {
    %c0_i32 = arith.constant 0 : i32
    %c0_i32_0 = arith.constant 0 : i32
    %c0_i32_1 = arith.constant 0 : i32
    %c0_i32_2 = arith.constant 0 : i32
    return %c0_i32, %c0_i32_0, %c0_i32_1 : i32, i32, i32
  }
  func.func @transform_8(%arg0: i32) -> (i32, i32) {
    %c0_i32 = arith.constant 0 : i32
    %c0_i32_0 = arith.constant 0 : i32
    %c0_i32_1 = arith.constant 0 : i32
    return %c0_i32, %c0_i32_0 : i32, i32
  }
  func.func @transform_9(%arg0: i32) -> (i32, i32, i32) {
    %c0_i32 = arith.constant 0 : i32
    %c0_i32_0 = arith.constant 0 : i32
    %c0_i32_1 = arith.constant 0 : i32
    %c0_i32_2 = arith.constant 0 : i32
    return %c0_i32, %c0_i32_0, %c0_i32_1 : i32, i32, i32
  }
  func.func @transform_10(%arg0: i32) -> (i32, i32, i32) {
    %c0_i32 = arith.constant 0 : i32
    %c0_i32_0 = arith.constant 0 : i32
    %c0_i32_1 = arith.constant 0 : i32
    %c0_i32_2 = arith.constant 0 : i32
    return %c0_i32, %c0_i32_0, %c0_i32_1 : i32, i32, i32
  }
  func.func @transform_11(%arg0: i32) -> (i32, i32) {
    %c0_i32 = arith.constant 0 : i32
    %c0_i32_0 = arith.constant 0 : i32
    %c0_i32_1 = arith.constant 0 : i32
    return %c0_i32, %c0_i32_0 : i32, i32
  }
  func.func @transform_12(%arg0: i32) -> (i32, i32, i32) {
    %c0_i32 = arith.constant 0 : i32
    %c0_i32_0 = arith.constant 0 : i32
    %c0_i32_1 = arith.constant 0 : i32
    %c0_i32_2 = arith.constant 0 : i32
    return %c0_i32, %c0_i32_0, %c0_i32_1 : i32, i32, i32
  }
  func.func @transform_13(%arg0: i32) -> (i32, i32, i32) {
    %c0_i32 = arith.constant 0 : i32
    %c0_i32_0 = arith.constant 0 : i32
    %c0_i32_1 = arith.constant 0 : i32
    %c0_i32_2 = arith.constant 0 : i32
    return %c0_i32, %c0_i32_0, %c0_i32_1 : i32, i32, i32
  }
  func.func @transform_14(%arg0: i32) -> (i32, i32) {
    %c0_i32 = arith.constant 0 : i32
    %c0_i32_0 = arith.constant 0 : i32
    %c0_i32_1 = arith.constant 0 : i32
    return %c0_i32, %c0_i32_0 : i32, i32
  }
  func.func @transform_15(%arg0: i32) -> (i32, i32) {
    %c0_i32 = arith.constant 0 : i32
    %c0_i32_0 = arith.constant 0 : i32
    %c0_i32_1 = arith.constant 0 : i32
    return %c0_i32, %c0_i32_0 : i32, i32
  }
  func.func @transform_16(%arg0: i32) -> (i32, i32) {
    %c0_i32 = arith.constant 0 : i32
    %c0_i32_0 = arith.constant 0 : i32
    %c0_i32_1 = arith.constant 0 : i32
    return %c0_i32, %c0_i32_0 : i32, i32
  }
  func.func @transform_17(%arg0: i32) -> (i32, i32) {
    %c0_i32 = arith.constant 0 : i32
    %c0_i32_0 = arith.constant 0 : i32
    %c0_i32_1 = arith.constant 0 : i32
    return %c0_i32, %c0_i32_0 : i32, i32
  }
  func.func @transform_18(%arg0: i32) -> (i32, i32, i32) {
    %c0_i32 = arith.constant 0 : i32
    %c0_i32_0 = arith.constant 0 : i32
    %c0_i32_1 = arith.constant 0 : i32
    return %arg0, %c0_i32, %c0_i32_0 : i32, i32, i32
  }
}

</mosaic_0001>

<bundles_post_ra>
// kernel: res_code_forward.1
= control target key start
LH: loop header
LB: loop body
LE: loop exit
PB: predicated region body
PF: predicated region fallthrough
CT: control target
= control target key end

     0   :  { %s12924_s0 = inlined_call_operand.vmem [shape: f32[2,2,304,21], index: 0, kind: input, shape index: {}]   ;;  %s12925_s1 = inlined_call_operand.vmem [shape: f32[7,21,16], index: 1, kind: input, shape index: {}]   ;;  %s12926_s2 = inlined_call_operand.vmem [shape: f32[1,16], index: 2, kind: input, shape index: {}]   ;;  %s12927_s3 = inlined_call_operand.vmem [shape: f32[9,64,256], index: 3, kind: input, shape index: {}]   ;;  %s12928_s4 = inlined_call_operand.vmem [shape: f32[9,64,64], index: 4, kind: input, shape index: {}]   ;;  %s12929_s5 = inlined_call_operand.vmem [shape: f32[9,16,16], index: 5, kind: input, shape index: {}]   ;;  %s12930_s6 = inlined_call_operand.vmem [shape: f32[1,16], index: 6, kind: input, shape index: {}]   ;;  %s12931_s7 = inlined_call_operand.vmem [shape: f32[9,16,16], index: 7, kind: input, shape index: {}]   ;;  %s12932_s8 = inlined_call_operand.vmem [shape: f32[1,16], index: 8, kind: input, shape index: {}]   ;;  %s12933_s9 = inlined_call_operand.vmem [shape: f32[9,16,64], index: 9, kind: input, shape index: {}]   ;;  %s12934_s10 = inlined_call_operand.vmem [shape: f32[9,16,32], index: 10, kind: input, shape index: {}]   ;;  %s12935_s11 = inlined_call_operand.vmem [shape: f32[1,32], index: 11, kind: input, shape index: {}]   ;;  %s12936_s12 = inlined_call_operand.vmem [shape: f32[9,16,16], index: 12, kind: input, shape index: {}]   ;;  %s12937_s13 = inlined_call_operand.vmem [shape: f32[9,32,32], index: 13, kind: input, shape index: {}]   ;;  %s12938_s14 = inlined_call_operand.vmem [shape: f32[1,32], index: 14, kind: input, shape index: {}]   ;;  %s12939_s15 = inlined_call_operand.vmem [shape: f32[16,64], index: 15, kind: input, shape index: {}]   ;;  %s12940_s16 = inlined_call_operand.vmem [shape: f32[16,32], index: 16, kind: input, shape index: {}]   ;;  %s12941_s17 = inlined_call_operand.vmem [shape: f32[1,32], index: 17, kind: input, shape index: {}]   ;;  %s12942_s18 = inlined_call_operand.hbm [shape: f32[2,1,32], index: 18, kind: output, shape index: {}]  }
   0x1   :  { %13008 = sst [smem:[#allocation94_spill]] %s12924_s0 }
   0x2   :  { %13009 = sst [smem:[#allocation95_spill]] %s12925_s1 }
   0x3   :  { %13010 = sst [smem:[#allocation96_spill]] %s12926_s2 }
   0x4   :  { %13011 = sst [smem:[#allocation97_spill]] %s12927_s3 }
   0x5   :  { %13012 = sst [smem:[#allocation98_spill]] %s12928_s4 }
   0x6   :  { %23 = vsyncpa [#allocation3], 0 }
   0x7   :  { %25 = vsyncpa [#allocation3 + $0x1], 0  ;;  %s8535_s27 = smov 0   ;;  %s8537_s28 = smov 0  }
   0x8   :  { %s8539_s29 = smov 0   ;;  %s8541_s30 = smov 0  }
   0x9 LB: > { %13013 = sst [smem:[#allocation5_spill]] %s8426_s27  ;;  %s8556_s0 = sadd.s32 4294967295, %s8438_s30   ;;  %s8438_s30 = sphi %s8541_s30, %s13509_s30   ;;  %s8434_s29 = sphi %s8539_s29, %s13511_s29   ;;  %s8430_s28 = sphi %s8537_s28, %s13513_s28   ;;  %s8426_s27 = sphi %s8535_s27, %s13512_s27  }
   0xa   : > { %13014 = sst [smem:[#allocation6_spill]] %s8434_s29  ;;  %s7270_s19 = sadd.s32 4294967294, %s8438_s30  }
   0xb   : > { %s8560_s1 = sadd.s32 1, %s8438_s30   ;;  %s421_s20 = sadd.s32 1, %s8434_s29 }
   0xc   : > { %13015 = sst [smem:[#allocation7_spill]] %s8560_s1  ;;  %s418_s21 = ssub.s32 %s8438_s30, %s8560_s1 }
   0xd   : > { %p431_p0 = scmp.ne.s32.totalorder %s8434_s29, %s8430_s28  ;;  %p419_p1 = scmp.eq.s32.totalorder %s418_s21, 0 }
   0xe   : > { %p432_p2 = scmp.eq.s32.totalorder %s8556_s0, 1  ;;  %p437_p3 = scmp.ne.s32.totalorder %s8430_s28, %s8426_s27 }
   0xf   : > { %p438_p4 = scmp.eq.s32.totalorder %s7270_s19, 1  ;;  %p7273_p7 = scmp.ge.s32.totalorder %s8438_s30, 1 }
  0x10   : > { %s8571_s22 = scalar_select %p419_p1, %s8434_s29, %s421_s20  }
  0x11   : > { %p8573_p5 = por %p432_p2, %p431_p0  ;;  %p8577_p6 = por %p438_p4, %p437_p3 }
  0x12   : > { %13016 = sst [smem:[#allocation8_spill]] %s8571_s22  ;;  %p515_p8 = scmp.lt.s32.totalorder %s8438_s30, 3 }
  0x13   : > { %s13018_s23 = scalar_select %p8577_p6, 1, 0 }
  0x14   : > { %p516_p9 = pnand %p7273_p7, %p515_p8 }
  0x15   : > { %13019 = sst [smem:[#allocation9_spill]] %s13018_s23 }
  0x16   : > { %519 = sbr.rel (%p516_p9) target bundleno = 3533 (0xdcd), region = 92 }
  0x1b   : > { %s13020_s26 = sld [smem:[#allocation95_spill]]  ;;  %vm742_vm0 = vcmask 1044480   ;;  %p568_p10 = scmp.lt.s32.totalorder %s8556_s0, 1  ;;  %vm645_vm1 = vcmask 171008   ;;  %vm3501_vm2 = vcmask 523264   ;;  %vm3646_vm3 = vcmask 130048  }
  0x1c   : > { %s13021_s19 = sld [smem:[#allocation94_spill]]  ;;  %vm6579_vm4 = vcmask 261120   ;;  %s566_s21 = sand.u32 1, %s8430_s28   ;;  %vm7200_vm5 = vcmask 253952  }
  0x1d   : > { %s569_s20 = scalar_select %p568_p10, %s8556_s0, 1 }
  0x1e   : > { %s13132_s23 = sld [smem:[#allocation96_spill]]  ;;  %s7211_s1 = scalar_lea.hbm %s12942_s18, %s8556_s0 }
  0x1f   : > { %s8296_s24 = smul.u32 608, %s569_s20  ;;  %s13156_s3 = sld [smem:[#allocation97_spill]] }
  0x20   : > { %s13388_s4 = sld [smem:[#allocation98_spill]]  ;;  %s7215_s22 = sshll.u32 %s7211_s1, 4  ;;  %s7216_s22 = int_to_ptr.hbm [resolvable:$true] %s7215_s22 }
  0x21   : > { %v7309_v0 = vld [vmem:[%s13020_s26 + $0x28] sm:$0x1f]  ;;  %v607_v1 = vld [vmem:[%s13020_s26 + $0x10] sm:$0x1f]  ;;  %v7308_v2 = vld [vmem:[%s13020_s26 + $0x20] sm:$0xff]  ;;  %s8396_s29 = scalar_lea.hbm %s12942_s18, 2 }
  0x22   : > { %7310 = vmatpush.msk.msra.mxu0 %vm742_vm0, %v7309_v0  ;;  %8290 = vmatpush.msk.msra.mxu2 %vm742_vm0, %v7309_v0  ;;  %v606_v3 = vld [vmem:[%s13020_s26 + $0x8] sm:$0xff]  ;;  %v7307_v4 = vld [vmem:[%s13020_s26 + $0x18] sm:$0xff]  ;;  %v605_v5 = vld [vmem:[%s13020_s26] sm:$0xff]  ;;  %s8616_s27 = scalar_lea.vmem %s13021_s19, %s8296_s24  ;;  %s567_s24 = scalar_lea.vmem [#allocation2], %s566_s21 }
  0x23   : > { %8293 = vmatpush.msk.msra.mxu3 %vm742_vm0, %v607_v1  ;;  %7343 = vmatpush.msk.msra.mxu1 %vm742_vm0, %v607_v1  ;;  %v7378_v6 = vld [vmem:[%s13020_s26 + $0x40] sm:$0x1f]  ;;  %v7446_v7 = vld [vmem:[%s13020_s26 + $0x58] sm:$0x1f]  ;;  %v7445_v9 = vld [vmem:[%s13020_s26 + $0x50] sm:$0xff]  ;;  %s7213_s25 = sshll.u32 %s567_s24, 4  ;;  %s7214_s25 = int_to_ptr.vmem [resolvable:$true] %s7213_s25 }
  0x24   : > { %760 = vmatpush.msra.mxu0 %v7308_v2  ;;  %8291 = vmatpush.msra.mxu2 %v7308_v2  ;;  %v7377_v8 = vld [vmem:[%s13020_s26 + $0x38] sm:$0xff]  ;;  %v7275_v10 = vld [vmem:[%s8616_s27 + $0x130] sm:$0xff]  ;;  %v8628_v11 = vld [vmem:[%s8616_s27 + $0x228] sm:$0xff]  ;;  %s8390_s19 = sshra.s32 %s7216_s22, 4  ;;  %s8391_s19 = int_to_ptr.hbm [resolvable:$true] %s8390_s19 }
  0x25   : > { %8294 = vmatpush.msra.mxu3 %v606_v3  ;;  %972 = vmatpush.msra.mxu1 %v606_v3  ;;  %v8631_v12 = vld [vmem:[%s8616_s27 + $0xf8] sm:$0xff]  ;;  %v573_v13 = vld [vmem:[%s8616_s27] sm:$0xff]  ;;  %v7376_v14 = vld [vmem:[%s13020_s26 + $0x30] sm:$0xff]  ;;  %p8397_p0 = scmp.lt.s32.totalorder %s8391_s19, %s12942_s18 }
  0x26   : > { %761 = vmatpush.msra.mxu0 %v7307_v4  ;;  %8292 = vmatpush.msra.mxu2 %v7307_v4  ;;  %v7444_v15 = vld [vmem:[%s13020_s26 + $0x48] sm:$0xff]  ;;  %v7276_v16 = vld [vmem:[%s8616_s27 + $0x138] sm:$0xff]  ;;  %v1071_v17 = vld [vmem:[%s8616_s27 + $0x10] sm:$0xff] }
  0x27   : > { %8295 = vmatpush.msra.mxu3 %v605_v5  ;;  %973 = vmatpush.msra.mxu1 %v605_v5  ;;  %v574_v18 = vld [vmem:[%s8616_s27 + $0x8] sm:$0xff]  ;;  %v7412_v19 = vld [vmem:[%s8616_s27 + $0x140] sm:$0xff]  ;;  %v1072_v20 = vld [vmem:[%s8616_s27 + $0x18] sm:$0xff] }
  0x28   : > { %7379 = vmatpush.msk.msrb.mxu2 %vm742_vm0, %v7378_v6  ;;  %7311 = vmatmul.msk.f32.vlgmr.msra.gmra.mxu0 %vm645_vm1, %v7275_v10  ;;  %v7413_v21 = vld [vmem:[%s8616_s27 + $0x148] sm:$0xff]  ;;  %v8661_v22 = vld [vmem:[%s8616_s27 + $0x20] sm:$0xff]  ;;  %v8664_v23 = vld [vmem:[%s8616_s27 + $0x150] sm:$0xff] }
  0x29   : > { %7447 = vmatpush.msk.msrb.mxu3 %vm742_vm0, %v7446_v7  ;;  %7342 = vmatmul.msk.f32.vlgmr.msra.gmra.mxu2 %vm645_vm1, %v8628_v11  ;;  %v8673_v24 = vld [vmem:[%s8616_s27 + $0x28] sm:$0xff]  ;;  %v8676_v25 = vld [vmem:[%s8616_s27 + $0x158] sm:$0xff]  ;;  %v8687_v26 = vld [vmem:[%s8616_s27 + $0x30] sm:$0xff] }
  0x2a   : > { %7375 = vmatmul.msk.f32.vlgmr.msra.gmra.mxu3 %vm645_vm1, %v8631_v12  ;;  %7344 = vmatmul.msk.f32.vlgmr.msra.gmra.mxu1 %vm645_vm1, %v573_v13  ;;  %v8690_v27 = vld [vmem:[%s8616_s27 + $0x160] sm:$0xff]  ;;  %v8701_v28 = vld [vmem:[%s8616_s27 + $0x38] sm:$0xff]  ;;  %v8704_v29 = vld [vmem:[%s8616_s27 + $0x168] sm:$0xff] }
  0x2b   : > { %1220 = vmatpush.msrb.mxu2 %v7377_v8  ;;  %1500 = vmatpush.msrb.mxu3 %v7445_v9  ;;  %v8715_v30 = vld [vmem:[%s8616_s27 + $0x40] sm:$0xff]  ;;  %v8718_v31 = vld [vmem:[%s8616_s27 + $0x170] sm:$0xff]  ;;  %v8729_v32 = vld [vmem:[%s8616_s27 + $0x48] sm:$0xff] }
  0x2c   : > { %v8732_v33 = vld [vmem:[%s8616_s27 + $0x178] sm:$0xff]  ;;  %v8743_v34 = vld [vmem:[%s8616_s27 + $0x50] sm:$0xff]  ;;  %v8746_v35 = vld [vmem:[%s8616_s27 + $0x180] sm:$0xff] }
  0x2d   : > { %1221 = vmatpush.msrb.mxu2 %v7376_v14  ;;  %1501 = vmatpush.msrb.mxu3 %v7444_v15  ;;  %v8757_v36 = vld [vmem:[%s8616_s27 + $0x58] sm:$0xff]  ;;  %v8760_v37 = vld [vmem:[%s8616_s27 + $0x188] sm:$0xff]  ;;  %v8771_v38 = vld [vmem:[%s8616_s27 + $0x60] sm:$0xff] }
  0x2e   : > { %v8774_v39 = vld [vmem:[%s8616_s27 + $0x190] sm:$0xff]  ;;  %v8785_v40 = vld [vmem:[%s8616_s27 + $0x68] sm:$0xff]  ;;  %v8788_v41 = vld [vmem:[%s8616_s27 + $0x198] sm:$0xff] }
  0x2f   : > { %v8799_v42 = vld [vmem:[%s8616_s27 + $0x70] sm:$0xff]  ;;  %v8802_v43 = vld [vmem:[%s8616_s27 + $0x1a0] sm:$0xff]  ;;  %v8813_v44 = vld [vmem:[%s8616_s27 + $0x78] sm:$0xff] }
  0x30   : > { %7312 = vmatmul.msk.f32.gmra.mxu0 %vm645_vm1, %v7276_v16  ;;  %v8816_v45 = vld [vmem:[%s8616_s27 + $0x1a8] sm:$0xff]  ;;  %v8827_v46 = vld [vmem:[%s8616_s27 + $0x80] sm:$0xff]  ;;  %v8830_v47 = vld [vmem:[%s8616_s27 + $0x1b0] sm:$0xff] }
  0x31   : > { %7380 = vmatmul.msk.f32.vlgmr.msrb.gmra.mxu2 %vm645_vm1, %v1071_v17  ;;  %v8841_v49 = vld [vmem:[%s8616_s27 + $0x88] sm:$0xff]  ;;  %v8844_v51 = vld [vmem:[%s8616_s27 + $0x1b8] sm:$0xff]  ;;  %v8857_v56 = vld [vmem:[%s8616_s27 + $0x90] sm:$0xff] }
  0x32   : > { %7345 = vmatmul.msk.f32.gmra.mxu1 %vm645_vm1, %v574_v18  ;;  %7448 = vmatmul.msk.f32.vlgmr.msrb.gmra.mxu3 %vm645_vm1, %v7412_v19  ;;  %v8860_v58 = vld [vmem:[%s8616_s27 + $0x1c0] sm:$0xff]  ;;  %v8875_v1 = vld [vmem:[%s8616_s27 + $0x98] sm:$0xff]  ;;  %v8880_v4 = vld [vmem:[%s8616_s27 + $0x1c8] sm:$0xff] }
  0x33   : > { %v7586_v60 = vld [vmem:[%s13020_s26 + $0xa0] sm:$0x1f]  ;;  %v7482_v9 = vld [vmem:[%s13020_s26 + $0x70] sm:$0x1f] }
  0x34   : > { %7587 = vmatpush.msk.msra.mxu2 %vm742_vm0, %v7586_v60  ;;  %v8894_v13 = vld [vmem:[%s8616_s27 + $0xa0] sm:$0xff]  ;;  %7483 = vmatpush.msk.msrb.mxu0 %vm742_vm0, %v7482_v9  ;;  %v8900_v16 = vld [vmem:[%s8616_s27 + $0x1d0] sm:$0xff] }
  0x38   : > { %7313 = vmatmul.msk.f32.gmra.mxu0 %vm645_vm1, %v7412_v19 }
  0x39   : > { %7381 = vmatmul.msk.f32.gmra.mxu2 %vm645_vm1, %v1072_v20 }
  0x3a   : > { %7346 = vmatmul.msk.f32.gmra.mxu1 %vm645_vm1, %v1071_v17  ;;  %7449 = vmatmul.msk.f32.gmra.mxu3 %vm645_vm1, %v7413_v21  ;;  %v7550_v17 = vld [vmem:[%s13020_s26 + $0x88] sm:$0x1f] }
  0x3b   : > { %7551 = vmatpush.msk.msrb.mxu1 %vm742_vm0, %v7550_v17 }
  0x40   : > { %7314 = vmatmul.msk.f32.gmra.mxu0 %vm645_vm1, %v7413_v21 }
  0x41   : > { %7382 = vmatmul.msk.f32.gmra.mxu2 %vm645_vm1, %v8661_v22 }
  0x42   : > { %7347 = vmatmul.msk.f32.gmra.mxu1 %vm645_vm1, %v1072_v20  ;;  %7450 = vmatmul.msk.f32.gmra.mxu3 %vm645_vm1, %v8664_v23 }
  0x48   : > { %7315 = vmatmul.msk.f32.gmra.mxu0 %vm645_vm1, %v8664_v23 }
  0x49   : > { %7383 = vmatmul.msk.f32.gmra.mxu2 %vm645_vm1, %v8673_v24 }
  0x4a   : > { %7348 = vmatmul.msk.f32.gmra.mxu1 %vm645_vm1, %v8661_v22  ;;  %7451 = vmatmul.msk.f32.gmra.mxu3 %vm645_vm1, %v8676_v25 }
  0x50   : > { %7316 = vmatmul.msk.f32.gmra.mxu0 %vm645_vm1, %v8676_v25 }
  0x51   : > { %7384 = vmatmul.msk.f32.gmra.mxu2 %vm645_vm1, %v8687_v26 }
  0x52   : > { %7349 = vmatmul.msk.f32.gmra.mxu1 %vm645_vm1, %v8673_v24  ;;  %7452 = vmatmul.msk.f32.gmra.mxu3 %vm645_vm1, %v8690_v27 }
  0x58   : > { %7317 = vmatmul.msk.f32.gmra.mxu0 %vm645_vm1, %v8690_v27 }
  0x59   : > { %7385 = vmatmul.msk.f32.gmra.mxu2 %vm645_vm1, %v8701_v28 }
  0x5a   : > { %7350 = vmatmul.msk.f32.gmra.mxu1 %vm645_vm1, %v8687_v26  ;;  %7453 = vmatmul.msk.f32.gmra.mxu3 %vm645_vm1, %v8704_v29 }
  0x60   : > { %7318 = vmatmul.msk.f32.gmra.mxu0 %vm645_vm1, %v8704_v29 }
  0x61   : > { %7386 = vmatmul.msk.f32.gmra.mxu2 %vm645_vm1, %v8715_v30 }
  0x62   : > { %7351 = vmatmul.msk.f32.gmra.mxu1 %vm645_vm1, %v8701_v28  ;;  %7454 = vmatmul.msk.f32.gmra.mxu3 %vm645_vm1, %v8718_v31 }
  0x68   : > { %7319 = vmatmul.msk.f32.gmra.mxu0 %vm645_vm1, %v8718_v31 }
  0x69   : > { %7387 = vmatmul.msk.f32.gmra.mxu2 %vm645_vm1, %v8729_v32 }
  0x6a   : > { %7352 = vmatmul.msk.f32.gmra.mxu1 %vm645_vm1, %v8715_v30  ;;  %7455 = vmatmul.msk.f32.gmra.mxu3 %vm645_vm1, %v8732_v33 }
  0x70   : > { %7320 = vmatmul.msk.f32.gmra.mxu0 %vm645_vm1, %v8732_v33 }
  0x71   : > { %7388 = vmatmul.msk.f32.gmra.mxu2 %vm645_vm1, %v8743_v34 }
  0x72   : > { %7353 = vmatmul.msk.f32.gmra.mxu1 %vm645_vm1, %v8729_v32  ;;  %7456 = vmatmul.msk.f32.gmra.mxu3 %vm645_vm1, %v8746_v35 }
  0x78   : > { %7321 = vmatmul.msk.f32.gmra.mxu0 %vm645_vm1, %v8746_v35 }
  0x79   : > { %7389 = vmatmul.msk.f32.gmra.mxu2 %vm645_vm1, %v8757_v36 }
  0x7a   : > { %7354 = vmatmul.msk.f32.gmra.mxu1 %vm645_vm1, %v8743_v34  ;;  %7457 = vmatmul.msk.f32.gmra.mxu3 %vm645_vm1, %v8760_v37 }
  0x80   : > { %7322 = vmatmul.msk.f32.gmra.mxu0 %vm645_vm1, %v8760_v37 }
  0x81   : > { %7390 = vmatmul.msk.f32.gmra.mxu2 %vm645_vm1, %v8771_v38 }
  0x82   : > { %7355 = vmatmul.msk.f32.gmra.mxu1 %vm645_vm1, %v8757_v36  ;;  %7458 = vmatmul.msk.f32.gmra.mxu3 %vm645_vm1, %v8774_v39 }
  0x88   : > { %7323 = vmatmul.msk.f32.gmra.mxu0 %vm645_vm1, %v8774_v39 }
  0x89   : > { %7391 = vmatmul.msk.f32.gmra.mxu2 %vm645_vm1, %v8785_v40 }
  0x8a   : > { %7356 = vmatmul.msk.f32.gmra.mxu1 %vm645_vm1, %v8771_v38  ;;  %7459 = vmatmul.msk.f32.gmra.mxu3 %vm645_vm1, %v8788_v41 }
  0x90   : > { %7324 = vmatmul.msk.f32.gmra.mxu0 %vm645_vm1, %v8788_v41 }
  0x91   : > { %7392 = vmatmul.msk.f32.gmra.mxu2 %vm645_vm1, %v8799_v42 }
  0x92   : > { %7357 = vmatmul.msk.f32.gmra.mxu1 %vm645_vm1, %v8785_v40  ;;  %7460 = vmatmul.msk.f32.gmra.mxu3 %vm645_vm1, %v8802_v43 }
  0x98   : > { %7325 = vmatmul.msk.f32.gmra.mxu0 %vm645_vm1, %v8802_v43 }
  0x99   : > { %7393 = vmatmul.msk.f32.gmra.mxu2 %vm645_vm1, %v8813_v44 }
  0x9a   : > { %7358 = vmatmul.msk.f32.gmra.mxu1 %vm645_vm1, %v8799_v42  ;;  %7461 = vmatmul.msk.f32.gmra.mxu3 %vm645_vm1, %v8816_v45 }
  0xa0   : > { %7326 = vmatmul.msk.f32.gmra.mxu0 %vm645_vm1, %v8816_v45 }
  0xa1   : > { %7394 = vmatmul.msk.f32.gmra.mxu2 %vm645_vm1, %v8827_v46 }
  0xa2   : > { %7359 = vmatmul.msk.f32.gmra.mxu1 %vm645_vm1, %v8813_v44  ;;  %7462 = vmatmul.msk.f32.gmra.mxu3 %vm645_vm1, %v8830_v47 }
  0xa5   : > { %v763_v48 = vpop.f32.mrf.mxu0 }
  0xa7   : > { %v975_v50 = vpop.f32.mrf.mxu1 }
  0xa8   : > { %7327 = vmatmul.msk.f32.gmra.mxu0 %vm645_vm1, %v8830_v47  ;;  %v976_v59 = vadd.f32 %v975_v50, %v763_v48  ;;  %v8915_v50 = vld [vmem:[%s8616_s27 + $0xa8] sm:$0xff] }
  0xa9   : > { %7395 = vmatmul.msk.f32.gmra.mxu2 %vm645_vm1, %v8841_v49 }
  0xaa   : > { %7360 = vmatmul.msk.f32.gmra.mxu1 %vm645_vm1, %v8827_v46  ;;  %7463 = vmatmul.msk.f32.gmra.mxu3 %vm645_vm1, %v8844_v51 }
  0xac   : > { %v856_v52 = vpop.f32.mrf.mxu2 }
  0xad   : > { %v1068_v53 = vpop.f32.mrf.mxu3  ;;  %v766_v55 = vpop.f32.mrf.mxu0 }
  0xae   : > { %v8854_v54 = vadd.f32 %v1068_v53, %v856_v52 }
  0xaf   : > { %v978_v57 = vpop.f32.mrf.mxu1 }
  0xb0   : > { %7328 = vmatmul.msk.f32.gmra.mxu0 %vm645_vm1, %v8844_v51  ;;  %v979_v5 = vadd.f32 %v978_v57, %v766_v55  ;;  %v8920_v55 = vld [vmem:[%s8616_s27 + $0x1d8] sm:$0xff] }
  0xb1   : > { %7396 = vmatmul.msk.f32.gmra.mxu2 %vm645_vm1, %v8857_v56 }
  0xb2   : > { %7361 = vmatmul.msk.f32.gmra.mxu1 %vm645_vm1, %v8841_v49  ;;  %7464 = vmatmul.msk.f32.gmra.mxu3 %vm645_vm1, %v8860_v58 }
  0xb4   : > { %v1223_v61 = vpop.f32.mrf.mxu2 }
  0xb5   : > { %v1319_v62 = vadd.f32 %v1223_v61, %v976_v59  ;;  %v1503_v63 = vpop.f32.mrf.mxu3  ;;  %v769_v0 = vpop.f32.mrf.mxu0 }
  0xb7   : > { %v8877_v2 = vadd.f32 %v1503_v63, %v1319_v62  ;;  %v981_v3 = vpop.f32.mrf.mxu1  ;;  %v8931_v63 = vld [vmem:[%s8616_s27 + $0xb0] sm:$0xff] }
  0xb8   : > { %7329 = vmatmul.msk.f32.gmra.mxu0 %vm645_vm1, %v8860_v58  ;;  %v982_v18 = vadd.f32 %v981_v3, %v769_v0 }
  0xb9   : > { %7397 = vmatmul.msk.f32.gmra.mxu2 %vm645_vm1, %v8875_v1 }
  0xba   : > { %7362 = vmatmul.msk.f32.gmra.mxu1 %vm645_vm1, %v8857_v56  ;;  %7465 = vmatmul.msk.f32.gmra.mxu3 %vm645_vm1, %v8880_v4 }
  0xbc   : > { %v1226_v6 = vpop.f32.mrf.mxu2 }
  0xbd   : > { %v1320_v7 = vadd.f32 %v1226_v6, %v979_v5  ;;  %v1506_v8 = vpop.f32.mrf.mxu3  ;;  %v772_v10 = vpop.f32.mrf.mxu0  ;;  %v8936_v5 = vld [vmem:[%s8616_s27 + $0x1e0] sm:$0xff] }
  0xbf   : > { %v8897_v14 = vadd.f32 %v1506_v8, %v1320_v7  ;;  %v984_v15 = vpop.f32.mrf.mxu1 }
  0xc0   : > { %7330 = vmatmul.msk.f32.gmra.mxu0 %vm645_vm1, %v8880_v4  ;;  %v985_v57 = vadd.f32 %v984_v15, %v772_v10  ;;  %v8947_v15 = vld [vmem:[%s8616_s27 + $0xb8] sm:$0xff] }
  0xc1   : > { %7398 = vmatmul.msk.f32.gmra.mxu2 %vm645_vm1, %v8894_v13 }
  0xc2   : > { %7363 = vmatmul.msk.f32.gmra.mxu1 %vm645_vm1, %v8875_v1  ;;  %7466 = vmatmul.msk.f32.gmra.mxu3 %vm645_vm1, %v8900_v16 }
  0xc4   : > { %v1229_v19 = vpop.f32.mrf.mxu2 }
  0xc5   : > { %v1321_v20 = vadd.f32 %v1229_v19, %v982_v18  ;;  %v1509_v21 = vpop.f32.mrf.mxu3  ;;  %v775_v48 = vpop.f32.mrf.mxu0  ;;  %v8952_v19 = vld [vmem:[%s8616_s27 + $0x1e8] sm:$0xff] }
  0xc7   : > { %v8917_v52 = vadd.f32 %v1509_v21, %v1321_v20  ;;  %v987_v53 = vpop.f32.mrf.mxu1 }
  0xc8   : > { %7331 = vmatmul.msk.f32.gmra.mxu0 %vm645_vm1, %v8900_v16  ;;  %v988_v6 = vadd.f32 %v987_v53, %v775_v48 }
  0xc9   : > { %7399 = vmatmul.msk.f32.gmra.mxu2 %vm645_vm1, %v8915_v50 }
  0xca   : > { %7364 = vmatmul.msk.f32.gmra.mxu1 %vm645_vm1, %v8894_v13  ;;  %7467 = vmatmul.msk.f32.gmra.mxu3 %vm645_vm1, %v8920_v55 }
  0xcc   : > { %v1232_v59 = vpop.f32.mrf.mxu2 }
  0xcd   : > { %v1322_v60 = vadd.f32 %v1232_v59, %v985_v57  ;;  %v1512_v61 = vpop.f32.mrf.mxu3  ;;  %v778_v62 = vpop.f32.mrf.mxu0  ;;  %v8963_v59 = vld [vmem:[%s8616_s27 + $0xc0] sm:$0xff] }
  0xcf   : > { %v8933_v0 = vadd.f32 %v1512_v61, %v1322_v60  ;;  %v990_v3 = vpop.f32.mrf.mxu1 }
  0xd0   : > { %7332 = vmatmul.msk.f32.gmra.mxu0 %vm645_vm1, %v8920_v55  ;;  %v991_v20 = vadd.f32 %v990_v3, %v778_v62  ;;  %v8968_v62 = vld [vmem:[%s8616_s27 + $0x1f0] sm:$0xff] }
  0xd1   : > { %7400 = vmatmul.msk.f32.gmra.mxu2 %vm645_vm1, %v8931_v63 }
  0xd2   : > { %7365 = vmatmul.msk.f32.gmra.mxu1 %vm645_vm1, %v8915_v50  ;;  %7468 = vmatmul.msk.f32.gmra.mxu3 %vm645_vm1, %v8936_v5 }
  0xd4   : > { %v1235_v7 = vpop.f32.mrf.mxu2 }
  0xd5   : > { %v1323_v8 = vadd.f32 %v1235_v7, %v988_v6  ;;  %v1515_v9 = vpop.f32.mrf.mxu3  ;;  %v781_v10 = vpop.f32.mrf.mxu0 }
  0xd7   : > { %v8949_v17 = vadd.f32 %v1515_v9, %v1323_v8  ;;  %v993_v18 = vpop.f32.mrf.mxu1 }
  0xd8   : > { %7333 = vmatmul.msk.f32.gmra.mxu0 %vm645_vm1, %v8936_v5  ;;  %v994_v3 = vadd.f32 %v993_v18, %v781_v10 }
  0xd9   : > { %7401 = vmatmul.msk.f32.gmra.mxu2 %vm645_vm1, %v8947_v15 }
  0xda   : > { %7366 = vmatmul.msk.f32.gmra.mxu1 %vm645_vm1, %v8931_v63  ;;  %7469 = vmatmul.msk.f32.gmra.mxu3 %vm645_vm1, %v8952_v19 }
  0xdc   : > { %v1238_v21 = vpop.f32.mrf.mxu2 }
  0xdd   : > { %v1324_v48 = vadd.f32 %v1238_v21, %v991_v20  ;;  %v1518_v53 = vpop.f32.mrf.mxu3  ;;  %v784_v57 = vpop.f32.mrf.mxu0  ;;  %v8981_v20 = vld [vmem:[%s8616_s27 + $0xc8] sm:$0xff]  ;;  %v8988_v21 = vld [vmem:[%s8616_s27 + $0x1f8] sm:$0xff] }
  0xdf   : > { %v8965_v60 = vadd.f32 %v1518_v53, %v1324_v48  ;;  %v996_v61 = vpop.f32.mrf.mxu1 }
  0xe0   : > { %7334 = vmatmul.msk.f32.gmra.mxu0 %vm645_vm1, %v8952_v19  ;;  %v997_v48 = vadd.f32 %v996_v61, %v784_v57  ;;  %v9001_v57 = vld [vmem:[%s8616_s27 + $0xd0] sm:$0xff] }
  0xe1   : > { %13022 = vst [vmem:[#allocation10_spill] sm:$0xff] %v8965_v60  ;;  %7402 = vmatmul.msk.f32.gmra.mxu2 %vm645_vm1, %v8963_v59 }
  0xe2   : > { %7367 = vmatmul.msk.f32.gmra.mxu1 %vm645_vm1, %v8947_v15  ;;  %7470 = vmatmul.msk.f32.gmra.mxu3 %vm645_vm1, %v8968_v62 }
  0xe4   : > { %v1241_v6 = vpop.f32.mrf.mxu2 }
  0xe5   : > { %v1325_v7 = vadd.f32 %v1241_v6, %v994_v3  ;;  %v1521_v8 = vpop.f32.mrf.mxu3  ;;  %v8978_v9 = vpop.f32.mrf.mxu0 }
  0xe6   : > { %13023 = vst [vmem:[#allocation11_spill] sm:$0xff] %v8978_v9  ;;  %v9028_v9 = vld [vmem:[%s8616_s27 + $0x208] sm:$0xff] }
  0xe7   : > { %v8983_v10 = vadd.f32 %v1521_v8, %v1325_v7  ;;  %v8985_v18 = vpop.f32.mrf.mxu1  ;;  %13034 = vst [vmem:[#allocation22_spill] sm:$0xff] %v9028_v9 }
  0xe8   : > { %13025 = vst [vmem:[#allocation13_spill] sm:$0xff] %v8985_v18  ;;  %7335 = vmatmul.msk.f32.gmra.mxu0 %vm645_vm1, %v8968_v62  ;;  %v9008_v18 = vld [vmem:[%s8616_s27 + $0x200] sm:$0xff] }
  0xe9   : > { %13024 = vst [vmem:[#allocation12_spill] sm:$0xff] %v8983_v10  ;;  %7403 = vmatmul.msk.f32.gmra.mxu2 %vm645_vm1, %v8981_v20  ;;  %v7480_v10 = vld [vmem:[%s13020_s26 + $0x60] sm:$0xff] }
  0xea   : > { %7368 = vmatmul.msk.f32.gmra.mxu1 %vm645_vm1, %v8963_v59  ;;  %7471 = vmatmul.msk.f32.gmra.mxu3 %vm645_vm1, %v8988_v21  ;;  %13029 = vst [vmem:[#allocation17_spill] sm:$0xff] %v9008_v18 }
  0xec   : > { %v1244_v53 = vpop.f32.mrf.mxu2 }
  0xed   : > { %v1326_v3 = vadd.f32 %v1244_v53, %v997_v48  ;;  %v1524_v6 = vpop.f32.mrf.mxu3  ;;  %v8998_v7 = vpop.f32.mrf.mxu0 }
  0xee   : > { %13026 = vst [vmem:[#allocation14_spill] sm:$0xff] %v8998_v7  ;;  %v9043_v7 = vld [vmem:[%s8616_s27 + $0xe0] sm:$0xff] }
  0xef   : > { %v9003_v61 = vadd.f32 %v1524_v6, %v1326_v3  ;;  %v9005_v8 = vpop.f32.mrf.mxu1  ;;  %v9023_v3 = vld [vmem:[%s8616_s27 + $0xd8] sm:$0xff] }
  0xf0   : > { %13028 = vst [vmem:[#allocation16_spill] sm:$0xff] %v9005_v8  ;;  %7336 = vmatmul.msk.f32.gmra.mxu0 %vm645_vm1, %v8988_v21 }
  0xf1   : > { %13027 = vst [vmem:[#allocation15_spill] sm:$0xff] %v9003_v61  ;;  %7404 = vmatmul.msk.f32.gmra.mxu2 %vm645_vm1, %v9001_v57  ;;  %v9051_v61 = vld [vmem:[%s8616_s27 + $0x210] sm:$0xff] }
  0xf2   : > { %7369 = vmatmul.msk.f32.gmra.mxu1 %vm645_vm1, %v8981_v20  ;;  %7472 = vmatmul.msk.f32.gmra.mxu3 %vm645_vm1, %v9008_v18  ;;  %13032 = vst [vmem:[#allocation20_spill] sm:$0xff] %v9023_v3 }
  0xf4   : > { %v9018_v48 = vpop.f32.mrf.mxu2 }
  0xf5   : > { %13030 = vst [vmem:[#allocation18_spill] sm:$0xff] %v9018_v48  ;;  %v9020_v53 = vpop.f32.mrf.mxu0 }
  0xf6   : > { %13031 = vst [vmem:[#allocation19_spill] sm:$0xff] %v9020_v53 }
  0xf7   : > { %v9025_v6 = vpop.f32.mrf.mxu1 }
  0xf8   : > { %13033 = vst [vmem:[#allocation21_spill] sm:$0xff] %v9025_v6  ;;  %7337 = vmatmul.msk.f32.gmra.mxu0 %vm645_vm1, %v9008_v18  ;;  %v7481_v6 = vld [vmem:[%s13020_s26 + $0x68] sm:$0xff]  ;;  %v7585_v18 = vld [vmem:[%s13020_s26 + $0x98] sm:$0xff] }
  0xf9   : > { %7405 = vmatmul.msk.f32.gmra.mxu2 %vm645_vm1, %v9023_v3  ;;  %1780 = vmatpush.msrb.mxu0 %v7481_v6  ;;  %v7548_v6 = vld [vmem:[%s13020_s26 + $0x78] sm:$0xff] }
  0xfa   : > { %7370 = vmatmul.msk.f32.gmra.mxu1 %vm645_vm1, %v9001_v57  ;;  %7473 = vmatmul.msk.f32.gmra.mxu3 %vm645_vm1, %v9028_v9 }
  0xfb   : > { %1781 = vmatpush.msrb.mxu0 %v7480_v10  ;;  %2340 = vmatpush.msra.mxu2 %v7585_v18 }
  0xfc   : > { %v9038_v48 = vpop.f32.mrf.mxu2 }
  0xfd   : > { %13035 = vst [vmem:[#allocation23_spill] sm:$0xff] %v9038_v48  ;;  %v9040_v8 = vpop.f32.mrf.mxu0  ;;  %v7549_v48 = vld [vmem:[%s13020_s26 + $0x80] sm:$0xff] }
  0xfe   : > { %13036 = vst [vmem:[#allocation24_spill] sm:$0xff] %v9040_v8  ;;  %2060 = vmatpush.msrb.mxu1 %v7549_v48 }
  0xff   : > { %v9048_v53 = vpop.f32.mrf.mxu1 }
 0x100   : > { %13037 = vst [vmem:[#allocation25_spill] sm:$0xff] %v9048_v53  ;;  %7338 = vmatmul.msk.f32.gmra.mxu0 %vm645_vm1, %v9028_v9  ;;  %2061 = vmatpush.msrb.mxu1 %v7548_v6  ;;  %v9075_v9 = vld [vmem:[%s8616_s27 + $0xe8] sm:$0xff]  ;;  %v9098_v6 = vld [vmem:[%s8616_s27 + $0xf0] sm:$0xff] }
 0x101   : > { %7406 = vmatmul.msk.f32.gmra.mxu2 %vm645_vm1, %v9043_v7 }
 0x102   : > { %7371 = vmatmul.msk.f32.gmra.mxu1 %vm645_vm1, %v9023_v3  ;;  %7474 = vmatmul.msk.f32.gmra.mxu3 %vm645_vm1, %v9051_v61  ;;  %v9080_v3 = vld [vmem:[%s8616_s27 + $0x218] sm:$0xff] }
 0x104   : > { %v9070_v53 = vpop.f32.mrf.mxu2 }
 0x105   : > { %13038 = vst [vmem:[#allocation26_spill] sm:$0xff] %v9070_v53  ;;  %v9072_v8 = vpop.f32.mrf.mxu0 }
 0x106   : > { %13039 = vst [vmem:[#allocation27_spill] sm:$0xff] %v9072_v8  ;;  %v7584_v8 = vld [vmem:[%s13020_s26 + $0x90] sm:$0xff] }
 0x107   : > { %v9077_v60 = vpop.f32.mrf.mxu1  ;;  %2341 = vmatpush.msra.mxu2 %v7584_v8 }
 0x108   : > { %13040 = vst [vmem:[#allocation28_spill] sm:$0xff] %v9077_v60  ;;  %7339 = vmatmul.msk.f32.gmra.mxu0 %vm645_vm1, %v9051_v61  ;;  %v9103_v60 = vld [vmem:[%s8616_s27 + $0x220] sm:$0xff] }
 0x109   : > { %7407 = vmatmul.msk.f32.gmra.mxu2 %vm645_vm1, %v9075_v9 }
 0x10a   : > { %7372 = vmatmul.msk.f32.gmra.mxu1 %vm645_vm1, %v9043_v7  ;;  %7475 = vmatmul.msk.f32.gmra.mxu3 %vm645_vm1, %v9080_v3 }
 0x10c   : > { %v9093_v10 = vpop.f32.mrf.mxu2 }
 0x10d   : > { %13041 = vst [vmem:[#allocation29_spill] sm:$0xff] %v9093_v10  ;;  %v9095_v48 = vpop.f32.mrf.mxu0 }
 0x10e   : > { %13042 = vst [vmem:[#allocation30_spill] sm:$0xff] %v9095_v48  ;;  %v9135_v48 = vld [vmem:[%s8616_s27 + $0x100] sm:$0xff] }
 0x10f   : > { %v9100_v53 = vpop.f32.mrf.mxu1 }
 0x110   : > { %13043 = vst [vmem:[#allocation31_spill] sm:$0xff] %v9100_v53  ;;  %7340 = vmatmul.msk.f32.gmra.mxu0 %vm645_vm1, %v9080_v3 }
 0x111   : > { %7408 = vmatmul.msk.f32.gmra.mxu2 %vm645_vm1, %v9098_v6 }
 0x112   : > { %7373 = vmatmul.msk.f32.gmra.mxu1 %vm645_vm1, %v9075_v9  ;;  %7476 = vmatmul.msk.f32.gmra.mxu3 %vm645_vm1, %v9103_v60 }
 0x114   : > { %v9116_v18 = vpop.f32.mrf.mxu2 }
 0x115   : > { %13044 = vst [vmem:[#allocation32_spill] sm:$0xff] %v9116_v18  ;;  %v9118_v10 = vpop.f32.mrf.mxu0 }
 0x116   : > { %13045 = vst [vmem:[#allocation33_spill] sm:$0xff] %v9118_v10  ;;  %v9140_v10 = vld [vmem:[%s8616_s27 + $0x230] sm:$0xff] }
 0x117   : > { %v9120_v53 = vpop.f32.mrf.mxu1 }
 0x118   : > { %13046 = vst [vmem:[#allocation34_spill] sm:$0xff] %v9120_v53  ;;  %7341 = vmatmul.msk.f32.gmra.mxu0 %vm645_vm1, %v9103_v60 }
 0x119   : > { %7409 = vmatmul.msk.f32.gmra.mxu2 %vm645_vm1, %v8631_v12 }
 0x11a   : > { %7374 = vmatmul.msk.f32.gmra.mxu1 %vm645_vm1, %v9098_v6  ;;  %7477 = vmatmul.msk.f32.gmra.mxu3 %vm645_vm1, %v8628_v11 }
 0x11c   : > { %v9130_v8 = vpop.f32.mrf.mxu2 }
 0x11d   : > { %13047 = vst [vmem:[#allocation35_spill] sm:$0xff] %v9130_v8  ;;  %v9132_v18 = vpop.f32.mrf.mxu0  ;;  %v9155_v8 = vld [vmem:[%s8616_s27 + $0x108] sm:$0xff] }
 0x11e   : > { %13048 = vst [vmem:[#allocation36_spill] sm:$0xff] %v9132_v18  ;;  %v9160_v18 = vld [vmem:[%s8616_s27 + $0x238] sm:$0xff] }
 0x11f   : > { %v9137_v53 = vpop.f32.mrf.mxu1 }
 0x120   : > { %13049 = vst [vmem:[#allocation37_spill] sm:$0xff] %v9137_v53  ;;  %7484 = vmatmul.msk.f32.vlgmr.msrb.gmra.mxu0 %vm645_vm1, %v8661_v22 }
 0x121   : > { %7410 = vmatmul.msk.f32.gmra.mxu2 %vm645_vm1, %v9135_v48 }
 0x122   : > { %7478 = vmatmul.msk.f32.gmra.mxu3 %vm645_vm1, %v9140_v10  ;;  %7552 = vmatmul.msk.f32.vlgmr.msrb.gmra.mxu1 %vm645_vm1, %v8664_v23 }
 0x124   : > { %v9150_v11 = vpop.f32.mrf.mxu2 }
 0x125   : > { %v9152_v12 = vpop.f32.mrf.mxu0 }
 0x126   : > { %13050 = vst [vmem:[#allocation38_spill] sm:$0xff] %v9152_v12 }
 0x127   : > { %v9157_v53 = vpop.f32.mrf.mxu1 }
 0x128   : > { %13051 = vst [vmem:[#allocation39_spill] sm:$0xff] %v9157_v53  ;;  %7485 = vmatmul.msk.f32.gmra.mxu0 %vm645_vm1, %v8673_v24 }
 0x129   : > { %7411 = vmatmul.msk.f32.gmra.mxu2 %vm645_vm1, %v9155_v8 }
 0x12a   : > { %7479 = vmatmul.msk.f32.gmra.mxu3 %vm645_vm1, %v9160_v18  ;;  %7553 = vmatmul.msk.f32.gmra.mxu1 %vm645_vm1, %v8676_v25 }
 0x12c   : > { %v9170_v22 = vpop.f32.mrf.mxu2 }
 0x12d   : > { %v9172_v23 = vpop.f32.mrf.mxu0 }
 0x12e   : > { %13052 = vst [vmem:[#allocation40_spill] sm:$0xff] %v9172_v23 }
 0x12f   : > { %v9174_v12 = vpop.f32.mrf.mxu1 }
 0x130   : > { %13053 = vst [vmem:[#allocation41_spill] sm:$0xff] %v9174_v12  ;;  %7486 = vmatmul.msk.f32.gmra.mxu0 %vm645_vm1, %v8687_v26 }
 0x131   : > { %7588 = vmatmul.msk.f32.vlgmr.msra.gmra.mxu2 %vm645_vm1, %v8687_v26 }
 0x132   : > { %7554 = vmatmul.msk.f32.gmra.mxu1 %vm645_vm1, %v8690_v27 }
 0x134   : > { %v9182_v24 = vpop.f32.mrf.mxu2 }
 0x135   : > { %13054 = vst [vmem:[#allocation42_spill] sm:$0xff] %v9182_v24  ;;  %v9184_v53 = vpop.f32.mrf.mxu0 }
 0x136   : > { %13055 = vst [vmem:[#allocation43_spill] sm:$0xff] %v9184_v53 }
 0x137   : > { %v9186_v25 = vpop.f32.mrf.mxu1 }
 0x138   : > { %13056 = vst [vmem:[#allocation44_spill] sm:$0xff] %v9186_v25  ;;  %7487 = vmatmul.msk.f32.gmra.mxu0 %vm645_vm1, %v8701_v28 }
 0x139   : > { %7589 = vmatmul.msk.f32.gmra.mxu2 %vm645_vm1, %v8701_v28 }
 0x13a   : > { %7555 = vmatmul.msk.f32.gmra.mxu1 %vm645_vm1, %v8704_v29 }
 0x13c   : > { %v9194_v12 = vpop.f32.mrf.mxu2 }
 0x13d   : > { %13057 = vst [vmem:[#allocation45_spill] sm:$0xff] %v9194_v12  ;;  %v9196_v26 = vpop.f32.mrf.mxu0 }
 0x13e   : > { %13058 = vst [vmem:[#allocation46_spill] sm:$0xff] %v9196_v26 }
 0x13f   : > { %v9198_v27 = vpop.f32.mrf.mxu1 }
 0x140   : > { %13059 = vst [vmem:[#allocation47_spill] sm:$0xff] %v9198_v27  ;;  %7488 = vmatmul.msk.f32.gmra.mxu0 %vm645_vm1, %v8715_v30 }
 0x141   : > { %7590 = vmatmul.msk.f32.gmra.mxu2 %vm645_vm1, %v8715_v30 }
 0x142   : > { %7556 = vmatmul.msk.f32.gmra.mxu1 %vm645_vm1, %v8718_v31 }
 0x144   : > { %v9206_v24 = vpop.f32.mrf.mxu2 }
 0x145   : > { %13060 = vst [vmem:[#allocation48_spill] sm:$0xff] %v9206_v24  ;;  %v9208_v28 = vpop.f32.mrf.mxu0 }
 0x146   : > { %13061 = vst [vmem:[#allocation49_spill] sm:$0xff] %v9208_v28 }
 0x147   : > { %v9210_v29 = vpop.f32.mrf.mxu1 }
 0x148   : > { %13062 = vst [vmem:[#allocation50_spill] sm:$0xff] %v9210_v29  ;;  %7489 = vmatmul.msk.f32.gmra.mxu0 %vm645_vm1, %v8729_v32 }
 0x149   : > { %7591 = vmatmul.msk.f32.gmra.mxu2 %vm645_vm1, %v8729_v32 }
 0x14a   : > { %7557 = vmatmul.msk.f32.gmra.mxu1 %vm645_vm1, %v8732_v33 }
 0x14c   : > { %v9218_v12 = vpop.f32.mrf.mxu2 }
 0x14d   : > { %13063 = vst [vmem:[#allocation51_spill] sm:$0xff] %v9218_v12  ;;  %v9220_v30 = vpop.f32.mrf.mxu0 }
 0x14e   : > { %13064 = vst [vmem:[#allocation52_spill] sm:$0xff] %v9220_v30 }
 0x14f   : > { %v9222_v31 = vpop.f32.mrf.mxu1 }
 0x150   : > { %13065 = vst [vmem:[#allocation53_spill] sm:$0xff] %v9222_v31  ;;  %7490 = vmatmul.msk.f32.gmra.mxu0 %vm645_vm1, %v8743_v34 }
 0x151   : > { %7592 = vmatmul.msk.f32.gmra.mxu2 %vm645_vm1, %v8743_v34 }
 0x152   : > { %7558 = vmatmul.msk.f32.gmra.mxu1 %vm645_vm1, %v8746_v35 }
 0x154   : > { %v9230_v24 = vpop.f32.mrf.mxu2 }
 0x155   : > { %13066 = vst [vmem:[#allocation54_spill] sm:$0xff] %v9230_v24  ;;  %v9232_v32 = vpop.f32.mrf.mxu0 }
 0x156   : > { %13067 = vst [vmem:[#allocation55_spill] sm:$0xff] %v9232_v32  ;;  %v7546_v32 = vld [vmem:[%s8616_s27 + $0x240] sm:$0xff] }
 0x157   : > { %v9234_v33 = vpop.f32.mrf.mxu1 }
 0x158   : > { %13068 = vst [vmem:[#allocation56_spill] sm:$0xff] %v9234_v33  ;;  %7491 = vmatmul.msk.f32.gmra.mxu0 %vm645_vm1, %v8757_v36 }
 0x159   : > { %7593 = vmatmul.msk.f32.gmra.mxu2 %vm645_vm1, %v8757_v36 }
 0x15a   : > { %7559 = vmatmul.msk.f32.gmra.mxu1 %vm645_vm1, %v8760_v37 }
 0x15c   : > { %v9242_v12 = vpop.f32.mrf.mxu2 }
 0x15d   : > { %13069 = vst [vmem:[#allocation57_spill] sm:$0xff] %v9242_v12  ;;  %v9244_v34 = vpop.f32.mrf.mxu0 }
 0x15e   : > { %13070 = vst [vmem:[#allocation58_spill] sm:$0xff] %v9244_v34  ;;  %v7547_v34 = vld [vmem:[%s8616_s27 + $0x248] sm:$0xff] }
 0x15f   : > { %v9246_v35 = vpop.f32.mrf.mxu1 }
 0x160   : > { %13071 = vst [vmem:[#allocation59_spill] sm:$0xff] %v9246_v35  ;;  %7492 = vmatmul.msk.f32.gmra.mxu0 %vm645_vm1, %v8771_v38  ;;  %v1662_v35 = vld [vmem:[%s8616_s27 + $0x118] sm:$0xff] }
 0x161   : > { %7594 = vmatmul.msk.f32.gmra.mxu2 %vm645_vm1, %v8771_v38 }
 0x162   : > { %7560 = vmatmul.msk.f32.gmra.mxu1 %vm645_vm1, %v8774_v39 }
 0x164   : > { %v9254_v23 = vpop.f32.mrf.mxu2 }
 0x165   : > { %13072 = vst [vmem:[#allocation60_spill] sm:$0xff] %v9254_v23  ;;  %v9256_v36 = vpop.f32.mrf.mxu0 }
 0x166   : > { %13073 = vst [vmem:[#allocation61_spill] sm:$0xff] %v9256_v36 }
 0x167   : > { %v9258_v37 = vpop.f32.mrf.mxu1 }
 0x168   : > { %13074 = vst [vmem:[#allocation62_spill] sm:$0xff] %v9258_v37  ;;  %7493 = vmatmul.msk.f32.gmra.mxu0 %vm645_vm1, %v8785_v40  ;;  %v13105_v37 = vld [vmem:[#allocation34_spill] sm:$0xff] }
 0x169   : > { %7595 = vmatmul.msk.f32.gmra.mxu2 %vm645_vm1, %v8785_v40 }
 0x16a   : > { %7561 = vmatmul.msk.f32.gmra.mxu1 %vm645_vm1, %v8788_v41 }
 0x16c   : > { %v9266_v24 = vpop.f32.mrf.mxu2 }
 0x16d   : > { %13075 = vst [vmem:[#allocation63_spill] sm:$0xff] %v9266_v24  ;;  %v9268_v38 = vpop.f32.mrf.mxu0 }
 0x16e   : > { %13076 = vst [vmem:[#allocation64_spill] sm:$0xff] %v9268_v38  ;;  %v13109_v38 = vld [vmem:[#allocation37_spill] sm:$0xff] }
 0x16f   : > { %v9270_v39 = vpop.f32.mrf.mxu1 }
 0x170   : > { %13077 = vst [vmem:[#allocation65_spill] sm:$0xff] %v9270_v39  ;;  %7494 = vmatmul.msk.f32.gmra.mxu0 %vm645_vm1, %v8799_v42  ;;  %v13108_v39 = vld [vmem:[#allocation36_spill] sm:$0xff] }
 0x171   : > { %7596 = vmatmul.msk.f32.gmra.mxu2 %vm645_vm1, %v8799_v42 }
 0x172   : > { %7562 = vmatmul.msk.f32.gmra.mxu1 %vm645_vm1, %v8802_v43 }
 0x174   : > { %v9278_v25 = vpop.f32.mrf.mxu2 }
 0x175   : > { %13078 = vst [vmem:[#allocation66_spill] sm:$0xff] %v9278_v25  ;;  %v9280_v40 = vpop.f32.mrf.mxu0 }
 0x176   : > { %13079 = vst [vmem:[#allocation67_spill] sm:$0xff] %v9280_v40  ;;  %v13111_v40 = vld [vmem:[#allocation27_spill] sm:$0xff] }
 0x177   : > { %v9282_v41 = vpop.f32.mrf.mxu1 }
 0x178   : > { %13080 = vst [vmem:[#allocation68_spill] sm:$0xff] %v9282_v41  ;;  %7495 = vmatmul.msk.f32.gmra.mxu0 %vm645_vm1, %v8813_v44  ;;  %v2221_v41 = vld [vmem:[%s8616_s27 + $0x120] sm:$0xff] }
 0x179   : > { %7597 = vmatmul.msk.f32.gmra.mxu2 %vm645_vm1, %v8813_v44 }
 0x17a   : > { %7563 = vmatmul.msk.f32.gmra.mxu1 %vm645_vm1, %v8816_v45 }
 0x17c   : > { %v9290_v53 = vpop.f32.mrf.mxu2 }
 0x17d   : > { %13081 = vst [vmem:[#allocation69_spill] sm:$0xff] %v9290_v53  ;;  %v9292_v42 = vpop.f32.mrf.mxu0 }
 0x17e   : > { %13082 = vst [vmem:[#allocation70_spill] sm:$0xff] %v9292_v42 }
 0x17f   : > { %v9294_v43 = vpop.f32.mrf.mxu1 }
 0x180   : > { %13083 = vst [vmem:[#allocation71_spill] sm:$0xff] %v9294_v43  ;;  %7496 = vmatmul.msk.f32.gmra.mxu0 %vm645_vm1, %v8827_v46 }
 0x181   : > { %7598 = vmatmul.msk.f32.gmra.mxu2 %vm645_vm1, %v8827_v46 }
 0x182   : > { %7564 = vmatmul.msk.f32.gmra.mxu1 %vm645_vm1, %v8830_v47 }
 0x184   : > { %v9302_v12 = vpop.f32.mrf.mxu2 }
 0x185   : > { %13084 = vst [vmem:[#allocation72_spill] sm:$0xff] %v9302_v12  ;;  %v9304_v44 = vpop.f32.mrf.mxu0  ;;  %v13104_v12 = vld [vmem:[#allocation33_spill] sm:$0xff] }
 0x186   : > { %13085 = vst [vmem:[#allocation73_spill] sm:$0xff] %v9304_v44 }
 0x187   : > { %v9306_v45 = vpop.f32.mrf.mxu1 }
 0x188   : > { %13086 = vst [vmem:[#allocation74_spill] sm:$0xff] %v9306_v45  ;;  %7497 = vmatmul.msk.f32.gmra.mxu0 %vm645_vm1, %v8841_v49  ;;  %v13117_v45 = vld [vmem:[#allocation35_spill] sm:$0xff] }
 0x189   : > { %7599 = vmatmul.msk.f32.gmra.mxu2 %vm645_vm1, %v8841_v49 }
 0x18a   : > { %7565 = vmatmul.msk.f32.gmra.mxu1 %vm645_vm1, %v8844_v51 }
 0x18c   : > { %v9314_v27 = vpop.f32.mrf.mxu2 }
 0x18d   : > { %13087 = vst [vmem:[#allocation75_spill] sm:$0xff] %v9314_v27  ;;  %v9316_v46 = vpop.f32.mrf.mxu0 }
 0x18e   : > { %13088 = vst [vmem:[#allocation76_spill] sm:$0xff] %v9316_v46 }
 0x18f   : > { %v9318_v47 = vpop.f32.mrf.mxu1 }
 0x190   : > { %13089 = vst [vmem:[#allocation77_spill] sm:$0xff] %v9318_v47  ;;  %7498 = vmatmul.msk.f32.gmra.mxu0 %vm645_vm1, %v8857_v56  ;;  %v13123_v47 = vld [vmem:[#allocation29_spill] sm:$0xff] }
 0x191   : > { %7600 = vmatmul.msk.f32.gmra.mxu2 %vm645_vm1, %v8857_v56 }
 0x192   : > { %7566 = vmatmul.msk.f32.gmra.mxu1 %vm645_vm1, %v8860_v58 }
 0x194   : > { %v9326_v26 = vpop.f32.mrf.mxu2 }
 0x195   : > { %13090 = vst [vmem:[#allocation78_spill] sm:$0xff] %v9326_v26  ;;  %v9328_v49 = vpop.f32.mrf.mxu0 }
 0x196   : > { %13091 = vst [vmem:[#allocation79_spill] sm:$0xff] %v9328_v49 }
 0x197   : > { %v9330_v51 = vpop.f32.mrf.mxu1 }
 0x198   : > { %13092 = vst [vmem:[#allocation80_spill] sm:$0xff] %v9330_v51  ;;  %7499 = vmatmul.msk.f32.gmra.mxu0 %vm645_vm1, %v8875_v1 }
 0x199   : > { %7601 = vmatmul.msk.f32.gmra.mxu2 %vm645_vm1, %v8875_v1 }
 0x19a   : > { %7567 = vmatmul.msk.f32.gmra.mxu1 %vm645_vm1, %v8880_v4 }
 0x19c   : > { %v9338_v23 = vpop.f32.mrf.mxu2 }
 0x19d   : > { %13093 = vst [vmem:[#allocation81_spill] sm:$0xff] %v9338_v23  ;;  %v1783_v56 = vpop.f32.mrf.mxu0  ;;  %v13112_v23 = vld [vmem:[#allocation28_spill] sm:$0xff] }
 0x19e   : > { %v1012_v43 = vadd.f32 %v13112_v23, %v13111_v40  ;;  %v13120_v23 = vld [vmem:[#allocation32_spill] sm:$0xff] }
 0x19f   : > { %v2063_v29 = vpop.f32.mrf.mxu1 }
 0x1a0   : > { %7500 = vmatmul.msk.f32.gmra.mxu0 %vm645_vm1, %v8894_v13  ;;  %v1331_v40 = vadd.f32 %v13120_v23, %v1012_v43 }
 0x1a1   : > { %7602 = vmatmul.msk.f32.gmra.mxu2 %vm645_vm1, %v8894_v13 }
 0x1a2   : > { %7568 = vmatmul.msk.f32.gmra.mxu1 %vm645_vm1, %v8900_v16  ;;  %v1879_v16 = vadd.f32 %v1783_v56, %v8877_v2 }
 0x1a4   : > { %v9346_v58 = vpop.f32.mrf.mxu2 }
 0x1a5   : > { %13094 = vst [vmem:[#allocation82_spill] sm:$0xff] %v9346_v58  ;;  %v1786_v28 = vpop.f32.mrf.mxu0 }
 0x1a7   : > { %v2066_v1 = vpop.f32.mrf.mxu1 }
 0x1a8   : > { %7501 = vmatmul.msk.f32.gmra.mxu0 %vm645_vm1, %v8915_v50 }
 0x1a9   : > { %7603 = vmatmul.msk.f32.gmra.mxu2 %vm645_vm1, %v8915_v50  ;;  %v2159_v50 = vadd.f32 %v2063_v29, %v1879_v16 }
 0x1aa   : > { %7569 = vmatmul.msk.f32.gmra.mxu1 %vm645_vm1, %v8920_v55 }
 0x1ac   : > { %v1316_v4 = vpop.f32.mrf.mxu2 }
 0x1ad   : > { %v9355_v24 = vadd.f32 %v1316_v4, %v8854_v54  ;;  %v1789_v13 = vpop.f32.mrf.mxu0  ;;  %v1880_v54 = vadd.f32 %v1786_v28, %v8897_v14 }
 0x1ae   : > { %v1881_v56 = vadd.f32 %v1789_v13, %v8917_v52 }
 0x1af   : > { %13095 = vst [vmem:[#allocation83_spill] sm:$0xff] %v9355_v24  ;;  %v2069_v31 = vpop.f32.mrf.mxu1  ;;  %v2160_v2 = vadd.f32 %v2066_v1, %v1880_v54  ;;  %v13106_v24 = vld [vmem:[#allocation30_spill] sm:$0xff] }
 0x1b0   : > { %7502 = vmatmul.msk.f32.gmra.mxu0 %vm645_vm1, %v8931_v63 }
 0x1b1   : > { %7604 = vmatmul.msk.f32.gmra.mxu2 %vm645_vm1, %v8931_v63  ;;  %v9373_v63 = vpop.f32.mrf.mxu3 }
 0x1b2   : > { %7570 = vmatmul.msk.f32.gmra.mxu1 %vm645_vm1, %v8936_v5 }
 0x1b4   : > { %v2343_v30 = vpop.f32.mrf.mxu2 }
 0x1b5   : > { %v9364_v55 = vadd.f32 %v2343_v30, %v2159_v50  ;;  %v1792_v25 = vpop.f32.mrf.mxu0 }
 0x1b6   : > { %v1882_v50 = vadd.f32 %v1792_v25, %v8933_v0  ;;  %v13096_v0 = vld [vmem:[#allocation17_spill] sm:$0xff] }
 0x1b7   : > { %v2072_v4 = vpop.f32.mrf.mxu1 }
 0x1b8   : > { %7503 = vmatmul.msk.f32.gmra.mxu0 %vm645_vm1, %v8947_v15 }
 0x1b9   : > { %7605 = vmatmul.msk.f32.gmra.mxu2 %vm645_vm1, %v8947_v15  ;;  %v2161_v15 = vadd.f32 %v2069_v31, %v1881_v56  ;;  %v9386_v1 = vpop.f32.mrf.mxu3  ;;  %v13097_v56 = vld [vmem:[#allocation10_spill] sm:$0xff] }
 0x1ba   : > { %7571 = vmatmul.msk.f32.gmra.mxu1 %vm645_vm1, %v8952_v19 }
 0x1bc   : > { %v2346_v5 = vpop.f32.mrf.mxu2 }
 0x1bd   : > { %v9375_v29 = vadd.f32 %v2346_v5, %v2160_v2  ;;  %v1795_v30 = vpop.f32.mrf.mxu0 }
 0x1be   : > { %v1883_v54 = vadd.f32 %v1795_v30, %v8949_v17  ;;  %v13098_v30 = vld [vmem:[#allocation20_spill] sm:$0xff] }
 0x1bf   : > { %v2075_v14 = vpop.f32.mrf.mxu1 }
 0x1c0   : > { %7504 = vmatmul.msk.f32.gmra.mxu0 %vm645_vm1, %v8963_v59 }
 0x1c1   : > { %7606 = vmatmul.msk.f32.gmra.mxu2 %vm645_vm1, %v8963_v59  ;;  %v2162_v59 = vadd.f32 %v2072_v4, %v1882_v50  ;;  %v9398_v5 = vpop.f32.mrf.mxu3 }
 0x1c2   : > { %7572 = vmatmul.msk.f32.gmra.mxu1 %vm645_vm1, %v8968_v62 }
 0x1c4   : > { %v2349_v19 = vpop.f32.mrf.mxu2 }
 0x1c5   : > { %v9384_v28 = vadd.f32 %v2349_v19, %v2161_v15  ;;  %v1798_v16 = vpop.f32.mrf.mxu0 }
 0x1c6   : > { %v1884_v15 = vadd.f32 %v1798_v16, %v13097_v56 }
 0x1c7   : > { %v2078_v52 = vpop.f32.mrf.mxu1 }
 0x1c8   : > { %7505 = vmatmul.msk.f32.gmra.mxu0 %vm645_vm1, %v8981_v20  ;;  %v2164_v50 = vadd.f32 %v2078_v52, %v1884_v15 }
 0x1c9   : > { %7607 = vmatmul.msk.f32.gmra.mxu2 %vm645_vm1, %v8981_v20  ;;  %v2163_v20 = vadd.f32 %v2075_v14, %v1883_v54  ;;  %v9413_v19 = vpop.f32.mrf.mxu3  ;;  %v13100_v54 = vld [vmem:[#allocation12_spill] sm:$0xff] }
 0x1ca   : > { %7573 = vmatmul.msk.f32.gmra.mxu1 %vm645_vm1, %v8988_v21 }
 0x1cc   : > { %v2352_v62 = vpop.f32.mrf.mxu2 }
 0x1cd   : > { %v9395_v31 = vadd.f32 %v2352_v62, %v2162_v59  ;;  %v1801_v13 = vpop.f32.mrf.mxu0 }
 0x1ce   : > { %v1885_v16 = vadd.f32 %v1801_v13, %v13100_v54  ;;  %v13101_v13 = vld [vmem:[#allocation15_spill] sm:$0xff] }
 0x1cf   : > { %v2081_v2 = vpop.f32.mrf.mxu1 }
 0x1d0   : > { %7506 = vmatmul.msk.f32.gmra.mxu0 %vm645_vm1, %v9001_v57 }
 0x1d1   : > { %7608 = vmatmul.msk.f32.gmra.mxu2 %vm645_vm1, %v9001_v57  ;;  %v13099_v57 = vld [vmem:[#allocation22_spill] sm:$0xff]  ;;  %v9430_v52 = vpop.f32.mrf.mxu3 }
 0x1d2   : > { %7574 = vmatmul.msk.f32.gmra.mxu1 %vm645_vm1, %v13096_v0  ;;  %v1611_v43 = vadd.f32 %v9430_v52, %v1331_v40 }
 0x1d4   : > { %v2355_v21 = vpop.f32.mrf.mxu2 }
 0x1d5   : > { %v9406_v25 = vadd.f32 %v2355_v21, %v2163_v20  ;;  %v1804_v4 = vpop.f32.mrf.mxu0  ;;  %v2165_v20 = vadd.f32 %v2081_v2, %v1885_v16  ;;  %v7543_v16 = vld [vmem:[%s8616_s27 + $0x228] sm:$0xff] }
 0x1d7   : > { %v2084_v17 = vpop.f32.mrf.mxu1 }
 0x1d8   : > { %7507 = vmatmul.msk.f32.gmra.mxu0 %vm645_vm1, %v13098_v30 }
 0x1d9   : > { %7609 = vmatmul.msk.f32.gmra.mxu2 %vm645_vm1, %v13098_v30  ;;  %v1886_v30 = vadd.f32 %v1804_v4, %v13101_v13 }
 0x1da   : > { %7575 = vmatmul.msk.f32.gmra.mxu1 %vm645_vm1, %v13099_v57 }
 0x1dc   : > { %v2358_v14 = vpop.f32.mrf.mxu2 }
 0x1dd   : > { %v9417_v59 = vadd.f32 %v2358_v14, %v2164_v50  ;;  %v9419_v62 = vpop.f32.mrf.mxu0  ;;  %v9447_v50 = vpop.f32.mrf.mxu3 }
 0x1df   : > { %v9422_v0 = vpop.f32.mrf.mxu1 }
 0x1e0   : > { %7508 = vmatmul.msk.f32.gmra.mxu0 %vm645_vm1, %v9043_v7 }
 0x1e1   : > { %7610 = vmatmul.msk.f32.gmra.mxu2 %vm645_vm1, %v9043_v7  ;;  %v2166_v7 = vadd.f32 %v2084_v17, %v1886_v30  ;;  %v1658_v17 = vld [vmem:[%s8616_s27 + $0xf8] sm:$0xff] }
 0x1e2   : > { %7576 = vmatmul.msk.f32.gmra.mxu1 %vm645_vm1, %v9051_v61 }
 0x1e4   : > { %v2361_v21 = vpop.f32.mrf.mxu2 }
 0x1e5   : > { %v9432_v56 = vadd.f32 %v2361_v21, %v2165_v20  ;;  %v9434_v15 = vpop.f32.mrf.mxu0  ;;  %v1545_v20 = vpop.f32.mrf.mxu3 }
 0x1e7   : > { %v9437_v57 = vpop.f32.mrf.mxu1 }
 0x1e8   : > { %7509 = vmatmul.msk.f32.gmra.mxu0 %vm645_vm1, %v9075_v9 }
 0x1e9   : > { %7611 = vmatmul.msk.f32.gmra.mxu2 %vm645_vm1, %v9075_v9 }
 0x1ea   : > { %7577 = vmatmul.msk.f32.gmra.mxu1 %vm645_vm1, %v9080_v3 }
 0x1ec   : > { %v2364_v61 = vpop.f32.mrf.mxu2 }
 0x1ed   : > { %v9445_v2 = vadd.f32 %v2364_v61, %v2166_v7  ;;  %v9449_v4 = vpop.f32.mrf.mxu0  ;;  %v1548_v13 = vpop.f32.mrf.mxu3 }
 0x1ef   : > { %v9451_v14 = vpop.f32.mrf.mxu1 }
 0x1f0   : > { %7510 = vmatmul.msk.f32.gmra.mxu0 %vm645_vm1, %v9098_v6 }
 0x1f1   : > { %7612 = vmatmul.msk.f32.gmra.mxu2 %vm645_vm1, %v9098_v6 }
 0x1f2   : > { %7578 = vmatmul.msk.f32.gmra.mxu1 %vm645_vm1, %v9103_v60 }
 0x1f4   : > { %v9459_v9 = vpop.f32.mrf.mxu2 }
 0x1f5   : > { %v9461_v3 = vpop.f32.mrf.mxu0 }
 0x1f7   : > { %v9464_v54 = vpop.f32.mrf.mxu1 }
 0x1f8   : > { %7511 = vmatmul.msk.f32.gmra.mxu0 %vm645_vm1, %v1658_v17 }
 0x1f9   : > { %7613 = vmatmul.msk.f32.gmra.mxu2 %vm645_vm1, %v1658_v17 }
 0x1fa   : > { %7579 = vmatmul.msk.f32.gmra.mxu1 %vm645_vm1, %v7543_v16  ;;  %v1661_v16 = vld [vmem:[%s8616_s27 + $0x110] sm:$0xff] }
 0x1fc   : > { %v9470_v21 = vpop.f32.mrf.mxu2 }
 0x1fd   : > { %v9472_v6 = vpop.f32.mrf.mxu0 }
 0x1ff   : > { %v9474_v60 = vpop.f32.mrf.mxu1 }
 0x200   : > { %7512 = vmatmul.msk.f32.gmra.mxu0 %vm645_vm1, %v9135_v48 }
 0x201   : > { %7614 = vmatmul.msk.f32.gmra.mxu2 %vm645_vm1, %v9135_v48  ;;  %v9490_v48 = vpop.f32.mrf.mxu3 }
 0x202   : > { %7580 = vmatmul.msk.f32.gmra.mxu1 %vm645_vm1, %v9140_v10  ;;  %13102 = vst [vmem:[#allocation17_spill] sm:$0xff] %v9490_v48 }
 0x204   : > { %v9482_v30 = vpop.f32.mrf.mxu2 }
 0x205   : > { %v1822_v7 = vpop.f32.mrf.mxu0 }
 0x207   : > { %v2102_v61 = vpop.f32.mrf.mxu1 }
 0x208   : > { %7513 = vmatmul.msk.f32.gmra.mxu0 %vm645_vm1, %v9155_v8 }
 0x209   : > { %7615 = vmatmul.msk.f32.gmra.mxu2 %vm645_vm1, %v9155_v8  ;;  %v9501_v53 = vpop.f32.mrf.mxu3 }
 0x20a   : > { %7581 = vmatmul.msk.f32.gmra.mxu1 %vm645_vm1, %v9160_v18  ;;  %13103 = vst [vmem:[#allocation10_spill] sm:$0xff] %v9501_v53  ;;  %v1021_v53 = vadd.f32 %v13109_v38, %v13108_v39  ;;  %v13118_v39 = vld [vmem:[#allocation19_spill] sm:$0xff] }
 0x20c   : > { %v9492_v17 = vpop.f32.mrf.mxu2  ;;  %v1334_v38 = vadd.f32 %v9170_v22, %v1021_v53  ;;  %v13125_v53 = vld [vmem:[#allocation13_spill] sm:$0xff] }
 0x20d   : > { %v1825_v10 = vpop.f32.mrf.mxu0 }
 0x20f   : > { %v2105_v33 = vpop.f32.mrf.mxu1 }
 0x210   : > { %7514 = vmatmul.msk.f32.gmra.mxu0 %vm645_vm1, %v1661_v16 }
 0x211   : > { %7616 = vmatmul.msk.f32.gmra.mxu2 %vm645_vm1, %v1661_v16  ;;  %v1018_v16 = vadd.f32 %v13105_v37, %v13104_v12  ;;  %v13115_v12 = vld [vmem:[#allocation24_spill] sm:$0xff]  ;;  %v13116_v37 = vld [vmem:[#allocation25_spill] sm:$0xff] }
 0x212   : > { %7582 = vmatmul.msk.f32.gmra.mxu1 %vm645_vm1, %v7546_v32  ;;  %v13107_v32 = vld [vmem:[#allocation31_spill] sm:$0xff]  ;;  %v1009_v58 = vadd.f32 %v13116_v37, %v13115_v12  ;;  %v1614_v37 = vadd.f32 %v1548_v13, %v1334_v38 }
 0x213   : > { %v1015_v27 = vadd.f32 %v13107_v32, %v13106_v24  ;;  %v13119_v32 = vld [vmem:[#allocation21_spill] sm:$0xff] }
 0x214   : > { %v9499_v8 = vpop.f32.mrf.mxu2  ;;  %v1330_v46 = vadd.f32 %v13123_v47, %v1009_v58 }
 0x215   : > { %v1828_v18 = vpop.f32.mrf.mxu0  ;;  %v1332_v24 = vadd.f32 %v13117_v45, %v1015_v27  ;;  %v13124_v45 = vld [vmem:[#allocation11_spill] sm:$0xff] }
 0x216   : > { %v1000_v22 = vadd.f32 %v13125_v53, %v13124_v45  ;;  %v1610_v58 = vadd.f32 %v9413_v19, %v1330_v46 }
 0x217   : > { %v2108_v48 = vpop.f32.mrf.mxu1  ;;  %v1612_v12 = vadd.f32 %v9447_v50, %v1332_v24  ;;  %v1891_v50 = vadd.f32 %v9472_v6, %v1611_v43 }
 0x218   : > { %7515 = vmatmul.msk.f32.gmra.mxu0 %vm645_vm1, %v1662_v35  ;;  %v1890_v52 = vadd.f32 %v9461_v3, %v1610_v58 }
 0x219   : > { %7617 = vmatmul.msk.f32.gmra.mxu2 %vm645_vm1, %v1662_v35  ;;  %v1333_v35 = vadd.f32 %v9150_v11, %v1018_v16  ;;  %v13121_v16 = vld [vmem:[#allocation14_spill] sm:$0xff]  ;;  %v2171_v19 = vadd.f32 %v9474_v60, %v1891_v50 }
 0x21a   : > { %7583 = vmatmul.msk.f32.gmra.mxu1 %vm645_vm1, %v7547_v34  ;;  %v9522_v34 = vpop.f32.mrf.mxu3 }
 0x21b   : > { %13114 = vst [vmem:[#allocation12_spill] sm:$0xff] %v9522_v34  ;;  %v1613_v11 = vadd.f32 %v1545_v20, %v1333_v35  ;;  %v1892_v20 = vadd.f32 %v1822_v7, %v1612_v12  ;;  %v1894_v35 = vadd.f32 %v1828_v18, %v1614_v37 }
 0x21c   : > { %v2382_v36 = vpop.f32.mrf.mxu2 }
 0x21d   : > { %v9514_v26 = vpop.f32.mrf.mxu0  ;;  %v1893_v27 = vadd.f32 %v1825_v10, %v1613_v11  ;;  %v13130_v10 = vld [vmem:[#allocation18_spill] sm:$0xff]  ;;  %v2172_v7 = vadd.f32 %v2102_v61, %v1892_v20  ;;  %v2174_v18 = vadd.f32 %v2108_v48, %v1894_v35  ;;  %v2451_v48 = vadd.f32 %v9499_v8, %v2171_v19 }
 0x21e   : > { %13110 = vst [vmem:[#allocation20_spill] sm:$0xff] %v9514_v26  ;;  %v1006_v26 = vadd.f32 %v13119_v32, %v13118_v39  ;;  %v2222_v39 = vld [vmem:[%s8616_s27 + $0x128] sm:$0xff]  ;;  %s7203_s27 = scalar_lea.sflag [#allocation3], %s566_s21 }
 0x21f   : > { %v9520_v42 = vpop.f32.mrf.mxu1  ;;  %v13129_v32 = vld [vmem:[#allocation23_spill] sm:$0xff]  ;;  %v2173_v13 = vadd.f32 %v2105_v33, %v1893_v27  ;;  %v9558_v33 = vld [vmem:[%s13132_s23] ss:$0 sm:$0xff]  ;;  %s8392_s23 = scalar_lea.hbm %s8391_s19, 1 }
 0x220   : > { %13113 = vst [vmem:[#allocation22_spill] sm:$0xff] %v9520_v42  ;;  %v13122_v42 = vld [vmem:[#allocation16_spill] sm:$0xff]  ;;  %v2487_v12 = vadd.f32 %v9558_v33, %v2451_v48  ;;  %v2482_v35 = vadd.f32 %v9558_v33, %v9445_v2  ;;  %v2481_v50 = vadd.f32 %v9558_v33, %v9432_v56  ;;  %v2479_v56 = vadd.f32 %v9558_v33, %v9406_v25  ;;  %p8393_p11 = scmp.ne.s32.totalorder %s8391_s19, %s8392_s23  ;;  %p8398_p1 = scmp.lt.s32.totalorder %s8396_s29, %s8392_s23 }
 0x221   : > { %7618 = vmatmul.msk.f32.gmra.mxu2 %vm645_vm1, %v2221_v41  ;;  %v1003_v44 = vadd.f32 %v13122_v42, %v13121_v16  ;;  %v13126_v41 = vld [vmem:[#allocation26_spill] sm:$0xff] }
 0x222   : > { %v1329_v51 = vadd.f32 %v13126_v41, %v1006_v26  ;;  %v1327_v26 = vadd.f32 %v13130_v10, %v1000_v22  ;;  %v9551_v38 = vpop.f32.mrf.mxu3  ;;  %v9602_v41 = vmax.f32 %v2487_v12, 0.0  ;;  %v2480_v10 = vadd.f32 %v9558_v33, %v9417_v59  ;;  %p8394_p12 = pnand %p8393_p11, %p8573_p5  ;;  %p8399_p2 = por %p8398_p1, %p8397_p0 }
 0x223   : > { %v1328_v47 = vadd.f32 %v13129_v32, %v1003_v44  ;;  %13131 = vst [vmem:[#allocation34_spill] sm:$0xff] %v9551_v38 }
 0x224   : > { %v2385_v34 = vpop.f32.mrf.mxu2  ;;  %v1609_v24 = vadd.f32 %v9398_v5, %v1329_v51  ;;  %v2452_v51 = vadd.f32 %v2382_v36, %v2172_v7  ;;  %v1607_v6 = vadd.f32 %v9373_v63, %v1327_v26  ;;  %13141 = vst [vmem:[#allocation35_spill] sm:$0xff] %v9602_v41  ;;  %v9645_v26 = vmax.f32 %v2482_v35, 0.0  ;;  %v7644_v35 = vld [vmem:[%s13156_s3 + $0x140] sm:$0xff]  ;;  %p8395_p13 = pneg %p8394_p12 }
 0x225   : > { %v9539_v49 = vpop.f32.mrf.mxu0  ;;  %v2453_v23 = vadd.f32 %v2385_v34, %v2173_v13  ;;  %v1608_v44 = vadd.f32 %v9386_v1, %v1328_v47  ;;  %v2170_v1 = vadd.f32 %v9464_v54, %v1890_v52  ;;  %v2478_v52 = vadd.f32 %v9558_v33, %v9395_v31 }
 0x226   : > { %13127 = vst [vmem:[#allocation15_spill] sm:$0xff] %v9539_v49  ;;  %v1889_v46 = vadd.f32 %v9449_v4, %v1609_v24  ;;  %v1887_v4 = vadd.f32 %v9419_v62, %v1607_v6  ;;  %v9652_v24 = vmax.f32 %v2481_v50, 0.0  ;;  %v9661_v7 = vmax.f32 %v2480_v10, 0.0  ;;  %v2539_v50 = vld [vmem:[%s13156_s3] sm:$0xff]  ;;  %v13164_v49 = vld [vmem:[#allocation79_spill] sm:$0xff]  ;;  %p8400_p3 = pnand %p8399_p2, %p8395_p13 }
 0x227   : > { %v9543_v42 = vpop.f32.mrf.mxu1  ;;  %v1888_v3 = vadd.f32 %v9434_v15, %v1608_v44  ;;  %v2489_v34 = vadd.f32 %v9558_v33, %v2453_v23  ;;  %v2450_v63 = vadd.f32 %v9492_v17, %v2170_v1  ;;  %v2488_v15 = vadd.f32 %v9558_v33, %v2452_v51  ;;  %13150 = vst [vmem:[#allocation26_spill] sm:$0xff] %v9645_v26  ;;  %v7652_v1 = vld [vmem:[%s13156_s3 + $0x180] sm:$0xff] }
 0x228   : > { %13128 = vst [vmem:[#allocation33_spill] sm:$0xff] %v9543_v42  ;;  %v2169_v36 = vadd.f32 %v9451_v14, %v1889_v46  ;;  %v2167_v17 = vadd.f32 %v9422_v0, %v1887_v4  ;;  %v9670_v23 = vmax.f32 %v2479_v56, 0.0  ;;  %v9681_v46 = vmax.f32 %v2478_v52, 0.0  ;;  %v7638_v4 = vld [vmem:[%s13156_s3 + $0x110] sm:$0xff] }
 0x229   : > { %7619 = vmatmul.msk.f32.gmra.mxu2 %vm645_vm1, %v2222_v39  ;;  %v2168_v54 = vadd.f32 %v9437_v57, %v1888_v3  ;;  %v9581_v37 = vmax.f32 %v2489_v34, 0.0  ;;  %v9593_v27 = vmax.f32 %v2488_v15, 0.0  ;;  %v7636_v3 = vld [vmem:[%s13156_s3 + $0x100] sm:$0xff] }
 0x22a   : > { %v2449_v8 = vadd.f32 %v9482_v30, %v2169_v36  ;;  %v9585_v62 = vpop.f32.mrf.mxu3  ;;  %v2486_v30 = vadd.f32 %v9558_v33, %v2450_v63  ;;  %v2447_v53 = vadd.f32 %v9459_v9, %v2167_v17 }
 0x22b   : > { %13136 = vst [vmem:[#allocation37_spill] sm:$0xff] %v9581_v37  ;;  %v2448_v57 = vadd.f32 %v9470_v21, %v2168_v54 }
 0x22c   : > { %v2388_v40 = vpop.f32.mrf.mxu2  ;;  %13137 = vst [vmem:[#allocation27_spill] sm:$0xff] %v9585_v62  ;;  %v2485_v22 = vadd.f32 %v9558_v33, %v2449_v8  ;;  %v9610_v39 = vmax.f32 %v2486_v30, 0.0  ;;  %v2483_v9 = vadd.f32 %v9558_v33, %v2447_v53  ;;  %v7640_v8 = vld [vmem:[%s13156_s3 + $0x120] sm:$0xff]  ;;  %v7642_v30 = vld [vmem:[%s13156_s3 + $0x130] sm:$0xff] }
 0x22d   : > { %v2454_v5 = vadd.f32 %v2388_v40, %v2174_v18  ;;  %v9564_v61 = vpop.f32.mrf.mxu0  ;;  %13139 = vst [vmem:[#allocation24_spill] sm:$0xff] %v9593_v27  ;;  %v2484_v21 = vadd.f32 %v9558_v33, %v2448_v57  ;;  %v2477_v18 = vadd.f32 %v9558_v33, %v9384_v28  ;;  %v2476_v40 = vadd.f32 %v9558_v33, %v9375_v29  ;;  %v13182_v62 = vld [vmem:[#allocation62_spill] sm:$0xff] }
 0x22e   : > { %13133 = vst [vmem:[#allocation30_spill] sm:$0xff] %v9564_v61  ;;  %v9616_v43 = vmax.f32 %v2485_v22, 0.0  ;;  %v9636_v13 = vmax.f32 %v2483_v9, 0.0  ;;  %v2475_v28 = vadd.f32 %v9558_v33, %v9364_v55 }
 0x22f   : > { %v2490_v11 = vadd.f32 %v9558_v33, %v2454_v5  ;;  %v9570_v16 = vpop.f32.mrf.mxu1  ;;  %13143 = vst [vmem:[#allocation21_spill] sm:$0xff] %v9610_v39  ;;  %v9625_v32 = vmax.f32 %v2484_v21, 0.0  ;;  %v9688_v19 = vmax.f32 %v2477_v18, 0.0  ;;  %v9695_v51 = vmax.f32 %v2476_v40, 0.0  ;;  %v7646_v18 = vld [vmem:[%s13156_s3 + $0x150] sm:$0xff] }
 0x230   : > { %13134 = vst [vmem:[#allocation31_spill] sm:$0xff] %v9570_v16  ;;  %v9702_v55 = vmax.f32 %v2475_v28, 0.0  ;;  %v2541_v28 = vld [vmem:[%s13156_s3 + $0x10] sm:$0xff] }
 0x231   : > { %v9576_v60 = vmax.f32 %v2490_v11, 0.0  ;;  %13144 = vst [vmem:[#allocation32_spill] sm:$0xff] %v9616_v43 }
 0x232   : > { %13146 = vst [vmem:[#allocation16_spill] sm:$0xff] %v9625_v32  ;;  %v9629_v47 = vpop.f32.mrf.mxu3 }
 0x233   : > { %13135 = vst [vmem:[#allocation36_spill] sm:$0xff] %v9576_v60  ;;  %2555 = vmatpush.msra.mxu3 %v9576_v60  ;;  %2761 = vmatpush.msra.mxu0 %v9576_v60 }
 0x234   : > { %2868 = vmatpush.msrb.mxu2 %v9576_v60  ;;  %v9588_v14 = vpop.f32.mrf.mxu2  ;;  %13148 = vst [vmem:[#allocation11_spill] sm:$0xff] %v9636_v13 }
 0x235   : > { %13138 = vst [vmem:[#allocation28_spill] sm:$0xff] %v9588_v14  ;;  %2556 = vmatpush.msra.mxu3 %v9581_v37  ;;  %2762 = vmatpush.msra.mxu0 %v9581_v37  ;;  %v9598_v45 = vpop.f32.mrf.mxu0 }
 0x236   : > { %2869 = vmatpush.msrb.mxu2 %v9581_v37  ;;  %13140 = vst [vmem:[#allocation25_spill] sm:$0xff] %v9598_v45  ;;  %v13170_v45 = vld [vmem:[#allocation82_spill] sm:$0xff] }
 0x237   : > { %2557 = vmatpush.msra.mxu3 %v9593_v27  ;;  %2763 = vmatpush.msra.mxu0 %v9593_v27  ;;  %v9606_v0 = vpop.f32.mrf.mxu1 }
 0x238   : > { %13142 = vst [vmem:[#allocation19_spill] sm:$0xff] %v9606_v0  ;;  %2870 = vmatpush.msrb.mxu2 %v9593_v27 }
 0x239   : > { %2558 = vmatpush.msra.mxu3 %v9602_v41  ;;  %2764 = vmatpush.msra.mxu0 %v9602_v41 }
 0x23a   : > { %2871 = vmatpush.msrb.mxu2 %v9602_v41  ;;  %v9676_v44 = vpop.f32.mrf.mxu3 }
 0x23b   : > { %2559 = vmatpush.msra.mxu3 %v9610_v39  ;;  %2765 = vmatpush.msra.mxu0 %v9610_v39 }
 0x23c   : > { %2872 = vmatpush.msrb.mxu2 %v9610_v39  ;;  %v9621_v20 = vpop.f32.mrf.mxu2 }
 0x23d   : > { %13145 = vst [vmem:[#allocation14_spill] sm:$0xff] %v9621_v20  ;;  %2560 = vmatpush.msra.mxu3 %v9616_v43  ;;  %2766 = vmatpush.msra.mxu0 %v9616_v43  ;;  %v9632_v58 = vpop.f32.mrf.mxu0 }
 0x23e   : > { %2873 = vmatpush.msrb.mxu2 %v9616_v43  ;;  %13147 = vst [vmem:[#allocation29_spill] sm:$0xff] %v9632_v58 }
 0x23f   : > { %2561 = vmatpush.msra.mxu3 %v9625_v32  ;;  %2767 = vmatpush.msra.mxu0 %v9625_v32  ;;  %v9640_v2 = vpop.f32.mrf.mxu1 }
 0x240   : > { %13149 = vst [vmem:[#allocation13_spill] sm:$0xff] %v9640_v2  ;;  %2874 = vmatpush.msrb.mxu2 %v9625_v32  ;;  %v13167_v2 = vld [vmem:[#allocation77_spill] sm:$0xff] }
 0x241   : > { %2562 = vmatpush.msra.mxu3 %v9636_v13  ;;  %2768 = vmatpush.msra.mxu0 %v9636_v13 }
 0x242   : > { %2875 = vmatpush.msrb.mxu2 %v9636_v13  ;;  %v9717_v48 = vpop.f32.mrf.mxu3 }
 0x243   : > { %2563 = vmatpush.msra.mxu3 %v9645_v26  ;;  %2769 = vmatpush.msra.mxu0 %v9645_v26 }
 0x244   : > { %2876 = vmatpush.msrb.mxu2 %v9645_v26  ;;  %v9657_v59 = vpop.f32.mrf.mxu2 }
 0x245   : > { %13151 = vst [vmem:[#allocation23_spill] sm:$0xff] %v9657_v59  ;;  %2564 = vmatpush.msra.mxu3 %v9652_v24  ;;  %2770 = vmatpush.msra.mxu0 %v9652_v24  ;;  %v9666_v25 = vpop.f32.mrf.mxu0 }
 0x246   : > { %2877 = vmatpush.msrb.mxu2 %v9652_v24  ;;  %13152 = vst [vmem:[#allocation18_spill] sm:$0xff] %v9666_v25 }
 0x247   : > { %2565 = vmatpush.msra.mxu3 %v9661_v7  ;;  %2771 = vmatpush.msra.mxu0 %v9661_v7  ;;  %v9674_v31 = vpop.f32.mrf.mxu1 }
 0x248   : > { %13153 = vst [vmem:[#allocation84_spill] sm:$0xff] %v9674_v31  ;;  %2878 = vmatpush.msrb.mxu2 %v9661_v7 }
 0x249   : > { %2566 = vmatpush.msra.mxu3 %v9670_v23  ;;  %2772 = vmatpush.msra.mxu0 %v9670_v23 }
 0x24a   : > { %2879 = vmatpush.msrb.mxu2 %v9670_v23  ;;  %v9739_v63 = vpop.f32.mrf.mxu3 }
 0x24b   : > { %2567 = vmatpush.msra.mxu3 %v9681_v46  ;;  %2773 = vmatpush.msra.mxu0 %v9681_v46 }
 0x24c   : > { %2880 = vmatpush.msrb.mxu2 %v9681_v46  ;;  %v9693_v29 = vpop.f32.mrf.mxu2 }
 0x24d   : > { %13154 = vst [vmem:[#allocation85_spill] sm:$0xff] %v9693_v29  ;;  %2568 = vmatpush.msra.mxu3 %v9688_v19  ;;  %2774 = vmatpush.msra.mxu0 %v9688_v19  ;;  %v9700_v5 = vpop.f32.mrf.mxu0 }
 0x24e   : > { %2881 = vmatpush.msrb.mxu2 %v9688_v19 }
 0x24f   : > { %2569 = vmatpush.msra.mxu3 %v9695_v51  ;;  %2775 = vmatpush.msra.mxu0 %v9695_v51  ;;  %v9706_v6 = vpop.f32.mrf.mxu1 }
 0x250   : > { %13155 = vst [vmem:[#allocation86_spill] sm:$0xff] %v9706_v6  ;;  %2882 = vmatpush.msrb.mxu2 %v9695_v51  ;;  %v13172_v6 = vld [vmem:[#allocation71_spill] sm:$0xff] }
 0x251   : > { %2570 = vmatpush.msra.mxu3 %v9702_v55  ;;  %2776 = vmatpush.msra.mxu0 %v9702_v55 }
 0x252   : > { %2883 = vmatpush.msrb.mxu2 %v9702_v55  ;;  %2777 = vmatmul.f32.vlgmr.msra.gmra.mxu0 %v7636_v3  ;;  %v9762_v57 = vpop.f32.mrf.mxu3 }
 0x253   : > { %2975 = vmatpush.msrb.mxu0 %v9576_v60  ;;  %2884 = vmatmul.f32.vlgmr.msrb.gmra.mxu2 %v7652_v1 }
 0x254   : > { %3082 = vmatpush.msra.mxu2 %v9576_v60  ;;  %v9722_v34 = vpop.f32.mrf.mxu2  ;;  %2571 = vmatmul.f32.vlgmr.msra.gmra.mxu3 %v2539_v50 }
 0x255   : > { %13157 = vst [vmem:[#allocation87_spill] sm:$0xff] %v9722_v34  ;;  %2976 = vmatpush.msrb.mxu0 %v9581_v37  ;;  %v9726_v11 = vpop.f32.mrf.mxu0  ;;  %v2549_v34 = vld [vmem:[%s13156_s3 + $0x50] sm:$0xff] }
 0x256   : > { %3083 = vmatpush.msra.mxu2 %v9581_v37 }
 0x257   : > { %2977 = vmatpush.msrb.mxu0 %v9593_v27  ;;  %v9733_v36 = vpop.f32.mrf.mxu1 }
 0x258   : > { %3084 = vmatpush.msra.mxu2 %v9593_v27  ;;  %13158 = vst [vmem:[#allocation88_spill] sm:$0xff] %v9733_v36  ;;  %v13180_v36 = vld [vmem:[#allocation83_spill] sm:$0xff] }
 0x259   : > { %2978 = vmatpush.msrb.mxu0 %v9602_v41 }
 0x25a   : > { %3085 = vmatpush.msra.mxu2 %v9602_v41  ;;  %2780 = vmatmul.f32.gmra.mxu0 %v7638_v4  ;;  %v9783_v9 = vpop.f32.mrf.mxu3 }
 0x25b   : > { %2979 = vmatpush.msrb.mxu0 %v9610_v39 }
 0x25c   : > { %3086 = vmatpush.msra.mxu2 %v9610_v39  ;;  %v9741_v15 = vpop.f32.mrf.mxu2  ;;  %2574 = vmatmul.f32.gmra.mxu3 %v2541_v28  ;;  %v7650_v28 = vld [vmem:[%s13156_s3 + $0x170] sm:$0xff] }
 0x25d   : > { %13159 = vst [vmem:[#allocation89_spill] sm:$0xff] %v9741_v15  ;;  %2980 = vmatpush.msrb.mxu0 %v9616_v43  ;;  %v9745_v54 = vpop.f32.mrf.mxu0  ;;  %v13166_v15 = vld [vmem:[#allocation76_spill] sm:$0xff] }
 0x25e   : > { %3087 = vmatpush.msra.mxu2 %v9616_v43 }
 0x25f   : > { %2981 = vmatpush.msrb.mxu0 %v9625_v32  ;;  %v9754_v12 = vpop.f32.mrf.mxu1 }
 0x260   : > { %3088 = vmatpush.msra.mxu2 %v9625_v32 }
 0x261   : > { %2982 = vmatpush.msrb.mxu0 %v9636_v13 }
 0x262   : > { %3089 = vmatpush.msra.mxu2 %v9636_v13  ;;  %2783 = vmatmul.f32.gmra.mxu0 %v7640_v8  ;;  %v9810_v40 = vpop.f32.mrf.mxu3  ;;  %v7648_v8 = vld [vmem:[%s13156_s3 + $0x160] sm:$0xff] }
 0x263   : > { %2983 = vmatpush.msrb.mxu0 %v9645_v26 }
 0x264   : > { %3090 = vmatpush.msra.mxu2 %v9645_v26  ;;  %v9758_v17 = vpop.f32.mrf.mxu2 }
 0x265   : > { %13160 = vst [vmem:[#allocation90_spill] sm:$0xff] %v9758_v17  ;;  %2984 = vmatpush.msrb.mxu0 %v9652_v24  ;;  %v9769_v53 = vpop.f32.mrf.mxu0  ;;  %v13169_v17 = vld [vmem:[#allocation74_spill] sm:$0xff] }
 0x266   : > { %3091 = vmatpush.msra.mxu2 %v9652_v24 }
 0x267   : > { %2985 = vmatpush.msrb.mxu0 %v9661_v7  ;;  %v9775_v22 = vpop.f32.mrf.mxu1 }
 0x268   : > { %3092 = vmatpush.msra.mxu2 %v9661_v7 }
 0x269   : > { %2986 = vmatpush.msrb.mxu0 %v9670_v23 }
 0x26a   : > { %3093 = vmatpush.msra.mxu2 %v9670_v23  ;;  %2786 = vmatmul.f32.gmra.mxu0 %v7642_v30  ;;  %v2543_v30 = vld [vmem:[%s13156_s3 + $0x20] sm:$0xff] }
 0x26b   : > { %2987 = vmatpush.msrb.mxu0 %v9681_v46  ;;  %2577 = vmatmul.f32.gmra.mxu3 %v2543_v30  ;;  %v2545_v30 = vld [vmem:[%s13156_s3 + $0x30] sm:$0xff] }
 0x26c   : > { %3094 = vmatpush.msra.mxu2 %v9681_v46  ;;  %v9777_v21 = vpop.f32.mrf.mxu2 }
 0x26d   : > { %13161 = vst [vmem:[#allocation91_spill] sm:$0xff] %v9777_v21  ;;  %2988 = vmatpush.msrb.mxu0 %v9688_v19  ;;  %v9793_v10 = vpop.f32.mrf.mxu0 }
 0x26e   : > { %3095 = vmatpush.msra.mxu2 %v9688_v19 }
 0x26f   : > { %2989 = vmatpush.msrb.mxu0 %v9695_v51  ;;  %v9801_v52 = vpop.f32.mrf.mxu1 }
 0x270   : > { %3096 = vmatpush.msra.mxu2 %v9695_v51 }
 0x271   : > { %2990 = vmatpush.msrb.mxu0 %v9702_v55 }
 0x272   : > { %3097 = vmatpush.msra.mxu2 %v9702_v55  ;;  %2789 = vmatmul.f32.gmra.mxu0 %v7644_v35  ;;  %v9837_v35 = vpop.f32.mrf.mxu3 }
 0x273   : > { %3189 = vmatpush.msra.mxu0 %v9576_v60  ;;  %2580 = vmatmul.f32.gmra.mxu3 %v2545_v30  ;;  %v2547_v30 = vld [vmem:[%s13156_s3 + $0x40] sm:$0xff] }
 0x274   : > { %3296 = vmatpush.msrb.mxu2 %v9576_v60  ;;  %v9799_v56 = vpop.f32.mrf.mxu2 }
 0x275   : > { %3190 = vmatpush.msra.mxu0 %v9581_v37  ;;  %13162 = vst [vmem:[#allocation92_spill] sm:$0xff] %v9799_v56  ;;  %v9817_v3 = vpop.f32.mrf.mxu0 }
 0x276   : > { %3297 = vmatpush.msrb.mxu2 %v9581_v37 }
 0x277   : > { %3191 = vmatpush.msra.mxu0 %v9593_v27  ;;  %v9825_v4 = vpop.f32.mrf.mxu1 }
 0x278   : > { %3298 = vmatpush.msrb.mxu2 %v9593_v27 }
 0x279   : > { %3192 = vmatpush.msra.mxu0 %v9602_v41 }
 0x27a   : > { %3299 = vmatpush.msrb.mxu2 %v9602_v41  ;;  %2792 = vmatmul.f32.gmra.mxu0 %v7646_v18  ;;  %v1590_v20 = vpop.f32.mrf.mxu3 }
 0x27b   : > { %3193 = vmatpush.msra.mxu0 %v9610_v39  ;;  %2583 = vmatmul.f32.gmra.mxu3 %v2547_v30 }
 0x27c   : > { %3300 = vmatpush.msrb.mxu2 %v9610_v39  ;;  %v9821_v1 = vpop.f32.mrf.mxu2 }
 0x27d   : > { %3194 = vmatpush.msra.mxu0 %v9616_v43  ;;  %13163 = vst [vmem:[#allocation93_spill] sm:$0xff] %v9821_v1  ;;  %v9843_v18 = vpop.f32.mrf.mxu0  ;;  %v13183_v1 = vld [vmem:[#allocation72_spill] sm:$0xff] }
 0x27e   : > { %3301 = vmatpush.msrb.mxu2 %v9616_v43 }
 0x27f   : > { %3195 = vmatpush.msra.mxu0 %v9625_v32 }
 0x280   : > { %3302 = vmatpush.msrb.mxu2 %v9625_v32 }
 0x281   : > { %3196 = vmatpush.msra.mxu0 %v9636_v13 }
 0x282   : > { %3303 = vmatpush.msrb.mxu2 %v9636_v13  ;;  %2795 = vmatmul.f32.gmra.mxu0 %v7648_v8  ;;  %v9852_v8 = vpop.f32.mrf.mxu1  ;;  %v1593_v16 = vpop.f32.mrf.mxu3 }
 0x283   : > { %3197 = vmatpush.msra.mxu0 %v9645_v26  ;;  %2586 = vmatmul.f32.gmra.mxu3 %v2549_v34  ;;  %v13173_v34 = vld [vmem:[#allocation81_spill] sm:$0xff] }
 0x284   : > { %3304 = vmatpush.msrb.mxu2 %v9645_v26  ;;  %v9841_v50 = vpop.f32.mrf.mxu2 }
 0x285   : > { %3198 = vmatpush.msra.mxu0 %v9652_v24  ;;  %v1870_v59 = vpop.f32.mrf.mxu0 }
 0x286   : > { %3305 = vmatpush.msrb.mxu2 %v9652_v24 }
 0x287   : > { %3199 = vmatpush.msra.mxu0 %v9661_v7 }
 0x288   : > { %3306 = vmatpush.msrb.mxu2 %v9661_v7 }
 0x289   : > { %3200 = vmatpush.msra.mxu0 %v9670_v23 }
 0x28a   : > { %3307 = vmatpush.msrb.mxu2 %v9670_v23  ;;  %2798 = vmatmul.f32.gmra.mxu0 %v7650_v28  ;;  %v7668_v28 = vld [vmem:[%s13156_s3 + $0x200] sm:$0xff]  ;;  %v2150_v42 = vpop.f32.mrf.mxu1 }
 0x28b   : > { %3201 = vmatpush.msra.mxu0 %v9681_v46 }
 0x28c   : > { %3308 = vmatpush.msrb.mxu2 %v9681_v46  ;;  %v9861_v14 = vpop.f32.mrf.mxu2 }
 0x28d   : > { %3202 = vmatpush.msra.mxu0 %v9688_v19  ;;  %v1873_v0 = vpop.f32.mrf.mxu0 }
 0x28e   : > { %3309 = vmatpush.msrb.mxu2 %v9688_v19 }
 0x28f   : > { %3203 = vmatpush.msra.mxu0 %v9695_v51 }
 0x290   : > { %3310 = vmatpush.msrb.mxu2 %v9695_v51 }
 0x291   : > { %3204 = vmatpush.msra.mxu0 %v9702_v55 }
 0x292   : > { %3311 = vmatpush.msrb.mxu2 %v9702_v55  ;;  %2991 = vmatmul.f32.vlgmr.msrb.gmra.mxu0 %v7668_v28  ;;  %v13165_v28 = vld [vmem:[#allocation80_spill] sm:$0xff]  ;;  %v2153_v61 = vpop.f32.mrf.mxu1 }
 0x293   : > { %3403 = vmatpush.msrb.mxu0 %v9576_v60  ;;  %v1066_v30 = vadd.f32 %v13165_v28, %v13164_v49 }
 0x294   : > { %v9874_v29 = vpop.f32.mrf.mxu2 }
 0x295   : > { %3404 = vmatpush.msrb.mxu0 %v9581_v37  ;;  %v1063_v37 = vadd.f32 %v13167_v2, %v13166_v15  ;;  %v1349_v21 = vadd.f32 %v13170_v45, %v1066_v30  ;;  %v13174_v2 = vld [vmem:[#allocation67_spill] sm:$0xff]  ;;  %v13175_v15 = vld [vmem:[#allocation68_spill] sm:$0xff] }
 0x296   : > { %v1054_v58 = vadd.f32 %v13175_v15, %v13174_v2  ;;  %v13177_v30 = vld [vmem:[#allocation64_spill] sm:$0xff]  ;;  %v13181_v15 = vld [vmem:[#allocation61_spill] sm:$0xff] }
 0x297   : > { %3405 = vmatpush.msrb.mxu0 %v9593_v27  ;;  %v13168_v27 = vld [vmem:[#allocation73_spill] sm:$0xff]  ;;  %v1348_v28 = vadd.f32 %v13173_v34, %v1063_v37  ;;  %v1629_v45 = vadd.f32 %v1593_v16, %v1349_v21  ;;  %v13184_v21 = vld [vmem:[#allocation58_spill] sm:$0xff] }
 0x298   : > { %v1060_v31 = vadd.f32 %v13169_v17, %v13168_v27  ;;  %v13176_v27 = vld [vmem:[#allocation78_spill] sm:$0xff] }
 0x299   : > { %3406 = vmatpush.msrb.mxu0 %v9602_v41  ;;  %v13171_v41 = vld [vmem:[#allocation70_spill] sm:$0xff]  ;;  %v1628_v56 = vadd.f32 %v1590_v20, %v1348_v28  ;;  %v1909_v2 = vadd.f32 %v1873_v0, %v1629_v45  ;;  %v13192_v45 = vld [vmem:[#allocation63_spill] sm:$0xff] }
 0x29a   : > { %v1057_v49 = vadd.f32 %v13172_v6, %v13171_v41  ;;  %v1347_v17 = vadd.f32 %v13176_v27, %v1060_v31  ;;  %v1876_v41 = vpop.f32.mrf.mxu0  ;;  %v13179_v6 = vld [vmem:[#allocation75_spill] sm:$0xff]  ;;  %v1345_v31 = vadd.f32 %v13183_v1, %v1054_v58  ;;  %v2156_v20 = vpop.f32.mrf.mxu1 }
 0x29b   : > { %3407 = vmatpush.msrb.mxu0 %v9610_v39  ;;  %v2551_v39 = vld [vmem:[%s13156_s3 + $0x60] sm:$0xff]  ;;  %v13185_v27 = vld [vmem:[#allocation59_spill] sm:$0xff] }
 0x29c   : > { %v2430_v60 = vpop.f32.mrf.mxu2  ;;  %2589 = vmatmul.f32.gmra.mxu3 %v2551_v39  ;;  %v1346_v34 = vadd.f32 %v13179_v6, %v1057_v49  ;;  %v1627_v16 = vadd.f32 %v9837_v35, %v1347_v17  ;;  %v1908_v39 = vadd.f32 %v1870_v59, %v1628_v56  ;;  %v2553_v58 = vld [vmem:[%s13156_s3 + $0x70] sm:$0xff]  ;;  %v13189_v56 = vld [vmem:[#allocation66_spill] sm:$0xff]  ;;  %v1625_v35 = vadd.f32 %v9783_v9, %v1345_v31 }
 0x29d   : > { %3408 = vmatpush.msrb.mxu0 %v9616_v43  ;;  %v1596_v43 = vpop.f32.mrf.mxu3  ;;  %v13188_v59 = vld [vmem:[#allocation56_spill] sm:$0xff] }
 0x29e   : > { %v1630_v25 = vadd.f32 %v1596_v43, %v13180_v36  ;;  %v1626_v0 = vadd.f32 %v9810_v40, %v1346_v34  ;;  %v2189_v43 = vadd.f32 %v2153_v61, %v1909_v2  ;;  %v13187_v36 = vld [vmem:[#allocation55_spill] sm:$0xff]  ;;  %v13190_v61 = vld [vmem:[#allocation52_spill] sm:$0xff]  ;;  %v1905_v9 = vadd.f32 %v9793_v10, %v1625_v35 }
 0x29f   : > { %3409 = vmatpush.msrb.mxu0 %v9625_v32  ;;  %v13178_v32 = vld [vmem:[#allocation65_spill] sm:$0xff]  ;;  %v13195_v31 = vld [vmem:[#allocation60_spill] sm:$0xff] }
 0x2a0   : > { %v1051_v38 = vadd.f32 %v13178_v32, %v13177_v30  ;;  %v1910_v32 = vadd.f32 %v1876_v41, %v1630_v25  ;;  %v1045_v30 = vadd.f32 %v13185_v27, %v13184_v21  ;;  %v1042_v25 = vadd.f32 %v13188_v59, %v13187_v36  ;;  %v13197_v27 = vld [vmem:[#allocation47_spill] sm:$0xff]  ;;  %v13201_v59 = vld [vmem:[#allocation54_spill] sm:$0xff]  ;;  %v13202_v35 = vld [vmem:[#allocation40_spill] sm:$0xff] }
 0x2a1   : > { %3410 = vmatpush.msrb.mxu0 %v9636_v13  ;;  %v1048_v13 = vadd.f32 %v13182_v62, %v13181_v15  ;;  %v1907_v62 = vadd.f32 %v9843_v18, %v1627_v16  ;;  %v13191_v18 = vld [vmem:[#allocation53_spill] sm:$0xff]  ;;  %v13194_v15 = vld [vmem:[#allocation50_spill] sm:$0xff] }
 0x2a2   : > { %v2190_v40 = vadd.f32 %v2156_v20, %v1910_v32  ;;  %v1039_v17 = vadd.f32 %v13191_v18, %v13190_v61  ;;  %v1342_v41 = vadd.f32 %v13192_v45, %v1045_v30  ;;  %v1341_v16 = vadd.f32 %v13195_v31, %v1042_v25  ;;  %v13206_v45 = vld [vmem:[#allocation38_spill] sm:$0xff] }
 0x2a3   : > { %3411 = vmatpush.msrb.mxu0 %v9645_v26  ;;  %v13186_v26 = vld [vmem:[#allocation69_spill] sm:$0xff]  ;;  %v1343_v1 = vadd.f32 %v13189_v56, %v1048_v13  ;;  %v2187_v34 = vadd.f32 %v9852_v8, %v1907_v62  ;;  %v13196_v8 = vld [vmem:[#allocation46_spill] sm:$0xff] }
 0x2a4   : > { %v2433_v37 = vpop.f32.mrf.mxu2  ;;  %v1344_v49 = vadd.f32 %v13186_v26, %v1051_v38  ;;  %v1906_v38 = vadd.f32 %v9817_v3, %v1626_v0  ;;  %v2188_v26 = vadd.f32 %v2150_v42, %v1908_v39  ;;  %2592 = vmatmul.f32.gmra.mxu3 %v2553_v58  ;;  %v13193_v42 = vld [vmem:[#allocation49_spill] sm:$0xff]  ;;  %v1033_v30 = vadd.f32 %v13197_v27, %v13196_v8  ;;  %v13200_v58 = vld [vmem:[#allocation44_spill] sm:$0xff]  ;;  %v13217_v27 = vld [vmem:[#allocation91_spill] sm:$0xff] }
 0x2a5   : > { %3412 = vmatpush.msrb.mxu0 %v9652_v24  ;;  %v2469_v28 = vadd.f32 %v2433_v37, %v2189_v43  ;;  %v1036_v37 = vadd.f32 %v13194_v15, %v13193_v42  ;;  %v1623_v39 = vadd.f32 %v9739_v63, %v1343_v1  ;;  %v2467_v21 = vadd.f32 %v9874_v29, %v2187_v34  ;;  %v13199_v43 = vld [vmem:[#allocation43_spill] sm:$0xff]  ;;  %v13212_v42 = vld [vmem:[#allocation92_spill] sm:$0xff] }
 0x2a6   : > { %v1624_v6 = vadd.f32 %v9762_v57, %v1344_v49  ;;  %v2468_v2 = vadd.f32 %v2430_v60, %v2188_v26  ;;  %v2186_v57 = vadd.f32 %v9825_v4, %v1906_v38  ;;  %v13198_v49 = vld [vmem:[#allocation57_spill] sm:$0xff]  ;;  %v1622_v0 = vadd.f32 %v9717_v48, %v1342_v41  ;;  %v13207_v41 = vld [vmem:[#allocation39_spill] sm:$0xff] }
 0x2a7   : > { %3413 = vmatpush.msrb.mxu0 %v9661_v7  ;;  %v2505_v10 = vadd.f32 %v9558_v33, %v2469_v28  ;;  %v1340_v20 = vadd.f32 %v13198_v49, %v1039_v17  ;;  %v1903_v63 = vadd.f32 %v9745_v54, %v1623_v39  ;;  %v1030_v36 = vadd.f32 %v13200_v58, %v13199_v43  ;;  %v13203_v38 = vld [vmem:[#allocation41_spill] sm:$0xff]  ;;  %v13221_v58 = vld [vmem:[#allocation84_spill] sm:$0xff] }
 0x2a8   : > { %v1904_v32 = vadd.f32 %v9769_v53, %v1624_v6  ;;  %v2185_v53 = vadd.f32 %v9801_v52, %v1905_v9  ;;  %v2466_v4 = vadd.f32 %v9861_v14, %v2186_v57  ;;  %v2504_v29 = vadd.f32 %v9558_v33, %v2468_v2 }
 0x2a9   : > { %3414 = vmatpush.msrb.mxu0 %v9670_v23  ;;  %v1339_v25 = vadd.f32 %v13201_v59, %v1036_v37  ;;  %v1621_v56 = vadd.f32 %v9676_v44, %v1341_v16  ;;  %v1902_v48 = vadd.f32 %v9726_v11, %v1622_v0  ;;  %v2503_v14 = vadd.f32 %v9558_v33, %v2467_v21  ;;  %v13204_v44 = vld [vmem:[#allocation51_spill] sm:$0xff]  ;;  %v13213_v16 = vld [vmem:[#allocation45_spill] sm:$0xff]  ;;  %v13218_v0 = vld [vmem:[#allocation42_spill] sm:$0xff] }
 0x2aa   : > { %v2184_v54 = vadd.f32 %v9775_v22, %v1904_v32  ;;  %v2465_v52 = vadd.f32 %v9841_v50, %v2185_v53  ;;  %v9964_v1 = vmax.f32 %v2505_v10, 0.0  ;;  %v1027_v26 = vadd.f32 %v13203_v38, %v13202_v35  ;;  %v13205_v50 = vld [vmem:[#allocation93_spill] sm:$0xff]  ;;  %v13214_v32 = vld [vmem:[#allocation34_spill] sm:$0xff]  ;;  %v13219_v53 = vld [vmem:[#allocation12_spill] sm:$0xff] }
 0x2ab   : > { %3415 = vmatpush.msrb.mxu0 %v9681_v46  ;;  %v1620_v11 = vadd.f32 %v9629_v47, %v1340_v20  ;;  %v1901_v28 = vadd.f32 %v9700_v5, %v1621_v56  ;;  %v2183_v22 = vadd.f32 %v9754_v12, %v1903_v63  ;;  %v2502_v18 = vadd.f32 %v9558_v33, %v2466_v4  ;;  %v13209_v47 = vld [vmem:[#allocation27_spill] sm:$0xff]  ;;  %v13210_v5 = vld [vmem:[#allocation18_spill] sm:$0xff]  ;;  %v13211_v12 = vld [vmem:[#allocation88_spill] sm:$0xff] }
 0x2ac   : > { %v2436_v13 = vpop.f32.mrf.mxu2  ;;  %v2464_v61 = vadd.f32 %v13205_v50, %v2184_v54  ;;  %v9976_v17 = vmax.f32 %v2504_v29, 0.0  ;;  %v1024_v6 = vadd.f32 %v13207_v41, %v13206_v45  ;;  %v1619_v34 = vadd.f32 %v13209_v47, %v1339_v25  ;;  %v13215_v21 = vld [vmem:[#allocation29_spill] sm:$0xff]  ;;  %v13222_v59 = vld [vmem:[#allocation90_spill] sm:$0xff]  ;;  %v13229_v45 = vld [vmem:[#allocation19_spill] sm:$0xff] }
 0x2ad   : > { %v2470_v3 = vadd.f32 %v2436_v13, %v2190_v40  ;;  %3416 = vmatpush.msrb.mxu0 %v9688_v19  ;;  %v1338_v40 = vadd.f32 %v13204_v44, %v1033_v30  ;;  %v13208_v13 = vld [vmem:[#allocation48_spill] sm:$0xff]  ;;  %v1900_v2 = vadd.f32 %v13210_v5, %v1620_v11  ;;  %v2463_v15 = vadd.f32 %v13212_v42, %v2183_v22  ;;  %v13220_v29 = vld [vmem:[#allocation25_spill] sm:$0xff]  ;;  %v13223_v54 = vld [vmem:[#allocation10_spill] sm:$0xff] }
 0x2ae   : > { %v1337_v9 = vadd.f32 %v13208_v13, %v1030_v36  ;;  %v2501_v37 = vadd.f32 %v9558_v33, %v2465_v52  ;;  %v9988_v31 = vmax.f32 %v2503_v14, 0.0  ;;  %v1336_v39 = vadd.f32 %v13213_v16, %v1027_v26  ;;  %v13224_v14 = vld [vmem:[#allocation30_spill] sm:$0xff]  ;;  %v13225_v38 = vld [vmem:[#allocation13_spill] sm:$0xff] }
 0x2af   : > { %v2506_v60 = vadd.f32 %v9558_v33, %v2470_v3  ;;  %3417 = vmatpush.msrb.mxu0 %v9695_v51  ;;  %v2182_v3 = vadd.f32 %v13211_v12, %v1902_v48  ;;  %v1618_v57 = vadd.f32 %v13214_v32, %v1338_v40  ;;  %v1899_v10 = vadd.f32 %v13215_v21, %v1619_v34  ;;  %v13226_v44 = vld [vmem:[#allocation89_spill] sm:$0xff]  ;;  %v13231_v34 = vld [vmem:[#allocation20_spill] sm:$0xff]  ;;  %v13235_v32 = vld [vmem:[#allocation23_spill] sm:$0xff] }
 0x2b0   : > { %v2500_v49 = vadd.f32 %v9558_v33, %v2464_v61  ;;  %v9998_v20 = vmax.f32 %v2502_v18, 0.0  ;;  %v1335_v63 = vadd.f32 %v13218_v0, %v1024_v6  ;;  %v1617_v4 = vadd.f32 %v13219_v53, %v1337_v9  ;;  %v13227_v22 = vld [vmem:[#allocation17_spill] sm:$0xff]  ;;  %v13228_v61 = vld [vmem:[#allocation15_spill] sm:$0xff] }
 0x2b1   : > { %v9953_v62 = vmax.f32 %v2506_v60, 0.0  ;;  %3418 = vmatpush.msrb.mxu0 %v9702_v55  ;;  %v13216_v60 = vld [vmem:[#allocation86_spill] sm:$0xff]  ;;  %v2462_v30 = vadd.f32 %v13217_v27, %v2182_v3  ;;  %v1898_v43 = vadd.f32 %v13220_v29, %v1618_v57  ;;  %v2180_v36 = vadd.f32 %v13221_v58, %v1900_v2  ;;  %v13230_v6 = vld [vmem:[#allocation87_spill] sm:$0xff]  ;;  %v13233_v3 = vld [vmem:[#allocation85_spill] sm:$0xff] }
 0x2b2   : > { %v2181_v8 = vadd.f32 %v13216_v60, %v1901_v28  ;;  %v2499_v56 = vadd.f32 %v9558_v33, %v2463_v15  ;;  %v10008_v48 = vmax.f32 %v2501_v37, 0.0  ;;  %v1616_v52 = vadd.f32 %v13223_v54, %v1336_v39  ;;  %v13232_v2 = vld [vmem:[#allocation31_spill] sm:$0xff]  ;;  %v13234_v16 = vld [vmem:[#allocation33_spill] sm:$0xff]  ;;  %v13236_v60 = vld [vmem:[#allocation22_spill] sm:$0xff] }
 0x2b3   : > { %2596 = vmatpush.msrb.mxu3 %v9953_v62  ;;  %2802 = vmatpush.msra.mxu1 %v9953_v62  ;;  %v1897_v35 = vadd.f32 %v13224_v14, %v1617_v4  ;;  %v2179_v26 = vadd.f32 %v13225_v38, %v1899_v10  ;;  %v2460_v40 = vadd.f32 %v13226_v44, %v2180_v36  ;;  %v10017_v28 = vmax.f32 %v2500_v49, 0.0  ;;  %v13237_v27 = vld [vmem:[#allocation14_spill] sm:$0xff]  ;;  %v13240_v14 = vld [vmem:[#allocation37_spill] sm:$0xff]  ;;  %v13242_v44 = vld [vmem:[#allocation35_spill] sm:$0xff] }
 0x2b4   : > { %v2461_v25 = vadd.f32 %v13222_v59, %v2181_v8  ;;  %v2498_v11 = vadd.f32 %v9558_v33, %v2462_v30  ;;  %v1615_v50 = vadd.f32 %v13227_v22, %v1335_v63  ;;  %v1896_v18 = vadd.f32 %v13228_v61, %v1616_v52  ;;  %v13238_v63 = vld [vmem:[#allocation28_spill] sm:$0xff]  ;;  %v7637_v54 = vld [vmem:[%s13156_s3 + $0x108] sm:$0xff] }
 0x2b5   : > { %2597 = vmatpush.msrb.mxu3 %v9964_v1  ;;  %2803 = vmatpush.msra.mxu1 %v9964_v1  ;;  %v2178_v41 = vadd.f32 %v13229_v45, %v1898_v43  ;;  %v2459_v13 = vadd.f32 %v13230_v6, %v2179_v26  ;;  %v10026_v47 = vmax.f32 %v2499_v56, 0.0  ;;  %v2177_v12 = vadd.f32 %v13232_v2, %v1897_v35  ;;  %v13239_v52 = vld [vmem:[#allocation36_spill] sm:$0xff]  ;;  %v7641_v61 = vld [vmem:[%s13156_s3 + $0x128] sm:$0xff] }
 0x2b6   : > { %v2497_v9 = vadd.f32 %v9558_v33, %v2461_v25  ;;  %v1895_v5 = vadd.f32 %v13231_v34, %v1615_v50  ;;  %v2496_v15 = vadd.f32 %v9558_v33, %v2460_v40  ;;  %v10034_v37 = vmax.f32 %v2498_v11, 0.0  ;;  %v13241_v35 = vld [vmem:[#allocation24_spill] sm:$0xff]  ;;  %v13243_v40 = vld [vmem:[#allocation21_spill] sm:$0xff]  ;;  %v2544_v50 = vld [vmem:[%s13156_s3 + $0x28] sm:$0xff] }
 0x2b7   : > { %2598 = vmatpush.msrb.mxu3 %v9976_v17  ;;  %2804 = vmatpush.msra.mxu1 %v9976_v17  ;;  %v2458_v42 = vadd.f32 %v13233_v3, %v2178_v41  ;;  %v2176_v39 = vadd.f32 %v13234_v16, %v1896_v18  ;;  %v2457_v57 = vadd.f32 %v13235_v32, %v2177_v12  ;;  %v2542_v38 = vld [vmem:[%s13156_s3 + $0x18] sm:$0xff]  ;;  %v13246_v18 = vld [vmem:[#allocation11_spill] sm:$0xff]  ;;  %v13247_v45 = vld [vmem:[#allocation26_spill] sm:$0xff] }
 0x2b8   : > { %v2495_v21 = vadd.f32 %v9558_v33, %v2459_v13  ;;  %v10041_v10 = vmax.f32 %v2497_v9, 0.0  ;;  %v2175_v8 = vadd.f32 %v13236_v60, %v1895_v5  ;;  %v10048_v0 = vmax.f32 %v2496_v15, 0.0  ;;  %v7639_v26 = vld [vmem:[%s13156_s3 + $0x118] sm:$0xff]  ;;  %v7620_v5 = vld [vmem:[%s13156_s3 + $0x80] sm:$0xff]  ;;  %v7669_v2 = vld [vmem:[%s13156_s3 + $0x208] sm:$0xff] }
 0x2b9   : > { %2599 = vmatpush.msrb.mxu3 %v9988_v31  ;;  %2805 = vmatpush.msra.mxu1 %v9988_v31  ;;  %v2456_v30 = vadd.f32 %v13237_v27, %v2176_v39  ;;  %v2494_v49 = vadd.f32 %v9558_v33, %v2458_v42  ;;  %v2493_v4 = vadd.f32 %v9558_v33, %v2457_v57  ;;  %v13244_v11 = vld [vmem:[#allocation32_spill] sm:$0xff]  ;;  %v7624_v42 = vld [vmem:[%s13156_s3 + $0xa0] sm:$0xff] }
 0x2ba   : > { %v2455_v53 = vadd.f32 %v13238_v63, %v2175_v8  ;;  %v10054_v29 = vmax.f32 %v2495_v21, 0.0  ;;  %v13245_v22 = vld [vmem:[#allocation16_spill] sm:$0xff]  ;;  %v7628_v32 = vld [vmem:[%s13156_s3 + $0xc0] sm:$0xff] }
 0x2bb   : > { %2600 = vmatpush.msrb.mxu3 %v9998_v20  ;;  %2806 = vmatpush.msra.mxu1 %v9998_v20  ;;  %v2492_v43 = vadd.f32 %v9558_v33, %v2456_v30  ;;  %v10059_v58 = vmax.f32 %v2494_v49, 0.0  ;;  %v10064_v59 = vmax.f32 %v2493_v4, 0.0  ;;  %v2546_v41 = vld [vmem:[%s13156_s3 + $0x38] sm:$0xff]  ;;  %v7622_v12 = vld [vmem:[%s13156_s3 + $0x90] sm:$0xff]  ;;  %v7632_v60 = vld [vmem:[%s13156_s3 + $0xe0] sm:$0xff] }
 0x2bc   : > { %v2491_v36 = vadd.f32 %v9558_v33, %v2455_v53  ;;  %v2540_v33 = vld [vmem:[%s13156_s3 + $0x8] sm:$0xff]  ;;  %v7643_v6 = vld [vmem:[%s13156_s3 + $0x138] sm:$0xff]  ;;  %v7626_v16 = vld [vmem:[%s13156_s3 + $0xb0] sm:$0xff] }
 0x2bd   : > { %2601 = vmatpush.msrb.mxu3 %v10008_v48  ;;  %2807 = vmatpush.msra.mxu1 %v10008_v48  ;;  %v10068_v25 = vmax.f32 %v2492_v43, 0.0  ;;  %v2554_v13 = vld [vmem:[%s13156_s3 + $0x78] sm:$0xff]  ;;  %v7630_v21 = vld [vmem:[%s13156_s3 + $0xd0] sm:$0xff]  ;;  %v7621_v49 = vld [vmem:[%s13156_s3 + $0x88] sm:$0xff] }
 0x2be   : > { %v10072_v56 = vmax.f32 %v2491_v36, 0.0  ;;  %v7651_v9 = vld [vmem:[%s13156_s3 + $0x178] sm:$0xff]  ;;  %v7634_v27 = vld [vmem:[%s13156_s3 + $0xf0] sm:$0xff]  ;;  %v7625_v43 = vld [vmem:[%s13156_s3 + $0xa8] sm:$0xff] }
 0x2bf   : > { %2602 = vmatpush.msrb.mxu3 %v10017_v28  ;;  %2808 = vmatpush.msra.mxu1 %v10017_v28  ;;  %v7623_v53 = vld [vmem:[%s13156_s3 + $0x98] sm:$0xff] }
 0x2c1   : > { %2603 = vmatpush.msrb.mxu3 %v10026_v47  ;;  %2809 = vmatpush.msra.mxu1 %v10026_v47 }
 0x2c3   : > { %2604 = vmatpush.msrb.mxu3 %v10034_v37  ;;  %2810 = vmatpush.msra.mxu1 %v10034_v37 }
 0x2c5   : > { %2605 = vmatpush.msrb.mxu3 %v10041_v10  ;;  %2811 = vmatpush.msra.mxu1 %v10041_v10 }
 0x2c7   : > { %2606 = vmatpush.msrb.mxu3 %v10048_v0  ;;  %2812 = vmatpush.msra.mxu1 %v10048_v0 }
 0x2c9   : > { %2607 = vmatpush.msrb.mxu3 %v10054_v29  ;;  %2813 = vmatpush.msra.mxu1 %v10054_v29 }
 0x2cb   : > { %2608 = vmatpush.msrb.mxu3 %v10059_v58  ;;  %2814 = vmatpush.msra.mxu1 %v10059_v58 }
 0x2cd   : > { %2609 = vmatpush.msrb.mxu3 %v10064_v59  ;;  %2815 = vmatpush.msra.mxu1 %v10064_v59 }
 0x2cf   : > { %2610 = vmatpush.msrb.mxu3 %v10068_v25  ;;  %2816 = vmatpush.msra.mxu1 %v10068_v25 }
 0x2d1   : > { %2611 = vmatpush.msrb.mxu3 %v10072_v56  ;;  %2817 = vmatpush.msra.mxu1 %v10072_v56 }
 0x2d2   : > { %2612 = vmatmul.f32.vlgmr.msrb.gmra.mxu3 %v2540_v33  ;;  %2818 = vmatmul.f32.vlgmr.msra.gmra.mxu1 %v7637_v54  ;;  %v7627_v33 = vld [vmem:[%s13156_s3 + $0xb8] sm:$0xff] }
 0x2d3   : > { %2654 = vmatpush.msra.mxu3 %v13239_v52  ;;  %3016 = vmatpush.msrb.mxu1 %v9953_v62  ;;  %v7629_v52 = vld [vmem:[%s13156_s3 + $0xc8] sm:$0xff] }
 0x2d5   : > { %2655 = vmatpush.msra.mxu3 %v13240_v14  ;;  %3017 = vmatpush.msrb.mxu1 %v9964_v1 }
 0x2d7   : > { %2656 = vmatpush.msra.mxu3 %v13241_v35  ;;  %3018 = vmatpush.msrb.mxu1 %v9976_v17  ;;  %v7631_v35 = vld [vmem:[%s13156_s3 + $0xd8] sm:$0xff] }
 0x2d9   : > { %2657 = vmatpush.msra.mxu3 %v13242_v44  ;;  %3019 = vmatpush.msrb.mxu1 %v9988_v31  ;;  %v7633_v44 = vld [vmem:[%s13156_s3 + $0xe8] sm:$0xff] }
 0x2da   : > { %2615 = vmatmul.f32.gmra.mxu3 %v2542_v38  ;;  %2821 = vmatmul.f32.gmra.mxu1 %v7639_v26  ;;  %v7654_v38 = vld [vmem:[%s13156_s3 + $0x190] sm:$0xff] }
 0x2db   : > { %2658 = vmatpush.msra.mxu3 %v13243_v40  ;;  %3020 = vmatpush.msrb.mxu1 %v9998_v20  ;;  %v7656_v40 = vld [vmem:[%s13156_s3 + $0x1a0] sm:$0xff] }
 0x2dc   : > { %2887 = vmatmul.f32.gmra.mxu2 %v7654_v38  ;;  %v7667_v38 = vld [vmem:[%s13156_s3 + $0x1f8] sm:$0xff] }
 0x2dd   : > { %2659 = vmatpush.msra.mxu3 %v13244_v11  ;;  %3021 = vmatpush.msrb.mxu1 %v10008_v48  ;;  %v7670_v11 = vld [vmem:[%s13156_s3 + $0x210] sm:$0xff] }
 0x2de   : > { %2994 = vmatmul.f32.gmra.mxu0 %v7670_v11  ;;  %v7690_v11 = vld [vmem:[%s13156_s3 + $0x2b0] sm:$0xff] }
 0x2df   : > { %2660 = vmatpush.msra.mxu3 %v13245_v22  ;;  %3022 = vmatpush.msrb.mxu1 %v10017_v28  ;;  %v7671_v22 = vld [vmem:[%s13156_s3 + $0x218] sm:$0xff] }
 0x2e1   : > { %2661 = vmatpush.msra.mxu3 %v13246_v18  ;;  %3023 = vmatpush.msrb.mxu1 %v10026_v47  ;;  %v7658_v18 = vld [vmem:[%s13156_s3 + $0x1b0] sm:$0xff] }
 0x2e2   : > { %2618 = vmatmul.f32.gmra.mxu3 %v2544_v50  ;;  %2824 = vmatmul.f32.gmra.mxu1 %v7641_v61  ;;  %v7635_v61 = vld [vmem:[%s13156_s3 + $0xf8] sm:$0xff] }
 0x2e3   : > { %2662 = vmatpush.msra.mxu3 %v13247_v45  ;;  %3024 = vmatpush.msrb.mxu1 %v10034_v37  ;;  %v7672_v45 = vld [vmem:[%s13156_s3 + $0x220] sm:$0xff] }
 0x2e4   : > { %2890 = vmatmul.f32.gmra.mxu2 %v7656_v40 }
 0x2e5   : > { %2663 = vmatpush.msra.mxu3 %v9652_v24  ;;  %3025 = vmatpush.msrb.mxu1 %v10041_v10  ;;  %v2548_v24 = vld [vmem:[%s13156_s3 + $0x48] sm:$0xff] }
 0x2e6   : > { %2997 = vmatmul.f32.gmra.mxu0 %v7672_v45  ;;  %v7685_v45 = vld [vmem:[%s13156_s3 + $0x288] sm:$0xff] }
 0x2e7   : > { %2664 = vmatpush.msra.mxu3 %v9661_v7  ;;  %3026 = vmatpush.msrb.mxu1 %v10048_v0  ;;  %v7645_v7 = vld [vmem:[%s13156_s3 + $0x148] sm:$0xff] }
 0x2e9   : > { %2665 = vmatpush.msra.mxu3 %v9670_v23  ;;  %3027 = vmatpush.msrb.mxu1 %v10054_v29  ;;  %v2550_v23 = vld [vmem:[%s13156_s3 + $0x58] sm:$0xff] }
 0x2ea   : > { %2621 = vmatmul.f32.gmra.mxu3 %v2546_v41  ;;  %2827 = vmatmul.f32.gmra.mxu1 %v7643_v6  ;;  %v7673_v41 = vld [vmem:[%s13156_s3 + $0x228] sm:$0xff] }
 0x2eb   : > { %2666 = vmatpush.msra.mxu3 %v9681_v46  ;;  %3028 = vmatpush.msrb.mxu1 %v10059_v58  ;;  %v7647_v46 = vld [vmem:[%s13156_s3 + $0x158] sm:$0xff] }
 0x2ec   : > { %2893 = vmatmul.f32.gmra.mxu2 %v7658_v18 }
 0x2ed   : > { %2667 = vmatpush.msra.mxu3 %v9688_v19  ;;  %3029 = vmatpush.msrb.mxu1 %v10064_v59  ;;  %v2552_v19 = vld [vmem:[%s13156_s3 + $0x68] sm:$0xff] }
 0x2ef   : > { %2668 = vmatpush.msra.mxu3 %v9695_v51  ;;  %3030 = vmatpush.msrb.mxu1 %v10068_v25  ;;  %v7649_v51 = vld [vmem:[%s13156_s3 + $0x168] sm:$0xff] }
 0x2f1   : > { %2669 = vmatpush.msra.mxu3 %v9702_v55  ;;  %3031 = vmatpush.msrb.mxu1 %v10072_v56  ;;  %v10172_v55 = vpop.f32.mrf.mxu3 }
 0x2f2   : > { %2624 = vmatmul.f32.gmra.mxu3 %v2548_v24  ;;  %2830 = vmatmul.f32.gmra.mxu1 %v7645_v7  ;;  %v7653_v7 = vld [vmem:[%s13156_s3 + $0x188] sm:$0xff] }
 0x2f3   : > { %2695 = vmatpush.msrb.mxu3 %v9953_v62  ;;  %3230 = vmatpush.msra.mxu1 %v9953_v62 }
 0x2f5   : > { %2696 = vmatpush.msrb.mxu3 %v9964_v1  ;;  %3231 = vmatpush.msra.mxu1 %v9964_v1 }
 0x2f7   : > { %2697 = vmatpush.msrb.mxu3 %v9976_v17  ;;  %3232 = vmatpush.msra.mxu1 %v9976_v17 }
 0x2f9   : > { %2698 = vmatpush.msrb.mxu3 %v9988_v31  ;;  %3233 = vmatpush.msra.mxu1 %v9988_v31  ;;  %v10190_v34 = vpop.f32.mrf.mxu3 }
 0x2fa   : > { %2627 = vmatmul.f32.gmra.mxu3 %v2550_v23  ;;  %2833 = vmatmul.f32.gmra.mxu1 %v7647_v46  ;;  %v7660_v23 = vld [vmem:[%s13156_s3 + $0x1c0] sm:$0xff]  ;;  %v7674_v46 = vld [vmem:[%s13156_s3 + $0x230] sm:$0xff] }
 0x2fb   : > { %2699 = vmatpush.msrb.mxu3 %v9998_v20  ;;  %3234 = vmatpush.msra.mxu1 %v9998_v20 }
 0x2fc   : > { %2896 = vmatmul.f32.gmra.mxu2 %v7660_v23  ;;  %3000 = vmatmul.f32.gmra.mxu0 %v7674_v46  ;;  %v7706_v23 = vld [vmem:[%s13156_s3 + $0x330] sm:$0xff]  ;;  %v7707_v46 = vld [vmem:[%s13156_s3 + $0x338] sm:$0xff] }
 0x2fd   : > { %2700 = vmatpush.msrb.mxu3 %v10008_v48  ;;  %3235 = vmatpush.msra.mxu1 %v10008_v48 }
 0x2ff   : > { %2701 = vmatpush.msrb.mxu3 %v10017_v28  ;;  %3236 = vmatpush.msra.mxu1 %v10017_v28 }
 0x301   : > { %2702 = vmatpush.msrb.mxu3 %v10026_v47  ;;  %3237 = vmatpush.msra.mxu1 %v10026_v47  ;;  %v10209_v3 = vpop.f32.mrf.mxu3 }
 0x302   : > { %2630 = vmatmul.f32.gmra.mxu3 %v2552_v19  ;;  %2836 = vmatmul.f32.gmra.mxu1 %v7649_v51  ;;  %v7675_v19 = vld [vmem:[%s13156_s3 + $0x238] sm:$0xff] }
 0x303   : > { %2703 = vmatpush.msrb.mxu3 %v10034_v37  ;;  %3238 = vmatpush.msra.mxu1 %v10034_v37 }
 0x305   : > { %2704 = vmatpush.msrb.mxu3 %v10041_v10  ;;  %3239 = vmatpush.msra.mxu1 %v10041_v10 }
 0x307   : > { %2705 = vmatpush.msrb.mxu3 %v10048_v0  ;;  %3240 = vmatpush.msra.mxu1 %v10048_v0 }
 0x309   : > { %2706 = vmatpush.msrb.mxu3 %v10054_v29  ;;  %3241 = vmatpush.msra.mxu1 %v10054_v29  ;;  %v10224_v15 = vpop.f32.mrf.mxu3 }
 0x30a   : > { %2633 = vmatmul.f32.gmra.mxu3 %v2554_v13  ;;  %2839 = vmatmul.f32.gmra.mxu1 %v7651_v9  ;;  %v7655_v13 = vld [vmem:[%s13156_s3 + $0x198] sm:$0xff]  ;;  %v7662_v9 = vld [vmem:[%s13156_s3 + $0x1d0] sm:$0xff] }
 0x30b   : > { %2707 = vmatpush.msrb.mxu3 %v10059_v58  ;;  %3242 = vmatpush.msra.mxu1 %v10059_v58 }
 0x30c   : > { %2899 = vmatmul.f32.gmra.mxu2 %v7662_v9 }
 0x30d   : > { %2708 = vmatpush.msrb.mxu3 %v10064_v59  ;;  %3243 = vmatpush.msra.mxu1 %v10064_v59 }
 0x30f   : > { %2709 = vmatpush.msrb.mxu3 %v10068_v25  ;;  %3244 = vmatpush.msra.mxu1 %v10068_v25 }
 0x311   : > { %2710 = vmatpush.msrb.mxu3 %v10072_v56  ;;  %3245 = vmatpush.msra.mxu1 %v10072_v56  ;;  %v10239_v39 = vpop.f32.mrf.mxu3 }
 0x312   : > { %2670 = vmatmul.f32.vlgmr.msra.gmra.mxu3 %v7620_v5  ;;  %3032 = vmatmul.f32.vlgmr.msrb.gmra.mxu1 %v7669_v2  ;;  %v7664_v5 = vld [vmem:[%s13156_s3 + $0x1e0] sm:$0xff]  ;;  %v7666_v2 = vld [vmem:[%s13156_s3 + $0x1f0] sm:$0xff] }
 0x313   : > { %2909 = vmatpush.msra.mxu3 %v9953_v62  ;;  %3444 = vmatpush.msrb.mxu1 %v9953_v62 }
 0x314   : > { %2902 = vmatmul.f32.gmra.mxu2 %v7664_v5 }
 0x315   : > { %2910 = vmatpush.msra.mxu3 %v9964_v1  ;;  %3445 = vmatpush.msrb.mxu1 %v9964_v1 }
 0x317   : > { %2911 = vmatpush.msra.mxu3 %v9976_v17  ;;  %3446 = vmatpush.msrb.mxu1 %v9976_v17 }
 0x319   : > { %2912 = vmatpush.msra.mxu3 %v9988_v31  ;;  %3447 = vmatpush.msrb.mxu1 %v9988_v31  ;;  %v10250_v57 = vpop.f32.mrf.mxu3 }
 0x31a   : > { %2673 = vmatmul.f32.gmra.mxu3 %v7622_v12  ;;  %3035 = vmatmul.f32.gmra.mxu1 %v7671_v22  ;;  %v7684_v12 = vld [vmem:[%s13156_s3 + $0x280] sm:$0xff] }
 0x31b   : > { %2913 = vmatpush.msra.mxu3 %v9998_v20  ;;  %3448 = vmatpush.msrb.mxu1 %v9998_v20  ;;  %v7704_v22 = vld [vmem:[%s13156_s3 + $0x320] sm:$0xff] }
 0x31c   : > { %2905 = vmatmul.f32.gmra.mxu2 %v7666_v2  ;;  %v7689_v2 = vld [vmem:[%s13156_s3 + $0x2a8] sm:$0xff] }
 0x31d   : > { %2914 = vmatpush.msra.mxu3 %v10008_v48  ;;  %3449 = vmatpush.msrb.mxu1 %v10008_v48 }
 0x31f   : > { %2915 = vmatpush.msra.mxu3 %v10017_v28  ;;  %3450 = vmatpush.msrb.mxu1 %v10017_v28 }
 0x321   : > { %2916 = vmatpush.msra.mxu3 %v10026_v47  ;;  %3451 = vmatpush.msrb.mxu1 %v10026_v47  ;;  %v10258_v8 = vpop.f32.mrf.mxu3 }
 0x322   : > { %2676 = vmatmul.f32.gmra.mxu3 %v7624_v42  ;;  %3038 = vmatmul.f32.gmra.mxu1 %v7673_v41  ;;  %v7663_v42 = vld [vmem:[%s13156_s3 + $0x1d8] sm:$0xff] }
 0x323   : > { %2917 = vmatpush.msra.mxu3 %v10034_v37  ;;  %3452 = vmatpush.msrb.mxu1 %v10034_v37 }
 0x324   : > { %3098 = vmatmul.f32.vlgmr.msra.gmra.mxu2 %v7684_v12 }
 0x325   : > { %2918 = vmatpush.msra.mxu3 %v10041_v10  ;;  %3453 = vmatpush.msrb.mxu1 %v10041_v10 }
 0x327   : > { %2919 = vmatpush.msra.mxu3 %v10048_v0  ;;  %3454 = vmatpush.msrb.mxu1 %v10048_v0 }
 0x329   : > { %2920 = vmatpush.msra.mxu3 %v10054_v29  ;;  %3455 = vmatpush.msrb.mxu1 %v10054_v29  ;;  %v2593_v30 = vpop.f32.mrf.mxu3 }
 0x32a   : > { %2679 = vmatmul.f32.gmra.mxu3 %v7626_v16  ;;  %3041 = vmatmul.f32.gmra.mxu1 %v7675_v19  ;;  %v10429_v16 = vpop.f32.mrf.mxu0 }
 0x32b   : > { %2921 = vmatpush.msra.mxu3 %v10059_v58  ;;  %3456 = vmatpush.msrb.mxu1 %v10059_v58 }
 0x32d   : > { %2922 = vmatpush.msra.mxu3 %v10064_v59  ;;  %3457 = vmatpush.msrb.mxu1 %v10064_v59 }
 0x32f   : > { %2923 = vmatpush.msra.mxu3 %v10068_v25  ;;  %3458 = vmatpush.msrb.mxu1 %v10068_v25 }
 0x331   : > { %2924 = vmatpush.msra.mxu3 %v10072_v56  ;;  %3459 = vmatpush.msrb.mxu1 %v10072_v56 }
 0x332   : > { %2682 = vmatmul.f32.gmra.mxu3 %v7628_v32 }
 0x33a   : > { %2685 = vmatmul.f32.gmra.mxu3 %v7630_v21  ;;  %v7700_v21 = vld [vmem:[%s13156_s3 + $0x300] sm:$0xff] }
 0x342   : > { %2688 = vmatmul.f32.gmra.mxu3 %v7632_v60  ;;  %v7701_v60 = vld [vmem:[%s13156_s3 + $0x308] sm:$0xff] }
 0x34a   : > { %2691 = vmatmul.f32.gmra.mxu3 %v7634_v27 }
 0x34f   : > { %v10431_v32 = vpop.f32.mrf.mxu1 }
 0x352   : > { %2711 = vmatmul.f32.vlgmr.msrb.gmra.mxu3 %v7621_v49  ;;  %v10447_v49 = vpop.f32.mrf.mxu0 }
 0x353   : > { %3123 = vmatpush.msrb.mxu3 %v9953_v62 }
 0x355   : > { %v10267_v63 = vpop.f32.mrf.mxu3  ;;  %3124 = vmatpush.msrb.mxu3 %v9964_v1 }
 0x357   : > { %3125 = vmatpush.msrb.mxu3 %v9976_v17 }
 0x359   : > { %3126 = vmatpush.msrb.mxu3 %v9988_v31 }
 0x35a   : > { %2714 = vmatmul.f32.gmra.mxu3 %v7623_v53  ;;  %v10449_v53 = vpop.f32.mrf.mxu1 }
 0x35b   : > { %3127 = vmatpush.msrb.mxu3 %v9998_v20 }
 0x35d   : > { %v10276_v4 = vpop.f32.mrf.mxu3  ;;  %3128 = vmatpush.msrb.mxu3 %v10008_v48 }
 0x35f   : > { %3129 = vmatpush.msrb.mxu3 %v10017_v28 }
 0x361   : > { %3130 = vmatpush.msrb.mxu3 %v10026_v47 }
 0x362   : > { %2717 = vmatmul.f32.gmra.mxu3 %v7625_v43  ;;  %v7688_v43 = vld [vmem:[%s13156_s3 + $0x2a0] sm:$0xff]  ;;  %v10467_v40 = vpop.f32.mrf.mxu1 }
 0x363   : > { %3131 = vmatpush.msrb.mxu3 %v10034_v37 }
 0x365   : > { %v10285_v36 = vpop.f32.mrf.mxu3  ;;  %3132 = vmatpush.msrb.mxu3 %v10041_v10 }
 0x367   : > { %3133 = vmatpush.msrb.mxu3 %v10048_v0 }
 0x369   : > { %3134 = vmatpush.msrb.mxu3 %v10054_v29 }
 0x36a   : > { %2720 = vmatmul.f32.gmra.mxu3 %v7627_v33  ;;  %v7702_v33 = vld [vmem:[%s13156_s3 + $0x310] sm:$0xff] }
 0x36b   : > { %3135 = vmatpush.msrb.mxu3 %v10059_v58 }
 0x36d   : > { %v10294_v54 = vpop.f32.mrf.mxu3  ;;  %3136 = vmatpush.msrb.mxu3 %v10064_v59 }
 0x36f   : > { %3137 = vmatpush.msrb.mxu3 %v10068_v25 }
 0x371   : > { %3138 = vmatpush.msrb.mxu3 %v10072_v56 }
 0x372   : > { %2723 = vmatmul.f32.gmra.mxu3 %v7629_v52  ;;  %v7703_v52 = vld [vmem:[%s13156_s3 + $0x318] sm:$0xff] }
 0x375   : > { %v10302_v14 = vpop.f32.mrf.mxu3 }
 0x37a   : > { %2726 = vmatmul.f32.gmra.mxu3 %v7631_v35 }
 0x37d   : > { %v10310_v26 = vpop.f32.mrf.mxu3 }
 0x382   : > { %2729 = vmatmul.f32.gmra.mxu3 %v7633_v44  ;;  %v10465_v44 = vpop.f32.mrf.mxu0 }
 0x385   : > { %v10324_v50 = vpop.f32.mrf.mxu3 }
 0x38a   : > { %2732 = vmatmul.f32.gmra.mxu3 %v7635_v61  ;;  %v7705_v61 = vld [vmem:[%s13156_s3 + $0x328] sm:$0xff]  ;;  %v10483_v41 = vpop.f32.mrf.mxu0 }
 0x38d   : > { %v2634_v6 = vpop.f32.mrf.mxu3 }
 0x38e   : > { %v10338_v24 = vadd.f32 %v2634_v6, %v2593_v30  ;;  %v7665_v30 = vld [vmem:[%s13156_s3 + $0x1e8] sm:$0xff]  ;;  %v10485_v6 = vpop.f32.mrf.mxu1 }
 0x392   : > { %2925 = vmatmul.f32.vlgmr.msra.gmra.mxu3 %v7653_v7  ;;  %v7692_v7 = vld [vmem:[%s13156_s3 + $0x2c0] sm:$0xff] }
 0x393   : > { %3337 = vmatpush.msra.mxu3 %v9953_v62  ;;  %v7676_v62 = vld [vmem:[%s13156_s3 + $0x240] sm:$0xff] }
 0x394   : > { %3003 = vmatmul.f32.gmra.mxu0 %v7676_v62  ;;  %v7687_v62 = vld [vmem:[%s13156_s3 + $0x298] sm:$0xff] }
 0x395   : > { %3338 = vmatpush.msra.mxu3 %v9964_v1  ;;  %v10354_v51 = vpop.f32.mrf.mxu3  ;;  %v7677_v1 = vld [vmem:[%s13156_s3 + $0x248] sm:$0xff] }
 0x396   : > { %3044 = vmatmul.f32.gmra.mxu1 %v7677_v1  ;;  %v10510_v5 = vpop.f32.mrf.mxu1 }
 0x397   : > { %3339 = vmatpush.msra.mxu3 %v9976_v17 }
 0x399   : > { %3340 = vmatpush.msra.mxu3 %v9988_v31  ;;  %v7657_v31 = vld [vmem:[%s13156_s3 + $0x1a8] sm:$0xff] }
 0x39a   : > { %2928 = vmatmul.f32.gmra.mxu3 %v7655_v13  ;;  %v10498_v13 = vadd.f32 %v10267_v63, %v10172_v55  ;;  %v7694_v55 = vld [vmem:[%s13156_s3 + $0x2d0] sm:$0xff]  ;;  %v7708_v63 = vld [vmem:[%s13156_s3 + $0x340] sm:$0xff] }
 0x39b   : > { %3341 = vmatpush.msra.mxu3 %v9998_v20  ;;  %v7678_v20 = vld [vmem:[%s13156_s3 + $0x250] sm:$0xff] }
 0x39c   : > { %3006 = vmatmul.f32.gmra.mxu0 %v7678_v20 }
 0x39d   : > { %3342 = vmatpush.msra.mxu3 %v10008_v48  ;;  %v10372_v17 = vpop.f32.mrf.mxu3  ;;  %v7679_v48 = vld [vmem:[%s13156_s3 + $0x258] sm:$0xff] }
 0x39e   : > { %3047 = vmatmul.f32.gmra.mxu1 %v7679_v48  ;;  %v10523_v48 = vadd.f32 %v10276_v4, %v10190_v34  ;;  %v7696_v34 = vld [vmem:[%s13156_s3 + $0x2e0] sm:$0xff]  ;;  %v7710_v4 = vld [vmem:[%s13156_s3 + $0x350] sm:$0xff] }
 0x39f   : > { %3343 = vmatpush.msra.mxu3 %v10017_v28 }
 0x3a1   : > { %3344 = vmatpush.msra.mxu3 %v10026_v47  ;;  %v7659_v47 = vld [vmem:[%s13156_s3 + $0x1b8] sm:$0xff] }
 0x3a2   : > { %2931 = vmatmul.f32.gmra.mxu3 %v7657_v31  ;;  %v10508_v31 = vpop.f32.mrf.mxu0 }
 0x3a3   : > { %3345 = vmatpush.msra.mxu3 %v10034_v37  ;;  %v7680_v37 = vld [vmem:[%s13156_s3 + $0x260] sm:$0xff] }
 0x3a4   : > { %3009 = vmatmul.f32.gmra.mxu0 %v7680_v37 }
 0x3a5   : > { %3346 = vmatpush.msra.mxu3 %v10041_v10  ;;  %v10390_v28 = vpop.f32.mrf.mxu3  ;;  %v7681_v10 = vld [vmem:[%s13156_s3 + $0x268] sm:$0xff] }
 0x3a6   : > { %3050 = vmatmul.f32.gmra.mxu1 %v7681_v10 }
 0x3a7   : > { %3347 = vmatpush.msra.mxu3 %v10048_v0 }
 0x3a9   : > { %3348 = vmatpush.msra.mxu3 %v10054_v29  ;;  %v7661_v29 = vld [vmem:[%s13156_s3 + $0x1c8] sm:$0xff] }
 0x3aa   : > { %2934 = vmatmul.f32.gmra.mxu3 %v7659_v47  ;;  %v10533_v10 = vpop.f32.mrf.mxu0 }
 0x3ab   : > { %3349 = vmatpush.msra.mxu3 %v10059_v58  ;;  %v7682_v58 = vld [vmem:[%s13156_s3 + $0x270] sm:$0xff] }
 0x3ac   : > { %3012 = vmatmul.f32.gmra.mxu0 %v7682_v58  ;;  %v10548_v58 = vadd.f32 %v10285_v36, %v10209_v3  ;;  %v7698_v3 = vld [vmem:[%s13156_s3 + $0x2f0] sm:$0xff]  ;;  %v7712_v36 = vld [vmem:[%s13156_s3 + $0x360] sm:$0xff] }
 0x3ad   : > { %3350 = vmatpush.msra.mxu3 %v10064_v59  ;;  %v10408_v0 = vpop.f32.mrf.mxu3  ;;  %v7683_v59 = vld [vmem:[%s13156_s3 + $0x278] sm:$0xff] }
 0x3ae   : > { %3053 = vmatmul.f32.gmra.mxu1 %v7683_v59 }
 0x3af   : > { %3351 = vmatpush.msra.mxu3 %v10068_v25 }
 0x3b1   : > { %3352 = vmatpush.msra.mxu3 %v10072_v56  ;;  %v7686_v56 = vld [vmem:[%s13156_s3 + $0x290] sm:$0xff] }
 0x3b2   : > { %2937 = vmatmul.f32.gmra.mxu3 %v7661_v29  ;;  %3101 = vmatmul.f32.gmra.mxu2 %v7686_v56  ;;  %v10535_v29 = vpop.f32.mrf.mxu1 }
 0x3b4   : > { %3205 = vmatmul.f32.vlgmr.msra.gmra.mxu0 %v7700_v21  ;;  %v10558_v21 = vpop.f32.mrf.mxu0 }
 0x3b5   : > { %v10424_v25 = vpop.f32.mrf.mxu3 }
 0x3b6   : > { %3246 = vmatmul.f32.vlgmr.msra.gmra.mxu1 %v7701_v60 }
 0x3ba   : > { %2940 = vmatmul.f32.gmra.mxu3 %v7663_v42  ;;  %3104 = vmatmul.f32.gmra.mxu2 %v7688_v43  ;;  %v7691_v42 = vld [vmem:[%s13156_s3 + $0x2b8] sm:$0xff]  ;;  %v10560_v60 = vpop.f32.mrf.mxu1  ;;  %v10573_v43 = vadd.f32 %v10294_v54, %v10224_v15  ;;  %v7714_v15 = vld [vmem:[%s13156_s3 + $0x370] sm:$0xff] }
 0x3bb   : > { %v7715_v54 = vld [vmem:[%s13156_s3 + $0x378] sm:$0xff] }
 0x3bc   : > { %3208 = vmatmul.f32.gmra.mxu0 %v7702_v33 }
 0x3bd   : > { %v10442_v27 = vpop.f32.mrf.mxu3 }
 0x3be   : > { %3249 = vmatmul.f32.gmra.mxu1 %v7703_v52  ;;  %v7693_v52 = vld [vmem:[%s13156_s3 + $0x2c8] sm:$0xff] }
 0x3c2   : > { %2943 = vmatmul.f32.gmra.mxu3 %v7665_v30  ;;  %3107 = vmatmul.f32.gmra.mxu2 %v7690_v11  ;;  %v10583_v11 = vpop.f32.mrf.mxu0 }
 0x3c4   : > { %3211 = vmatmul.f32.gmra.mxu0 %v7704_v22  ;;  %v10585_v22 = vpop.f32.mrf.mxu1 }
 0x3c5   : > { %v10460_v35 = vpop.f32.mrf.mxu3 }
 0x3c6   : > { %3252 = vmatmul.f32.gmra.mxu1 %v7705_v61  ;;  %v10596_v61 = vpop.f32.mrf.mxu2 }
 0x3ca   : > { %2946 = vmatmul.f32.gmra.mxu3 %v7667_v38  ;;  %3110 = vmatmul.f32.gmra.mxu2 %v7692_v7  ;;  %v10600_v7 = vadd.f32 %v10302_v14, %v10239_v39  ;;  %v7718_v39 = vld [vmem:[%s13156_s3 + $0x390] sm:$0xff]  ;;  %v7732_v14 = vld [vmem:[%s13156_s3 + $0x400] sm:$0xff] }
 0x3cc   : > { %3214 = vmatmul.f32.gmra.mxu0 %v7706_v23 }
 0x3cd   : > { %v10478_v18 = vpop.f32.mrf.mxu3 }
 0x3ce   : > { %3255 = vmatmul.f32.gmra.mxu1 %v7707_v46  ;;  %v7695_v46 = vld [vmem:[%s13156_s3 + $0x2d8] sm:$0xff] }
 0x3d2   : > { %3139 = vmatmul.f32.vlgmr.msrb.gmra.mxu3 %v7685_v45  ;;  %3113 = vmatmul.f32.gmra.mxu2 %v7694_v55  ;;  %v10612_v55 = vpop.f32.mrf.mxu1 }
 0x3d4   : > { %3217 = vmatmul.f32.gmra.mxu0 %v7708_v63 }
 0x3d5   : > { %v2712_v19 = vpop.f32.mrf.mxu3 }
 0x3d6   : > { %v10501_v9 = vadd.f32 %v2712_v19, %v10354_v51  ;;  %v7709_v51 = vld [vmem:[%s13156_s3 + $0x348] sm:$0xff] }
 0x3d7   : > { %3258 = vmatmul.f32.gmra.mxu1 %v7709_v51  ;;  %v10623_v51 = vpop.f32.mrf.mxu2 }
 0x3da   : > { %3142 = vmatmul.f32.gmra.mxu3 %v7687_v62  ;;  %3116 = vmatmul.f32.gmra.mxu2 %v7696_v34  ;;  %v10610_v62 = vpop.f32.mrf.mxu0  ;;  %v7697_v34 = vld [vmem:[%s13156_s3 + $0x2e8] sm:$0xff] }
 0x3dc   : > { %3220 = vmatmul.f32.gmra.mxu0 %v7710_v4 }
 0x3dd   : > { %v2715_v20 = vpop.f32.mrf.mxu3 }
 0x3de   : > { %v10526_v47 = vadd.f32 %v2715_v20, %v10372_v17  ;;  %v7711_v17 = vld [vmem:[%s13156_s3 + $0x358] sm:$0xff]  ;;  %v10627_v20 = vadd.f32 %v10310_v26, %v10250_v57  ;;  %v7720_v57 = vld [vmem:[%s13156_s3 + $0x3a0] sm:$0xff]  ;;  %v7734_v26 = vld [vmem:[%s13156_s3 + $0x410] sm:$0xff] }
 0x3df   : > { %3261 = vmatmul.f32.gmra.mxu1 %v7711_v17 }
 0x3e2   : > { %3145 = vmatmul.f32.gmra.mxu3 %v7689_v2  ;;  %3119 = vmatmul.f32.gmra.mxu2 %v7698_v3  ;;  %v10637_v17 = vpop.f32.mrf.mxu0  ;;  %v10650_v3 = vpop.f32.mrf.mxu2 }
 0x3e3   : > { %13248 = vst [vmem:[#allocation79_spill] sm:$0xff] %v10637_v17 }
 0x3e4   : > { %3223 = vmatmul.f32.gmra.mxu0 %v7712_v36  ;;  %v10654_v36 = vadd.f32 %v10324_v50, %v10258_v8  ;;  %v7722_v8 = vld [vmem:[%s13156_s3 + $0x3b0] sm:$0xff]  ;;  %v7736_v50 = vld [vmem:[%s13156_s3 + $0x420] sm:$0xff] }
 0x3e5   : > { %v2718_v12 = vpop.f32.mrf.mxu3 }
 0x3e6   : > { %v10551_v59 = vadd.f32 %v2718_v12, %v10390_v28  ;;  %v7713_v28 = vld [vmem:[%s13156_s3 + $0x368] sm:$0xff]  ;;  %v10639_v12 = vpop.f32.mrf.mxu1 }
 0x3e7   : > { %3264 = vmatmul.f32.gmra.mxu1 %v7713_v28  ;;  %13249 = vst [vmem:[#allocation80_spill] sm:$0xff] %v10639_v12 }
 0x3ea   : > { %3148 = vmatmul.f32.gmra.mxu3 %v7691_v42 }
 0x3ec   : > { %3226 = vmatmul.f32.gmra.mxu0 %v7714_v15  ;;  %v10664_v15 = vpop.f32.mrf.mxu0 }
 0x3ed   : > { %v2721_v30 = vpop.f32.mrf.mxu3  ;;  %13250 = vst [vmem:[#allocation76_spill] sm:$0xff] %v10664_v15 }
 0x3ee   : > { %v10576_v33 = vadd.f32 %v2721_v30, %v10408_v0  ;;  %v7716_v0 = vld [vmem:[%s13156_s3 + $0x380] sm:$0xff]  ;;  %v7699_v30 = vld [vmem:[%s13156_s3 + $0x2f8] sm:$0xff] }
 0x3ef   : > { %3312 = vmatmul.f32.vlgmr.msrb.gmra.mxu2 %v7716_v0  ;;  %3267 = vmatmul.f32.gmra.mxu1 %v7715_v54  ;;  %v10666_v54 = vpop.f32.mrf.mxu1 }
 0x3f0   : > { %13251 = vst [vmem:[#allocation77_spill] sm:$0xff] %v10666_v54 }
 0x3f2   : > { %3151 = vmatmul.f32.gmra.mxu3 %v7693_v52 }
 0x3f4   : > { %3419 = vmatmul.f32.vlgmr.msrb.gmra.mxu0 %v7732_v14 }
 0x3f5   : > { %v2724_v45 = vpop.f32.mrf.mxu3 }
 0x3f6   : > { %v10603_v23 = vadd.f32 %v2724_v45, %v10424_v25  ;;  %v7733_v25 = vld [vmem:[%s13156_s3 + $0x408] sm:$0xff]  ;;  %v10677_v45 = vpop.f32.mrf.mxu2 }
 0x3f7   : > { %3315 = vmatmul.f32.gmra.mxu2 %v7718_v39  ;;  %3460 = vmatmul.f32.vlgmr.msrb.gmra.mxu1 %v7733_v25  ;;  %v7717_v39 = vld [vmem:[%s13156_s3 + $0x388] sm:$0xff]  ;;  %v10687_v25 = vpop.f32.mrf.mxu0 }
 0x3f8   : > { %13252 = vst [vmem:[#allocation73_spill] sm:$0xff] %v10687_v25 }
 0x3fa   : > { %3154 = vmatmul.f32.gmra.mxu3 %v7695_v46 }
 0x3fc   : > { %3422 = vmatmul.f32.gmra.mxu0 %v7734_v26 }
 0x3fd   : > { %v2727_v63 = vpop.f32.mrf.mxu3 }
 0x3fe   : > { %v10630_v2 = vadd.f32 %v2727_v63, %v10442_v27  ;;  %v7735_v27 = vld [vmem:[%s13156_s3 + $0x418] sm:$0xff]  ;;  %v10689_v63 = vpop.f32.mrf.mxu1 }
 0x3ff   : > { %3318 = vmatmul.f32.gmra.mxu2 %v7720_v57  ;;  %3463 = vmatmul.f32.gmra.mxu1 %v7735_v27  ;;  %13253 = vst [vmem:[#allocation74_spill] sm:$0xff] %v10689_v63  ;;  %v7739_v57 = vld [vmem:[%s13156_s3 + $0x438] sm:$0xff]  ;;  %v10702_v27 = vpop.f32.mrf.mxu2 }
 0x402   : > { %3157 = vmatmul.f32.gmra.mxu3 %v7697_v34  ;;  %v7724_v34 = vld [vmem:[%s13156_s3 + $0x3c0] sm:$0xff] }
 0x404   : > { %3425 = vmatmul.f32.gmra.mxu0 %v7736_v50  ;;  %v7726_v50 = vld [vmem:[%s13156_s3 + $0x3d0] sm:$0xff] }
 0x405   : > { %v2730_v42 = vpop.f32.mrf.mxu3 }
 0x406   : > { %v10657_v28 = vadd.f32 %v2730_v42, %v10460_v35  ;;  %v7737_v35 = vld [vmem:[%s13156_s3 + $0x428] sm:$0xff]  ;;  %v7719_v42 = vld [vmem:[%s13156_s3 + $0x398] sm:$0xff] }
 0x407   : > { %3321 = vmatmul.f32.gmra.mxu2 %v7722_v8  ;;  %3466 = vmatmul.f32.gmra.mxu1 %v7737_v35  ;;  %v7740_v35 = vld [vmem:[%s13156_s3 + $0x440] sm:$0xff] }
 0x40a   : > { %3160 = vmatmul.f32.gmra.mxu3 %v7699_v30 }
 0x40d   : > { %v2733_v0 = vpop.f32.mrf.mxu3 }
 0x40e   : > { %v10680_v46 = vadd.f32 %v2733_v0, %v10478_v18  ;;  %v7738_v18 = vld [vmem:[%s13156_s3 + $0x430] sm:$0xff]  ;;  %v7741_v0 = vld [vmem:[%s13156_s3 + $0x448] sm:$0xff] }
 0x40f   : > { %3324 = vmatmul.f32.gmra.mxu2 %v7724_v34  ;;  %3428 = vmatmul.f32.gmra.mxu0 %v7738_v18  ;;  %v10722_v34 = vpop.f32.mrf.mxu2  ;;  %v7721_v18 = vld [vmem:[%s13156_s3 + $0x3a8] sm:$0xff] }
 0x410   : > { %3469 = vmatmul.f32.gmra.mxu1 %v7739_v57 }
 0x411   : > { %v10707_v30 = vpop.f32.mrf.mxu0 }
 0x412   : > { %3353 = vmatmul.f32.vlgmr.msra.gmra.mxu3 %v7717_v39  ;;  %13254 = vst [vmem:[#allocation82_spill] sm:$0xff] %v10707_v30  ;;  %v7727_v30 = vld [vmem:[%s13156_s3 + $0x3d8] sm:$0xff] }
 0x413   : > { %v10709_v8 = vpop.f32.mrf.mxu1 }
 0x414   : > { %13255 = vst [vmem:[#allocation70_spill] sm:$0xff] %v10709_v8 }
 0x415   : > { %v10700_v26 = vpop.f32.mrf.mxu3 }
 0x417   : > { %3327 = vmatmul.f32.gmra.mxu2 %v7726_v50  ;;  %3431 = vmatmul.f32.gmra.mxu0 %v7740_v35  ;;  %v7728_v50 = vld [vmem:[%s13156_s3 + $0x3e0] sm:$0xff]  ;;  %v7742_v35 = vld [vmem:[%s13156_s3 + $0x450] sm:$0xff]  ;;  %v10742_v4 = vpop.f32.mrf.mxu2 }
 0x418   : > { %3472 = vmatmul.f32.gmra.mxu1 %v7741_v0  ;;  %v7743_v0 = vld [vmem:[%s13156_s3 + $0x458] sm:$0xff] }
 0x419   : > { %v10727_v57 = vpop.f32.mrf.mxu0 }
 0x41a   : > { %3356 = vmatmul.f32.gmra.mxu3 %v7719_v42  ;;  %13256 = vst [vmem:[#allocation71_spill] sm:$0xff] %v10727_v57 }
 0x41b   : > { %v10729_v42 = vpop.f32.mrf.mxu1 }
 0x41c   : > { %13257 = vst [vmem:[#allocation81_spill] sm:$0xff] %v10729_v42 }
 0x41d   : > { %v10720_v39 = vpop.f32.mrf.mxu3 }
 0x41f   : > { %3330 = vmatmul.f32.gmra.mxu2 %v7728_v50  ;;  %3434 = vmatmul.f32.gmra.mxu0 %v7742_v35  ;;  %v7730_v50 = vld [vmem:[%s13156_s3 + $0x3f0] sm:$0xff]  ;;  %v7744_v35 = vld [vmem:[%s13156_s3 + $0x460] sm:$0xff]  ;;  %v10762_v56 = vpop.f32.mrf.mxu2 }
 0x420   : > { %3475 = vmatmul.f32.gmra.mxu1 %v7743_v0  ;;  %v7745_v0 = vld [vmem:[%s13156_s3 + $0x468] sm:$0xff] }
 0x421   : > { %v10747_v19 = vpop.f32.mrf.mxu0 }
 0x422   : > { %3359 = vmatmul.f32.gmra.mxu3 %v7721_v18  ;;  %v7723_v18 = vld [vmem:[%s13156_s3 + $0x3b8] sm:$0xff] }
 0x423   : > { %v10749_v52 = vpop.f32.mrf.mxu1 }
 0x425   : > { %v10740_v14 = vpop.f32.mrf.mxu3 }
 0x427   : > { %3333 = vmatmul.f32.gmra.mxu2 %v7730_v50  ;;  %3437 = vmatmul.f32.gmra.mxu0 %v7744_v35  ;;  %v7746_v50 = vld [vmem:[%s13156_s3 + $0x470] sm:$0xff]  ;;  %v7747_v35 = vld [vmem:[%s13156_s3 + $0x478] sm:$0xff]  ;;  %v10779_v8 = vpop.f32.mrf.mxu2 }
 0x428   : > { %3478 = vmatmul.f32.gmra.mxu1 %v7745_v0  ;;  %13259 = vst [vmem:[#allocation68_spill] sm:$0xff] %v10779_v8 }
 0x429   : > { %v10767_v37 = vpop.f32.mrf.mxu0 }
 0x42a   : > { %3362 = vmatmul.f32.gmra.mxu3 %v7723_v18  ;;  %v7725_v18 = vld [vmem:[%s13156_s3 + $0x3c8] sm:$0xff] }
 0x42b   : > { %v10769_v1 = vpop.f32.mrf.mxu1 }
 0x42c   : > { %13258 = vst [vmem:[#allocation67_spill] sm:$0xff] %v10769_v1 }
 0x42d   : > { %v10760_v38 = vpop.f32.mrf.mxu3 }
 0x42f   : > { %3440 = vmatmul.f32.gmra.mxu0 %v7746_v50  ;;  %v7729_v50 = vld [vmem:[%s13156_s3 + $0x3e8] sm:$0xff] }
 0x430   : > { %3481 = vmatmul.f32.gmra.mxu1 %v7747_v35 }
 0x431   : > { %v10784_v63 = vpop.f32.mrf.mxu0 }
 0x432   : > { %3365 = vmatmul.f32.gmra.mxu3 %v7725_v18  ;;  %13260 = vst [vmem:[#allocation78_spill] sm:$0xff] %v10784_v63 }
 0x433   : > { %v10786_v18 = vpop.f32.mrf.mxu1 }
 0x434   : > { %13261 = vst [vmem:[#allocation64_spill] sm:$0xff] %v10786_v18  ;;  %v7731_v18 = vld [vmem:[%s13156_s3 + $0x3f8] sm:$0xff] }
 0x435   : > { %v10777_v0 = vpop.f32.mrf.mxu3  ;;  %v10790_v54 = vpop.f32.mrf.mxu2 }
 0x436   : > { %13262 = vst [vmem:[#allocation65_spill] sm:$0xff] %v10790_v54 }
 0x439   : > { %v10795_v35 = vpop.f32.mrf.mxu0 }
 0x43a   : > { %3368 = vmatmul.f32.gmra.mxu3 %v7727_v30  ;;  %13263 = vst [vmem:[#allocation75_spill] sm:$0xff] %v10795_v35 }
 0x43b   : > { %v10797_v8 = vpop.f32.mrf.mxu1 }
 0x43c   : > { %13264 = vst [vmem:[#allocation83_spill] sm:$0xff] %v10797_v8 }
 0x43d   : > { %v10788_v25 = vpop.f32.mrf.mxu3  ;;  %v10804_v30 = vpop.f32.mrf.mxu2 }
 0x43e   : > { %13265 = vst [vmem:[#allocation61_spill] sm:$0xff] %v10804_v30 }
 0x441   : > { %v10806_v63 = vpop.f32.mrf.mxu0 }
 0x442   : > { %3371 = vmatmul.f32.gmra.mxu3 %v7729_v50  ;;  %13266 = vst [vmem:[#allocation62_spill] sm:$0xff] %v10806_v63 }
 0x443   : > { %v10808_v54 = vpop.f32.mrf.mxu1 }
 0x444   : > { %13267 = vst [vmem:[#allocation72_spill] sm:$0xff] %v10808_v54 }
 0x445   : > { %v10799_v15 = vpop.f32.mrf.mxu3  ;;  %v10812_v57 = vpop.f32.mrf.mxu2 }
 0x446   : > { %13268 = vst [vmem:[#allocation58_spill] sm:$0xff] %v10812_v57 }
 0x449   : > { %v10814_v35 = vpop.f32.mrf.mxu0 }
 0x44a   : > { %3374 = vmatmul.f32.gmra.mxu3 %v7731_v18  ;;  %13269 = vst [vmem:[#allocation59_spill] sm:$0xff] %v10814_v35 }
 0x44b   : > { %v10816_v50 = vpop.f32.mrf.mxu1 }
 0x44c   : > { %13270 = vst [vmem:[#allocation69_spill] sm:$0xff] %v10816_v50 }
 0x44d   : > { %v10810_v42 = vpop.f32.mrf.mxu3  ;;  %v10820_v12 = vpop.f32.mrf.mxu2 }
 0x44e   : > { %13272 = vst [vmem:[#allocation56_spill] sm:$0xff] %v10820_v12 }
 0x451   : > { %v10822_v17 = vpop.f32.mrf.mxu0 }
 0x452   : > { %13273 = vst [vmem:[#allocation66_spill] sm:$0xff] %v10822_v17 }
 0x454   : > { %v10826_v63 = vpop.f32.mrf.mxu1 }
 0x455   : > { %v10818_v8 = vpop.f32.mrf.mxu3  ;;  %13275 = vst [vmem:[#allocation53_spill] sm:$0xff] %v10826_v63  ;;  %v10830_v18 = vpop.f32.mrf.mxu2 }
 0x456   : > { %13271 = vst [vmem:[#allocation55_spill] sm:$0xff] %v10818_v8 }
 0x457   : > { %13277 = vst [vmem:[#allocation49_spill] sm:$0xff] %v10830_v18 }
 0x459   : > { %v10832_v1 = vpop.f32.mrf.mxu0 }
 0x45a   : > { %13278 = vst [vmem:[#allocation50_spill] sm:$0xff] %v10832_v1 }
 0x45c   : > { %v10834_v57 = vpop.f32.mrf.mxu1 }
 0x45d   : > { %v10824_v30 = vpop.f32.mrf.mxu3  ;;  %13279 = vst [vmem:[#allocation60_spill] sm:$0xff] %v10834_v57  ;;  %v10838_v50 = vpop.f32.mrf.mxu2 }
 0x45e   : > { %13274 = vst [vmem:[#allocation52_spill] sm:$0xff] %v10824_v30 }
 0x45f   : > { %13281 = vst [vmem:[#allocation47_spill] sm:$0xff] %v10838_v50 }
 0x461   : > { %v10840_v8 = vpop.f32.mrf.mxu0 }
 0x462   : > { %13282 = vst [vmem:[#allocation57_spill] sm:$0xff] %v10840_v8 }
 0x464   : > { %v10842_v12 = vpop.f32.mrf.mxu1 }
 0x465   : > { %v10828_v54 = vpop.f32.mrf.mxu3  ;;  %13283 = vst [vmem:[#allocation43_spill] sm:$0xff] %v10842_v12  ;;  %v10846_v30 = vpop.f32.mrf.mxu2 }
 0x466   : > { %13276 = vst [vmem:[#allocation63_spill] sm:$0xff] %v10828_v54 }
 0x467   : > { %13285 = vst [vmem:[#allocation54_spill] sm:$0xff] %v10846_v30 }
 0x469   : > { %v10848_v63 = vpop.f32.mrf.mxu0 }
 0x46a   : > { %13286 = vst [vmem:[#allocation40_spill] sm:$0xff] %v10848_v63 }
 0x46c   : > { %v10850_v54 = vpop.f32.mrf.mxu1 }
 0x46d   : > { %v10836_v35 = vpop.f32.mrf.mxu3  ;;  %13287 = vst [vmem:[#allocation41_spill] sm:$0xff] %v10850_v54 }
 0x46e   : > { %13280 = vst [vmem:[#allocation46_spill] sm:$0xff] %v10836_v35 }
 0x471   : > { %v10856_v57 = vpop.f32.mrf.mxu0 }
 0x472   : > { %v10854_v1 = vpop.f32.mrf.mxu2  ;;  %13290 = vst [vmem:[#allocation38_spill] sm:$0xff] %v10856_v57 }
 0x473   : > { %13289 = vst [vmem:[#allocation93_spill] sm:$0xff] %v10854_v1 }
 0x474   : > { %v10860_v50 = vpop.f32.mrf.mxu1 }
 0x475   : > { %v10844_v17 = vpop.f32.mrf.mxu3  ;;  %13292 = vst [vmem:[#allocation48_spill] sm:$0xff] %v10860_v50 }
 0x476   : > { %13284 = vst [vmem:[#allocation44_spill] sm:$0xff] %v10844_v17 }
 0x479   : > { %v10866_v17 = vpop.f32.mrf.mxu0 }
 0x47a   : > { %v10864_v12 = vpop.f32.mrf.mxu2  ;;  %13295 = vst [vmem:[#allocation88_spill] sm:$0xff] %v10866_v17 }
 0x47b   : > { %13294 = vst [vmem:[#allocation18_spill] sm:$0xff] %v10864_v12 }
 0x47c   : > { %v10868_v30 = vpop.f32.mrf.mxu1 }
 0x47d   : > { %v10852_v18 = vpop.f32.mrf.mxu3  ;;  %13296 = vst [vmem:[#allocation92_spill] sm:$0xff] %v10868_v30 }
 0x47e   : > { %13288 = vst [vmem:[#allocation51_spill] sm:$0xff] %v10852_v18 }
 0x481   : > { %v10874_v18 = vpop.f32.mrf.mxu0 }
 0x482   : > { %v10872_v54 = vpop.f32.mrf.mxu2  ;;  %13299 = vst [vmem:[#allocation29_spill] sm:$0xff] %v10874_v18  ;;  %v7772_v18 = vld [vmem:[%s12929_s5 + $0x10] sm:$0xff] }
 0x483   : > { %13298 = vst [vmem:[#allocation34_spill] sm:$0xff] %v10872_v54 }
 0x484   : > { %v10876_v1 = vpop.f32.mrf.mxu1 }
 0x485   : > { %v10858_v35 = vpop.f32.mrf.mxu3  ;;  %13300 = vst [vmem:[#allocation86_spill] sm:$0xff] %v10876_v1  ;;  %v7773_v1 = vld [vmem:[%s12929_s5 + $0x18] sm:$0xff] }
 0x486   : > { %13291 = vst [vmem:[#allocation39_spill] sm:$0xff] %v10858_v35  ;;  %3685 = vmatpush.msra.mxu0 %v7773_v1  ;;  %v2826_v1 = vadd.f32 %v10467_v40, %v10465_v44  ;;  %v13311_v40 = vmax.f32 %v10523_v48, %v10526_v47  ;;  %v3034_v48 = vadd.f32 %v10612_v55, %v10610_v62 }
 0x487   : > { %v2942_v47 = vadd.f32 %v10788_v25, %v10722_v34  ;;  %v2927_v62 = vadd.f32 %v10700_v26, %v10596_v61  ;;  %v2930_v55 = vadd.f32 %v10720_v39, %v10623_v51 }
 0x488   : > { %3686 = vmatpush.msra.mxu0 %v7772_v18  ;;  %v2829_v18 = vadd.f32 %v10485_v6, %v10483_v41  ;;  %v13312_v6 = vmax.f32 %v10548_v58, %v10551_v59 }
 0x48a   : > { %v10880_v35 = vpop.f32.mrf.mxu2 }
 0x48b   : > { %13302 = vst [vmem:[#allocation42_spill] sm:$0xff] %v10880_v35 }
 0x48c   : > { %v10882_v50 = vpop.f32.mrf.mxu0 }
 0x48d   : > { %v10862_v8 = vpop.f32.mrf.mxu3  ;;  %13303 = vst [vmem:[#allocation12_spill] sm:$0xff] %v10882_v50  ;;  %v13324_v26 = vld [vmem:[#allocation39_spill] sm:$0xff] }
 0x48e   : > { %13293 = vst [vmem:[#allocation27_spill] sm:$0xff] %v10862_v8  ;;  %v10884_v8 = vpop.f32.mrf.mxu1 }
 0x48f   : > { %13304 = vst [vmem:[#allocation25_spill] sm:$0xff] %v10884_v8 }
 0x492   : > { %v10888_v17 = vpop.f32.mrf.mxu2 }
 0x494   : > { %v10890_v30 = vpop.f32.mrf.mxu0 }
 0x495   : > { %v10870_v63 = vpop.f32.mrf.mxu3  ;;  %13306 = vst [vmem:[#allocation90_spill] sm:$0xff] %v10890_v30  ;;  %v2823_v30 = vadd.f32 %v10449_v53, %v10447_v49  ;;  %v2945_v49 = vadd.f32 %v10799_v15, %v10742_v4  ;;  %v13310_v53 = vmax.f32 %v10498_v13, %v10501_v9  ;;  %v13314_v13 = vmax.f32 %v10654_v36, %v10657_v28  ;;  %v13320_v28 = vld [vmem:[#allocation80_spill] sm:$0xff] }
 0x496   : > { %13297 = vst [vmem:[#allocation45_spill] sm:$0xff] %v10870_v63  ;;  %v10894_v54 = vpop.f32.mrf.mxu1  ;;  %v2939_v4 = vadd.f32 %v10777_v0, %v10702_v27 }
 0x497   : > { %13308 = vst [vmem:[#allocation30_spill] sm:$0xff] %v10894_v54  ;;  %v2820_v54 = vadd.f32 %v10431_v32, %v10429_v16  ;;  %v2835_v16 = vadd.f32 %v10535_v29, %v10533_v10  ;;  %v2841_v32 = vadd.f32 %v10585_v22, %v10583_v11  ;;  %v2844_v41 = vmax.f32 %v13311_v40, %v2823_v30 }
 0x498   : > { %v13313_v29 = vmax.f32 %v10573_v43, %v10576_v33  ;;  %v13316_v43 = vmax.f32 %v10627_v20, %v10630_v2  ;;  %v13317_v11 = vmax.f32 %v10338_v24, %v10680_v46  ;;  %v2936_v24 = vadd.f32 %v10760_v38, %v10677_v45  ;;  %v13318_v2 = vld [vmem:[#allocation67_spill] sm:$0xff]  ;;  %v13322_v46 = vld [vmem:[#allocation81_spill] sm:$0xff]  ;;  %v13328_v45 = vld [vmem:[#allocation74_spill] sm:$0xff] }
 0x499   : > { %v2843_v44 = vmax.f32 %v13310_v53, %v2820_v54  ;;  %v3055_v61 = vadd.f32 %v13318_v2, %v10767_v37  ;;  %v13321_v54 = vld [vmem:[#allocation71_spill] sm:$0xff]  ;;  %v13327_v38 = vld [vmem:[#allocation73_spill] sm:$0xff] }
 0x49a   : > { %v10904_v8 = vpop.f32.mrf.mxu2  ;;  %v2848_v33 = vmax.f32 %v13316_v43, %v2835_v16  ;;  %v2850_v22 = vmax.f32 %v13317_v11, %v2841_v32  ;;  %v3049_v25 = vadd.f32 %v13322_v46, %v13321_v54  ;;  %v3043_v34 = vadd.f32 %v13328_v45, %v13327_v38  ;;  %v13330_v37 = vld [vmem:[#allocation27_spill] sm:$0xff] }
 0x49b   : > { %v2950_v27 = vmax.f32 %v2843_v44, %v2927_v62  ;;  %v13334_v53 = vld [vmem:[#allocation51_spill] sm:$0xff] }
 0x49c   : > { %v10906_v50 = vpop.f32.mrf.mxu0  ;;  %v2955_v15 = vmax.f32 %v2848_v33, %v2942_v47  ;;  %v13336_v47 = vld [vmem:[#allocation44_spill] sm:$0xff]  ;;  %v13337_v33 = vld [vmem:[#allocation57_spill] sm:$0xff]  ;;  %v13338_v11 = vld [vmem:[#allocation43_spill] sm:$0xff] }
 0x49d   : > { %v10878_v57 = vpop.f32.mrf.mxu3 }
 0x49e   : > { %13301 = vst [vmem:[#allocation91_spill] sm:$0xff] %v10878_v57 }
 0x4a2   : > { %v3331_v10 = vpop.f32.mrf.mxu2 }
 0x4a4   : > { %v10951_v58 = vpop.f32.mrf.mxu0 }
 0x4a5   : > { %v10886_v12 = vpop.f32.mrf.mxu3 }
 0x4a6   : > { %13305 = vst [vmem:[#allocation84_spill] sm:$0xff] %v10886_v12  ;;  %v10908_v12 = vpop.f32.mrf.mxu1 }
 0x4a7   : > { %13309 = vst [vmem:[#allocation13_spill] sm:$0xff] %v10908_v12  ;;  %v2832_v12 = vadd.f32 %v10510_v5, %v10508_v31  ;;  %v2845_v31 = vmax.f32 %v13312_v6, %v2826_v1  ;;  %v2948_v5 = vadd.f32 %v10810_v42, %v10762_v56  ;;  %v13315_v56 = vmax.f32 %v10600_v7, %v10603_v23  ;;  %v13329_v42 = vld [vmem:[#allocation54_spill] sm:$0xff] }
 0x4a8   : > { %v3052_v7 = vadd.f32 %v10749_v52, %v10747_v19  ;;  %v2933_v23 = vadd.f32 %v10740_v14, %v10650_v3  ;;  %v13325_v3 = vld [vmem:[#allocation76_spill] sm:$0xff]  ;;  %v13326_v14 = vld [vmem:[#allocation77_spill] sm:$0xff]  ;;  %v3162_v0 = vadd.f32 %v13330_v37, %v13329_v42  ;;  %v13331_v1 = vld [vmem:[#allocation82_spill] sm:$0xff]  ;;  %v2951_v6 = vmax.f32 %v2844_v41, %v2930_v55 }
 0x4a9   : > { %v2957_v20 = vmax.f32 %v2850_v22, %v2948_v5  ;;  %v3040_v39 = vadd.f32 %v13326_v14, %v13325_v3  ;;  %v3266_v22 = vadd.f32 %v13338_v11, %v13337_v33  ;;  %v13341_v41 = vld [vmem:[#allocation58_spill] sm:$0xff]  ;;  %v13348_v3 = vld [vmem:[#allocation53_spill] sm:$0xff] }
 0x4aa   : > { %v2952_v5 = vmax.f32 %v2845_v31, %v2933_v23  ;;  %v3334_v2 = vpop.f32.mrf.mxu2  ;;  %v13342_v31 = vld [vmem:[#allocation46_spill] sm:$0xff] }
 0x4ab   : > { %v13343_v23 = vld [vmem:[#allocation50_spill] sm:$0xff] }
 0x4ac   : > { %v3059_v54 = vmax.f32 %v2952_v5, %v3040_v39 }
 0x4ad   : > { %v10892_v63 = vpop.f32.mrf.mxu3 }
 0x4ae   : > { %13307 = vst [vmem:[#allocation10_spill] sm:$0xff] %v10892_v63  ;;  %v2838_v63 = vadd.f32 %v10560_v60, %v10558_v21  ;;  %v2846_v21 = vmax.f32 %v13313_v29, %v2829_v18  ;;  %v10953_v59 = vpop.f32.mrf.mxu1  ;;  %v2847_v60 = vmax.f32 %v13315_v56, %v2832_v12  ;;  %v13319_v12 = vld [vmem:[#allocation79_spill] sm:$0xff]  ;;  %v13332_v18 = vld [vmem:[#allocation70_spill] sm:$0xff]  ;;  %v3064_v29 = vmax.f32 %v2957_v20, %v3055_v61  ;;  %v3441_v61 = vpop.f32.mrf.mxu0  ;;  %v13359_v11 = vld [vmem:[#allocation13_spill] sm:$0xff] }
 0x4af   : > { %v3037_v51 = vadd.f32 %v13320_v28, %v13319_v12  ;;  %v3046_v16 = vadd.f32 %v13332_v18, %v13331_v1  ;;  %v13349_v1 = vld [vmem:[#allocation65_spill] sm:$0xff] }
 0x4b0   : > { %v2849_v9 = vmax.f32 %v13314_v13, %v2838_v63  ;;  %v13323_v63 = vld [vmem:[#allocation47_spill] sm:$0xff]  ;;  %v2954_v30 = vmax.f32 %v2847_v60, %v2939_v4  ;;  %v2953_v44 = vmax.f32 %v2846_v21, %v2936_v24  ;;  %v3062_v13 = vmax.f32 %v2955_v15, %v3049_v25  ;;  %v13339_v4 = vld [vmem:[#allocation40_spill] sm:$0xff]  ;;  %v13345_v25 = vld [vmem:[#allocation61_spill] sm:$0xff] }
 0x4b1   : > { %v3159_v19 = vadd.f32 %v13324_v26, %v13323_v63  ;;  %v10998_v60 = vmax.f32 %v2950_v27, %v3034_v48  ;;  %v3171_v62 = vmax.f32 %v3064_v29, %v3162_v0  ;;  %v3150_v21 = vadd.f32 %v13342_v31, %v13341_v41  ;;  %v13344_v24 = vld [vmem:[#allocation60_spill] sm:$0xff]  ;;  %v13346_v63 = vld [vmem:[#allocation63_spill] sm:$0xff]  ;;  %v13347_v27 = vld [vmem:[#allocation66_spill] sm:$0xff] }
 0x4b2   : > { %v2956_v36 = vmax.f32 %v2849_v9, %v2945_v49  ;;  %v13333_v49 = vld [vmem:[#allocation49_spill] sm:$0xff]  ;;  %v13335_v9 = vld [vmem:[#allocation56_spill] sm:$0xff]  ;;  %v3061_v12 = vmax.f32 %v2954_v30, %v3046_v16  ;;  %v3263_v20 = vadd.f32 %v13344_v24, %v13343_v23  ;;  %v3058_v15 = vmax.f32 %v2951_v6, %v3037_v51  ;;  %v13368_v23 = vld [vmem:[#allocation78_spill] sm:$0xff] }
 0x4b3   : > { %v3156_v40 = vadd.f32 %v13334_v53, %v13333_v49  ;;  %v3153_v56 = vadd.f32 %v13336_v47, %v13335_v9  ;;  %v3060_v46 = vmax.f32 %v2953_v44, %v3043_v34  ;;  %v3147_v26 = vadd.f32 %v13346_v63, %v13345_v25  ;;  %v13350_v51 = vld [vmem:[#allocation52_spill] sm:$0xff]  ;;  %v13355_v44 = vld [vmem:[#allocation62_spill] sm:$0xff] }
 0x4b4   : > { %v3063_v32 = vmax.f32 %v2956_v36, %v3052_v7  ;;  %v13340_v36 = vld [vmem:[#allocation41_spill] sm:$0xff]  ;;  %v3260_v14 = vadd.f32 %v13348_v3, %v13347_v27  ;;  %v3144_v39 = vadd.f32 %v13350_v51, %v13349_v1  ;;  %v3480_v53 = vadd.f32 %v10953_v59, %v10951_v58  ;;  %v13353_v6 = vld [vmem:[#allocation68_spill] sm:$0xff]  ;;  %v13357_v47 = vld [vmem:[#allocation42_spill] sm:$0xff] }
 0x4b5   : > { %v10902_v57 = vpop.f32.mrf.mxu3  ;;  %v3269_v7 = vadd.f32 %v13340_v36, %v13339_v4  ;;  %v3169_v55 = vmax.f32 %v3062_v13, %v3156_v40  ;;  %v3167_v34 = vmax.f32 %v3060_v46, %v3150_v21  ;;  %v3166_v5 = vmax.f32 %v3059_v54, %v3147_v26  ;;  %v13356_v29 = vld [vmem:[#allocation72_spill] sm:$0xff]  ;;  %v13361_v58 = vld [vmem:[#allocation75_spill] sm:$0xff]  ;;  %v13363_v36 = vld [vmem:[#allocation90_spill] sm:$0xff] }
 0x4b6   : > { %v3170_v43 = vmax.f32 %v3063_v32, %v3159_v19  ;;  %v3482_v28 = vpop.f32.mrf.mxu1  ;;  %v3168_v19 = vmax.f32 %v3061_v12, %v3153_v56  ;;  %v3367_v32 = vadd.f32 %v10902_v57, %v10888_v17  ;;  %v3254_v13 = vadd.f32 %v13356_v29, %v13355_v44  ;;  %v13358_v56 = vld [vmem:[#allocation10_spill] sm:$0xff]  ;;  %v13362_v59 = vld [vmem:[#allocation83_spill] sm:$0xff]  ;;  %v13366_v41 = vld [vmem:[#allocation84_spill] sm:$0xff] }
 0x4b7   : > { %v3278_v42 = vmax.f32 %v3171_v62, %v3269_v7  ;;  %v3483_v30 = vadd.f32 %v3482_v28, %v3441_v61  ;;  %v3276_v16 = vmax.f32 %v3169_v55, %v3263_v20  ;;  %v3477_v17 = vadd.f32 %v13359_v11, %v10906_v50  ;;  %v13364_v7 = vld [vmem:[#allocation30_spill] sm:$0xff]  ;;  %v13369_v24 = vld [vmem:[#allocation64_spill] sm:$0xff] }
 0x4b8   : > { %v3277_v38 = vmax.f32 %v3170_v43, %v3266_v22  ;;  %v3275_v9 = vmax.f32 %v3168_v19, %v3260_v14  ;;  %v3364_v43 = vadd.f32 %v13358_v56, %v13357_v47  ;;  %v3165_v22 = vmax.f32 %v3058_v15, %v3144_v39  ;;  %v13365_v12 = vld [vmem:[#allocation34_spill] sm:$0xff]  ;;  %v13370_v28 = vld [vmem:[#allocation12_spill] sm:$0xff]  ;;  %v13371_v15 = vld [vmem:[#allocation25_spill] sm:$0xff] }
 0x4b9   : > { %v3251_v62 = vadd.f32 %v13362_v59, %v13361_v58  ;;  %v3361_v31 = vadd.f32 %v13366_v41, %v13365_v12  ;;  %v3248_v20 = vadd.f32 %v13369_v24, %v13368_v23  ;;  %v3273_v61 = vmax.f32 %v3166_v5, %v3254_v13  ;;  %v13372_v46 = vld [vmem:[#allocation18_spill] sm:$0xff]  ;;  %v13375_v19 = vld [vmem:[#allocation29_spill] sm:$0xff]  ;;  %v13380_v1 = vld [vmem:[#allocation88_spill] sm:$0xff] }
 0x4ba   : > { %v3382_v21 = vmax.f32 %v3275_v9, %v3367_v32  ;;  %v3471_v54 = vadd.f32 %v13371_v15, %v13370_v28  ;;  %v13376_v27 = vld [vmem:[#allocation86_spill] sm:$0xff]  ;;  %v13377_v14 = vld [vmem:[#allocation93_spill] sm:$0xff]  ;;  %v13381_v51 = vld [vmem:[#allocation92_spill] sm:$0xff] }
 0x4bb   : > { %v3468_v3 = vadd.f32 %v13376_v27, %v13375_v19  ;;  %v3465_v39 = vadd.f32 %v13381_v51, %v13380_v1  ;;  %v3495_v5 = vld [vmem:[%s13388_s4 + $0x10] sm:$0xff]  ;;  %v3496_v29 = vld [vmem:[%s13388_s4 + $0x18] sm:$0xff]  ;;  %v3497_v9 = vld [vmem:[%s13388_s4 + $0x20] sm:$0xff] }
 0x4bc   : > { %v7758_v44 = vld [vmem:[%s13388_s4 + $0x50] sm:$0xff]  ;;  %v7759_v13 = vld [vmem:[%s13388_s4 + $0x58] sm:$0xff]  ;;  %v7760_v47 = vld [vmem:[%s13388_s4 + $0x60] sm:$0xff] }
 0x4bd   : > { %v10920_v35 = vpop.f32.mrf.mxu3  ;;  %v3498_v56 = vld [vmem:[%s13388_s4 + $0x28] sm:$0xff]  ;;  %v7762_v11 = vld [vmem:[%s13388_s4 + $0x70] sm:$0xff]  ;;  %v7790_v58 = vld [vmem:[%s13388_s4 + $0x80] sm:$0xff] }
 0x4be   : > { %v3370_v37 = vadd.f32 %v10920_v35, %v10904_v8  ;;  %v13354_v8 = vld [vmem:[#allocation55_spill] sm:$0xff]  ;;  %v7816_v51 = vld [vmem:[%s13388_s4 + $0xc0] sm:$0xff] }
 0x4bf   : > { %v3141_v35 = vadd.f32 %v13354_v8, %v13353_v6  ;;  %v7756_v6 = vld [vmem:[%s13388_s4 + $0x40] sm:$0xff]  ;;  %v3494_v8 = vld [vmem:[%s13388_s4 + $0x8] sm:$0xff]  ;;  %v7796_v41 = vld [vmem:[%s13388_s4 + $0xb0] sm:$0xff] }
 0x4c0   : > { %v3383_v33 = vmax.f32 %v3276_v16, %v3370_v37  ;;  %v7791_v59 = vld [vmem:[%s13388_s4 + $0x88] sm:$0xff]  ;;  %v11261_v19 = vld [vmem:[%s13388_s4 + $0x110] sm:$0xff] }
 0x4c1   : > { %v3164_v50 = vmax.f32 %v10998_v60, %v3141_v35  ;;  %v3272_v60 = vmax.f32 %v3165_v22, %v3251_v62  ;;  %v7757_v35 = vld [vmem:[%s13388_s4 + $0x48] sm:$0xff]  ;;  %v7763_v22 = vld [vmem:[%s13388_s4 + $0x78] sm:$0xff]  ;;  %v7792_v62 = vld [vmem:[%s13388_s4 + $0x90] sm:$0xff]  ;;  %13390 = vst [vmem:[#allocation23_spill] sm:$0xff] %v11261_v19 }
 0x4c2   : > { %v11048_v26 = vmax.f32 %v3383_v33, %v3477_v17  ;;  %v3499_v33 = vld [vmem:[%s13388_s4 + $0x30] sm:$0xff]  ;;  %v3500_v17 = vld [vmem:[%s13388_s4 + $0x38] sm:$0xff]  ;;  %v7795_v12 = vld [vmem:[%s13388_s4 + $0xa8] sm:$0xff] }
 0x4c3   : > { %v7847_v1 = vld [vmem:[%s13388_s4 + $0x128] sm:$0xff] }
 0x4c4   : > { %13374 = vst [vmem:[#allocation15_spill] sm:$0xff] %v11048_v26 }
 0x4c5   : > { %v3372_v52 = vpop.f32.mrf.mxu3 }
 0x4c6   : > { %v3373_v48 = vadd.f32 %v3372_v52, %v3331_v10  ;;  %v13351_v10 = vld [vmem:[#allocation59_spill] sm:$0xff]  ;;  %v13352_v52 = vld [vmem:[#allocation69_spill] sm:$0xff] }
 0x4c7   : > { %v3257_v18 = vadd.f32 %v13352_v52, %v13351_v10  ;;  %v13383_v52 = vld [vmem:[#allocation38_spill] sm:$0xff] }
 0x4c8   : > { %v3384_v49 = vmax.f32 %v3277_v38, %v3373_v48  ;;  %v13373_v48 = vld [vmem:[#allocation91_spill] sm:$0xff]  ;;  %v13378_v38 = vld [vmem:[#allocation45_spill] sm:$0xff] }
 0x4c9   : > { %v3274_v4 = vmax.f32 %v3167_v34, %v3257_v18  ;;  %v3358_v25 = vadd.f32 %v13373_v48, %v13372_v46  ;;  %v13384_v18 = vld [vmem:[#allocation48_spill] sm:$0xff]  ;;  %v11245_v46 = vld [vmem:[%s13388_s4 + $0x108] sm:$0xff] }
 0x4ca   : > { %v11036_v55 = vmax.f32 %v3384_v49, %v3480_v53  ;;  %v3462_v16 = vadd.f32 %v13384_v18, %v13383_v52  ;;  %13389 = vst [vmem:[#allocation33_spill] sm:$0xff] %v11245_v46  ;;  %v7807_v48 = vld [vmem:[%s12929_s5 + $0x28] sm:$0xff] }
 0x4cb   : > { %v3381_v63 = vmax.f32 %v3274_v4, %v3364_v43  ;;  %v7761_v43 = vld [vmem:[%s13388_s4 + $0x68] sm:$0xff]  ;;  %v7793_v4 = vld [vmem:[%s13388_s4 + $0x98] sm:$0xff] }
 0x4cc   : > { %13367 = vst [vmem:[#allocation17_spill] sm:$0xff] %v11036_v55  ;;  %v7817_v52 = vld [vmem:[%s13388_s4 + $0xc8] sm:$0xff] }
 0x4cd   : > { %v3375_v45 = vpop.f32.mrf.mxu3  ;;  %v11064_v34 = vmax.f32 %v3381_v63, %v3471_v54 }
 0x4ce   : > { %v3376_v0 = vadd.f32 %v3375_v45, %v3334_v2  ;;  %v3474_v2 = vadd.f32 %v13364_v7, %v13363_v36  ;;  %v3355_v45 = vadd.f32 %v13378_v38, %v13377_v14  ;;  %v7794_v36 = vld [vmem:[%s13388_s4 + $0xa0] sm:$0xff]  ;;  %v3568_v7 = vld [vmem:[%s12929_s5 + $0x8] sm:$0xff]  ;;  %v11270_v14 = vld [vmem:[%s13388_s4 + $0x118] sm:$0xff] }
 0x4cf   : > { %13382 = vst [vmem:[#allocation87_spill] sm:$0xff] %v11064_v34  ;;  %3750 = vmatpush.msra.mxu1 %v3568_v7  ;;  %v11407_v7 = vld [vmem:[%s13388_s4 + $0x148] sm:$0xff] }
 0x4d0   : > { %v3385_v40 = vmax.f32 %v3278_v42, %v3376_v0  ;;  %v3380_v42 = vmax.f32 %v3273_v61, %v3361_v31  ;;  %v11057_v37 = vmax.f32 %v3382_v21, %v3474_v2  ;;  %v3271_v0 = vmax.f32 %v3164_v50, %v3248_v20  ;;  %v3567_v2 = vld [vmem:[%s12929_s5] sm:$0xff]  ;;  %v7797_v31 = vld [vmem:[%s13388_s4 + $0xb8] sm:$0xff]  ;;  %13391 = vst [vmem:[#allocation22_spill] sm:$0xff] %v11270_v14 }
 0x4d1   : > { %3751 = vmatpush.msra.mxu1 %v3567_v2  ;;  %v7842_v21 = vld [vmem:[%s13388_s4 + $0x100] sm:$0xff]  ;;  %13402 = vst [vmem:[#allocation26_spill] sm:$0xff] %v11407_v7  ;;  %v11412_v2 = vld [vmem:[%s13388_s4 + $0x1b0] sm:$0xff] }
 0x4d2   : > { %v11028_v57 = vmax.f32 %v3385_v40, %v3483_v30  ;;  %13379 = vst [vmem:[#allocation19_spill] sm:$0xff] %v11057_v37  ;;  %v3379_v30 = vmax.f32 %v3272_v60, %v3358_v25  ;;  %v3378_v10 = vmax.f32 %v3271_v0, %v3355_v45  ;;  %v11071_v32 = vmax.f32 %v3380_v42, %v3468_v3  ;;  %v3493_v40 = vld [vmem:[%s13388_s4] sm:$0xff] }
 0x4d3   : > { %v7806_v60 = vld [vmem:[%s12929_s5 + $0x20] sm:$0xff]  ;;  %13403 = vst [vmem:[#allocation67_spill] sm:$0xff] %v11412_v2 }
 0x4d4   : > { %13360 = vst [vmem:[#allocation89_spill] sm:$0xff] %v11028_v57  ;;  %3534 = vmatpush.msra.mxu2 %v11028_v57  ;;  %3610 = vmatpush.msrb.mxu3 %v11028_v57  ;;  %v11076_v49 = vmax.f32 %v3379_v30, %v3465_v39  ;;  %v11081_v53 = vmax.f32 %v3378_v10, %v3462_v16  ;;  %v7846_v42 = vld [vmem:[%s13388_s4 + $0x120] sm:$0xff]  ;;  %v11296_v10 = vld [vmem:[%s13388_s4 + $0x130] sm:$0xff]  ;;  %v11312_v16 = vld [vmem:[%s13388_s4 + $0x138] sm:$0xff] }
 0x4d5   : > { %3968 = vmatpush.msrb.mxu0 %v11028_v57  ;;  %13385 = vst [vmem:[#allocation20_spill] sm:$0xff] %v11071_v32 }
 0x4d6   : > { %3535 = vmatpush.msra.mxu2 %v11036_v55  ;;  %3611 = vmatpush.msrb.mxu3 %v11036_v55  ;;  %13386 = vst [vmem:[#allocation31_spill] sm:$0xff] %v11076_v49 }
 0x4d7   : > { %3969 = vmatpush.msrb.mxu0 %v11036_v55  ;;  %13387 = vst [vmem:[#allocation85_spill] sm:$0xff] %v11081_v53 }
 0x4d8   : > { %3536 = vmatpush.msra.mxu2 %v11048_v26  ;;  %3612 = vmatpush.msrb.mxu3 %v11048_v26  ;;  %13392 = vst [vmem:[#allocation14_spill] sm:$0xff] %v11296_v10 }
 0x4d9   : > { %3970 = vmatpush.msrb.mxu0 %v11048_v26  ;;  %13393 = vst [vmem:[#allocation28_spill] sm:$0xff] %v11312_v16 }
 0x4da   : > { %3537 = vmatpush.msra.mxu2 %v11057_v37  ;;  %3613 = vmatpush.msrb.mxu3 %v11057_v37 }
 0x4db   : > { %3971 = vmatpush.msrb.mxu0 %v11057_v37 }
 0x4dc   : > { %3538 = vmatpush.msra.mxu2 %v11064_v34  ;;  %3614 = vmatpush.msrb.mxu3 %v11064_v34 }
 0x4dd   : > { %3972 = vmatpush.msrb.mxu0 %v11064_v34 }
 0x4de   : > { %3539 = vmatpush.msra.mxu2 %v11071_v32  ;;  %3615 = vmatpush.msrb.mxu3 %v11071_v32 }
 0x4df   : > { %3973 = vmatpush.msrb.mxu0 %v11071_v32 }
 0x4e0   : > { %3540 = vmatpush.msra.mxu2 %v11076_v49  ;;  %3616 = vmatpush.msrb.mxu3 %v11076_v49 }
 0x4e1   : > { %3974 = vmatpush.msrb.mxu0 %v11076_v49 }
 0x4e2   : > { %3541 = vmatpush.msra.mxu2 %v11081_v53  ;;  %3617 = vmatpush.msrb.mxu3 %v11081_v53 }
 0x4e3   : > { %3975 = vmatpush.msrb.mxu0 %v11081_v53  ;;  %7748 = vmatmul.msk.f32.vlgmr.msra.gmra.mxu2 %vm3501_vm2, %v3493_v40  ;;  %v7818_v40 = vld [vmem:[%s13388_s4 + $0xd0] sm:$0xff] }
 0x4e4   : > { %7764 = vmatmul.msk.f32.vlgmr.msrb.gmra.mxu3 %vm3501_vm2, %v7756_v6  ;;  %3818 = vmatpush.msrb.mxu2 %v11028_v57 }
 0x4e5   : > { %3892 = vmatpush.msra.mxu3 %v7807_v48  ;;  %v7832_v48 = vld [vmem:[%s12929_s5 + $0x30] sm:$0xff] }
 0x4e6   : > { %3819 = vmatpush.msrb.mxu2 %v11036_v55 }
 0x4e7   : > { %3893 = vmatpush.msra.mxu3 %v7806_v60 }
 0x4e8   : > { %3820 = vmatpush.msrb.mxu2 %v11048_v26 }
 0x4ea   : > { %3821 = vmatpush.msrb.mxu2 %v11057_v37 }
 0x4eb   : > { %7749 = vmatmul.msk.f32.gmra.mxu2 %vm3501_vm2, %v3494_v8  ;;  %v11326_v8 = vld [vmem:[%s13388_s4 + $0x180] sm:$0xff] }
 0x4ec   : > { %7765 = vmatmul.msk.f32.gmra.mxu3 %vm3501_vm2, %v7757_v35  ;;  %3822 = vmatpush.msrb.mxu2 %v11064_v34  ;;  %13394 = vst [vmem:[#allocation36_spill] sm:$0xff] %v11326_v8  ;;  %v7819_v35 = vld [vmem:[%s13388_s4 + $0xd8] sm:$0xff] }
 0x4ee   : > { %3823 = vmatpush.msrb.mxu2 %v11071_v32 }
 0x4f0   : > { %3824 = vmatpush.msrb.mxu2 %v11076_v49 }
 0x4f2   : > { %3825 = vmatpush.msrb.mxu2 %v11081_v53 }
 0x4f3   : > { %7750 = vmatmul.msk.f32.gmra.mxu2 %vm3501_vm2, %v3495_v5 }
 0x4f4   : > { %4118 = vmatpush.msra.mxu2 %v11028_v57  ;;  %7766 = vmatmul.msk.f32.gmra.mxu3 %vm3501_vm2, %v7758_v44  ;;  %v7820_v44 = vld [vmem:[%s13388_s4 + $0xe0] sm:$0xff] }
 0x4f6   : > { %4119 = vmatpush.msra.mxu2 %v11036_v55 }
 0x4f8   : > { %4120 = vmatpush.msra.mxu2 %v11048_v26 }
 0x4fa   : > { %4121 = vmatpush.msra.mxu2 %v11057_v37 }
 0x4fb   : > { %7751 = vmatmul.msk.f32.gmra.mxu2 %vm3501_vm2, %v3496_v29  ;;  %v11341_v29 = vld [vmem:[%s13388_s4 + $0x188] sm:$0xff] }
 0x4fc   : > { %4122 = vmatpush.msra.mxu2 %v11064_v34  ;;  %7767 = vmatmul.msk.f32.gmra.mxu3 %vm3501_vm2, %v7759_v13  ;;  %13395 = vst [vmem:[#allocation37_spill] sm:$0xff] %v11341_v29 }
 0x4fe   : > { %4123 = vmatpush.msra.mxu2 %v11071_v32 }
 0x500   : > { %4124 = vmatpush.msra.mxu2 %v11076_v49 }
 0x502   : > { %4125 = vmatpush.msra.mxu2 %v11081_v53 }
 0x503   : > { %7752 = vmatmul.msk.f32.gmra.mxu2 %vm3501_vm2, %v3497_v9  ;;  %v7821_v9 = vld [vmem:[%s13388_s4 + $0xe8] sm:$0xff] }
 0x504   : > { %7768 = vmatmul.msk.f32.gmra.mxu3 %vm3501_vm2, %v7760_v47  ;;  %v11353_v47 = vld [vmem:[%s13388_s4 + $0x190] sm:$0xff] }
 0x505   : > { %13396 = vst [vmem:[#allocation24_spill] sm:$0xff] %v11353_v47 }
 0x50b   : > { %7753 = vmatmul.msk.f32.gmra.mxu2 %vm3501_vm2, %v3498_v56 }
 0x50c   : > { %7769 = vmatmul.msk.f32.gmra.mxu3 %vm3501_vm2, %v7761_v43  ;;  %v7822_v43 = vld [vmem:[%s13388_s4 + $0xf0] sm:$0xff] }
 0x513   : > { %7754 = vmatmul.msk.f32.gmra.mxu2 %vm3501_vm2, %v3499_v33  ;;  %v11365_v33 = vld [vmem:[%s13388_s4 + $0x198] sm:$0xff] }
 0x514   : > { %7770 = vmatmul.msk.f32.gmra.mxu3 %vm3501_vm2, %v7762_v11  ;;  %13397 = vst [vmem:[#allocation35_spill] sm:$0xff] %v11365_v33 }
 0x51b   : > { %7755 = vmatmul.msk.f32.gmra.mxu2 %vm3501_vm2, %v3500_v17  ;;  %v11374_v17 = vld [vmem:[%s13388_s4 + $0xf8] sm:$0xff] }
 0x51c   : > { %7771 = vmatmul.msk.f32.gmra.mxu3 %vm3501_vm2, %v7763_v22  ;;  %13398 = vst [vmem:[#allocation21_spill] sm:$0xff] %v11374_v17  ;;  %v11379_v22 = vld [vmem:[%s13388_s4 + $0x1a0] sm:$0xff] }
 0x51d   : > { %13399 = vst [vmem:[#allocation32_spill] sm:$0xff] %v11379_v22 }
 0x523   : > { %7798 = vmatmul.msk.f32.vlgmr.msrb.gmra.mxu2 %vm3501_vm2, %v7790_v58 }
 0x524   : > { %4418 = vmatpush.msrb.mxu2 %v11028_v57 }
 0x526   : > { %4419 = vmatpush.msrb.mxu2 %v11036_v55 }
 0x528   : > { %4420 = vmatpush.msrb.mxu2 %v11048_v26 }
 0x52a   : > { %4421 = vmatpush.msrb.mxu2 %v11057_v37 }
 0x52b   : > { %7799 = vmatmul.msk.f32.gmra.mxu2 %vm3501_vm2, %v7791_v59 }
 0x52c   : > { %4422 = vmatpush.msrb.mxu2 %v11064_v34 }
 0x52e   : > { %4423 = vmatpush.msrb.mxu2 %v11071_v32 }
 0x530   : > { %4424 = vmatpush.msrb.mxu2 %v11076_v49 }
 0x532   : > { %4425 = vmatpush.msrb.mxu2 %v11081_v53 }
 0x533   : > { %7800 = vmatmul.msk.f32.gmra.mxu2 %vm3501_vm2, %v7792_v62  ;;  %v11391_v62 = vld [vmem:[%s13388_s4 + $0x140] sm:$0xff] }
 0x534   : > { %13400 = vst [vmem:[#allocation16_spill] sm:$0xff] %v11391_v62 }
 0x53b   : > { %7801 = vmatmul.msk.f32.gmra.mxu2 %vm3501_vm2, %v7793_v4  ;;  %v11396_v4 = vld [vmem:[%s13388_s4 + $0x1a8] sm:$0xff] }
 0x53c   : > { %13401 = vst [vmem:[#allocation11_spill] sm:$0xff] %v11396_v4 }
 0x543   : > { %7802 = vmatmul.msk.f32.gmra.mxu2 %vm3501_vm2, %v7794_v36 }
 0x54b   : > { %7803 = vmatmul.msk.f32.gmra.mxu2 %vm3501_vm2, %v7795_v12 }
 0x553   : > { %7804 = vmatmul.msk.f32.gmra.mxu2 %vm3501_vm2, %v7796_v41  ;;  %v11423_v41 = vld [vmem:[%s13388_s4 + $0x150] sm:$0xff] }
 0x554   : > { %13404 = vst [vmem:[#allocation79_spill] sm:$0xff] %v11423_v41 }
 0x55b   : > { %7805 = vmatmul.msk.f32.gmra.mxu2 %vm3501_vm2, %v7797_v31  ;;  %v11428_v31 = vld [vmem:[%s13388_s4 + $0x1b8] sm:$0xff] }
 0x55c   : > { %13405 = vst [vmem:[#allocation80_spill] sm:$0xff] %v11428_v31 }
 0x563   : > { %7850 = vmatmul.msk.f32.vlgmr.msra.gmra.mxu2 %vm3501_vm2, %v7842_v21 }
 0x564   : > { %4718 = vmatpush.msra.mxu2 %v11028_v57 }
 0x566   : > { %v3543_v50 = vpop.f32.mrf.mxu2  ;;  %4719 = vmatpush.msra.mxu2 %v11036_v55 }
 0x567   : > { %v3619_v23 = vpop.f32.mrf.mxu3  ;;  %7782 = vmatmul.msk.f32.vlgmr.msra.gmra.mxu1 %vm3646_vm3, %v3543_v50  ;;  %v11439_v50 = vld [vmem:[%s13388_s4 + $0x158] sm:$0xff] }
 0x568   : > { %7774 = vmatmul.msk.f32.vlgmr.msra.gmra.mxu0 %vm3646_vm3, %v3619_v23  ;;  %4720 = vmatpush.msra.mxu2 %v11048_v26  ;;  %13406 = vst [vmem:[#allocation71_spill] sm:$0xff] %v11439_v50  ;;  %v11444_v23 = vld [vmem:[%s13388_s4 + $0x200] sm:$0xff] }
 0x569   : > { %4268 = vmatpush.msra.mxu0 %v11028_v57  ;;  %13407 = vst [vmem:[#allocation81_spill] sm:$0xff] %v11444_v23 }
 0x56a   : > { %4721 = vmatpush.msra.mxu2 %v11057_v37 }
 0x56b   : > { %4269 = vmatpush.msra.mxu0 %v11036_v55  ;;  %7851 = vmatmul.msk.f32.gmra.mxu2 %vm3501_vm2, %v11245_v46 }
 0x56c   : > { %4722 = vmatpush.msra.mxu2 %v11064_v34 }
 0x56d   : > { %4270 = vmatpush.msra.mxu0 %v11048_v26 }
 0x56e   : > { %v3546_v24 = vpop.f32.mrf.mxu2  ;;  %4723 = vmatpush.msra.mxu2 %v11071_v32 }
 0x56f   : > { %4271 = vmatpush.msra.mxu0 %v11057_v37  ;;  %v3622_v20 = vpop.f32.mrf.mxu3  ;;  %7783 = vmatmul.msk.f32.gmra.mxu1 %vm3646_vm3, %v3546_v24  ;;  %v7859_v24 = vld [vmem:[%s12929_s5 + $0x48] sm:$0xff] }
 0x570   : > { %7775 = vmatmul.msk.f32.gmra.mxu0 %vm3646_vm3, %v3622_v20  ;;  %4724 = vmatpush.msra.mxu2 %v11076_v49 }
 0x571   : > { %4272 = vmatpush.msra.mxu0 %v11064_v34  ;;  %4192 = vmatpush.msrb.mxu3 %v7859_v24 }
 0x572   : > { %4725 = vmatpush.msra.mxu2 %v11081_v53 }
 0x573   : > { %4273 = vmatpush.msra.mxu0 %v11071_v32  ;;  %7852 = vmatmul.msk.f32.gmra.mxu2 %vm3501_vm2, %v11261_v19 }
 0x575   : > { %4274 = vmatpush.msra.mxu0 %v11076_v49 }
 0x576   : > { %v3549_v28 = vpop.f32.mrf.mxu2 }
 0x577   : > { %4275 = vmatpush.msra.mxu0 %v11081_v53  ;;  %v3625_v61 = vpop.f32.mrf.mxu3  ;;  %7784 = vmatmul.msk.f32.gmra.mxu1 %vm3646_vm3, %v3549_v28  ;;  %v7833_v28 = vld [vmem:[%s12929_s5 + $0x38] sm:$0xff] }
 0x578   : > { %7776 = vmatmul.msk.f32.gmra.mxu0 %vm3646_vm3, %v3625_v61  ;;  %v7858_v61 = vld [vmem:[%s12929_s5 + $0x40] sm:$0xff]  ;;  %4042 = vmatpush.msrb.mxu1 %v7833_v28  ;;  %v7911_v28 = vld [vmem:[%s12929_s5 + $0x68] sm:$0xff] }
 0x579   : > { %4193 = vmatpush.msrb.mxu3 %v7858_v61  ;;  %v11584_v61 = vld [vmem:[%s13388_s4 + $0x1d8] sm:$0xff] }
 0x57a   : > { %4043 = vmatpush.msrb.mxu1 %v7832_v48  ;;  %13422 = vst [vmem:[#allocation57_spill] sm:$0xff] %v11584_v61  ;;  %v7910_v48 = vld [vmem:[%s12929_s5 + $0x60] sm:$0xff] }
 0x57b   : > { %7853 = vmatmul.msk.f32.gmra.mxu2 %vm3501_vm2, %v11270_v14 }
 0x57e   : > { %v3552_v54 = vpop.f32.mrf.mxu2 }
 0x57f   : > { %v3628_v15 = vpop.f32.mrf.mxu3  ;;  %7785 = vmatmul.msk.f32.gmra.mxu1 %vm3646_vm3, %v3552_v54  ;;  %v11465_v54 = vld [vmem:[%s13388_s4 + $0x160] sm:$0xff] }
 0x580   : > { %7777 = vmatmul.msk.f32.gmra.mxu0 %vm3646_vm3, %v3628_v15  ;;  %13408 = vst [vmem:[#allocation47_spill] sm:$0xff] %v11465_v54 }
 0x583   : > { %7854 = vmatmul.msk.f32.gmra.mxu2 %vm3501_vm2, %v7846_v42  ;;  %v11502_v42 = vld [vmem:[%s13388_s4 + $0x170] sm:$0xff] }
 0x584   : > { %13412 = vst [vmem:[#allocation73_spill] sm:$0xff] %v11502_v42 }
 0x586   : > { %v3555_v63 = vpop.f32.mrf.mxu2 }
 0x587   : > { %v3631_v25 = vpop.f32.mrf.mxu3  ;;  %7786 = vmatmul.msk.f32.gmra.mxu1 %vm3646_vm3, %v3555_v63 }
 0x588   : > { %7778 = vmatmul.msk.f32.gmra.mxu0 %vm3646_vm3, %v3631_v25  ;;  %v11473_v25 = vld [vmem:[%s13388_s4 + $0x208] sm:$0xff] }
 0x589   : > { %13409 = vst [vmem:[#allocation39_spill] sm:$0xff] %v11473_v25 }
 0x58b   : > { %7855 = vmatmul.msk.f32.gmra.mxu2 %vm3501_vm2, %v7847_v1 }
 0x58e   : > { %v3558_v3 = vpop.f32.mrf.mxu2 }
 0x58f   : > { %v3634_v27 = vpop.f32.mrf.mxu3  ;;  %7787 = vmatmul.msk.f32.gmra.mxu1 %vm3646_vm3, %v3558_v3  ;;  %v11490_v3 = vld [vmem:[%s13388_s4 + $0x210] sm:$0xff] }
 0x590   : > { %7779 = vmatmul.msk.f32.gmra.mxu0 %vm3646_vm3, %v3634_v27  ;;  %v11485_v27 = vld [vmem:[%s13388_s4 + $0x168] sm:$0xff]  ;;  %13411 = vst [vmem:[#allocation77_spill] sm:$0xff] %v11490_v3 }
 0x591   : > { %13410 = vst [vmem:[#allocation76_spill] sm:$0xff] %v11485_v27 }
 0x593   : > { %7856 = vmatmul.msk.f32.gmra.mxu2 %vm3501_vm2, %v11296_v10 }
 0x596   : > { %v3561_v45 = vpop.f32.mrf.mxu2 }
 0x597   : > { %v3637_v38 = vpop.f32.mrf.mxu3  ;;  %7788 = vmatmul.msk.f32.gmra.mxu1 %vm3646_vm3, %v3561_v45 }
 0x598   : > { %7780 = vmatmul.msk.f32.gmra.mxu0 %vm3646_vm3, %v3637_v38 }
 0x59b   : > { %7857 = vmatmul.msk.f32.gmra.mxu2 %vm3501_vm2, %v11312_v16 }
 0x59e   : > { %v3564_v30 = vpop.f32.mrf.mxu2 }
 0x59f   : > { %v3640_v0 = vpop.f32.mrf.mxu3  ;;  %7789 = vmatmul.msk.f32.gmra.mxu1 %vm3646_vm3, %v3564_v30 }
 0x5a0   : > { %7781 = vmatmul.msk.f32.gmra.mxu0 %vm3646_vm3, %v3640_v0  ;;  %v11507_v0 = vld [vmem:[%s13388_s4 + $0x218] sm:$0xff] }
 0x5a1   : > { %13413 = vst [vmem:[#allocation74_spill] sm:$0xff] %v11507_v0 }
 0x5a3   : > { %7902 = vmatmul.msk.f32.vlgmr.msrb.gmra.mxu2 %vm3501_vm2, %v11326_v8 }
 0x5a6   : > { %v3827_v39 = vpop.f32.mrf.mxu2 }
 0x5a7   : > { %7808 = vmatmul.msk.f32.vlgmr.msra.gmra.mxu3 %vm3646_vm3, %v3827_v39  ;;  %v11524_v39 = vld [vmem:[%s13388_s4 + $0x220] sm:$0xff] }
 0x5a8   : > { %7824 = vmatmul.msk.f32.vlgmr.msrb.gmra.mxu0 %vm3501_vm2, %v7816_v51  ;;  %v11519_v51 = vld [vmem:[%s13388_s4 + $0x178] sm:$0xff]  ;;  %13415 = vst [vmem:[#allocation27_spill] sm:$0xff] %v11524_v39  ;;  %4492 = vmatpush.msra.mxu3 %v7911_v28 }
 0x5a9   : > { %4568 = vmatpush.msrb.mxu0 %v11028_v57  ;;  %13414 = vst [vmem:[#allocation54_spill] sm:$0xff] %v11519_v51 }
 0x5aa   : > { %4493 = vmatpush.msra.mxu3 %v7910_v48 }
 0x5ab   : > { %4569 = vmatpush.msrb.mxu0 %v11036_v55  ;;  %7903 = vmatmul.msk.f32.gmra.mxu2 %vm3501_vm2, %v11341_v29 }
 0x5ad   : > { %4570 = vmatpush.msrb.mxu0 %v11048_v26 }
 0x5ae   : > { %v3830_v18 = vpop.f32.mrf.mxu2 }
 0x5af   : > { %4571 = vmatpush.msrb.mxu0 %v11057_v37  ;;  %7809 = vmatmul.msk.f32.gmra.mxu3 %vm3646_vm3, %v3830_v18 }
 0x5b0   : > { %7825 = vmatmul.msk.f32.gmra.mxu0 %vm3501_vm2, %v7817_v52 }
 0x5b1   : > { %4572 = vmatpush.msrb.mxu0 %v11064_v34 }
 0x5b3   : > { %4573 = vmatpush.msrb.mxu0 %v11071_v32  ;;  %7904 = vmatmul.msk.f32.gmra.mxu2 %vm3501_vm2, %v11353_v47 }
 0x5b5   : > { %4574 = vmatpush.msrb.mxu0 %v11076_v49 }
 0x5b6   : > { %v3833_v6 = vpop.f32.mrf.mxu2 }
 0x5b7   : > { %4575 = vmatpush.msrb.mxu0 %v11081_v53  ;;  %7810 = vmatmul.msk.f32.gmra.mxu3 %vm3646_vm3, %v3833_v6  ;;  %v11540_v6 = vld [vmem:[%s13388_s4 + $0x228] sm:$0xff] }
 0x5b8   : > { %7826 = vmatmul.msk.f32.gmra.mxu0 %vm3501_vm2, %v7818_v40  ;;  %v11534_v40 = vld [vmem:[%s13388_s4 + $0x1c0] sm:$0xff]  ;;  %13417 = vst [vmem:[#allocation70_spill] sm:$0xff] %v11540_v6 }
 0x5b9   : > { %13416 = vst [vmem:[#allocation82_spill] sm:$0xff] %v11534_v40 }
 0x5bb   : > { %7905 = vmatmul.msk.f32.gmra.mxu2 %vm3501_vm2, %v11365_v33 }
 0x5be   : > { %v3836_v5 = vpop.f32.mrf.mxu2 }
 0x5bf   : > { %7811 = vmatmul.msk.f32.gmra.mxu3 %vm3646_vm3, %v3836_v5 }
 0x5c0   : > { %7827 = vmatmul.msk.f32.gmra.mxu0 %vm3501_vm2, %v7819_v35 }
 0x5c3   : > { %7906 = vmatmul.msk.f32.gmra.mxu2 %vm3501_vm2, %v11379_v22 }
 0x5c6   : > { %v3839_v13 = vpop.f32.mrf.mxu2 }
 0x5c7   : > { %7812 = vmatmul.msk.f32.gmra.mxu3 %vm3646_vm3, %v3839_v13  ;;  %v11556_v13 = vld [vmem:[%s13388_s4 + $0x230] sm:$0xff] }
 0x5c8   : > { %7828 = vmatmul.msk.f32.gmra.mxu0 %vm3501_vm2, %v7820_v44  ;;  %v11550_v44 = vld [vmem:[%s13388_s4 + $0x1c8] sm:$0xff]  ;;  %13419 = vst [vmem:[#allocation51_spill] sm:$0xff] %v11556_v13 }
 0x5c9   : > { %13418 = vst [vmem:[#allocation49_spill] sm:$0xff] %v11550_v44 }
 0x5cb   : > { %7907 = vmatmul.msk.f32.gmra.mxu2 %vm3501_vm2, %v11396_v4 }
 0x5ce   : > { %v3842_v56 = vpop.f32.mrf.mxu2 }
 0x5cf   : > { %7813 = vmatmul.msk.f32.gmra.mxu3 %vm3646_vm3, %v3842_v56 }
 0x5d0   : > { %7829 = vmatmul.msk.f32.gmra.mxu0 %vm3501_vm2, %v7821_v9 }
 0x5d3   : > { %7908 = vmatmul.msk.f32.gmra.mxu2 %vm3501_vm2, %v11412_v2 }
 0x5d6   : > { %v3845_v11 = vpop.f32.mrf.mxu2 }
 0x5d7   : > { %7814 = vmatmul.msk.f32.gmra.mxu3 %vm3646_vm3, %v3845_v11  ;;  %v11572_v11 = vld [vmem:[%s13388_s4 + $0x238] sm:$0xff] }
 0x5d8   : > { %7830 = vmatmul.msk.f32.gmra.mxu0 %vm3501_vm2, %v7822_v43  ;;  %v11566_v43 = vld [vmem:[%s13388_s4 + $0x1d0] sm:$0xff]  ;;  %13421 = vst [vmem:[#allocation44_spill] sm:$0xff] %v11572_v11 }
 0x5d9   : > { %13420 = vst [vmem:[#allocation56_spill] sm:$0xff] %v11566_v43 }
 0x5db   : > { %7909 = vmatmul.msk.f32.gmra.mxu2 %vm3501_vm2, %v11428_v31 }
 0x5de   : > { %v3848_v58 = vpop.f32.mrf.mxu2 }
 0x5df   : > { %7815 = vmatmul.msk.f32.gmra.mxu3 %vm3646_vm3, %v3848_v58 }
 0x5e0   : > { %7831 = vmatmul.msk.f32.gmra.mxu0 %vm3501_vm2, %v11374_v17 }
 0x5e3   : > { %7954 = vmatmul.msk.f32.vlgmr.msra.gmra.mxu2 %vm3501_vm2, %v11444_v23 }
 0x5e4   : > { %v11624_v28 = vpop.f32.mrf.mxu1 }
 0x5e5   : > { %v11386_v59 = vpop.f32.mrf.mxu0 }
 0x5e6   : > { %v4127_v20 = vpop.f32.mrf.mxu2 }
 0x5e7   : > { %7860 = vmatmul.msk.f32.vlgmr.msrb.gmra.mxu3 %vm3646_vm3, %v4127_v20 }
 0x5e8   : > { %7876 = vmatmul.msk.f32.vlgmr.msra.gmra.mxu0 %vm3501_vm2, %v11391_v62 }
 0x5eb   : > { %7955 = vmatmul.msk.f32.gmra.mxu2 %vm3501_vm2, %v11473_v25 }
 0x5ed   : > { %v11402_v36 = vpop.f32.mrf.mxu0 }
 0x5ee   : > { %v4130_v63 = vpop.f32.mrf.mxu2 }
 0x5ef   : > { %7861 = vmatmul.msk.f32.gmra.mxu3 %vm3646_vm3, %v4130_v63  ;;  %v7885_v63 = vld [vmem:[%s12929_s5 + $0x58] sm:$0xff] }
 0x5f0   : > { %7877 = vmatmul.msk.f32.gmra.mxu0 %vm3501_vm2, %v11407_v7  ;;  %4342 = vmatpush.msra.mxu1 %v7885_v63  ;;  %v11629_v63 = vld [vmem:[%s13388_s4 + $0x1f0] sm:$0xff] }
 0x5f1   : > { %13425 = vst [vmem:[#allocation41_spill] sm:$0xff] %v11629_v63 }
 0x5f3   : > { %7956 = vmatmul.msk.f32.gmra.mxu2 %vm3501_vm2, %v11490_v3 }
 0x5f5   : > { %v11418_v12 = vpop.f32.mrf.mxu0 }
 0x5f6   : > { %v4133_v38 = vpop.f32.mrf.mxu2 }
 0x5f7   : > { %7862 = vmatmul.msk.f32.gmra.mxu3 %vm3646_vm3, %v4133_v38 }
 0x5f8   : > { %7878 = vmatmul.msk.f32.gmra.mxu0 %vm3501_vm2, %v11423_v41 }
 0x5fb   : > { %7957 = vmatmul.msk.f32.gmra.mxu2 %vm3501_vm2, %v11507_v0 }
 0x5fd   : > { %v11434_v21 = vpop.f32.mrf.mxu0 }
 0x5fe   : > { %v4136_v30 = vpop.f32.mrf.mxu2 }
 0x5ff   : > { %7863 = vmatmul.msk.f32.gmra.mxu3 %vm3646_vm3, %v4136_v30 }
 0x600   : > { %7879 = vmatmul.msk.f32.gmra.mxu0 %vm3501_vm2, %v11439_v50 }
 0x603   : > { %7958 = vmatmul.msk.f32.gmra.mxu2 %vm3501_vm2, %v11524_v39 }
 0x605   : > { %v11460_v15 = vpop.f32.mrf.mxu0 }
 0x606   : > { %v4139_v52 = vpop.f32.mrf.mxu2 }
 0x607   : > { %7864 = vmatmul.msk.f32.gmra.mxu3 %vm3646_vm3, %v4139_v52 }
 0x608   : > { %7880 = vmatmul.msk.f32.gmra.mxu0 %vm3501_vm2, %v11465_v54 }
 0x60b   : > { %7959 = vmatmul.msk.f32.gmra.mxu2 %vm3501_vm2, %v11540_v6 }
 0x60d   : > { %v11480_v60 = vpop.f32.mrf.mxu0 }
 0x60e   : > { %v4142_v35 = vpop.f32.mrf.mxu2 }
 0x60f   : > { %7865 = vmatmul.msk.f32.gmra.mxu3 %vm3646_vm3, %v4142_v35  ;;  %v7884_v35 = vld [vmem:[%s12929_s5 + $0x50] sm:$0xff] }
 0x610   : > { %7881 = vmatmul.msk.f32.gmra.mxu0 %vm3501_vm2, %v11485_v27  ;;  %4343 = vmatpush.msra.mxu1 %v7884_v35 }
 0x613   : > { %7960 = vmatmul.msk.f32.gmra.mxu2 %vm3501_vm2, %v11556_v13 }
 0x615   : > { %v11497_v45 = vpop.f32.mrf.mxu0 }
 0x616   : > { %v4145_v9 = vpop.f32.mrf.mxu2 }
 0x617   : > { %7866 = vmatmul.msk.f32.gmra.mxu3 %vm3646_vm3, %v4145_v9 }
 0x618   : > { %7882 = vmatmul.msk.f32.gmra.mxu0 %vm3501_vm2, %v11502_v42 }
 0x61b   : > { %7961 = vmatmul.msk.f32.gmra.mxu2 %vm3501_vm2, %v11572_v11 }
 0x61d   : > { %v11514_v1 = vpop.f32.mrf.mxu0 }
 0x61e   : > { %v4148_v24 = vpop.f32.mrf.mxu2 }
 0x61f   : > { %7867 = vmatmul.msk.f32.gmra.mxu3 %vm3646_vm3, %v4148_v24  ;;  %v11618_v24 = vld [vmem:[%s13388_s4 + $0x1e8] sm:$0xff] }
 0x620   : > { %7883 = vmatmul.msk.f32.gmra.mxu0 %vm3501_vm2, %v11519_v51  ;;  %13424 = vst [vmem:[#allocation40_spill] sm:$0xff] %v11618_v24 }
 0x625   : > { %v3977_v18 = vpop.f32.mrf.mxu0 }
 0x626   : > { %7834 = vmatmul.msk.f32.vlgmr.msrb.gmra.mxu1 %vm3646_vm3, %v3977_v18  ;;  %v4427_v30 = vpop.f32.mrf.mxu2  ;;  %v11604_v18 = vld [vmem:[%s13388_s4 + $0x1e0] sm:$0xff] }
 0x627   : > { %7912 = vmatmul.msk.f32.vlgmr.msra.gmra.mxu3 %vm3646_vm3, %v4427_v30  ;;  %13423 = vst [vmem:[#allocation43_spill] sm:$0xff] %v11604_v18 }
 0x628   : > { %7928 = vmatmul.msk.f32.vlgmr.msrb.gmra.mxu0 %vm3501_vm2, %v11534_v40 }
 0x62a   : > { %v11576_v58 = vpop.f32.mrf.mxu3 }
 0x62d   : > { %v3980_v5 = vpop.f32.mrf.mxu0 }
 0x62e   : > { %7835 = vmatmul.msk.f32.gmra.mxu1 %vm3646_vm3, %v3980_v5  ;;  %v4430_v5 = vpop.f32.mrf.mxu2 }
 0x62f   : > { %7913 = vmatmul.msk.f32.gmra.mxu3 %vm3646_vm3, %v4430_v5  ;;  %v11640_v5 = vld [vmem:[%s13388_s4 + $0x1f8] sm:$0xff] }
 0x630   : > { %7929 = vmatmul.msk.f32.gmra.mxu0 %vm3501_vm2, %v11550_v44  ;;  %13426 = vst [vmem:[#allocation58_spill] sm:$0xff] %v11640_v5 }
 0x632   : > { %v11598_v38 = vpop.f32.mrf.mxu3 }
 0x635   : > { %v3983_v56 = vpop.f32.mrf.mxu0 }
 0x636   : > { %7836 = vmatmul.msk.f32.gmra.mxu1 %vm3646_vm3, %v3983_v56 }
 0x638   : > { %7930 = vmatmul.msk.f32.gmra.mxu0 %vm3501_vm2, %v11566_v43 }
 0x63a   : > { %v11613_v9 = vpop.f32.mrf.mxu3 }
 0x63d   : > { %v3986_v20 = vpop.f32.mrf.mxu0 }
 0x63e   : > { %7837 = vmatmul.msk.f32.gmra.mxu1 %vm3646_vm3, %v3986_v20  ;;  %v4433_v20 = vpop.f32.mrf.mxu2 }
 0x63f   : > { %7914 = vmatmul.msk.f32.gmra.mxu3 %vm3646_vm3, %v4433_v20 }
 0x640   : > { %7931 = vmatmul.msk.f32.gmra.mxu0 %vm3501_vm2, %v11584_v61 }
 0x642   : > { %v11631_v30 = vpop.f32.mrf.mxu3 }
 0x645   : > { %v3989_v52 = vpop.f32.mrf.mxu0 }
 0x646   : > { %7838 = vmatmul.msk.f32.gmra.mxu1 %vm3646_vm3, %v3989_v52  ;;  %v4436_v52 = vpop.f32.mrf.mxu2 }
 0x647   : > { %7915 = vmatmul.msk.f32.gmra.mxu3 %vm3646_vm3, %v4436_v52 }
 0x648   : > { %7932 = vmatmul.msk.f32.gmra.mxu0 %vm3501_vm2, %v11604_v18 }
 0x64a   : > { %v11645_v20 = vpop.f32.mrf.mxu3 }
 0x64d   : > { %v3992_v56 = vpop.f32.mrf.mxu0 }
 0x64e   : > { %7839 = vmatmul.msk.f32.gmra.mxu1 %vm3646_vm3, %v3992_v56  ;;  %v11642_v56 = vpop.f32.mrf.mxu1 }
 0x650   : > { %7933 = vmatmul.msk.f32.gmra.mxu0 %vm3501_vm2, %v11618_v24 }
 0x652   : > { %v11653_v49 = vpop.f32.mrf.mxu3 }
 0x655   : > { %v3995_v48 = vpop.f32.mrf.mxu0 }
 0x656   : > { %7840 = vmatmul.msk.f32.gmra.mxu1 %vm3646_vm3, %v3995_v48  ;;  %v4439_v48 = vpop.f32.mrf.mxu2  ;;  %v11651_v52 = vpop.f32.mrf.mxu1 }
 0x657   : > { %7916 = vmatmul.msk.f32.gmra.mxu3 %vm3646_vm3, %v4439_v48 }
 0x658   : > { %7934 = vmatmul.msk.f32.gmra.mxu0 %vm3501_vm2, %v11629_v63  ;;  %v7936_v63 = vld [vmem:[%s12929_s5 + $0x70] sm:$0xff] }
 0x65a   : > { %v11660_v26 = vpop.f32.mrf.mxu3 }
 0x65d   : > { %v3998_v35 = vpop.f32.mrf.mxu0 }
 0x65e   : > { %7841 = vmatmul.msk.f32.gmra.mxu1 %vm3646_vm3, %v3998_v35  ;;  %v4442_v32 = vpop.f32.mrf.mxu2  ;;  %v11657_v37 = vpop.f32.mrf.mxu1 }
 0x65f   : > { %7917 = vmatmul.msk.f32.gmra.mxu3 %vm3646_vm3, %v4442_v32 }
 0x660   : > { %7935 = vmatmul.msk.f32.gmra.mxu0 %vm3501_vm2, %v11640_v5 }
 0x662   : > { %v11666_v32 = vpop.f32.mrf.mxu3 }
 0x665   : > { %v4277_v53 = vpop.f32.mrf.mxu0 }
 0x666   : > { %7886 = vmatmul.msk.f32.vlgmr.msra.gmra.mxu1 %vm3646_vm3, %v4277_v53  ;;  %v4445_v35 = vpop.f32.mrf.mxu2  ;;  %v11664_v57 = vpop.f32.mrf.mxu1 }
 0x667   : > { %7918 = vmatmul.msk.f32.gmra.mxu3 %vm3646_vm3, %v4445_v35  ;;  %v7962_v35 = vld [vmem:[%s12929_s5 + $0x80] sm:$0xff] }
 0x66d   : > { %v4280_v34 = vpop.f32.mrf.mxu0 }
 0x66e   : > { %7887 = vmatmul.msk.f32.gmra.mxu1 %vm3646_vm3, %v4280_v34  ;;  %v4448_v53 = vpop.f32.mrf.mxu2  ;;  %v7963_v34 = vld [vmem:[%s12929_s5 + $0x88] sm:$0xff]  ;;  %v11685_v24 = vpop.f32.mrf.mxu1 }
 0x66f   : > { %7919 = vmatmul.msk.f32.gmra.mxu3 %vm3646_vm3, %v4448_v53  ;;  %v7937_v53 = vld [vmem:[%s12929_s5 + $0x78] sm:$0xff] }
 0x670   : > { %4792 = vmatpush.msrb.mxu3 %v7963_v34  ;;  %4642 = vmatpush.msrb.mxu1 %v7937_v53 }
 0x672   : > { %4793 = vmatpush.msrb.mxu3 %v7962_v35  ;;  %4643 = vmatpush.msrb.mxu1 %v7936_v63 }
 0x675   : > { %v4283_v48 = vpop.f32.mrf.mxu0 }
 0x676   : > { %7888 = vmatmul.msk.f32.gmra.mxu1 %vm3646_vm3, %v4283_v48  ;;  %v4727_v48 = vpop.f32.mrf.mxu2  ;;  %v11691_v53 = vpop.f32.mrf.mxu1 }
 0x677   : > { %7964 = vmatmul.msk.f32.vlgmr.msrb.gmra.mxu3 %vm3646_vm3, %v4727_v48 }
 0x67d   : > { %v4286_v55 = vpop.f32.mrf.mxu0 }
 0x67e   : > { %7889 = vmatmul.msk.f32.gmra.mxu1 %vm3646_vm3, %v4286_v55  ;;  %v11679_v55 = vpop.f32.mrf.mxu3  ;;  %v4730_v34 = vpop.f32.mrf.mxu2 }
 0x67f   : > { %7965 = vmatmul.msk.f32.gmra.mxu3 %vm3646_vm3, %v4730_v34  ;;  %v11697_v63 = vpop.f32.mrf.mxu1 }
 0x685   : > { %v4289_v5 = vpop.f32.mrf.mxu0 }
 0x686   : > { %7890 = vmatmul.msk.f32.gmra.mxu1 %vm3646_vm3, %v4289_v5  ;;  %v11688_v48 = vpop.f32.mrf.mxu3  ;;  %v4733_v18 = vpop.f32.mrf.mxu2 }
 0x687   : > { %7966 = vmatmul.msk.f32.gmra.mxu3 %vm3646_vm3, %v4733_v18 }
 0x68d   : > { %v4292_v35 = vpop.f32.mrf.mxu0 }
 0x68e   : > { %7891 = vmatmul.msk.f32.gmra.mxu1 %vm3646_vm3, %v4292_v35  ;;  %v11694_v43 = vpop.f32.mrf.mxu3  ;;  %v4736_v5 = vpop.f32.mrf.mxu2 }
 0x68f   : > { %7967 = vmatmul.msk.f32.gmra.mxu3 %vm3646_vm3, %v4736_v5 }
 0x695   : > { %v4295_v61 = vpop.f32.mrf.mxu0 }
 0x696   : > { %7892 = vmatmul.msk.f32.gmra.mxu1 %vm3646_vm3, %v4295_v61  ;;  %v11700_v44 = vpop.f32.mrf.mxu3  ;;  %v4739_v35 = vpop.f32.mrf.mxu2 }
 0x697   : > { %7968 = vmatmul.msk.f32.gmra.mxu3 %vm3646_vm3, %v4739_v35 }
 0x69d   : > { %v4298_v34 = vpop.f32.mrf.mxu0 }
 0x69e   : > { %7893 = vmatmul.msk.f32.gmra.mxu1 %vm3646_vm3, %v4298_v34  ;;  %v11706_v11 = vpop.f32.mrf.mxu3  ;;  %v4742_v61 = vpop.f32.mrf.mxu2 }
 0x69f   : > { %7969 = vmatmul.msk.f32.gmra.mxu3 %vm3646_vm3, %v4742_v61 }
 0x6a3   : > { %v11703_v40 = vpop.f32.mrf.mxu1 }
 0x6a5   : > { %v4577_v18 = vpop.f32.mrf.mxu0 }
 0x6a6   : > { %7938 = vmatmul.msk.f32.vlgmr.msrb.gmra.mxu1 %vm3646_vm3, %v4577_v18  ;;  %v11712_v13 = vpop.f32.mrf.mxu3  ;;  %v4745_v34 = vpop.f32.mrf.mxu2 }
 0x6a7   : > { %7970 = vmatmul.msk.f32.gmra.mxu3 %vm3646_vm3, %v4745_v34 }
 0x6ab   : > { %v11709_v51 = vpop.f32.mrf.mxu1 }
 0x6ad   : > { %v4580_v5 = vpop.f32.mrf.mxu0 }
 0x6ae   : > { %7939 = vmatmul.msk.f32.gmra.mxu1 %vm3646_vm3, %v4580_v5  ;;  %v11718_v6 = vpop.f32.mrf.mxu3  ;;  %v4748_v18 = vpop.f32.mrf.mxu2 }
 0x6af   : > { %7971 = vmatmul.msk.f32.gmra.mxu3 %vm3646_vm3, %v4748_v18 }
 0x6b3   : > { %v11715_v42 = vpop.f32.mrf.mxu1 }
 0x6b5   : > { %v4583_v35 = vpop.f32.mrf.mxu0 }
 0x6b6   : > { %7940 = vmatmul.msk.f32.gmra.mxu1 %vm3646_vm3, %v4583_v35  ;;  %v11724_v39 = vpop.f32.mrf.mxu3 }
 0x6bb   : > { %v11721_v27 = vpop.f32.mrf.mxu1 }
 0x6bd   : > { %v4586_v61 = vpop.f32.mrf.mxu0 }
 0x6be   : > { %7941 = vmatmul.msk.f32.gmra.mxu1 %vm3646_vm3, %v4586_v61  ;;  %v11727_v0 = vpop.f32.mrf.mxu3 }
 0x6bf   : > { %13427 = vst [vmem:[#allocation46_spill] sm:$0xff] %v11727_v0 }
 0x6c3   : > { %v4057_v5 = vpop.f32.mrf.mxu1 }
 0x6c5   : > { %v4589_v54 = vpop.f32.mrf.mxu0 }
 0x6c6   : > { %7942 = vmatmul.msk.f32.gmra.mxu1 %vm3646_vm3, %v4589_v54  ;;  %v11731_v35 = vpop.f32.mrf.mxu3 }
 0x6c7   : > { %13428 = vst [vmem:[#allocation50_spill] sm:$0xff] %v11731_v35  ;;  %v3766_v35 = vadd.f32 %v11664_v57, %v11460_v15  ;;  %v3757_v15 = vadd.f32 %v11642_v56, %v11402_v36 }
 0x6cb   : > { %v4060_v34 = vpop.f32.mrf.mxu1 }
 0x6cd   : > { %v4592_v50 = vpop.f32.mrf.mxu0 }
 0x6ce   : > { %7943 = vmatmul.msk.f32.gmra.mxu1 %vm3646_vm3, %v4592_v50  ;;  %v11734_v18 = vpop.f32.mrf.mxu3 }
 0x6cf   : > { %13429 = vst [vmem:[#allocation60_spill] sm:$0xff] %v11734_v18 }
 0x6d3   : > { %v4063_v3 = vpop.f32.mrf.mxu1 }
 0x6d5   : > { %v4595_v41 = vpop.f32.mrf.mxu0 }
 0x6d6   : > { %7944 = vmatmul.msk.f32.gmra.mxu1 %vm3646_vm3, %v4595_v41  ;;  %v11739_v23 = vpop.f32.mrf.mxu3 }
 0x6db   : > { %v4066_v25 = vpop.f32.mrf.mxu1 }
 0x6dd   : > { %v4598_v61 = vpop.f32.mrf.mxu0 }
 0x6de   : > { %7945 = vmatmul.msk.f32.gmra.mxu1 %vm3646_vm3, %v4598_v61  ;;  %v11743_v62 = vpop.f32.mrf.mxu3 }
 0x6e3   : > { %v11737_v7 = vpop.f32.mrf.mxu1 }
 0x6e6   : > { %v4510_v31 = vpop.f32.mrf.mxu3 }
 0x6eb   : > { %v11741_v54 = vpop.f32.mrf.mxu1 }
 0x6ee   : > { %v4513_v2 = vpop.f32.mrf.mxu3 }
 0x6f3   : > { %v11745_v50 = vpop.f32.mrf.mxu1 }
 0x6f6   : > { %v4516_v22 = vpop.f32.mrf.mxu3 }
 0x6fb   : > { %v4354_v17 = vpop.f32.mrf.mxu1 }
 0x6fe   : > { %v11747_v47 = vpop.f32.mrf.mxu3 }
 0x6ff   : > { %13430 = vst [vmem:[#allocation61_spill] sm:$0xff] %v11747_v47  ;;  %v7989_v47 = vld [vmem:[%s12931_s7 + $0x18] sm:$0xff] }
 0x700   : > { %4972 = vmatpush.msrb.mxu2 %v7989_v47 }
 0x703   : > { %v4357_v41 = vpop.f32.mrf.mxu1 }
 0x706   : > { %v11749_v29 = vpop.f32.mrf.mxu3 }
 0x707   : > { %13431 = vst [vmem:[#allocation63_spill] sm:$0xff] %v11749_v29  ;;  %v7988_v29 = vld [vmem:[%s12931_s7 + $0x10] sm:$0xff] }
 0x708   : > { %4973 = vmatpush.msrb.mxu2 %v7988_v29  ;;  %v3763_v29 = vadd.f32 %v11657_v37, %v11434_v21 }
 0x70b   : > { %v4360_v4 = vpop.f32.mrf.mxu1 }
 0x70e   : > { %v11753_v16 = vpop.f32.mrf.mxu3 }
 0x70f   : > { %13433 = vst [vmem:[#allocation53_spill] sm:$0xff] %v11753_v16 }
 0x713   : > { %v4363_v33 = vpop.f32.mrf.mxu1 }
 0x716   : > { %v11759_v19 = vpop.f32.mrf.mxu3 }
 0x717   : > { %13436 = vst [vmem:[#allocation59_spill] sm:$0xff] %v11759_v19  ;;  %v3769_v19 = vadd.f32 %v11685_v24, %v11480_v60 }
 0x719   : > { %v3924_v47 = vadd.f32 %v11653_v49, %v3769_v19 }
 0x71b   : > { %v4366_v61 = vpop.f32.mrf.mxu1  ;;  %v4074_v60 = vadd.f32 %v4060_v34, %v3924_v47 }
 0x71e   : > { %v11763_v0 = vpop.f32.mrf.mxu3 }
 0x71f   : > { %13438 = vst [vmem:[#allocation68_spill] sm:$0xff] %v11763_v0 }
 0x723   : > { %v11751_v8 = vpop.f32.mrf.mxu1 }
 0x724   : > { %13432 = vst [vmem:[#allocation66_spill] sm:$0xff] %v11751_v8 }
 0x726   : > { %v4810_v8 = vpop.f32.mrf.mxu3 }
 0x72b   : > { %v11755_v10 = vpop.f32.mrf.mxu1 }
 0x72c   : > { %13434 = vst [vmem:[#allocation65_spill] sm:$0xff] %v11755_v10  ;;  %v3772_v10 = vadd.f32 %v11691_v53, %v11497_v45  ;;  %v3923_v45 = vadd.f32 %v11645_v20, %v3766_v35 }
 0x72e   : > { %v3925_v0 = vadd.f32 %v11660_v26, %v3772_v10  ;;  %v3760_v26 = vadd.f32 %v11651_v52, %v11418_v12  ;;  %v3922_v10 = vadd.f32 %v11631_v30, %v3763_v29  ;;  %v4073_v57 = vadd.f32 %v4057_v5, %v3923_v45  ;;  %v13444_v29 = vld [vmem:[#allocation46_spill] sm:$0xff] }
 0x72f   : > { %v3754_v12 = vadd.f32 %v11624_v28, %v11386_v59 }
 0x730   : > { %v4075_v18 = vadd.f32 %v4063_v3, %v3925_v0  ;;  %v4813_v3 = vpop.f32.mrf.mxu3  ;;  %v3921_v37 = vadd.f32 %v11613_v9, %v3760_v26  ;;  %v4072_v21 = vadd.f32 %v11721_v27, %v3922_v10 }
 0x731   : > { %v3919_v9 = vadd.f32 %v11576_v58, %v3754_v12 }
 0x732   : > { %v4225_v49 = vadd.f32 %v11718_v6, %v4075_v18  ;;  %v4071_v6 = vadd.f32 %v11715_v42, %v3921_v37  ;;  %v13441_v18 = vld [vmem:[#allocation50_spill] sm:$0xff] }
 0x733   : > { %v11757_v14 = vpop.f32.mrf.mxu1  ;;  %v4069_v59 = vadd.f32 %v11703_v40, %v3919_v9  ;;  %v13445_v45 = vld [vmem:[#allocation65_spill] sm:$0xff] }
 0x734   : > { %13435 = vst [vmem:[#allocation52_spill] sm:$0xff] %v11757_v14  ;;  %v4375_v0 = vadd.f32 %v4363_v33, %v4225_v49  ;;  %v13447_v49 = vld [vmem:[#allocation66_spill] sm:$0xff] }
 0x736   : > { %v4525_v56 = vadd.f32 %v4513_v2, %v4375_v0 }
 0x73b   : > { %v11761_v46 = vpop.f32.mrf.mxu1 }
 0x73c   : > { %13437 = vst [vmem:[#allocation69_spill] sm:$0xff] %v11761_v46  ;;  %v3775_v46 = vadd.f32 %v11697_v63, %v11514_v1  ;;  %v3920_v1 = vadd.f32 %v11598_v38, %v3757_v15  ;;  %v4221_v38 = vadd.f32 %v11694_v43, %v4071_v6  ;;  %v4816_v63 = vpop.f32.mrf.mxu3 }
 0x73e   : > { %v3926_v53 = vadd.f32 %v11666_v32, %v3775_v46  ;;  %v4224_v46 = vadd.f32 %v11712_v13, %v4074_v60  ;;  %v4070_v27 = vadd.f32 %v11709_v51, %v3920_v1  ;;  %v4222_v13 = vadd.f32 %v11700_v44, %v4072_v21  ;;  %v13446_v60 = vld [vmem:[#allocation59_spill] sm:$0xff]  ;;  %v13450_v1 = vld [vmem:[#allocation61_spill] sm:$0xff] }
 0x73f   : > { %v4219_v44 = vadd.f32 %v11679_v55, %v4069_v59  ;;  %v13449_v21 = vld [vmem:[#allocation63_spill] sm:$0xff] }
 0x740   : > { %v4076_v19 = vadd.f32 %v4066_v25, %v3926_v53  ;;  %v4223_v25 = vadd.f32 %v11706_v11, %v4073_v57  ;;  %v4374_v30 = vadd.f32 %v4360_v4, %v4224_v46  ;;  %v4372_v28 = vadd.f32 %v4354_v17, %v4222_v13  ;;  %v8344_v59 = vld [vmem:[%s13388_s4 + $0x8] sm:$0xff] }
 0x741   : > { %v4220_v11 = vadd.f32 %v11688_v48, %v4070_v27  ;;  %v4371_v4 = vadd.f32 %v11745_v50, %v4221_v38  ;;  %v4369_v5 = vadd.f32 %v11737_v7, %v4219_v44  ;;  %v13439_v48 = vld [vmem:[#allocation60_spill] sm:$0xff]  ;;  %v8345_v38 = vld [vmem:[%s13388_s4 + $0x48] sm:$0xff] }
 0x742   : > { %v4226_v36 = vadd.f32 %v11724_v39, %v4076_v19  ;;  %v4373_v33 = vadd.f32 %v4357_v41, %v4223_v25  ;;  %v4524_v42 = vadd.f32 %v4510_v31, %v4374_v30  ;;  %v4522_v40 = vadd.f32 %v11739_v23, %v4372_v28  ;;  %v13442_v50 = vld [vmem:[#allocation52_spill] sm:$0xff]  ;;  %v13448_v19 = vld [vmem:[#allocation53_spill] sm:$0xff] }
 0x743   : > { %v4657_v16 = vpop.f32.mrf.mxu1  ;;  %v4370_v2 = vadd.f32 %v11741_v54, %v4220_v11  ;;  %v4521_v34 = vadd.f32 %v13439_v48, %v4371_v4  ;;  %v13443_v23 = vld [vmem:[#allocation68_spill] sm:$0xff]  ;;  %v4519_v7 = vadd.f32 %v13444_v29, %v4369_v5  ;;  %v8350_v4 = vld [vmem:[%s13388_s4 + $0x20] sm:$0xff]  ;;  %v4889_v5 = vld [vmem:[%s12931_s7 + $0x8] sm:$0xff] }
 0x744   : > { %v4376_v20 = vadd.f32 %v4366_v61, %v4226_v36  ;;  %v4523_v39 = vadd.f32 %v11743_v62, %v4373_v33  ;;  %v8346_v28 = vld [vmem:[%s13388_s4 + $0x10] sm:$0xff]  ;;  %v8349_v11 = vld [vmem:[%s13388_s4 + $0x58] sm:$0xff]  ;;  %5037 = vmatpush.msra.mxu3 %v4889_v5  ;;  %v4888_v48 = vld [vmem:[%s12931_s7] sm:$0xff] }
 0x745   : > { %v4520_v54 = vadd.f32 %v13441_v18, %v4370_v2  ;;  %v4671_v41 = vadd.f32 %v13442_v50, %v4521_v34  ;;  %v8354_v44 = vld [vmem:[%s13388_s4 + $0x30] sm:$0xff]  ;;  %v8362_v34 = vld [vmem:[%s13388_s4 + $0xa0] sm:$0xff] }
 0x746   : > { %v4526_v58 = vadd.f32 %v4516_v22, %v4376_v20  ;;  %v4673_v43 = vadd.f32 %v4657_v16, %v4523_v39  ;;  %v8337_v22 = vld [vmem:[%s12930_s6] ss:$0 sm:$0xff]  ;;  %v8355_v2 = vld [vmem:[%s13388_s4 + $0x70] sm:$0xff]  ;;  %5038 = vmatpush.msra.mxu3 %v4888_v48 }
 0x747   : > { %v4670_v53 = vadd.f32 %v13445_v45, %v4520_v54  ;;  %v4821_v15 = vadd.f32 %v13448_v19, %v4671_v41  ;;  %v8343_v20 = vld [vmem:[%s13388_s4 + $0x40] sm:$0xff]  ;;  %v8015_v45 = vld [vmem:[%s12931_s7 + $0x28] sm:$0xff] }
 0x748   : > { %v4823_v16 = vadd.f32 %v13443_v23, %v4673_v43  ;;  %v8351_v39 = vld [vmem:[%s13388_s4 + $0x60] sm:$0xff]  ;;  %v8359_v43 = vld [vmem:[%s13388_s4 + $0x88] sm:$0xff] }
 0x749   : > { %v4820_v46 = vadd.f32 %v13449_v21, %v4670_v53  ;;  %v4833_v6 = vadd.f32 %v8337_v22, %v4821_v15  ;;  %v8366_v18 = vld [vmem:[%s13388_s4 + $0x100] sm:$0xff]  ;;  %v8368_v19 = vld [vmem:[%s13388_s4 + $0x128] sm:$0xff] }
 0x74a   : > { %v13451_v41 = vld [vmem:[#allocation33_spill] sm:$0xff]  ;;  %v13454_v21 = vld [vmem:[#allocation14_spill] sm:$0xff]  ;;  %v13471_v48 = vld [vmem:[#allocation71_spill] sm:$0xff] }
 0x74b   : > { %v4660_v14 = vpop.f32.mrf.mxu1  ;;  %v4832_v36 = vadd.f32 %v8337_v22, %v4820_v46  ;;  %v11849_v27 = vmax.f32 %v4833_v6, 0.0  ;;  %v8369_v6 = vld [vmem:[%s13388_s4 + $0xc0] sm:$0xff] }
 0x74c   : > { %v4674_v51 = vadd.f32 %v4660_v14, %v4524_v42  ;;  %v13440_v14 = vld [vmem:[#allocation69_spill] sm:$0xff]  ;;  %v8347_v42 = vld [vmem:[%s13388_s4 + $0x50] sm:$0xff] }
 0x74d   : > { %v4672_v62 = vadd.f32 %v13440_v14, %v4522_v40  ;;  %v11854_v13 = vmax.f32 %v4832_v36, 0.0  ;;  %v8358_v40 = vld [vmem:[%s13388_s4 + $0x80] sm:$0xff]  ;;  %v8364_v14 = vld [vmem:[%s13388_s4 + $0xb0] sm:$0xff] }
 0x74e   : > { %v4824_v55 = vadd.f32 %v4810_v8, %v4674_v51  ;;  %v4669_v8 = vadd.f32 %v13447_v49, %v4519_v7  ;;  %v8353_v51 = vld [vmem:[%s13388_s4 + $0x68] sm:$0xff]  ;;  %v13456_v36 = vld [vmem:[#allocation36_spill] sm:$0xff] }
 0x74f   : > { %v4822_v26 = vadd.f32 %v13446_v60, %v4672_v62  ;;  %v8365_v62 = vld [vmem:[%s13388_s4 + $0xb8] sm:$0xff]  ;;  %v13453_v7 = vld [vmem:[#allocation22_spill] sm:$0xff] }
 0x750   : > { %v4836_v10 = vadd.f32 %v8337_v22, %v4824_v55 }
 0x751   : > { %v4834_v0 = vadd.f32 %v8337_v22, %v4822_v26  ;;  %v8014_v26 = vld [vmem:[%s12931_s7 + $0x20] sm:$0xff] }
 0x752   : > { %v11833_v12 = vmax.f32 %v4836_v10, 0.0  ;;  %v8367_v10 = vld [vmem:[%s13388_s4 + $0x120] sm:$0xff] }
 0x753   : > { %v4663_v24 = vpop.f32.mrf.mxu1  ;;  %v11844_v30 = vmax.f32 %v4834_v0, 0.0 }
 0x754   : > { %v4675_v52 = vadd.f32 %v4663_v24, %v4525_v56  ;;  %v4819_v24 = vadd.f32 %v13450_v1, %v4669_v8  ;;  %v8342_v56 = vld [vmem:[%s13388_s4] sm:$0xff]  ;;  %v13455_v1 = vld [vmem:[#allocation28_spill] sm:$0xff] }
 0x756   : > { %v4825_v17 = vadd.f32 %v4813_v3, %v4675_v52  ;;  %v4835_v3 = vadd.f32 %v8337_v22, %v4823_v16  ;;  %v4831_v9 = vadd.f32 %v8337_v22, %v4819_v24  ;;  %v8348_v52 = vld [vmem:[%s13388_s4 + $0x18] sm:$0xff] }
 0x758   : > { %v4837_v61 = vadd.f32 %v8337_v22, %v4825_v17  ;;  %v11839_v25 = vmax.f32 %v4835_v3, 0.0  ;;  %v11859_v33 = vmax.f32 %v4831_v9, 0.0  ;;  %v8360_v17 = vld [vmem:[%s13388_s4 + $0x90] sm:$0xff] }
 0x75a   : > { %v11827_v37 = vmax.f32 %v4837_v61, 0.0  ;;  %v13452_v61 = vld [vmem:[#allocation23_spill] sm:$0xff] }
 0x75b   : > { %v4666_v32 = vpop.f32.mrf.mxu1 }
 0x75c   : > { %v4676_v31 = vadd.f32 %v4666_v32, %v4526_v58  ;;  %v8352_v58 = vld [vmem:[%s13388_s4 + $0x28] sm:$0xff]  ;;  %v8356_v32 = vld [vmem:[%s13388_s4 + $0x38] sm:$0xff] }
 0x75e   : > { %v4826_v35 = vadd.f32 %v4816_v63, %v4676_v31  ;;  %v8357_v63 = vld [vmem:[%s13388_s4 + $0x78] sm:$0xff] }
 0x75f   : > { %v8361_v31 = vld [vmem:[%s13388_s4 + $0x98] sm:$0xff] }
 0x760   : > { %v4838_v47 = vadd.f32 %v8337_v22, %v4826_v35  ;;  %v8363_v22 = vld [vmem:[%s13388_s4 + $0xa8] sm:$0xff] }
 0x762   : > { %v11823_v57 = vmax.f32 %v4838_v47, 0.0 }
 0x764   : > { %4855 = vmatpush.msra.mxu0 %v11823_v57  ;;  %4898 = vmatpush.msra.mxu1 %v11823_v57 }
 0x765   : > { %5189 = vmatpush.msra.mxu2 %v11823_v57 }
 0x766   : > { %4856 = vmatpush.msra.mxu0 %v11827_v37  ;;  %4899 = vmatpush.msra.mxu1 %v11827_v37 }
 0x767   : > { %5190 = vmatpush.msra.mxu2 %v11827_v37 }
 0x768   : > { %4857 = vmatpush.msra.mxu0 %v11833_v12  ;;  %4900 = vmatpush.msra.mxu1 %v11833_v12 }
 0x769   : > { %5191 = vmatpush.msra.mxu2 %v11833_v12 }
 0x76a   : > { %4858 = vmatpush.msra.mxu0 %v11839_v25  ;;  %4901 = vmatpush.msra.mxu1 %v11839_v25 }
 0x76b   : > { %5192 = vmatpush.msra.mxu2 %v11839_v25 }
 0x76c   : > { %4859 = vmatpush.msra.mxu0 %v11844_v30  ;;  %4902 = vmatpush.msra.mxu1 %v11844_v30 }
 0x76d   : > { %5193 = vmatpush.msra.mxu2 %v11844_v30 }
 0x76e   : > { %4860 = vmatpush.msra.mxu0 %v11849_v27  ;;  %4903 = vmatpush.msra.mxu1 %v11849_v27 }
 0x76f   : > { %5194 = vmatpush.msra.mxu2 %v11849_v27 }
 0x770   : > { %4861 = vmatpush.msra.mxu0 %v11854_v13  ;;  %4904 = vmatpush.msra.mxu1 %v11854_v13 }
 0x771   : > { %5195 = vmatpush.msra.mxu2 %v11854_v13 }
 0x772   : > { %4862 = vmatpush.msra.mxu0 %v11859_v33  ;;  %4905 = vmatpush.msra.mxu1 %v11859_v33 }
 0x773   : > { %5196 = vmatpush.msra.mxu2 %v11859_v33  ;;  %7972 = vmatmul.msk.f32.vlgmr.msra.gmra.mxu0 %vm3501_vm2, %v8342_v56  ;;  %v8370_v56 = vld [vmem:[%s13388_s4 + $0xc8] sm:$0xff] }
 0x774   : > { %7980 = vmatmul.msk.f32.vlgmr.msra.gmra.mxu1 %vm3501_vm2, %v8343_v20  ;;  %5072 = vmatpush.msrb.mxu0 %v11823_v57  ;;  %v8373_v20 = vld [vmem:[%s13388_s4 + $0xe0] sm:$0xff] }
 0x775   : > { %5146 = vmatpush.msrb.mxu1 %v8015_v45 }
 0x776   : > { %5073 = vmatpush.msrb.mxu0 %v11827_v37 }
 0x777   : > { %5147 = vmatpush.msrb.mxu1 %v8014_v26 }
 0x778   : > { %5074 = vmatpush.msrb.mxu0 %v11833_v12 }
 0x77a   : > { %5075 = vmatpush.msrb.mxu0 %v11839_v25 }
 0x77b   : > { %7973 = vmatmul.msk.f32.gmra.mxu0 %vm3501_vm2, %v8344_v59  ;;  %v13460_v59 = vld [vmem:[#allocation32_spill] sm:$0xff] }
 0x77c   : > { %7981 = vmatmul.msk.f32.gmra.mxu1 %vm3501_vm2, %v8345_v38  ;;  %5076 = vmatpush.msrb.mxu0 %v11844_v30 }
 0x77e   : > { %5077 = vmatpush.msrb.mxu0 %v11849_v27 }
 0x780   : > { %5078 = vmatpush.msrb.mxu0 %v11854_v13 }
 0x782   : > { %5079 = vmatpush.msrb.mxu0 %v11859_v33 }
 0x783   : > { %7974 = vmatmul.msk.f32.gmra.mxu0 %vm3501_vm2, %v8346_v28  ;;  %v8374_v28 = vld [vmem:[%s13388_s4 + $0xe8] sm:$0xff] }
 0x784   : > { %5306 = vmatpush.msra.mxu0 %v11823_v57  ;;  %7982 = vmatmul.msk.f32.gmra.mxu1 %vm3501_vm2, %v8347_v42  ;;  %v13461_v42 = vld [vmem:[#allocation11_spill] sm:$0xff] }
 0x786   : > { %5307 = vmatpush.msra.mxu0 %v11827_v37 }
 0x788   : > { %5308 = vmatpush.msra.mxu0 %v11833_v12 }
 0x78a   : > { %5309 = vmatpush.msra.mxu0 %v11839_v25 }
 0x78b   : > { %7975 = vmatmul.msk.f32.gmra.mxu0 %vm3501_vm2, %v8348_v52 }
 0x78c   : > { %5310 = vmatpush.msra.mxu0 %v11844_v30  ;;  %7983 = vmatmul.msk.f32.gmra.mxu1 %vm3501_vm2, %v8349_v11  ;;  %v8375_v11 = vld [vmem:[%s13388_s4 + $0xf0] sm:$0xff] }
 0x78e   : > { %5311 = vmatpush.msra.mxu0 %v11849_v27 }
 0x790   : > { %5312 = vmatpush.msra.mxu0 %v11854_v13 }
 0x792   : > { %5313 = vmatpush.msra.mxu0 %v11859_v33 }
 0x793   : > { %7976 = vmatmul.msk.f32.gmra.mxu0 %vm3501_vm2, %v8350_v4  ;;  %v13462_v4 = vld [vmem:[#allocation67_spill] sm:$0xff] }
 0x794   : > { %7984 = vmatmul.msk.f32.gmra.mxu1 %vm3501_vm2, %v8351_v39 }
 0x79b   : > { %7977 = vmatmul.msk.f32.gmra.mxu0 %vm3501_vm2, %v8352_v58  ;;  %v13463_v58 = vld [vmem:[#allocation21_spill] sm:$0xff] }
 0x79c   : > { %7985 = vmatmul.msk.f32.gmra.mxu1 %vm3501_vm2, %v8353_v51  ;;  %v13464_v51 = vld [vmem:[#allocation80_spill] sm:$0xff] }
 0x7a3   : > { %7978 = vmatmul.msk.f32.gmra.mxu0 %vm3501_vm2, %v8354_v44  ;;  %v13465_v44 = vld [vmem:[#allocation16_spill] sm:$0xff] }
 0x7a4   : > { %7986 = vmatmul.msk.f32.gmra.mxu1 %vm3501_vm2, %v8355_v2  ;;  %v13466_v2 = vld [vmem:[#allocation81_spill] sm:$0xff] }
 0x7ab   : > { %7979 = vmatmul.msk.f32.gmra.mxu0 %vm3501_vm2, %v8356_v32 }
 0x7ac   : > { %7987 = vmatmul.msk.f32.gmra.mxu1 %vm3501_vm2, %v8357_v63  ;;  %v13467_v63 = vld [vmem:[#allocation26_spill] sm:$0xff] }
 0x7b3   : > { %8006 = vmatmul.msk.f32.vlgmr.msrb.gmra.mxu0 %vm3501_vm2, %v8358_v40  ;;  %v13468_v40 = vld [vmem:[#allocation39_spill] sm:$0xff] }
 0x7b4   : > { %5540 = vmatpush.msrb.mxu0 %v11823_v57 }
 0x7b6   : > { %5541 = vmatpush.msrb.mxu0 %v11827_v37 }
 0x7b8   : > { %5542 = vmatpush.msrb.mxu0 %v11833_v12 }
 0x7ba   : > { %5543 = vmatpush.msrb.mxu0 %v11839_v25 }
 0x7bb   : > { %8007 = vmatmul.msk.f32.gmra.mxu0 %vm3501_vm2, %v8359_v43 }
 0x7bc   : > { %5544 = vmatpush.msrb.mxu0 %v11844_v30 }
 0x7be   : > { %5545 = vmatpush.msrb.mxu0 %v11849_v27 }
 0x7c0   : > { %5546 = vmatpush.msrb.mxu0 %v11854_v13 }
 0x7c2   : > { %5547 = vmatpush.msrb.mxu0 %v11859_v33 }
 0x7c3   : > { %8008 = vmatmul.msk.f32.gmra.mxu0 %vm3501_vm2, %v8360_v17  ;;  %v13469_v17 = vld [vmem:[#allocation79_spill] sm:$0xff] }
 0x7cb   : > { %8009 = vmatmul.msk.f32.gmra.mxu0 %vm3501_vm2, %v8361_v31  ;;  %v13470_v31 = vld [vmem:[#allocation77_spill] sm:$0xff] }
 0x7d3   : > { %8010 = vmatmul.msk.f32.gmra.mxu0 %vm3501_vm2, %v8362_v34  ;;  %v13472_v34 = vld [vmem:[#allocation74_spill] sm:$0xff] }
 0x7db   : > { %8011 = vmatmul.msk.f32.gmra.mxu0 %vm3501_vm2, %v8363_v22 }
 0x7e3   : > { %8012 = vmatmul.msk.f32.gmra.mxu0 %vm3501_vm2, %v8364_v14  ;;  %v13473_v14 = vld [vmem:[#allocation47_spill] sm:$0xff] }
 0x7eb   : > { %8013 = vmatmul.msk.f32.gmra.mxu0 %vm3501_vm2, %v8365_v62  ;;  %v8033_v62 = vld [vmem:[%s12931_s7 + $0x38] sm:$0xff] }
 0x7ec   : > { %5263 = vmatpush.msrb.mxu3 %v8033_v62 }
 0x7f0   : > { %v4864_v55 = vpop.f32.mrf.mxu0 }
 0x7f1   : > { %v4907_v35 = vpop.f32.mrf.mxu1  ;;  %7998 = vmatmul.msk.f32.vlgmr.msra.gmra.mxu3 %vm3646_vm3, %v4864_v55  ;;  %v13474_v55 = vld [vmem:[#allocation27_spill] sm:$0xff] }
 0x7f2   : > { %7990 = vmatmul.msk.f32.vlgmr.msrb.gmra.mxu2 %vm3646_vm3, %v4907_v35 }
 0x7f3   : > { %5423 = vmatpush.msrb.mxu2 %v11823_v57  ;;  %8042 = vmatmul.msk.f32.vlgmr.msra.gmra.mxu0 %vm3501_vm2, %v8366_v18  ;;  %v8032_v18 = vld [vmem:[%s12931_s7 + $0x30] sm:$0xff] }
 0x7f4   : > { %5774 = vmatpush.msra.mxu0 %v11823_v57  ;;  %5264 = vmatpush.msrb.mxu3 %v8032_v18 }
 0x7f5   : > { %5424 = vmatpush.msrb.mxu2 %v11827_v37 }
 0x7f6   : > { %5775 = vmatpush.msra.mxu0 %v11827_v37 }
 0x7f7   : > { %5425 = vmatpush.msrb.mxu2 %v11833_v12 }
 0x7f8   : > { %v4867_v54 = vpop.f32.mrf.mxu0  ;;  %5776 = vmatpush.msra.mxu0 %v11833_v12 }
 0x7f9   : > { %5426 = vmatpush.msrb.mxu2 %v11839_v25  ;;  %v4910_v50 = vpop.f32.mrf.mxu1  ;;  %7999 = vmatmul.msk.f32.gmra.mxu3 %vm3646_vm3, %v4867_v54  ;;  %v13475_v54 = vld [vmem:[#allocation76_spill] sm:$0xff] }
 0x7fa   : > { %7991 = vmatmul.msk.f32.gmra.mxu2 %vm3646_vm3, %v4910_v50  ;;  %5777 = vmatpush.msra.mxu0 %v11839_v25  ;;  %v8051_v50 = vld [vmem:[%s12931_s7 + $0x48] sm:$0xff] }
 0x7fb   : > { %5427 = vmatpush.msrb.mxu2 %v11844_v30  ;;  %8043 = vmatmul.msk.f32.gmra.mxu0 %vm3501_vm2, %v13451_v41  ;;  %v13476_v41 = vld [vmem:[#allocation70_spill] sm:$0xff] }
 0x7fc   : > { %5778 = vmatpush.msra.mxu0 %v11844_v30  ;;  %5380 = vmatpush.msra.mxu1 %v8051_v50 }
 0x7fd   : > { %5428 = vmatpush.msrb.mxu2 %v11849_v27 }
 0x7fe   : > { %5779 = vmatpush.msra.mxu0 %v11849_v27 }
 0x7ff   : > { %5429 = vmatpush.msrb.mxu2 %v11854_v13 }
 0x800   : > { %5780 = vmatpush.msra.mxu0 %v11854_v13  ;;  %v4870_v16 = vpop.f32.mrf.mxu0 }
 0x801   : > { %5430 = vmatpush.msrb.mxu2 %v11859_v33  ;;  %v4913_v23 = vpop.f32.mrf.mxu1  ;;  %8000 = vmatmul.msk.f32.gmra.mxu3 %vm3646_vm3, %v4870_v16 }
 0x802   : > { %7992 = vmatmul.msk.f32.gmra.mxu2 %vm3646_vm3, %v4913_v23  ;;  %5781 = vmatpush.msra.mxu0 %v11859_v33 }
 0x803   : > { %8044 = vmatmul.msk.f32.gmra.mxu0 %vm3501_vm2, %v13452_v61  ;;  %v8050_v61 = vld [vmem:[%s12931_s7 + $0x40] sm:$0xff] }
 0x804   : > { %5381 = vmatpush.msra.mxu1 %v8050_v61 }
 0x808   : > { %v4873_v29 = vpop.f32.mrf.mxu0 }
 0x809   : > { %v4916_v47 = vpop.f32.mrf.mxu1  ;;  %8001 = vmatmul.msk.f32.gmra.mxu3 %vm3646_vm3, %v4873_v29  ;;  %v13478_v29 = vld [vmem:[#allocation51_spill] sm:$0xff] }
 0x80a   : > { %7993 = vmatmul.msk.f32.gmra.mxu2 %vm3646_vm3, %v4916_v47  ;;  %v13477_v47 = vld [vmem:[#allocation73_spill] sm:$0xff] }
 0x80b   : > { %8045 = vmatmul.msk.f32.gmra.mxu0 %vm3501_vm2, %v13453_v7 }
 0x810   : > { %v4876_v60 = vpop.f32.mrf.mxu0 }
 0x811   : > { %v4919_v53 = vpop.f32.mrf.mxu1  ;;  %8002 = vmatmul.msk.f32.gmra.mxu3 %vm3646_vm3, %v4876_v60  ;;  %v13480_v60 = vld [vmem:[#allocation44_spill] sm:$0xff] }
 0x812   : > { %7994 = vmatmul.msk.f32.gmra.mxu2 %vm3646_vm3, %v4919_v53  ;;  %v13479_v53 = vld [vmem:[#allocation54_spill] sm:$0xff] }
 0x813   : > { %8046 = vmatmul.msk.f32.gmra.mxu0 %vm3501_vm2, %v8367_v10 }
 0x818   : > { %v4879_v8 = vpop.f32.mrf.mxu0 }
 0x819   : > { %v4922_v49 = vpop.f32.mrf.mxu1  ;;  %8003 = vmatmul.msk.f32.gmra.mxu3 %vm3646_vm3, %v4879_v8 }
 0x81a   : > { %7995 = vmatmul.msk.f32.gmra.mxu2 %vm3646_vm3, %v4922_v49  ;;  %v13481_v49 = vld [vmem:[#allocation82_spill] sm:$0xff] }
 0x81b   : > { %8047 = vmatmul.msk.f32.gmra.mxu0 %vm3501_vm2, %v8368_v19 }
 0x820   : > { %v4882_v3 = vpop.f32.mrf.mxu0 }
 0x821   : > { %v4925_v15 = vpop.f32.mrf.mxu1  ;;  %8004 = vmatmul.msk.f32.gmra.mxu3 %vm3646_vm3, %v4882_v3 }
 0x822   : > { %7996 = vmatmul.msk.f32.gmra.mxu2 %vm3646_vm3, %v4925_v15  ;;  %v13482_v15 = vld [vmem:[#allocation49_spill] sm:$0xff] }
 0x823   : > { %8048 = vmatmul.msk.f32.gmra.mxu0 %vm3501_vm2, %v13454_v21 }
 0x828   : > { %v4885_v0 = vpop.f32.mrf.mxu0 }
 0x829   : > { %v4928_v46 = vpop.f32.mrf.mxu1  ;;  %8005 = vmatmul.msk.f32.gmra.mxu3 %vm3646_vm3, %v4885_v0 }
 0x82a   : > { %7997 = vmatmul.msk.f32.gmra.mxu2 %vm3646_vm3, %v4928_v46  ;;  %v13483_v46 = vld [vmem:[#allocation56_spill] sm:$0xff] }
 0x82b   : > { %8049 = vmatmul.msk.f32.gmra.mxu0 %vm3501_vm2, %v13455_v1 }
 0x830   : > { %v5081_v24 = vpop.f32.mrf.mxu0 }
 0x831   : > { %8016 = vmatmul.msk.f32.vlgmr.msrb.gmra.mxu1 %vm3646_vm3, %v5081_v24  ;;  %v13484_v24 = vld [vmem:[#allocation57_spill] sm:$0xff] }
 0x832   : > { %8024 = vmatmul.msk.f32.vlgmr.msra.gmra.mxu2 %vm3501_vm2, %v8369_v6 }
 0x833   : > { %5657 = vmatpush.msra.mxu2 %v11823_v57  ;;  %8078 = vmatmul.msk.f32.vlgmr.msrb.gmra.mxu0 %vm3501_vm2, %v13456_v36  ;;  %v13457_v57 = vld [vmem:[#allocation37_spill] sm:$0xff] }
 0x835   : > { %5658 = vmatpush.msra.mxu2 %v11827_v37 }
 0x837   : > { %5659 = vmatpush.msra.mxu2 %v11833_v12  ;;  %v8371_v12 = vld [vmem:[%s13388_s4 + $0xd0] sm:$0xff] }
 0x838   : > { %v5084_v9 = vpop.f32.mrf.mxu0 }
 0x839   : > { %5660 = vmatpush.msra.mxu2 %v11839_v25  ;;  %8017 = vmatmul.msk.f32.gmra.mxu1 %vm3646_vm3, %v5084_v9  ;;  %v13458_v25 = vld [vmem:[#allocation24_spill] sm:$0xff] }
 0x83a   : > { %8025 = vmatmul.msk.f32.gmra.mxu2 %vm3501_vm2, %v8370_v56  ;;  %v8069_v56 = vld [vmem:[%s12931_s7 + $0x58] sm:$0xff] }
 0x83b   : > { %5661 = vmatpush.msra.mxu2 %v11844_v30  ;;  %8079 = vmatmul.msk.f32.gmra.mxu0 %vm3501_vm2, %v13457_v57  ;;  %v13485_v57 = vld [vmem:[#allocation43_spill] sm:$0xff] }
 0x83c   : > { %5497 = vmatpush.msra.mxu3 %v8069_v56 }
 0x83d   : > { %5662 = vmatpush.msra.mxu2 %v11849_v27  ;;  %v8372_v27 = vld [vmem:[%s13388_s4 + $0xd8] sm:$0xff] }
 0x83f   : > { %5663 = vmatpush.msra.mxu2 %v11854_v13  ;;  %v13459_v13 = vld [vmem:[#allocation35_spill] sm:$0xff] }
 0x840   : > { %v5087_v37 = vpop.f32.mrf.mxu0 }
 0x841   : > { %5664 = vmatpush.msra.mxu2 %v11859_v33  ;;  %8018 = vmatmul.msk.f32.gmra.mxu1 %vm3646_vm3, %v5087_v37 }
 0x842   : > { %8026 = vmatmul.msk.f32.gmra.mxu2 %vm3501_vm2, %v8371_v12 }
 0x843   : > { %8080 = vmatmul.msk.f32.gmra.mxu0 %vm3501_vm2, %v13458_v25  ;;  %v8068_v25 = vld [vmem:[%s12931_s7 + $0x50] sm:$0xff] }
 0x844   : > { %5498 = vmatpush.msra.mxu3 %v8068_v25 }
 0x848   : > { %v5090_v30 = vpop.f32.mrf.mxu0 }
 0x849   : > { %8019 = vmatmul.msk.f32.gmra.mxu1 %vm3646_vm3, %v5090_v30  ;;  %v8087_v30 = vld [vmem:[%s12931_s7 + $0x68] sm:$0xff] }
 0x84a   : > { %8027 = vmatmul.msk.f32.gmra.mxu2 %vm3501_vm2, %v8372_v27  ;;  %5614 = vmatpush.msrb.mxu1 %v8087_v30 }
 0x84b   : > { %8081 = vmatmul.msk.f32.gmra.mxu0 %vm3501_vm2, %v13459_v13  ;;  %v13486_v13 = vld [vmem:[#allocation40_spill] sm:$0xff] }
 0x850   : > { %v5093_v33 = vpop.f32.mrf.mxu0 }
 0x851   : > { %8020 = vmatmul.msk.f32.gmra.mxu1 %vm3646_vm3, %v5093_v33 }
 0x852   : > { %8028 = vmatmul.msk.f32.gmra.mxu2 %vm3501_vm2, %v8373_v20 }
 0x853   : > { %8082 = vmatmul.msk.f32.gmra.mxu0 %vm3501_vm2, %v13460_v59  ;;  %v8086_v59 = vld [vmem:[%s12931_s7 + $0x60] sm:$0xff] }
 0x854   : > { %5615 = vmatpush.msrb.mxu1 %v8086_v59 }
 0x858   : > { %v5096_v38 = vpop.f32.mrf.mxu0 }
 0x859   : > { %8021 = vmatmul.msk.f32.gmra.mxu1 %vm3646_vm3, %v5096_v38  ;;  %v13487_v38 = vld [vmem:[#allocation41_spill] sm:$0xff] }
 0x85a   : > { %8029 = vmatmul.msk.f32.gmra.mxu2 %vm3501_vm2, %v8374_v28 }
 0x85b   : > { %8083 = vmatmul.msk.f32.gmra.mxu0 %vm3501_vm2, %v13461_v42 }
 0x860   : > { %v5099_v52 = vpop.f32.mrf.mxu0 }
 0x861   : > { %8022 = vmatmul.msk.f32.gmra.mxu1 %vm3646_vm3, %v5099_v52 }
 0x862   : > { %8030 = vmatmul.msk.f32.gmra.mxu2 %vm3501_vm2, %v8375_v11 }
 0x863   : > { %8084 = vmatmul.msk.f32.gmra.mxu0 %vm3501_vm2, %v13462_v4  ;;  %v13488_v4 = vld [vmem:[#allocation58_spill] sm:$0xff] }
 0x868   : > { %v5102_v39 = vpop.f32.mrf.mxu0 }
 0x869   : > { %8023 = vmatmul.msk.f32.gmra.mxu1 %vm3646_vm3, %v5102_v39 }
 0x86a   : > { %8031 = vmatmul.msk.f32.gmra.mxu2 %vm3501_vm2, %v13463_v58 }
 0x86b   : > { %8085 = vmatmul.msk.f32.gmra.mxu0 %vm3501_vm2, %v13464_v51 }
 0x870   : > { %v5315_v16 = vpop.f32.mrf.mxu0 }
 0x871   : > { %8052 = vmatmul.msk.f32.vlgmr.msra.gmra.mxu1 %vm3646_vm3, %v5315_v16 }
 0x872   : > { %8060 = vmatmul.msk.f32.vlgmr.msrb.gmra.mxu2 %vm3501_vm2, %v13465_v44 }
 0x873   : > { %8114 = vmatmul.msk.f32.vlgmr.msra.gmra.mxu0 %vm3501_vm2, %v13466_v2 }
 0x874   : > { %v12224_v11 = vpop.f32.mrf.mxu3 }
 0x875   : > { %v12119_v32 = vpop.f32.mrf.mxu2 }
 0x878   : > { %v5318_v45 = vpop.f32.mrf.mxu0 }
 0x879   : > { %8053 = vmatmul.msk.f32.gmra.mxu1 %vm3646_vm3, %v5318_v45  ;;  %v8104_v45 = vld [vmem:[%s12931_s7 + $0x70] sm:$0xff] }
 0x87a   : > { %8061 = vmatmul.msk.f32.gmra.mxu2 %vm3501_vm2, %v13467_v63 }
 0x87b   : > { %8115 = vmatmul.msk.f32.gmra.mxu0 %vm3501_vm2, %v13468_v40 }
 0x87c   : > { %v12232_v44 = vpop.f32.mrf.mxu3 }
 0x87d   : > { %v12125_v43 = vpop.f32.mrf.mxu2 }
 0x880   : > { %v5321_v10 = vpop.f32.mrf.mxu0 }
 0x881   : > { %8054 = vmatmul.msk.f32.gmra.mxu1 %vm3646_vm3, %v5321_v10 }
 0x882   : > { %8062 = vmatmul.msk.f32.gmra.mxu2 %vm3501_vm2, %v13469_v17 }
 0x883   : > { %8116 = vmatmul.msk.f32.gmra.mxu0 %vm3501_vm2, %v13470_v31 }
 0x885   : > { %v12131_v5 = vpop.f32.mrf.mxu2 }
 0x888   : > { %v5324_v19 = vpop.f32.mrf.mxu0 }
 0x889   : > { %8055 = vmatmul.msk.f32.gmra.mxu1 %vm3646_vm3, %v5324_v19  ;;  %v8122_v19 = vld [vmem:[%s12931_s7 + $0x80] sm:$0xff] }
 0x88a   : > { %8063 = vmatmul.msk.f32.gmra.mxu2 %vm3501_vm2, %v13471_v48  ;;  %v12238_v48 = vpop.f32.mrf.mxu3 }
 0x88b   : > { %8117 = vmatmul.msk.f32.gmra.mxu0 %vm3501_vm2, %v13472_v34 }
 0x88d   : > { %v12137_v22 = vpop.f32.mrf.mxu2 }
 0x890   : > { %v5327_v21 = vpop.f32.mrf.mxu0 }
 0x891   : > { %8056 = vmatmul.msk.f32.gmra.mxu1 %vm3646_vm3, %v5327_v21 }
 0x892   : > { %8064 = vmatmul.msk.f32.gmra.mxu2 %vm3501_vm2, %v13473_v14 }
 0x893   : > { %8118 = vmatmul.msk.f32.gmra.mxu0 %vm3501_vm2, %v13474_v55  ;;  %v12246_v55 = vpop.f32.mrf.mxu3 }
 0x895   : > { %v12146_v35 = vpop.f32.mrf.mxu2 }
 0x898   : > { %v5330_v1 = vpop.f32.mrf.mxu0 }
 0x899   : > { %8057 = vmatmul.msk.f32.gmra.mxu1 %vm3646_vm3, %v5330_v1 }
 0x89a   : > { %8065 = vmatmul.msk.f32.gmra.mxu2 %vm3501_vm2, %v13475_v54 }
 0x89b   : > { %8119 = vmatmul.msk.f32.gmra.mxu0 %vm3501_vm2, %v13476_v41  ;;  %v8105_v41 = vld [vmem:[%s12931_s7 + $0x78] sm:$0xff]  ;;  %v12255_v16 = vpop.f32.mrf.mxu3 }
 0x89d   : > { %v12158_v23 = vpop.f32.mrf.mxu2 }
 0x8a0   : > { %v5333_v36 = vpop.f32.mrf.mxu0 }
 0x8a1   : > { %8058 = vmatmul.msk.f32.gmra.mxu1 %vm3646_vm3, %v5333_v36 }
 0x8a2   : > { %8066 = vmatmul.msk.f32.gmra.mxu2 %vm3501_vm2, %v13477_v47 }
 0x8a3   : > { %8120 = vmatmul.msk.f32.gmra.mxu0 %vm3501_vm2, %v13478_v29 }
 0x8a5   : > { %v12168_v7 = vpop.f32.mrf.mxu2 }
 0x8a8   : > { %v5336_v12 = vpop.f32.mrf.mxu0 }
 0x8a9   : > { %8059 = vmatmul.msk.f32.gmra.mxu1 %vm3646_vm3, %v5336_v12 }
 0x8aa   : > { %8067 = vmatmul.msk.f32.gmra.mxu2 %vm3501_vm2, %v13479_v53  ;;  %v8123_v53 = vld [vmem:[%s12931_s7 + $0x88] sm:$0xff] }
 0x8ab   : > { %8121 = vmatmul.msk.f32.gmra.mxu0 %vm3501_vm2, %v13480_v60  ;;  %v12267_v60 = vpop.f32.mrf.mxu3  ;;  %5848 = vmatpush.msra.mxu1 %v8123_v53 }
 0x8ad   : > { %v12175_v26 = vpop.f32.mrf.mxu2  ;;  %5849 = vmatpush.msra.mxu1 %v8122_v19 }
 0x8ae   : > { %v12193_v9 = vpop.f32.mrf.mxu1 }
 0x8b0   : > { %v5549_v20 = vpop.f32.mrf.mxu0 }
 0x8b1   : > { %8088 = vmatmul.msk.f32.vlgmr.msrb.gmra.mxu1 %vm3646_vm3, %v5549_v20 }
 0x8b2   : > { %8096 = vmatmul.msk.f32.vlgmr.msra.gmra.mxu2 %vm3501_vm2, %v13481_v49 }
 0x8b5   : > { %v5198_v8 = vpop.f32.mrf.mxu2 }
 0x8b6   : > { %8034 = vmatmul.msk.f32.vlgmr.msrb.gmra.mxu3 %vm3646_vm3, %v5198_v8  ;;  %v12209_v27 = vpop.f32.mrf.mxu1 }
 0x8b7   : > { %5731 = vmatpush.msrb.mxu3 %v8105_v41 }
 0x8b8   : > { %v5552_v52 = vpop.f32.mrf.mxu0 }
 0x8b9   : > { %8089 = vmatmul.msk.f32.gmra.mxu1 %vm3646_vm3, %v5552_v52  ;;  %5732 = vmatpush.msrb.mxu3 %v8104_v45 }
 0x8ba   : > { %8097 = vmatmul.msk.f32.gmra.mxu2 %vm3501_vm2, %v13482_v15 }
 0x8bd   : > { %v5201_v3 = vpop.f32.mrf.mxu2 }
 0x8be   : > { %8035 = vmatmul.msk.f32.gmra.mxu3 %vm3646_vm3, %v5201_v3  ;;  %v12220_v28 = vpop.f32.mrf.mxu1 }
 0x8c0   : > { %v5555_v51 = vpop.f32.mrf.mxu0 }
 0x8c1   : > { %8090 = vmatmul.msk.f32.gmra.mxu1 %vm3646_vm3, %v5555_v51 }
 0x8c2   : > { %8098 = vmatmul.msk.f32.gmra.mxu2 %vm3501_vm2, %v13483_v46  ;;  %v12279_v46 = vpop.f32.mrf.mxu3 }
 0x8c5   : > { %v5204_v0 = vpop.f32.mrf.mxu2 }
 0x8c6   : > { %8036 = vmatmul.msk.f32.gmra.mxu3 %vm3646_vm3, %v5204_v0  ;;  %v12228_v39 = vpop.f32.mrf.mxu1 }
 0x8c8   : > { %v5558_v63 = vpop.f32.mrf.mxu0 }
 0x8c9   : > { %8091 = vmatmul.msk.f32.gmra.mxu1 %vm3646_vm3, %v5558_v63 }
 0x8ca   : > { %8099 = vmatmul.msk.f32.gmra.mxu2 %vm3501_vm2, %v13484_v24 }
 0x8cd   : > { %v5207_v6 = vpop.f32.mrf.mxu2 }
 0x8ce   : > { %8037 = vmatmul.msk.f32.gmra.mxu3 %vm3646_vm3, %v5207_v6  ;;  %v12235_v40 = vpop.f32.mrf.mxu1  ;;  %v12286_v6 = vpop.f32.mrf.mxu3 }
 0x8d0   : > { %v5561_v31 = vpop.f32.mrf.mxu0 }
 0x8d1   : > { %8092 = vmatmul.msk.f32.gmra.mxu1 %vm3646_vm3, %v5561_v31 }
 0x8d2   : > { %8100 = vmatmul.msk.f32.gmra.mxu2 %vm3501_vm2, %v13485_v57 }
 0x8d5   : > { %v5210_v37 = vpop.f32.mrf.mxu2 }
 0x8d6   : > { %8038 = vmatmul.msk.f32.gmra.mxu3 %vm3646_vm3, %v5210_v37  ;;  %v12242_v34 = vpop.f32.mrf.mxu1 }
 0x8d8   : > { %v5564_v62 = vpop.f32.mrf.mxu0 }
 0x8d9   : > { %8093 = vmatmul.msk.f32.gmra.mxu1 %vm3646_vm3, %v5564_v62 }
 0x8da   : > { %8101 = vmatmul.msk.f32.gmra.mxu2 %vm3501_vm2, %v13486_v13 }
 0x8dd   : > { %v5213_v33 = vpop.f32.mrf.mxu2 }
 0x8de   : > { %8039 = vmatmul.msk.f32.gmra.mxu3 %vm3646_vm3, %v5213_v33  ;;  %v12248_v18 = vpop.f32.mrf.mxu1 }
 0x8e0   : > { %v5567_v50 = vpop.f32.mrf.mxu0 }
 0x8e1   : > { %8094 = vmatmul.msk.f32.gmra.mxu1 %vm3646_vm3, %v5567_v50 }
 0x8e2   : > { %8102 = vmatmul.msk.f32.gmra.mxu2 %vm3501_vm2, %v13487_v38 }
 0x8e5   : > { %v5216_v42 = vpop.f32.mrf.mxu2 }
 0x8e6   : > { %8040 = vmatmul.msk.f32.gmra.mxu3 %vm3646_vm3, %v5216_v42  ;;  %v12257_v61 = vpop.f32.mrf.mxu1 }
 0x8e8   : > { %v5570_v29 = vpop.f32.mrf.mxu0 }
 0x8e9   : > { %8095 = vmatmul.msk.f32.gmra.mxu1 %vm3646_vm3, %v5570_v29 }
 0x8ea   : > { %8103 = vmatmul.msk.f32.gmra.mxu2 %vm3501_vm2, %v13488_v4 }
 0x8ed   : > { %v5219_v58 = vpop.f32.mrf.mxu2 }
 0x8ee   : > { %8041 = vmatmul.msk.f32.gmra.mxu3 %vm3646_vm3, %v5219_v58  ;;  %v12269_v10 = vpop.f32.mrf.mxu1 }
 0x8f0   : > { %v5783_v8 = vpop.f32.mrf.mxu0 }
 0x8f1   : > { %8124 = vmatmul.msk.f32.vlgmr.msra.gmra.mxu1 %vm3646_vm3, %v5783_v8 }
 0x8f5   : > { %v5432_v2 = vpop.f32.mrf.mxu2 }
 0x8f6   : > { %8070 = vmatmul.msk.f32.vlgmr.msra.gmra.mxu3 %vm3646_vm3, %v5432_v2  ;;  %v12276_v15 = vpop.f32.mrf.mxu1 }
 0x8f8   : > { %v5786_v21 = vpop.f32.mrf.mxu0 }
 0x8f9   : > { %8125 = vmatmul.msk.f32.gmra.mxu1 %vm3646_vm3, %v5786_v21 }
 0x8fd   : > { %v5435_v17 = vpop.f32.mrf.mxu2 }
 0x8fe   : > { %8071 = vmatmul.msk.f32.gmra.mxu3 %vm3646_vm3, %v5435_v17  ;;  %v12282_v0 = vpop.f32.mrf.mxu1 }
 0x900   : > { %v5789_v24 = vpop.f32.mrf.mxu0 }
 0x901   : > { %8126 = vmatmul.msk.f32.gmra.mxu1 %vm3646_vm3, %v5789_v24 }
 0x905   : > { %v5438_v14 = vpop.f32.mrf.mxu2 }
 0x906   : > { %8072 = vmatmul.msk.f32.gmra.mxu3 %vm3646_vm3, %v5438_v14  ;;  %v12288_v36 = vpop.f32.mrf.mxu1 }
 0x908   : > { %v5792_v57 = vpop.f32.mrf.mxu0 }
 0x909   : > { %8127 = vmatmul.msk.f32.gmra.mxu1 %vm3646_vm3, %v5792_v57 }
 0x90d   : > { %v5441_v54 = vpop.f32.mrf.mxu2 }
 0x90e   : > { %8073 = vmatmul.msk.f32.gmra.mxu3 %vm3646_vm3, %v5441_v54  ;;  %v12292_v12 = vpop.f32.mrf.mxu1 }
 0x910   : > { %v5795_v30 = vpop.f32.mrf.mxu0 }
 0x911   : > { %8128 = vmatmul.msk.f32.gmra.mxu1 %vm3646_vm3, %v5795_v30 }
 0x915   : > { %v5444_v47 = vpop.f32.mrf.mxu2 }
 0x916   : > { %8074 = vmatmul.msk.f32.gmra.mxu3 %vm3646_vm3, %v5444_v47  ;;  %v12298_v33 = vpop.f32.mrf.mxu1 }
 0x918   : > { %v5798_v59 = vpop.f32.mrf.mxu0 }
 0x919   : > { %8129 = vmatmul.msk.f32.gmra.mxu1 %vm3646_vm3, %v5798_v59 }
 0x91d   : > { %v5447_v49 = vpop.f32.mrf.mxu2 }
 0x91e   : > { %8075 = vmatmul.msk.f32.gmra.mxu3 %vm3646_vm3, %v5447_v49  ;;  %v12304_v42 = vpop.f32.mrf.mxu1 }
 0x920   : > { %v5801_v4 = vpop.f32.mrf.mxu0 }
 0x921   : > { %8130 = vmatmul.msk.f32.gmra.mxu1 %vm3646_vm3, %v5801_v4 }
 0x925   : > { %v5450_v3 = vpop.f32.mrf.mxu2 }
 0x926   : > { %8076 = vmatmul.msk.f32.gmra.mxu3 %vm3646_vm3, %v5450_v3  ;;  %v12310_v51 = vpop.f32.mrf.mxu1 }
 0x928   : > { %v5804_v63 = vpop.f32.mrf.mxu0 }
 0x929   : > { %8131 = vmatmul.msk.f32.gmra.mxu1 %vm3646_vm3, %v5804_v63 }
 0x92d   : > { %v5453_v1 = vpop.f32.mrf.mxu2 }
 0x92e   : > { %8077 = vmatmul.msk.f32.gmra.mxu3 %vm3646_vm3, %v5453_v1  ;;  %v5617_v31 = vpop.f32.mrf.mxu1 }
 0x935   : > { %v5666_v56 = vpop.f32.mrf.mxu2 }
 0x936   : > { %8106 = vmatmul.msk.f32.vlgmr.msrb.gmra.mxu3 %vm3646_vm3, %v5666_v56  ;;  %v12315_v50 = vpop.f32.mrf.mxu1 }
 0x937   : > { %13489 = vst [vmem:[#allocation55_spill] sm:$0xff] %v12315_v50 }
 0x939   : > { %v5266_v37 = vpop.f32.mrf.mxu3 }
 0x93d   : > { %v5669_v25 = vpop.f32.mrf.mxu2 }
 0x93e   : > { %8107 = vmatmul.msk.f32.gmra.mxu3 %vm3646_vm3, %v5669_v25  ;;  %v12319_v29 = vpop.f32.mrf.mxu1 }
 0x93f   : > { %13490 = vst [vmem:[#allocation62_spill] sm:$0xff] %v12319_v29 }
 0x941   : > { %v12296_v13 = vpop.f32.mrf.mxu3 }
 0x945   : > { %v5672_v20 = vpop.f32.mrf.mxu2 }
 0x946   : > { %8108 = vmatmul.msk.f32.gmra.mxu3 %vm3646_vm3, %v5672_v20  ;;  %v12321_v49 = vpop.f32.mrf.mxu1  ;;  %v5041_v20 = vadd.f32 %v12224_v11, %v12119_v32 }
 0x947   : > { %13491 = vst [vmem:[#allocation72_spill] sm:$0xff] %v12321_v49 }
 0x949   : > { %v12302_v38 = vpop.f32.mrf.mxu3 }
 0x94d   : > { %v5675_v52 = vpop.f32.mrf.mxu2 }
 0x94e   : > { %8109 = vmatmul.msk.f32.gmra.mxu3 %vm3646_vm3, %v5675_v52  ;;  %v12325_v19 = vpop.f32.mrf.mxu1  ;;  %v5173_v52 = vadd.f32 %v12193_v9, %v5041_v20 }
 0x950   : > { %v5290_v4 = vadd.f32 %v5266_v37, %v5173_v52 }
 0x951   : > { %v12308_v58 = vpop.f32.mrf.mxu3 }
 0x952   : > { %v5407_v63 = vadd.f32 %v12269_v10, %v5290_v4  ;;  %v5059_v10 = vadd.f32 %v12279_v46, %v12168_v7  ;;  %v5062_v7 = vadd.f32 %v12286_v6, %v12175_v26 }
 0x955   : > { %v5678_v2 = vpop.f32.mrf.mxu2 }
 0x956   : > { %8110 = vmatmul.msk.f32.gmra.mxu3 %vm3646_vm3, %v5678_v2  ;;  %v5632_v21 = vpop.f32.mrf.mxu1 }
 0x959   : > { %v5278_v17 = vpop.f32.mrf.mxu3 }
 0x95d   : > { %v5681_v14 = vpop.f32.mrf.mxu2 }
 0x95e   : > { %8111 = vmatmul.msk.f32.gmra.mxu3 %vm3646_vm3, %v5681_v14  ;;  %v5635_v24 = vpop.f32.mrf.mxu1 }
 0x961   : > { %v5281_v62 = vpop.f32.mrf.mxu3 }
 0x965   : > { %v5684_v54 = vpop.f32.mrf.mxu2 }
 0x966   : > { %8112 = vmatmul.msk.f32.gmra.mxu3 %vm3646_vm3, %v5684_v54  ;;  %v12329_v25 = vpop.f32.mrf.mxu1 }
 0x967   : > { %13493 = vst [vmem:[#allocation10_spill] sm:$0xff] %v12329_v25 }
 0x969   : > { %v5284_v41 = vpop.f32.mrf.mxu3 }
 0x96d   : > { %v5687_v47 = vpop.f32.mrf.mxu2 }
 0x96e   : > { %8113 = vmatmul.msk.f32.gmra.mxu3 %vm3646_vm3, %v5687_v47  ;;  %v5851_v59 = vpop.f32.mrf.mxu1 }
 0x971   : > { %v5287_v45 = vpop.f32.mrf.mxu3 }
 0x976   : > { %v12335_v54 = vpop.f32.mrf.mxu1 }
 0x979   : > { %v5500_v53 = vpop.f32.mrf.mxu3 }
 0x97a   : > { %v5524_v14 = vadd.f32 %v5500_v53, %v5407_v63  ;;  %v5050_v63 = vadd.f32 %v12246_v55, %v12137_v22 }
 0x97c   : > { %v5641_v47 = vadd.f32 %v5617_v31, %v5524_v14  ;;  %v5056_v31 = vadd.f32 %v12267_v60, %v12158_v23  ;;  %v5047_v23 = vadd.f32 %v12238_v48, %v12131_v5  ;;  %v5044_v60 = vadd.f32 %v12232_v44, %v12125_v43 }
 0x97e   : > { %v12339_v25 = vpop.f32.mrf.mxu1  ;;  %v5175_v22 = vadd.f32 %v12220_v28, %v5047_v23  ;;  %v5174_v5 = vadd.f32 %v12209_v27, %v5044_v60 }
 0x981   : > { %v12323_v8 = vpop.f32.mrf.mxu3 }
 0x982   : > { %13492 = vst [vmem:[#allocation42_spill] sm:$0xff] %v12323_v8 }
 0x986   : > { %v12343_v11 = vpop.f32.mrf.mxu1 }
 0x989   : > { %v12327_v3 = vpop.f32.mrf.mxu3 }
 0x98e   : > { %v5863_v37 = vpop.f32.mrf.mxu1 }
 0x991   : > { %v5509_v1 = vpop.f32.mrf.mxu3 }
 0x996   : > { %v5866_v53 = vpop.f32.mrf.mxu1 }
 0x999   : > { %v5512_v56 = vpop.f32.mrf.mxu3 }
 0x99e   : > { %v5869_v48 = vpop.f32.mrf.mxu1 }
 0x9a1   : > { %v5515_v57 = vpop.f32.mrf.mxu3 }
 0x9a9   : > { %v5518_v30 = vpop.f32.mrf.mxu3 }
 0x9b1   : > { %v5521_v2 = vpop.f32.mrf.mxu3 }
 0x9b9   : > { %v5734_v50 = vpop.f32.mrf.mxu3 }
 0x9ba   : > { %v5758_v29 = vadd.f32 %v5734_v50, %v5641_v47  ;;  %v5179_v50 = vadd.f32 %v12248_v18, %v5059_v10  ;;  %v5176_v18 = vadd.f32 %v12228_v39, %v5050_v63  ;;  %v5292_v39 = vadd.f32 %v12302_v38, %v5175_v22  ;;  %v13494_v47 = vld [vmem:[#allocation42_spill] sm:$0xff] }
 0x9bc   : > { %v12337_v49 = vadd.f32 %v5851_v59, %v5758_v29  ;;  %v5053_v29 = vadd.f32 %v12255_v16, %v12146_v35  ;;  %v5178_v59 = vadd.f32 %v12242_v34, %v5056_v31  ;;  %v5296_v52 = vadd.f32 %v5284_v41, %v5179_v50 }
 0x9bd   : > { %v5180_v35 = vadd.f32 %v12257_v61, %v5062_v7 }
 0x9be   : > { %v5177_v14 = vadd.f32 %v12235_v40, %v5053_v29  ;;  %v5295_v46 = vadd.f32 %v5281_v62, %v5178_v59  ;;  %v5413_v34 = vadd.f32 %v12304_v42, %v5296_v52  ;;  %v5293_v40 = vadd.f32 %v12308_v58, %v5176_v18  ;;  %v13498_v59 = vld [vmem:[#allocation55_spill] sm:$0xff] }
 0x9bf   : > { %v5297_v55 = vadd.f32 %v5287_v45, %v5180_v35  ;;  %v5291_v42 = vadd.f32 %v12296_v13, %v5174_v5  ;;  %v13503_v5 = vld [vmem:[#allocation87_spill] sm:$0xff] }
 0x9c0   : > { %v5294_v16 = vadd.f32 %v5278_v17, %v5177_v14  ;;  %v5412_v26 = vadd.f32 %v12298_v33, %v5295_v46  ;;  %v5530_v6 = vadd.f32 %v5518_v30, %v5413_v34  ;;  %v5410_v43 = vadd.f32 %v12288_v36, %v5293_v40  ;;  %v13495_v36 = vld [vmem:[#allocation72_spill] sm:$0xff]  ;;  %v13499_v34 = vld [vmem:[#allocation17_spill] sm:$0xff] }
 0x9c1   : > { %v12341_v8 = vpop.f32.mrf.mxu3  ;;  %v5414_v28 = vadd.f32 %v12310_v51, %v5297_v55  ;;  %v5409_v33 = vadd.f32 %v12282_v0, %v5292_v39  ;;  %v5408_v38 = vadd.f32 %v12276_v15, %v5291_v42  ;;  %v13496_v51 = vld [vmem:[#allocation10_spill] sm:$0xff]  ;;  %v8338_v15 = vld [vmem:[%s12932_s8] ss:$0 sm:$0xff] }
 0x9c2   : > { %v5411_v61 = vadd.f32 %v12292_v12, %v5294_v16  ;;  %v5529_v17 = vadd.f32 %v5515_v57, %v5412_v26  ;;  %v5647_v58 = vadd.f32 %v5635_v24, %v5530_v6  ;;  %v5527_v41 = vadd.f32 %v5509_v1, %v5410_v43  ;;  %v5872_v1 = vpop.f32.mrf.mxu1 }
 0x9c3   : > { %v5531_v27 = vadd.f32 %v5521_v2, %v5414_v28  ;;  %v5526_v12 = vadd.f32 %v12327_v3, %v5409_v33  ;;  %v5525_v10 = vadd.f32 %v13494_v47, %v5408_v38  ;;  %v8160_v38 = vld [vmem:[%s12933_s9 + $0x40] sm:$0xff]  ;;  %v5943_v47 = vld [vmem:[%s12934_s10 + $0x8] sm:$0xff] }
 0x9c4   : > { %v5528_v44 = vadd.f32 %v5512_v56, %v5411_v61  ;;  %v5646_v45 = vadd.f32 %v5632_v21, %v5529_v17  ;;  %v5644_v31 = vadd.f32 %v13495_v36, %v5527_v41  ;;  %v13497_v21 = vld [vmem:[#allocation62_spill] sm:$0xff]  ;;  %v13504_v61 = vld [vmem:[#allocation20_spill] sm:$0xff] }
 0x9c5   : > { %v5648_v56 = vadd.f32 %v13496_v51, %v5531_v27  ;;  %v5643_v2 = vadd.f32 %v13497_v21, %v5526_v12  ;;  %v5642_v52 = vadd.f32 %v13498_v59, %v5525_v10  ;;  %v8139_v27 = vld [vmem:[%s12934_s10 + $0x18] sm:$0xff]  ;;  %v8138_v12 = vld [vmem:[%s12934_s10 + $0x10] sm:$0xff]  ;;  %v5942_v10 = vld [vmem:[%s12934_s10] sm:$0xff] }
 0x9c6   : > { %v5645_v57 = vadd.f32 %v12325_v19, %v5528_v44  ;;  %v8152_v21 = vld [vmem:[%s12933_s9 + $0x30] sm:$0xff]  ;;  %v8169_v59 = vld [vmem:[%s12933_s9 + $0x58] sm:$0xff] }
 0x9c9   : > { %v5740_v32 = vpop.f32.mrf.mxu3 }
 0x9d1   : > { %v5743_v9 = vpop.f32.mrf.mxu3 }
 0x9d2   : > { %v5761_v3 = vadd.f32 %v5743_v9, %v5644_v31  ;;  %v13500_v9 = vld [vmem:[#allocation89_spill] sm:$0xff] }
 0x9d4   : > { %v5878_v46 = vadd.f32 %v12343_v11, %v5761_v3  ;;  %v8192_v3 = vld [vmem:[%s12933_s9 + $0x80] sm:$0xff] }
 0x9d6   : > { %v5890_v40 = vadd.f32 %v8338_v15, %v5878_v46  ;;  %v8156_v46 = vld [vmem:[%s12934_s10 + $0x30] sm:$0xff] }
 0x9d8   : > { %v5898_v39 = vadd.f32 %v5890_v40, %v13503_v5  ;;  %v8197_v5 = vld [vmem:[%s12934_s10 + $0x88] sm:$0xff] }
 0x9d9   : > { %v5746_v20 = vpop.f32.mrf.mxu3 }
 0x9da   : > { %v5762_v24 = vadd.f32 %v5746_v20, %v5645_v57  ;;  %v5759_v20 = vadd.f32 %v12341_v8, %v5642_v52  ;;  %v13502_v8 = vld [vmem:[#allocation19_spill] sm:$0xff]  ;;  %v12415_v28 = vmax.f32 %v5898_v39, 0.0  ;;  %v8135_v57 = vld [vmem:[%s12933_s9 + $0x18] sm:$0xff] }
 0x9db   : > { %v8184_v52 = vld [vmem:[%s12933_s9 + $0x70] sm:$0xff] }
 0x9dc   : > { %v5879_v63 = vadd.f32 %v5863_v37, %v5762_v24  ;;  %v5876_v22 = vadd.f32 %v12335_v54, %v5759_v20  ;;  %v8144_v24 = vld [vmem:[%s12933_s9 + $0x20] sm:$0xff] }
 0x9de   : > { %v5891_v16 = vadd.f32 %v8338_v15, %v5879_v63  ;;  %v8149_v63 = vld [vmem:[%s12934_s10 + $0x28] sm:$0xff] }
 0x9e0   : > { %v5899_v6 = vadd.f32 %v5891_v16, %v13502_v8  ;;  %v8164_v16 = vld [vmem:[%s12934_s10 + $0x40] sm:$0xff] }
 0x9e1   : > { %v5749_v4 = vpop.f32.mrf.mxu3 }
 0x9e2   : > { %v5763_v13 = vadd.f32 %v5749_v4, %v5646_v45  ;;  %v5760_v4 = vadd.f32 %v5740_v32, %v5643_v2  ;;  %v13501_v32 = vld [vmem:[#allocation15_spill] sm:$0xff]  ;;  %v12409_v42 = vmax.f32 %v5899_v6, 0.0 }
 0x9e3   : > { %v8134_v45 = vld [vmem:[%s12933_s9 + $0x10] sm:$0xff]  ;;  %v8177_v2 = vld [vmem:[%s12933_s9 + $0x68] sm:$0xff] }
 0x9e4   : > { %v5880_v29 = vadd.f32 %v5866_v53, %v5763_v13  ;;  %v5877_v35 = vadd.f32 %v12339_v25, %v5760_v4  ;;  %v5888_v25 = vadd.f32 %v8338_v15, %v5876_v22  ;;  %v5912_v13 = vld [vmem:[%s12933_s9 + $0x8] sm:$0xff]  ;;  %v8185_v4 = vld [vmem:[%s12933_s9 + $0x78] sm:$0xff] }
 0x9e5   : > { %v8181_v22 = vld [vmem:[%s12934_s10 + $0x68] sm:$0xff] }
 0x9e6   : > { %v5892_v23 = vadd.f32 %v8338_v15, %v5880_v29  ;;  %v5889_v55 = vadd.f32 %v8338_v15, %v5877_v35  ;;  %v8168_v29 = vld [vmem:[%s12933_s9 + $0x50] sm:$0xff] }
 0x9e8   : > { %v5900_v37 = vadd.f32 %v5892_v23, %v13501_v32  ;;  %v5897_v17 = vadd.f32 %v5889_v55, %v13504_v61  ;;  %v8165_v23 = vld [vmem:[%s12934_s10 + $0x48] sm:$0xff]  ;;  %v8189_v55 = vld [vmem:[%s12934_s10 + $0x78] sm:$0xff]  ;;  %v8196_v61 = vld [vmem:[%s12934_s10 + $0x80] sm:$0xff] }
 0x9e9   : > { %v5752_v62 = vpop.f32.mrf.mxu3  ;;  %6224 = vmatpush.msrb.mxu1 %v8165_v23 }
 0x9ea   : > { %v5764_v30 = vadd.f32 %v5752_v62, %v5647_v58  ;;  %v12402_v54 = vmax.f32 %v5900_v37, 0.0  ;;  %v13505_v62 = vld [vmem:[#allocation31_spill] sm:$0xff]  ;;  %v12421_v58 = vmax.f32 %v5897_v17, 0.0  ;;  %v8180_v37 = vld [vmem:[%s12934_s10 + $0x60] sm:$0xff] }
 0x9eb   : > { %v5896_v43 = vadd.f32 %v5888_v25, %v13505_v62  ;;  %6225 = vmatpush.msrb.mxu1 %v8164_v16  ;;  %v8188_v25 = vld [vmem:[%s12934_s10 + $0x70] sm:$0xff] }
 0x9ec   : > { %v5881_v50 = vadd.f32 %v5869_v48, %v5764_v30  ;;  %v5887_v48 = vadd.f32 %v8338_v15, %v12337_v49  ;;  %v13506_v49 = vld [vmem:[#allocation85_spill] sm:$0xff] }
 0x9ed   : > { %v12426_v33 = vmax.f32 %v5896_v43, 0.0  ;;  %v5911_v30 = vld [vmem:[%s12933_s9] sm:$0xff]  ;;  %6356 = vmatpush.msra.mxu1 %v8181_v22 }
 0x9ee   : > { %v5893_v14 = vadd.f32 %v8338_v15, %v5881_v50  ;;  %v5895_v44 = vadd.f32 %v5887_v48, %v13506_v49  ;;  %v8161_v50 = vld [vmem:[%s12933_s9 + $0x48] sm:$0xff] }
 0x9ef   : > { %6357 = vmatpush.msra.mxu1 %v8180_v37  ;;  %v8202_v37 = vld [vmem:[%s12936_s12 + $0x10] sm:$0xff] }
 0x9f0   : > { %v5901_v60 = vadd.f32 %v5893_v14, %v13499_v34  ;;  %v12431_v41 = vmax.f32 %v5895_v44, 0.0  ;;  %v8148_v14 = vld [vmem:[%s12934_s10 + $0x20] sm:$0xff]  ;;  %v8173_v34 = vld [vmem:[%s12934_s10 + $0x58] sm:$0xff] }
 0x9f1   : > { %v5755_v0 = vpop.f32.mrf.mxu3 }
 0x9f2   : > { %v5765_v19 = vadd.f32 %v5755_v0, %v5648_v56  ;;  %v12396_v11 = vmax.f32 %v5901_v60, 0.0  ;;  %v8145_v0 = vld [vmem:[%s12933_s9 + $0x28] sm:$0xff] }
 0x9f4   : > { %v5882_v7 = vadd.f32 %v5872_v1, %v5765_v19  ;;  %v8176_v1 = vld [vmem:[%s12933_s9 + $0x60] sm:$0xff]  ;;  %v8193_v19 = vld [vmem:[%s12933_s9 + $0x88] sm:$0xff] }
 0x9f6   : > { %v5894_v18 = vadd.f32 %v8338_v15, %v5882_v7  ;;  %v8153_v15 = vld [vmem:[%s12933_s9 + $0x38] sm:$0xff] }
 0x9f7   : > { %v8157_v7 = vld [vmem:[%s12934_s10 + $0x38] sm:$0xff] }
 0x9f8   : > { %v5902_v53 = vadd.f32 %v5894_v18, %v13500_v9 }
 0x9fa   : > { %v12393_v26 = vmax.f32 %v5902_v53, 0.0  ;;  %v8172_v53 = vld [vmem:[%s12934_s10 + $0x50] sm:$0xff] }
 0x9fc   : > { %5927 = vmatpush.msrb.mxu2 %v12393_v26  ;;  %5961 = vmatpush.msra.mxu3 %v12393_v26 }
 0x9fd   : > { %6186 = vmatpush.msrb.mxu0 %v12393_v26 }
 0x9fe   : > { %5928 = vmatpush.msrb.mxu2 %v12396_v11  ;;  %5962 = vmatpush.msra.mxu3 %v12396_v11 }
 0x9ff   : > { %6187 = vmatpush.msrb.mxu0 %v12396_v11 }
 0xa00   : > { %5929 = vmatpush.msrb.mxu2 %v12402_v54  ;;  %5963 = vmatpush.msra.mxu3 %v12402_v54 }
 0xa01   : > { %6188 = vmatpush.msrb.mxu0 %v12402_v54 }
 0xa02   : > { %5930 = vmatpush.msrb.mxu2 %v12409_v42  ;;  %5964 = vmatpush.msra.mxu3 %v12409_v42 }
 0xa03   : > { %6189 = vmatpush.msrb.mxu0 %v12409_v42 }
 0xa04   : > { %5931 = vmatpush.msrb.mxu2 %v12415_v28  ;;  %5965 = vmatpush.msra.mxu3 %v12415_v28 }
 0xa05   : > { %6190 = vmatpush.msrb.mxu0 %v12415_v28 }
 0xa06   : > { %5932 = vmatpush.msrb.mxu2 %v12421_v58  ;;  %5966 = vmatpush.msra.mxu3 %v12421_v58 }
 0xa07   : > { %6191 = vmatpush.msrb.mxu0 %v12421_v58 }
 0xa08   : > { %5933 = vmatpush.msrb.mxu2 %v12426_v33  ;;  %5967 = vmatpush.msra.mxu3 %v12426_v33 }
 0xa09   : > { %6192 = vmatpush.msrb.mxu0 %v12426_v33 }
 0xa0a   : > { %5934 = vmatpush.msrb.mxu2 %v12431_v41  ;;  %5968 = vmatpush.msra.mxu3 %v12431_v41 }
 0xa0b   : > { %6193 = vmatpush.msrb.mxu0 %v12431_v41  ;;  %8136 = vmatmul.msk.f32.vlgmr.msra.gmra.mxu3 %vm3501_vm2, %v8134_v45 }
 0xa0c   : > { %5999 = vmatpush.msra.mxu2 %v8139_v27  ;;  %8162 = vmatmul.msk.f32.vlgmr.msrb.gmra.mxu0 %vm3501_vm2, %v8160_v38 }
 0xa0d   : > { %6318 = vmatpush.msra.mxu0 %v12393_v26  ;;  %8132 = vmatmul.msk.f32.vlgmr.msrb.gmra.mxu2 %vm3501_vm2, %v5911_v30 }
 0xa0e   : > { %6000 = vmatpush.msra.mxu2 %v8138_v12  ;;  %6028 = vmatpush.msrb.mxu3 %v5943_v47 }
 0xa0f   : > { %6319 = vmatpush.msra.mxu0 %v12396_v11 }
 0xa10   : > { %6054 = vmatpush.msrb.mxu2 %v12393_v26  ;;  %6029 = vmatpush.msrb.mxu3 %v5942_v10 }
 0xa11   : > { %6320 = vmatpush.msra.mxu0 %v12402_v54 }
 0xa12   : > { %6055 = vmatpush.msrb.mxu2 %v12396_v11  ;;  %6092 = vmatpush.msra.mxu3 %v8149_v63 }
 0xa13   : > { %6321 = vmatpush.msra.mxu0 %v12409_v42  ;;  %8137 = vmatmul.msk.f32.gmra.mxu3 %vm3501_vm2, %v8135_v57 }
 0xa14   : > { %6056 = vmatpush.msrb.mxu2 %v12402_v54  ;;  %8163 = vmatmul.msk.f32.gmra.mxu0 %vm3501_vm2, %v8161_v50 }
 0xa15   : > { %6322 = vmatpush.msra.mxu0 %v12415_v28  ;;  %8133 = vmatmul.msk.f32.gmra.mxu2 %vm3501_vm2, %v5912_v13 }
 0xa16   : > { %6057 = vmatpush.msrb.mxu2 %v12409_v42  ;;  %6093 = vmatpush.msra.mxu3 %v8148_v14 }
 0xa17   : > { %6323 = vmatpush.msra.mxu0 %v12421_v58 }
 0xa18   : > { %6058 = vmatpush.msrb.mxu2 %v12415_v28 }
 0xa19   : > { %6324 = vmatpush.msra.mxu0 %v12426_v33 }
 0xa1a   : > { %6059 = vmatpush.msrb.mxu2 %v12421_v58 }
 0xa1b   : > { %6325 = vmatpush.msra.mxu0 %v12431_v41 }
 0xa1c   : > { %6060 = vmatpush.msrb.mxu2 %v12426_v33  ;;  %8178 = vmatmul.msk.f32.vlgmr.msra.gmra.mxu0 %vm3501_vm2, %v8176_v1 }
 0xa1d   : > { %6450 = vmatpush.msrb.mxu0 %v12393_v26 }
 0xa1e   : > { %6061 = vmatpush.msrb.mxu2 %v12431_v41 }
 0xa1f   : > { %6451 = vmatpush.msrb.mxu0 %v12396_v11 }
 0xa21   : > { %6452 = vmatpush.msrb.mxu0 %v12402_v54 }
 0xa23   : > { %6453 = vmatpush.msrb.mxu0 %v12409_v42 }
 0xa24   : > { %8179 = vmatmul.msk.f32.gmra.mxu0 %vm3501_vm2, %v8177_v2 }
 0xa25   : > { %6454 = vmatpush.msrb.mxu0 %v12415_v28 }
 0xa27   : > { %6455 = vmatpush.msrb.mxu0 %v12421_v58 }
 0xa29   : > { %6456 = vmatpush.msrb.mxu0 %v12426_v33 }
 0xa2b   : > { %6457 = vmatpush.msrb.mxu0 %v12431_v41 }
 0xa2c   : > { %8194 = vmatmul.msk.f32.vlgmr.msrb.gmra.mxu0 %vm3501_vm2, %v8192_v3 }
 0xa34   : > { %8195 = vmatmul.msk.f32.gmra.mxu0 %vm3501_vm2, %v8193_v19 }
 0xa89   : > { %v6195_v35 = vpop.f32.mrf.mxu0 }
 0xa8a   : > { %8166 = vmatmul.msk.f32.vlgmr.msrb.gmra.mxu1 %vm3646_vm3, %v6195_v35 }
 0xa8b   : > { %6488 = vmatpush.msrb.mxu1 %v8197_v5  ;;  %v8234_v5 = vld [vmem:[%s12936_s12 + $0x40] sm:$0xff] }
 0xa8d   : > { %6489 = vmatpush.msrb.mxu1 %v8196_v61  ;;  %v6539_v61 = vld [vmem:[%s12937_s13 + $0x8] sm:$0xff] }
 0xa8e   : > { %v5970_v36 = vpop.f32.mrf.mxu3 }
 0xa8f   : > { %8140 = vmatmul.msk.f32.vlgmr.msra.gmra.mxu2 %vm3646_vm3, %v5970_v36  ;;  %v8209_v36 = vld [vmem:[%s12937_s13 + $0x38] sm:$0xff] }
 0xa90   : > { %6120 = vmatpush.msra.mxu2 %v12393_v26  ;;  %v5936_v31 = vpop.f32.mrf.mxu2  ;;  %6598 = vmatpush.msra.mxu0 %v8209_v36  ;;  %v8275_v36 = vld [vmem:[%s12936_s12 + $0x88] sm:$0xff] }
 0xa91   : > { %8142 = vmatmul.msk.f32.vlgmr.msrb.gmra.mxu3 %vm3646_vm3, %v5936_v31  ;;  %v6198_v9 = vpop.f32.mrf.mxu0  ;;  %v8208_v31 = vld [vmem:[%s12937_s13 + $0x30] sm:$0xff] }
 0xa92   : > { %6121 = vmatpush.msra.mxu2 %v12396_v11  ;;  %6158 = vmatpush.msrb.mxu3 %v8157_v7 }
 0xa93   : > { %8167 = vmatmul.msk.f32.gmra.mxu1 %vm3646_vm3, %v6198_v9  ;;  %6599 = vmatpush.msra.mxu0 %v8208_v31 }
 0xa94   : > { %6122 = vmatpush.msra.mxu2 %v12402_v54  ;;  %6159 = vmatpush.msrb.mxu3 %v8156_v46 }
 0xa96   : > { %6123 = vmatpush.msra.mxu2 %v12409_v42  ;;  %v5973_v51 = vpop.f32.mrf.mxu3 }
 0xa97   : > { %8141 = vmatmul.msk.f32.gmra.mxu2 %vm3646_vm3, %v5973_v51  ;;  %v8207_v51 = vld [vmem:[%s12937_s13 + $0x28] sm:$0xff] }
 0xa98   : > { %6124 = vmatpush.msra.mxu2 %v12415_v28  ;;  %v5939_v56 = vpop.f32.mrf.mxu2  ;;  %6600 = vmatpush.msra.mxu0 %v8207_v51  ;;  %v8225_v51 = vld [vmem:[%s12936_s12 + $0x38] sm:$0xff] }
 0xa99   : > { %8143 = vmatmul.msk.f32.gmra.mxu3 %vm3646_vm3, %v5939_v56  ;;  %v6327_v32 = vpop.f32.mrf.mxu0 }
 0xa9a   : > { %6125 = vmatpush.msra.mxu2 %v12421_v58 }
 0xa9b   : > { %8182 = vmatmul.msk.f32.vlgmr.msra.gmra.mxu1 %vm3646_vm3, %v6327_v32  ;;  %v6507_v32 = vld [vmem:[%s12936_s12] sm:$0xff] }
 0xa9c   : > { %6126 = vmatpush.msra.mxu2 %v12426_v33 }
 0xa9e   : > { %6127 = vmatpush.msra.mxu2 %v12431_v41 }
 0xa9f   : > { %8146 = vmatmul.msk.f32.vlgmr.msrb.gmra.mxu2 %vm3501_vm2, %v8144_v24  ;;  %v8206_v24 = vld [vmem:[%s12937_s13 + $0x20] sm:$0xff] }
 0xaa0   : > { %6252 = vmatpush.msrb.mxu2 %v12393_v26  ;;  %6601 = vmatpush.msra.mxu0 %v8206_v24  ;;  %v8244_v24 = vld [vmem:[%s12936_s12 + $0x50] sm:$0xff] }
 0xaa1   : > { %v6330_v6 = vpop.f32.mrf.mxu0 }
 0xaa2   : > { %6253 = vmatpush.msrb.mxu2 %v12396_v11 }
 0xaa3   : > { %8183 = vmatmul.msk.f32.gmra.mxu1 %vm3646_vm3, %v6330_v6  ;;  %v8214_v6 = vld [vmem:[%s12936_s12 + $0x20] sm:$0xff] }
 0xaa4   : > { %6254 = vmatpush.msrb.mxu2 %v12402_v54 }
 0xaa6   : > { %6255 = vmatpush.msrb.mxu2 %v12409_v42 }
 0xaa7   : > { %8147 = vmatmul.msk.f32.gmra.mxu2 %vm3501_vm2, %v8145_v0 }
 0xaa8   : > { %6256 = vmatpush.msrb.mxu2 %v12415_v28 }
 0xaa9   : > { %v6459_v48 = vpop.f32.mrf.mxu0 }
 0xaaa   : > { %6257 = vmatpush.msrb.mxu2 %v12421_v58 }
 0xaab   : > { %8198 = vmatmul.msk.f32.vlgmr.msrb.gmra.mxu1 %vm3646_vm3, %v6459_v48  ;;  %v6540_v48 = vld [vmem:[%s12937_s13 + $0x10] sm:$0xff] }
 0xaac   : > { %6258 = vmatpush.msrb.mxu2 %v12426_v33 }
 0xaae   : > { %6259 = vmatpush.msrb.mxu2 %v12431_v41 }
 0xaaf   : > { %8154 = vmatmul.msk.f32.vlgmr.msra.gmra.mxu2 %vm3501_vm2, %v8152_v21 }
 0xab0   : > { %6384 = vmatpush.msra.mxu2 %v12393_v26 }
 0xab1   : > { %v6462_v62 = vpop.f32.mrf.mxu0 }
 0xab2   : > { %6385 = vmatpush.msra.mxu2 %v12396_v11 }
 0xab3   : > { %8199 = vmatmul.msk.f32.gmra.mxu1 %vm3646_vm3, %v6462_v62  ;;  %v8235_v62 = vld [vmem:[%s12936_s12 + $0x48] sm:$0xff] }
 0xab4   : > { %6386 = vmatpush.msra.mxu2 %v12402_v54 }
 0xab6   : > { %6387 = vmatpush.msra.mxu2 %v12409_v42 }
 0xab7   : > { %8155 = vmatmul.msk.f32.gmra.mxu2 %vm3501_vm2, %v8153_v15 }
 0xab8   : > { %6388 = vmatpush.msra.mxu2 %v12415_v28 }
 0xaba   : > { %6389 = vmatpush.msra.mxu2 %v12421_v58 }
 0xabc   : > { %6390 = vmatpush.msra.mxu2 %v12426_v33 }
 0xabe   : > { %6391 = vmatpush.msra.mxu2 %v12431_v41 }
 0xabf   : > { %8170 = vmatmul.msk.f32.vlgmr.msrb.gmra.mxu2 %vm3501_vm2, %v8168_v29 }
 0xac7   : > { %8171 = vmatmul.msk.f32.gmra.mxu2 %vm3501_vm2, %v8169_v59 }
 0xacf   : > { %8186 = vmatmul.msk.f32.vlgmr.msra.gmra.mxu2 %vm3501_vm2, %v8184_v52 }
 0xad7   : > { %8187 = vmatmul.msk.f32.gmra.mxu2 %vm3501_vm2, %v8185_v4 }
 0xb07   : > { %v6227_v38 = vpop.f32.mrf.mxu1 }
 0xb10   : > { %v6230_v13 = vpop.f32.mrf.mxu1 }
 0xb12   : > { %v12584_v20 = vpop.f32.mrf.mxu2 }
 0xb14   : > { %v6031_v45 = vpop.f32.mrf.mxu3 }
 0xb15   : > { %v6032_v0 = vadd.f32 %v6031_v45, %v12584_v20  ;;  %v8339_v20 = vld [vmem:[%s12935_s11] ss:$0 sm:$0xff] }
 0xb16   : > { %v8218_v45 = vld [vmem:[%s12937_s13 + $0x40] sm:$0xff] }
 0xb18   : > { %v6359_v10 = vpop.f32.mrf.mxu1 }
 0xb1a   : > { %v12592_v18 = vpop.f32.mrf.mxu2 }
 0xb1c   : > { %v6034_v27 = vpop.f32.mrf.mxu3 }
 0xb1d   : > { %v6035_v2 = vadd.f32 %v6034_v27, %v12592_v18  ;;  %v8254_v27 = vld [vmem:[%s12936_s12 + $0x60] sm:$0xff] }
 0xb20   : > { %v6362_v50 = vpop.f32.mrf.mxu1 }
 0xb22   : > { %v6063_v60 = vpop.f32.mrf.mxu2 }
 0xb23   : > { %8150 = vmatmul.msk.f32.vlgmr.msra.gmra.mxu3 %vm3646_vm3, %v6063_v60 }
 0xb24   : > { %6290 = vmatpush.msra.mxu3 %v8173_v34 }
 0xb26   : > { %6291 = vmatpush.msra.mxu3 %v8172_v53 }
 0xb28   : > { %v6491_v59 = vpop.f32.mrf.mxu1 }
 0xb2a   : > { %v6066_v40 = vpop.f32.mrf.mxu2 }
 0xb2b   : > { %8151 = vmatmul.msk.f32.gmra.mxu3 %vm3646_vm3, %v6066_v40 }
 0xb30   : > { %v6494_v16 = vpop.f32.mrf.mxu1 }
 0xb32   : > { %v6129_v8 = vpop.f32.mrf.mxu2 }
 0xb33   : > { %8158 = vmatmul.msk.f32.vlgmr.msrb.gmra.mxu3 %vm3646_vm3, %v6129_v8  ;;  %v8203_v8 = vld [vmem:[%s12936_s12 + $0x18] sm:$0xff] }
 0xb34   : > { %6422 = vmatpush.msrb.mxu3 %v8189_v55  ;;  %v6508_v55 = vld [vmem:[%s12936_s12 + $0x8] sm:$0xff] }
 0xb36   : > { %6423 = vmatpush.msrb.mxu3 %v8188_v25  ;;  %v8215_v25 = vld [vmem:[%s12936_s12 + $0x28] sm:$0xff] }
 0xb3a   : > { %v6132_v39 = vpop.f32.mrf.mxu2 }
 0xb3b   : > { %8159 = vmatmul.msk.f32.gmra.mxu3 %vm3646_vm3, %v6132_v39  ;;  %v6541_v39 = vld [vmem:[%s12937_s13 + $0x18] sm:$0xff] }
 0xb3c   : > { %6627 = vmatpush.msra.mxu1 %v6541_v39 }
 0xb3e   : > { %6628 = vmatpush.msra.mxu1 %v6540_v48 }
 0xb40   : > { %6629 = vmatpush.msra.mxu1 %v6539_v61 }
 0xb42   : > { %v6261_v17 = vpop.f32.mrf.mxu2 }
 0xb43   : > { %8174 = vmatmul.msk.f32.vlgmr.msra.gmra.mxu3 %vm3646_vm3, %v6261_v17  ;;  %v6538_v17 = vld [vmem:[%s12937_s13] sm:$0xff] }
 0xb44   : > { %6630 = vmatpush.msra.mxu1 %v6538_v17 }
 0xb4a   : > { %v6264_v43 = vpop.f32.mrf.mxu2 }
 0xb4b   : > { %8175 = vmatmul.msk.f32.gmra.mxu3 %vm3646_vm3, %v6264_v43  ;;  %v8221_v43 = vld [vmem:[%s12937_s13 + $0x58] sm:$0xff] }
 0xb52   : > { %v6393_v49 = vpop.f32.mrf.mxu2 }
 0xb53   : > { %8190 = vmatmul.msk.f32.vlgmr.msrb.gmra.mxu3 %vm3646_vm3, %v6393_v49  ;;  %v8220_v49 = vld [vmem:[%s12937_s13 + $0x50] sm:$0xff] }
 0xb5a   : > { %v6396_v44 = vpop.f32.mrf.mxu2 }
 0xb5b   : > { %8191 = vmatmul.msk.f32.gmra.mxu3 %vm3646_vm3, %v6396_v44  ;;  %v8219_v44 = vld [vmem:[%s12937_s13 + $0x48] sm:$0xff] }
 0xba6   : > { %v6095_v30 = vpop.f32.mrf.mxu3 }
 0xba7   : > { %v6101_v1 = vadd.f32 %v6095_v30, %v6032_v0  ;;  %v8255_v30 = vld [vmem:[%s12936_s12 + $0x68] sm:$0xff] }
 0xbae   : > { %v6098_v12 = vpop.f32.mrf.mxu3 }
 0xbaf   : > { %v6102_v3 = vadd.f32 %v6098_v12, %v6035_v2  ;;  %v8229_v2 = vld [vmem:[%s12937_s13 + $0x68] sm:$0xff] }
 0xbb6   : > { %v6161_v57 = vpop.f32.mrf.mxu3 }
 0xbb7   : > { %v6167_v15 = vadd.f32 %v6161_v57, %v6101_v1  ;;  %v8274_v57 = vld [vmem:[%s12936_s12 + $0x80] sm:$0xff]  ;;  %v8230_v1 = vld [vmem:[%s12937_s13 + $0x70] sm:$0xff] }
 0xbb9   : > { %v6233_v29 = vadd.f32 %v6227_v38, %v6167_v15  ;;  %v8228_v15 = vld [vmem:[%s12937_s13 + $0x60] sm:$0xff] }
 0xbbe   : > { %v6164_v47 = vpop.f32.mrf.mxu3 }
 0xbbf   : > { %v6168_v19 = vadd.f32 %v6164_v47, %v6102_v3 }
 0xbc1   : > { %v6234_v63 = vadd.f32 %v6230_v13, %v6168_v19  ;;  %v8260_v19 = vld [vmem:[%s12937_s13 + $0xd0] sm:$0xff] }
 0xbc6   : > { %v6293_v56 = vpop.f32.mrf.mxu3 }
 0xbc7   : > { %v6299_v52 = vadd.f32 %v6293_v56, %v6233_v29  ;;  %v8261_v29 = vld [vmem:[%s12937_s13 + $0xd8] sm:$0xff] }
 0xbc9   : > { %v6365_v14 = vadd.f32 %v6359_v10, %v6299_v52  ;;  %v8224_v10 = vld [vmem:[%s12936_s12 + $0x30] sm:$0xff]  ;;  %v8259_v52 = vld [vmem:[%s12937_s13 + $0xc8] sm:$0xff] }
 0xbce   : > { %v6296_v21 = vpop.f32.mrf.mxu3 }
 0xbcf   : > { %v6300_v7 = vadd.f32 %v6296_v21, %v6234_v63  ;;  %v8238_v21 = vld [vmem:[%s12937_s13 + $0x80] sm:$0xff] }
 0xbd1   : > { %v6366_v23 = vadd.f32 %v6362_v50, %v6300_v7  ;;  %v8245_v50 = vld [vmem:[%s12936_s12 + $0x58] sm:$0xff]  ;;  %v8249_v7 = vld [vmem:[%s12937_s13 + $0xa8] sm:$0xff] }
 0xbd6   : > { %v6425_v4 = vpop.f32.mrf.mxu3 }
 0xbd7   : > { %v6431_v46 = vadd.f32 %v6425_v4, %v6365_v14  ;;  %v8250_v4 = vld [vmem:[%s12937_s13 + $0xb0] sm:$0xff]  ;;  %v8258_v14 = vld [vmem:[%s12937_s13 + $0xc0] sm:$0xff] }
 0xbd9   : > { %v6497_v34 = vadd.f32 %v6491_v59, %v6431_v46  ;;  %v8251_v59 = vld [vmem:[%s12937_s13 + $0xb8] sm:$0xff] }
 0xbdb   : > { %v6503_v9 = vadd.f32 %v8339_v20, %v6497_v34 }
 0xbdd   : > { %v12654_v40 = vmax.f32 %v6503_v9, 0.0 }
 0xbde   : > { %v6428_v35 = vpop.f32.mrf.mxu3 }
 0xbdf   : > { %v6432_v18 = vadd.f32 %v6428_v35, %v6366_v23  ;;  %v8248_v23 = vld [vmem:[%s12937_s13 + $0xa0] sm:$0xff]  ;;  %v8281_v35 = vld [vmem:[%s12937_s13 + $0x118] sm:$0xff] }
 0xbe1   : > { %v6498_v60 = vadd.f32 %v6494_v16, %v6432_v18  ;;  %v8279_v18 = vld [vmem:[%s12937_s13 + $0x108] sm:$0xff] }
 0xbe3   : > { %v6504_v53 = vadd.f32 %v8339_v20, %v6498_v60  ;;  %v8280_v20 = vld [vmem:[%s12937_s13 + $0x110] sm:$0xff]  ;;  %v8278_v60 = vld [vmem:[%s12937_s13 + $0x100] sm:$0xff] }
 0xbe5   : > { %v12652_v22 = vmax.f32 %v6504_v53, 0.0  ;;  %v8271_v53 = vld [vmem:[%s12937_s13 + $0xf8] sm:$0xff] }
 0xbe7   : > { %6529 = vmatpush.msrb.mxu2 %v12652_v22  ;;  %6565 = vmatpush.msra.mxu3 %v12652_v22 }
 0xbe8   : > { %6729 = vmatpush.msrb.mxu0 %v12652_v22 }
 0xbe9   : > { %6530 = vmatpush.msrb.mxu2 %v12654_v40  ;;  %6566 = vmatpush.msra.mxu3 %v12654_v40 }
 0xbea   : > { %6730 = vmatpush.msrb.mxu0 %v12654_v40  ;;  %8200 = vmatmul.msk.f32.vlgmr.msrb.gmra.mxu2 %vm3646_vm3, %v6507_v32  ;;  %v8269_v32 = vld [vmem:[%s12937_s13 + $0xe8] sm:$0xff] }
 0xbeb   : > { %8204 = vmatmul.msk.f32.vlgmr.msra.gmra.mxu3 %vm3646_vm3, %v8202_v37  ;;  %6661 = vmatpush.msra.mxu2 %v12652_v22 }
 0xbec   : > { %6693 = vmatpush.msrb.mxu3 %v8221_v43 }
 0xbed   : > { %6662 = vmatpush.msra.mxu2 %v12654_v40 }
 0xbee   : > { %6694 = vmatpush.msrb.mxu3 %v8220_v49 }
 0xbef   : > { %6797 = vmatpush.msrb.mxu2 %v12652_v22 }
 0xbf0   : > { %6695 = vmatpush.msrb.mxu3 %v8219_v44 }
 0xbf1   : > { %6798 = vmatpush.msrb.mxu2 %v12654_v40 }
 0xbf2   : > { %8201 = vmatmul.msk.f32.gmra.mxu2 %vm3646_vm3, %v6508_v55  ;;  %6696 = vmatpush.msrb.mxu3 %v8218_v45  ;;  %v8268_v55 = vld [vmem:[%s12937_s13 + $0xe0] sm:$0xff] }
 0xbf3   : > { %8205 = vmatmul.msk.f32.gmra.mxu3 %vm3646_vm3, %v8203_v8 }
 0xbfa   : > { %8216 = vmatmul.msk.f32.vlgmr.msra.gmra.mxu2 %vm3646_vm3, %v8214_v6  ;;  %v7146_v6 = vld [vmem:[%s12940_s16 + $0x8] sm:$0xff] }
 0xbfb   : > { %6933 = vmatpush.msra.mxu2 %v12652_v22 }
 0xbfd   : > { %6934 = vmatpush.msra.mxu2 %v12654_v40 }
 0xc02   : > { %8217 = vmatmul.msk.f32.gmra.mxu2 %vm3646_vm3, %v8215_v25 }
 0xc0a   : > { %8236 = vmatmul.msk.f32.vlgmr.msrb.gmra.mxu2 %vm3646_vm3, %v8234_v5  ;;  %v7145_v5 = vld [vmem:[%s12940_s16] sm:$0xff] }
 0xc0b   : > { %7069 = vmatpush.msrb.mxu2 %v12652_v22 }
 0xc0d   : > { %7070 = vmatpush.msrb.mxu2 %v12654_v40 }
 0xc12   : > { %8237 = vmatmul.msk.f32.gmra.mxu2 %vm3646_vm3, %v8235_v62 }
 0xc1a   : > { %8256 = vmatmul.msk.f32.vlgmr.msra.gmra.mxu2 %vm3646_vm3, %v8254_v27 }
 0xc22   : > { %8257 = vmatmul.msk.f32.gmra.mxu2 %vm3646_vm3, %v8255_v30 }
 0xc2a   : > { %8276 = vmatmul.msk.f32.vlgmr.msrb.gmra.mxu2 %vm3646_vm3, %v8274_v57 }
 0xc32   : > { %8277 = vmatmul.msk.f32.gmra.mxu2 %vm3646_vm3, %v8275_v36 }
 0xc6d   : > { %v6532_v38 = vpop.f32.mrf.mxu2 }
 0xc6e   : > { %v6568_v12 = vpop.f32.mrf.mxu3  ;;  %8212 = vmatmul.msk.f32.vlgmr.msra.gmra.mxu1 %vm6579_vm4, %v6532_v38 }
 0xc6f   : > { %8210 = vmatmul.msk.f32.vlgmr.msra.gmra.mxu0 %vm6579_vm4, %v6568_v12 }
 0xc70   : > { %6865 = vmatpush.msra.mxu0 %v12652_v22 }
 0xc72   : > { %6866 = vmatpush.msra.mxu0 %v12654_v40 }
 0xc75   : > { %v6535_v13 = vpop.f32.mrf.mxu2 }
 0xc76   : > { %v6571_v47 = vpop.f32.mrf.mxu3  ;;  %8213 = vmatmul.msk.f32.gmra.mxu1 %vm6579_vm4, %v6535_v13 }
 0xc77   : > { %8211 = vmatmul.msk.f32.gmra.mxu0 %vm6579_vm4, %v6571_v47 }
 0xc7d   : > { %v6664_v31 = vpop.f32.mrf.mxu2 }
 0xc7e   : > { %8222 = vmatmul.msk.f32.vlgmr.msrb.gmra.mxu3 %vm6579_vm4, %v6664_v31 }
 0xc7f   : > { %8226 = vmatmul.msk.f32.vlgmr.msrb.gmra.mxu0 %vm3646_vm3, %v8224_v10 }
 0xc80   : > { %7001 = vmatpush.msrb.mxu0 %v12652_v22 }
 0xc82   : > { %7002 = vmatpush.msrb.mxu0 %v12654_v40  ;;  %v8270_v40 = vld [vmem:[%s12937_s13 + $0xf0] sm:$0xff] }
 0xc85   : > { %v6667_v56 = vpop.f32.mrf.mxu2 }
 0xc86   : > { %8223 = vmatmul.msk.f32.gmra.mxu3 %vm6579_vm4, %v6667_v56 }
 0xc87   : > { %8227 = vmatmul.msk.f32.gmra.mxu0 %vm3646_vm3, %v8225_v51 }
 0xc8d   : > { %v6800_v0 = vpop.f32.mrf.mxu2 }
 0xc8f   : > { %8246 = vmatmul.msk.f32.vlgmr.msra.gmra.mxu0 %vm3646_vm3, %v8244_v24 }
 0xc90   : > { %7130 = vmatpush.msra.mxu0 %v12393_v26  ;;  %v8264_v26 = vld [vmem:[%s12936_s12 + $0x70] sm:$0xff] }
 0xc92   : > { %7131 = vmatpush.msra.mxu0 %v12396_v11  ;;  %v8265_v11 = vld [vmem:[%s12936_s12 + $0x78] sm:$0xff] }
 0xc94   : > { %7132 = vmatpush.msra.mxu0 %v12402_v54  ;;  %v7114_v54 = vld [vmem:[%s12939_s15] sm:$0xff] }
 0xc95   : > { %v6803_v3 = vpop.f32.mrf.mxu2 }
 0xc96   : > { %7133 = vmatpush.msra.mxu0 %v12409_v42  ;;  %v7115_v42 = vld [vmem:[%s12939_s15 + $0x8] sm:$0xff] }
 0xc97   : > { %8247 = vmatmul.msk.f32.gmra.mxu0 %vm3646_vm3, %v8245_v50 }
 0xc98   : > { %7134 = vmatpush.msra.mxu0 %v12415_v28  ;;  %v8241_v28 = vld [vmem:[%s12937_s13 + $0x98] sm:$0xff] }
 0xc99   : > { %6829 = vmatpush.msra.mxu3 %v8241_v28 }
 0xc9a   : > { %7135 = vmatpush.msra.mxu0 %v12421_v58  ;;  %v8240_v58 = vld [vmem:[%s12937_s13 + $0x90] sm:$0xff] }
 0xc9b   : > { %6830 = vmatpush.msra.mxu3 %v8240_v58 }
 0xc9c   : > { %7136 = vmatpush.msra.mxu0 %v12426_v33  ;;  %v8231_v33 = vld [vmem:[%s12937_s13 + $0x78] sm:$0xff] }
 0xc9d   : > { %6761 = vmatpush.msrb.mxu1 %v8231_v33  ;;  %v6936_v63 = vpop.f32.mrf.mxu2 }
 0xc9e   : > { %7137 = vmatpush.msra.mxu0 %v12431_v41  ;;  %v8239_v41 = vld [vmem:[%s12937_s13 + $0x88] sm:$0xff] }
 0xc9f   : > { %8266 = vmatmul.msk.f32.vlgmr.msrb.gmra.mxu0 %vm3646_vm3, %v8264_v26  ;;  %6831 = vmatpush.msra.mxu3 %v8239_v41 }
 0xca0   : > { %6762 = vmatpush.msrb.mxu1 %v8230_v1 }
 0xca1   : > { %6832 = vmatpush.msra.mxu3 %v8238_v21  ;;  %v8341_v21 = vld [vmem:[%s12941_s17] ss:$0 sm:$0xff] }
 0xca2   : > { %6763 = vmatpush.msrb.mxu1 %v8229_v2  ;;  %8242 = vmatmul.msk.f32.vlgmr.msra.gmra.mxu3 %vm6579_vm4, %v6800_v0 }
 0xca3   : > { %6965 = vmatpush.msrb.mxu3 %v8261_v29 }
 0xca4   : > { %6764 = vmatpush.msrb.mxu1 %v8228_v15 }
 0xca5   : > { %6966 = vmatpush.msrb.mxu3 %v8260_v19  ;;  %v6939_v16 = vpop.f32.mrf.mxu2 }
 0xca6   : > { %6897 = vmatpush.msra.mxu1 %v8251_v59 }
 0xca7   : > { %8267 = vmatmul.msk.f32.gmra.mxu0 %vm3646_vm3, %v8265_v11  ;;  %6967 = vmatpush.msrb.mxu3 %v8259_v52 }
 0xca8   : > { %6898 = vmatpush.msra.mxu1 %v8250_v4 }
 0xca9   : > { %6968 = vmatpush.msrb.mxu3 %v8258_v14 }
 0xcaa   : > { %8243 = vmatmul.msk.f32.gmra.mxu3 %vm6579_vm4, %v6803_v3  ;;  %6899 = vmatpush.msra.mxu1 %v8249_v7  ;;  %v8340_v3 = vld [vmem:[%s12938_s14] ss:$0 sm:$0xff] }
 0xcab   : > { %7101 = vmatpush.msra.mxu3 %v8281_v35 }
 0xcac   : > { %6900 = vmatpush.msra.mxu1 %v8248_v23 }
 0xcad   : > { %7102 = vmatpush.msra.mxu3 %v8280_v20  ;;  %v7072_v9 = vpop.f32.mrf.mxu2 }
 0xcaf   : > { %8284 = vmatmul.msk.f32.vlgmr.msra.gmra.mxu0 %vm3501_vm2, %v7114_v54  ;;  %7103 = vmatpush.msra.mxu3 %v8279_v18 }
 0xcb1   : > { %7104 = vmatpush.msra.mxu3 %v8278_v60 }
 0xcb2   : > { %8262 = vmatmul.msk.f32.vlgmr.msrb.gmra.mxu3 %vm6579_vm4, %v6936_v63 }
 0xcb5   : > { %v7075_v37 = vpop.f32.mrf.mxu2 }
 0xcb7   : > { %8285 = vmatmul.msk.f32.gmra.mxu0 %vm3501_vm2, %v7115_v42 }
 0xcba   : > { %8263 = vmatmul.msk.f32.gmra.mxu3 %vm6579_vm4, %v6939_v16 }
 0xcc2   : > { %8282 = vmatmul.msk.f32.vlgmr.msra.gmra.mxu3 %vm6579_vm4, %v7072_v9 }
 0xcca   : > { %8283 = vmatmul.msk.f32.gmra.mxu3 %vm6579_vm4, %v7075_v37 }
 0xceb   : > { %v6632_v43 = vpop.f32.mrf.mxu1 }
 0xcec   : > { %v6603_v46 = vpop.f32.mrf.mxu0 }
 0xced   : > { %v6633_v10 = vadd.f32 %v6632_v43, %v6603_v46 }
 0xcf3   : > { %v6635_v44 = vpop.f32.mrf.mxu1 }
 0xcf4   : > { %v6606_v34 = vpop.f32.mrf.mxu0 }
 0xcf5   : > { %v6636_v56 = vadd.f32 %v6635_v44, %v6606_v34 }
 0xcfc   : > { %v6732_v22 = vpop.f32.mrf.mxu0 }
 0xcfd   : > { %8232 = vmatmul.msk.f32.vlgmr.msrb.gmra.mxu1 %vm6579_vm4, %v6732_v22 }
 0xcfe   : > { %7033 = vmatpush.msrb.mxu1 %v8271_v53 }
 0xd00   : > { %7034 = vmatpush.msrb.mxu1 %v8270_v40 }
 0xd01   : > { %v6698_v49 = vpop.f32.mrf.mxu3 }
 0xd02   : > { %7035 = vmatpush.msrb.mxu1 %v8269_v32  ;;  %v6704_v31 = vadd.f32 %v6698_v49, %v6633_v10 }
 0xd04   : > { %v6735_v8 = vpop.f32.mrf.mxu0  ;;  %7036 = vmatpush.msrb.mxu1 %v8268_v55 }
 0xd05   : > { %8233 = vmatmul.msk.f32.gmra.mxu1 %vm6579_vm4, %v6735_v8 }
 0xd09   : > { %v6701_v45 = vpop.f32.mrf.mxu3 }
 0xd0a   : > { %v6705_v50 = vadd.f32 %v6701_v45, %v6636_v56 }
 0xd0c   : > { %v6868_v25 = vpop.f32.mrf.mxu0 }
 0xd0d   : > { %8252 = vmatmul.msk.f32.vlgmr.msra.gmra.mxu1 %vm6579_vm4, %v6868_v25 }
 0xd0e   : > { %7171 = vmatpush.msra.mxu1 %v7146_v6 }
 0xd10   : > { %7172 = vmatpush.msra.mxu1 %v7145_v5 }
 0xd14   : > { %v6871_v39 = vpop.f32.mrf.mxu0 }
 0xd15   : > { %8253 = vmatmul.msk.f32.gmra.mxu1 %vm6579_vm4, %v6871_v39 }
 0xd1c   : > { %v7004_v48 = vpop.f32.mrf.mxu0 }
 0xd1d   : > { %8272 = vmatmul.msk.f32.vlgmr.msrb.gmra.mxu1 %vm6579_vm4, %v7004_v48 }
 0xd24   : > { %v7007_v61 = vpop.f32.mrf.mxu0 }
 0xd25   : > { %8273 = vmatmul.msk.f32.gmra.mxu1 %vm6579_vm4, %v7007_v61  ;;  %v6834_v30 = vpop.f32.mrf.mxu3 }
 0xd2c   : > { %v7139_v17 = vpop.f32.mrf.mxu0 }
 0xd2d   : > { %8286 = vmatmul.msk.f32.vlgmr.msra.gmra.mxu1 %vm3646_vm3, %v7139_v17  ;;  %v6837_v12 = vpop.f32.mrf.mxu3 }
 0xd34   : > { %v7142_v62 = vpop.f32.mrf.mxu0 }
 0xd35   : > { %8287 = vmatmul.msk.f32.gmra.mxu1 %vm3646_vm3, %v7142_v62  ;;  %v6970_v13 = vpop.f32.mrf.mxu3 }
 0xd3d   : > { %v6973_v36 = vpop.f32.mrf.mxu3 }
 0xd45   : > { %v7106_v42 = vpop.f32.mrf.mxu3 }
 0xd4d   : > { %v7109_v19 = vpop.f32.mrf.mxu3 }
 0xd7a   : > { %v6766_v27 = vpop.f32.mrf.mxu1 }
 0xd7b   : > { %v6772_v24 = vadd.f32 %v6766_v27, %v6704_v31 }
 0xd7d   : > { %v6840_v26 = vadd.f32 %v6834_v30, %v6772_v24 }
 0xd82   : > { %v6769_v38 = vpop.f32.mrf.mxu1 }
 0xd83   : > { %v6773_v11 = vadd.f32 %v6769_v38, %v6705_v50 }
 0xd85   : > { %v6841_v58 = vadd.f32 %v6837_v12, %v6773_v11 }
 0xd8a   : > { %v6902_v57 = vpop.f32.mrf.mxu1 }
 0xd8b   : > { %v6908_v54 = vadd.f32 %v6902_v57, %v6840_v26 }
 0xd8d   : > { %v6976_v33 = vadd.f32 %v6970_v13, %v6908_v54 }
 0xd92   : > { %v6905_v47 = vpop.f32.mrf.mxu1 }
 0xd93   : > { %v6909_v41 = vadd.f32 %v6905_v47, %v6841_v58 }
 0xd95   : > { %v6977_v1 = vadd.f32 %v6973_v36, %v6909_v41 }
 0xd9a   : > { %v7038_v51 = vpop.f32.mrf.mxu1 }
 0xd9b   : > { %v7044_v0 = vadd.f32 %v7038_v51, %v6976_v33 }
 0xd9d   : > { %v7112_v15 = vadd.f32 %v7106_v42, %v7044_v0 }
 0xd9f   : > { %v7184_v52 = vadd.f32 %v8340_v3, %v7112_v15 }
 0xda2   : > { %v7041_v28 = vpop.f32.mrf.mxu1 }
 0xda3   : > { %v7045_v29 = vadd.f32 %v7041_v28, %v6977_v1 }
 0xda5   : > { %v7113_v4 = vadd.f32 %v7109_v19, %v7045_v29 }
 0xda7   : > { %v7185_v7 = vadd.f32 %v8340_v3, %v7113_v4 }
 0xdaa   : > { %v7174_v2 = vpop.f32.mrf.mxu1 }
 0xdab   : > { %v7175_v59 = vadd.f32 %v8341_v21, %v7174_v2 }
 0xdad   : > { %v7186_v63 = vadd.f32 %v7184_v52, %v7175_v59 }
 0xdaf   : > { %v7188_v23 = vmax.f32 %v7186_v63, 0.0 }
 0xdb1   : > { %v7190_v34 = vsel %vm6579_vm4, %v7188_v23, 0.0 }
 0xdb2   : > { %v7177_v14 = vpop.f32.mrf.mxu1 }
 0xdb3   : > { %v7178_v46 = vadd.f32 %v8341_v21, %v7177_v14 }
 0xdb5   : > { %v7187_v35 = vadd.f32 %v7185_v7, %v7178_v46 }
 0xdb7   : > { %v7189_v16 = vmax.f32 %v7187_v35, 0.0 }
 0xdb9   : > { %v7191_v20 = vsel %vm6579_vm4, %v7189_v16, 0.0 }
 0xdba   : > { %v7192_v18 = vadd.f32 %v7191_v20, %v7190_v34 }
 0xdbc   : > { %v7193_v60 = vrot.slane %v7192_v18, 4 }
 0xdbe   : > { %v7194_v9 = vadd.f32 %v7193_v60, %v7192_v18 }
 0xdc0   : > { %v7195_v53 = vrot.slane %v7194_v9, 2 }
 0xdc2   : > { %v7196_v22 = vadd.f32 %v7195_v53, %v7194_v9 }
 0xdc4   : > { %v7197_v40 = vrot.slane %v7196_v22, 1 }
 0xdc6   : > { %v7198_v32 = vadd.f32 %v7197_v40, %v7196_v22 }
 0xdc8   : > { %v7199_v37 = vmul.f32 0.0625, %v7198_v32 }
 0xdca   : > { %7201 = vst.msk [vmem:[%s567_s24] sm:$0x1] %vm7200_vm5, %v7199_v37 }
 0xdcb   : > { %8403 = shalt.err (!%p8400_p3)
}
 0xdcc   : > { %8297 = dma.vmem_to_hbm [thread:$0]  (%p8573_p5), %s7214_s25, 16, %s7216_s22, %s7203_s27  }
 0xdcd PF: > { %s13507_s21 = sld [smem:[#allocation5_spill]]  ;;  %p8303_p4 = scmp.ge.s32.totalorder %s8438_s30, 2 }
 0xdcf   : > { %p8300_p7 = pnand %p8303_p4, %p8577_p6 }
 0xdd1   : > { %p8301_p8 = pneg %p8300_p7 }
 0xdd3   : > { %s7227_s4 = sand.u32 1, %s13507_s21  }
 0xdd4   : > { %s7228_s0 = scalar_lea.sflag [#allocation3], %s7227_s4 }
 0xdd5   : > { %8421 = dma.done.wait (%p8301_p8), %s7228_s0, 16  }
 0xdd6   : > { %8423 = vsyncadd (%p8301_p8), %s7228_s0, 4294967280  ;;  %s13509_s30 = sld [smem:[#allocation7_spill]]  ;;  %s13512_s27 = smov %s8430_s28 }
 0xdd7   : > { %s13510_s3 = sld [smem:[#allocation6_spill]] }
 0xdd8   : > { %s13511_s29 = sld [smem:[#allocation8_spill]] }
 0xddc   : > { %p28_p9 = scmp.ge.s32.totalorder %s13509_s30, 4  }
 0xddd   : > { %s13513_s28 = smov %s13510_s3 }
 0xdde   :  { %30 = sbr.rel (!%p28_p9) target bundleno = 9 (0x9), region = 198 }
 0xde3   :  { %7233 = vsyncpa [#allocation3], 1 }
 0xde4   :  { %7235 = vsyncpa [#allocation3 + $0x1], 1 }

</bundles_post_ra>
